<compile_context>
chip_gen: v7x
topology: tpu7x:2x2x1
jax: 0.10.0
libtpu: 0.0.40
codegen_flags: <defaults>
</compile_context>

<pallas_src>
import jax
import jax.numpy as jnp
from jax import lax
from jax.experimental import pallas as pl
from jax.experimental.pallas import tpu as pltpu

NUM_BLOCKS = 19
H, W = 6, 7
HP, WP = H + 2, W + 2            # zero-padded spatial grid
QP = HP * WP                     # 72 padded positions per sample (multiple of 8)
C_IN, C_TRUNK = 3, 128
N_CONVS = 1 + 2 * NUM_BLOCKS     # 39 trunk convs
KCAT = 9 * C_TRUNK               # 1152: K-concatenated im2col width
BN_EPS = 1e-5


def _vmem():
    return pl.BlockSpec(memory_space=pltpu.MemorySpace.VMEM)


# ---------------------------------------------------------------------------
# The fused kernel: whole forward pass in one pallas_call
# ---------------------------------------------------------------------------
def _resnet_kernel(convw_hbm, x_ref, shift_ref, mask_ref, sel_ref,
                   wv_ref, bv_ref, wp_ref, bp_ref,
                   w1t_ref, b1_ref, w2_ref, b2_ref, wf_ref, g_ref, bf_ref,
                   policy_ref, value_ref,
                   wbuf, xcat, sem):
    r = x_ref.shape[0]                       # N * 72 (multiple of 8)

    # ---- streamed trunk weights: double-buffered per-layer [1152,128] bf16 slabs
    def start_fetch(layer, slot):
        pltpu.make_async_copy(convw_hbm.at[layer], wbuf.at[slot],
                              sem.at[slot]).start()

    def wait_fetch(slot):
        pltpu.make_async_copy(convw_hbm.at[0], wbuf.at[slot],
                              sem.at[slot]).wait()

    def conv3x3(xval, layer, slot, pre_layer=None, pre_cond=None):
        """3x3 conv (BN scale pre-folded) as ONE [R,1152]x[1152,128] MXU matmul.
        Issues the prefetch of `pre_layer` into the other slot before computing,
        so the next layer's HBM->VMEM weight DMA overlaps this layer's compute."""
        if pre_layer is not None:
            if pre_cond is None:
                start_fetch(pre_layer, 1 - slot)
            else:
                @pl.when(pre_cond)
                def _():
                    start_fetch(pre_layer, 1 - slot)
        wait_fetch(slot)
        # im2col: 9 sublane-rolled copies of the resident tile, K-concatenated in
        # a bf16 VMEM scratch.  Rolls wrap across the padded 8x9 grid; interior
        # rows never read outside their own sample's 72-row block because
        # |tap offset| <= WP+1 = 10, and border rows are re-zeroed by relu_mask
        # every layer.  Do not change HP/WP/row layout or drop the mask without
        # re-checking this invariant.
        for k in range(9):
            d = (k // 3 - 1) * WP + (k % 3 - 1)      # row offset of this tap
            xs = xval if d == 0 else pltpu.roll(xval, shift=(-d) % r, axis=0)
            xcat[:, k * C_TRUNK:(k + 1) * C_TRUNK] = xs.astype(jnp.bfloat16)
        y = jnp.dot(xcat[...], wbuf[slot], preferred_element_type=jnp.float32)
        return y + shift_ref[layer]                  # [1,128] broadcast BN shift

    def relu_mask(y):
        # ReLU, then force the padded border rows back to exactly zero.
        return jnp.maximum(y, 0.0) * mask_ref[...]   # mask is pre-broadcast [R,128]

    start_fetch(0, 0)                                # prime the weight pipeline

    # ConvBlock (layer 0)
    x = relu_mask(conv3x3(x_ref[...], 0, 0, pre_layer=1))

    # 19 residual BasicBlocks; activation stays VMEM/vreg-resident across the loop.
    def block(b, xc):
        y = relu_mask(conv3x3(xc, 1 + 2 * b, 1, pre_layer=2 + 2 * b))
        z = conv3x3(y, 2 + 2 * b, 0, pre_layer=3 + 2 * b,
                    pre_cond=b < NUM_BLOCKS - 1)
        return relu_mask(z + xc)

    x = lax.fori_loop(0, NUM_BLOCKS, block, x)

    # ---------------- OutputBlock (fused heads) ----------------
    x16 = x.astype(jnp.bfloat16)
    # value 1x1 conv (128->3, padded to 8 lanes) + BN + ReLU
    v = jnp.maximum(jnp.dot(x16, wv_ref[...],
                            preferred_element_type=jnp.float32) + bv_ref[...], 0.0)
    # policy 1x1 conv (128->32, padded to 128 lanes) + BN + ReLU
    p = jnp.maximum(jnp.dot(x16, wp_ref[...],
                            preferred_element_type=jnp.float32) + bp_ref[...], 0.0)
    # Border rows of v/p are nonzero (= relu(bias)) but the pre-permuted FC
    # weights below are zero there, so no explicit head masking is needed.

    # fc1 over the NCHW-flattened value conv: fc1 weights pre-permuted onto the
    # padded grid ([3, R, 32]); contract channels on the VPU, then sum each
    # sample's rows with a 0/1 selection matmul (replaces a runtime transpose).
    m1 = (v[:, 0:1] * w1t_ref[0] + v[:, 1:2] * w1t_ref[1] + v[:, 2:3] * w1t_ref[2])
    h1 = jnp.maximum(jnp.dot(sel_ref[...], m1,
                             preferred_element_type=jnp.float32) + b1_ref[...], 0.0)
    v_out = jnp.tanh(jnp.dot(h1, w2_ref[...],
                             preferred_element_type=jnp.float32) + b2_ref[...])
    value_ref[...] = v_out[:, 0:1]                           # [N, 1]

    # fc over the NCHW-flattened policy conv, expressed as vreg-aligned
    # tile + elementwise mul + two small matmuls (no 32-iteration scalar loop):
    #   logits[n,a] = sum_{r in n, c} p[r,c] * wf[r, a*128+c]
    pv = jnp.tile(p, (1, 7)) * wf_ref[...]                   # [R, 7*128]
    ps = jnp.dot(sel_ref[...], pv, preferred_element_type=jnp.float32)   # [N, 896]
    logits = jnp.dot(ps, g_ref[...],
                     preferred_element_type=jnp.float32) + bf_ref[...]   # [N, 7]
    logits = logits - jnp.max(logits, axis=-1, keepdims=True)
    e = jnp.exp(logits)                       # logsoftmax(...).exp() == softmax
    policy_ref[...] = e / jnp.sum(e, axis=-1, keepdims=True)


# ---------------------------------------------------------------------------
# Parameter prep (BN folding, bf16 weight packing, FC weight permutation)
# ---------------------------------------------------------------------------
def _fold_bn(bn, conv_bias=None):
    scale = bn["gamma"] / jnp.sqrt(bn["var"] + BN_EPS)
    shift = bn["beta"] - bn["mean"] * scale
    if conv_bias is not None:
        shift = shift + conv_bias * scale
    return scale, shift


def _prep_trunk(params):
    """All 39 trunk convs: BN scale folded in -> bf16 [39, 1152, 128]; f32 shifts."""
    cb = params["conv_block"]
    sc0, sh0 = _fold_bn(cb["bn"], cb["cb"])
    w0 = jnp.zeros((9, C_TRUNK, C_TRUNK), jnp.float32).at[:, :C_IN, :].set(cb["w"])
    ws, shifts = [w0 * sc0[None, None, :]], [sh0]
    for blk in params["blocks"]:
        s1, h1 = _fold_bn(blk["bn1"])
        s2, h2 = _fold_bn(blk["bn2"])
        ws.append(blk["w1"] * s1[None, None, :]); shifts.append(h1)
        ws.append(blk["w2"] * s2[None, None, :]); shifts.append(h2)
    conv_w = jnp.stack(ws, axis=0).reshape(N_CONVS, KCAT, C_TRUNK)
    conv_w = conv_w.astype(jnp.bfloat16)                            # [39,1152,128]
    shift = jnp.stack(shifts, axis=0).reshape(N_CONVS, 1, C_TRUNK)  # f32
    return conv_w, shift


def _prep_head(params, n):
    out = params["out"]
    sv, hv = _fold_bn(out["bn_v"], out["cb_v"])
    sp, hp_ = _fold_bn(out["bn_p"], out["cb_p"])
    # value 1x1 conv 128->3, padded to 8 lanes
    wv = jnp.zeros((C_TRUNK, 8), jnp.float32).at[:, :3].set(out["w_v"] * sv[None, :])
    bv = jnp.zeros((1, 8), jnp.float32).at[0, :3].set(hv)
    # policy 1x1 conv 128->32, padded to 128 lanes (keeps later lane ops aligned)
    wp = jnp.zeros((C_TRUNK, C_TRUNK), jnp.float32).at[:, :32].set(
        out["w_p"] * sp[None, :])
    bp = jnp.zeros((1, C_TRUNK), jnp.float32).at[0, :32].set(hp_)

    def on_padded_grid(w_flat, cin, cout):
        # PyTorch NCHW flatten order is c*42 + h*7 + w; re-lay the FC weight onto
        # the padded 8x9 grid (zeros at border rows), tiled over the batch.
        w = w_flat.reshape(cin, H, W, cout)
        wpad = jnp.zeros((cin, HP, WP, cout), jnp.float32)
        wpad = wpad.at[:, 1:1 + H, 1:1 + W, :].set(w)
        return jnp.tile(wpad.reshape(cin, QP, cout), (1, n, 1))     # [cin, R, cout]

    w1t = on_padded_grid(out["fc1_w"], 3, 32)                       # [3, R, 32]
    b1 = out["fc1_b"].reshape(1, 32)
    w2 = jnp.zeros((32, 8), jnp.float32).at[:, 0].set(out["fc2_w"][:, 0])
    b2 = jnp.zeros((1, 8), jnp.float32).at[0, 0].set(out["fc2_b"][0])

    # policy fc weight laid out so logits = (sel @ (tile(p,(1,7)) * wf)) @ g + bf,
    # with lane index a*128 + c (channels padded 32->128, zeros at border rows).
    wgrid = on_padded_grid(out["fc_w"], 32, 7)                      # [32, R, 7]
    wgrid = jnp.zeros((C_TRUNK,) + wgrid.shape[1:], jnp.float32).at[:32].set(wgrid)
    wf = jnp.transpose(wgrid, (1, 2, 0)).reshape(n * QP, 7 * C_TRUNK)  # [R, 896]
    g = jnp.repeat(jnp.eye(7, dtype=jnp.float32), C_TRUNK, axis=0)     # [896, 7]
    bf = out["fc_b"].reshape(1, 7)
    return (wv.astype(jnp.bfloat16), bv, wp.astype(jnp.bfloat16), bp,
            w1t, b1, w2, b2, wf, g, bf)


# ---------------------------------------------------------------------------
# Forward pass (single pallas_call, trunk weights streamed from HBM)
# ---------------------------------------------------------------------------
def resnet_forward(params, s):
    """Returns (policy [N,7] = logsoftmax().exp() == softmax, value [N,1] = tanh)."""
    s = s.reshape(-1, C_IN, H, W).astype(jnp.float32)   # s.view(-1,3,6,7)
    n = s.shape[0]
    r = n * QP

    # NCHW -> NHWC, zero-pad spatially (6x7 -> 8x9) and channels (3 -> 128),
    # flatten to rows so the kernel works on a lane-dense [R, 128] tile.
    x = jnp.transpose(s, (0, 2, 3, 1))
    x = jnp.pad(x, ((0, 0), (1, 1), (1, 1), (0, C_TRUNK - C_IN)))
    x = x.reshape(r, C_TRUNK)

    conv_w, shift = _prep_trunk(params)
    head = _prep_head(params, n)

    q = jnp.arange(QP)
    valid = ((q // WP >= 1) & (q // WP <= H) &
             (q % WP >= 1) & (q % WP <= W)).astype(jnp.float32)
    mask = jnp.tile(valid[:, None], (n, C_TRUNK))                   # [R,128] mask
    sel = jnp.repeat(jnp.eye(n, dtype=jnp.float32), QP, axis=1)     # [N, R] row-sum

    args = (conv_w, x, shift, mask, sel) + head
    policy, value = pl.pallas_call(
        _resnet_kernel,
        out_shape=(jax.ShapeDtypeStruct((n, 7), jnp.float32),
                   jax.ShapeDtypeStruct((n, 1), jnp.float32)),
        in_specs=[pl.BlockSpec(memory_space=pl.ANY)]        # conv_w stays in HBM
                 + [_vmem() for _ in range(len(args) - 1)],
        out_specs=(_vmem(), _vmem()),
        scratch_shapes=[
            pltpu.VMEM((2, KCAT, C_TRUNK), jnp.bfloat16),   # weight double-buffer
            pltpu.VMEM((r, KCAT), jnp.bfloat16),            # im2col K-concat tile
            pltpu.SemaphoreType.DMA((2,)),
        ],
        compiler_params=pltpu.CompilerParams(
            vmem_limit_bytes=16 * 1024 * 1024),             # ~2 MB resident
    )(*args)
    return policy, value


# ---------------------------------------------------------------------------
# Plain-jnp reference (mirrors the kernel's bf16 matmul operands) for checking
# ---------------------------------------------------------------------------
def resnet_reference(params, s):
    conv_w, shift = _prep_trunk(params)
    conv_w = conv_w.reshape(N_CONVS, 9, C_TRUNK, C_TRUNK)
    s = s.reshape(-1, C_IN, H, W).astype(jnp.float32)
    n = s.shape[0]
    x = jnp.transpose(s, (0, 2, 3, 1))
    x = jnp.pad(x, ((0, 0), (0, 0), (0, 0), (0, C_TRUNK - C_IN)))   # [n,6,7,128]

    def conv3x3(x, layer):
        xp = jnp.pad(x, ((0, 0), (1, 1), (1, 1), (0, 0)))
        acc = jnp.zeros((n * H * W, C_TRUNK), jnp.float32)
        for kh in range(3):
            for kw in range(3):
                patch = xp[:, kh:kh + H, kw:kw + W, :].reshape(n * H * W, C_TRUNK)
                acc = acc + jnp.dot(patch.astype(jnp.bfloat16),
                                    conv_w[layer, kh * 3 + kw],
                                    preferred_element_type=jnp.float32)
        return (acc + shift[layer]).reshape(n, H, W, C_TRUNK)

    x = jnp.maximum(conv3x3(x, 0), 0.0)
    for b in range(NUM_BLOCKS):
        y = jnp.maximum(conv3x3(x, 1 + 2 * b), 0.0)
        x = jnp.maximum(conv3x3(y, 2 + 2 * b) + x, 0.0)

    out = params["out"]
    sv, hv = _fold_bn(out["bn_v"], out["cb_v"])
    sp, hp_ = _fold_bn(out["bn_p"], out["cb_p"])
    flat = x.reshape(n * H * W, C_TRUNK).astype(jnp.bfloat16)
    v = jnp.maximum(jnp.dot(flat, (out["w_v"] * sv[None, :]).astype(jnp.bfloat16),
                            preferred_element_type=jnp.float32) + hv, 0.0)
    p = jnp.maximum(jnp.dot(flat, (out["w_p"] * sp[None, :]).astype(jnp.bfloat16),
                            preferred_element_type=jnp.float32) + hp_, 0.0)
    v = v.reshape(n, H, W, 3).transpose(0, 3, 1, 2).reshape(n, 3 * H * W)
    p = p.reshape(n, H, W, 32).transpose(0, 3, 1, 2).reshape(n, 32 * H * W)
    v = jnp.maximum(v @ out["fc1_w"] + out["fc1_b"], 0.0)
    value = jnp.tanh(v @ out["fc2_w"] + out["fc2_b"])
    logits = p @ out["fc_w"] + out["fc_b"]
    policy = jax.nn.softmax(logits, axis=-1)
    return policy, value


# ---------------------------------------------------------------------------
# Deterministic synthetic parameters (shapes match the PyTorch module __init__)
# ---------------------------------------------------------------------------
def _bn_params(key, c):
    k1, k2, k3, k4 = jax.random.split(key, 4)
    return dict(
        gamma=1.0 + 0.1 * jax.random.normal(k1, (c,), jnp.float32),
        beta=0.1 * jax.random.normal(k2, (c,), jnp.float32),
        mean=0.1 * jax.random.normal(k3, (c,), jnp.float32),
        var=1.0 + 0.1 * jax.random.uniform(k4, (c,), jnp.float32),
    )


def init_params(key):
    keys = iter(jax.random.split(key, 256))
    nxt = lambda: next(keys)

    def conv_w3(cin, cout):
        std = (2.0 / (cin * 9)) ** 0.5
        return std * jax.random.normal(nxt(), (9, cin, cout), jnp.float32)

    def lin(cin, cout):
        std = (2.0 / cin) ** 0.5
        return (std * jax.random.normal(nxt(), (cin, cout), jnp.float32),
                0.05 * jax.random.normal(nxt(), (cout,), jnp.float32))

    params = {}
    params["conv_block"] = dict(
        w=conv_w3(C_IN, C_TRUNK),
        cb=0.05 * jax.random.normal(nxt(), (C_TRUNK,), jnp.float32),
        bn=_bn_params(nxt(), C_TRUNK),
    )
    params["blocks"] = [
        dict(w1=conv_w3(C_TRUNK, C_TRUNK), bn1=_bn_params(nxt(), C_TRUNK),
             w2=conv_w3(C_TRUNK, C_TRUNK), bn2=_bn_params(nxt(), C_TRUNK))
        for _ in range(NUM_BLOCKS)
    ]
    w_v, cb_v = lin(C_TRUNK, 3)          # Conv2d(128,3,1)
    fc1_w, fc1_b = lin(3 * H * W, 32)    # Linear(126,32)
    fc2_w, fc2_b = lin(32, 1)            # Linear(32,1)
    w_p, cb_p = lin(C_TRUNK, 32)         # Conv2d(128,32,1)
    fc_w, fc_b = lin(H * W * 32, 7)      # Linear(1344,7)
    params["out"] = dict(
        w_v=w_v, cb_v=cb_v, bn_v=_bn_params(nxt(), 3),
        fc1_w=fc1_w, fc1_b=fc1_b, fc2_w=fc2_w, fc2_b=fc2_b,
        w_p=w_p, cb_p=cb_p, bn_p=_bn_params(nxt(), 32),
        fc_w=fc_w, fc_b=fc_b,
    )
    return params


if __name__ == "__main__":
    key = jax.random.PRNGKey(0)
    pkey, xkey = jax.random.split(key)
    params = init_params(pkey)
    s = jax.random.normal(xkey, (2, C_IN, H, W), jnp.float32)   # batch=2, 3x6x7

    fwd = jax.jit(resnet_forward)
    policy, value = fwd(params, s)
    jax.block_until_ready((policy, value))

    assert policy.shape == (2, 7) and value.shape == (2, 1)
    assert bool(jnp.all(jnp.isfinite(policy))) and bool(jnp.all(jnp.isfinite(value)))

    # Cross-check the fused kernel against a plain-jnp reference.
    p_ref, v_ref = jax.jit(resnet_reference)(params, s)
    assert bool(jnp.allclose(policy, p_ref, atol=5e-2, rtol=5e-2))
    assert bool(jnp.allclose(value, v_ref, atol=5e-2, rtol=5e-2))
    print("KERNEL_OK")
</pallas_src>

<mosaic_0001>
module attributes {stable_mosaic.version = 11 : i64} {
  func.func @_resnet_kernel(%arg0: memref<39x1152x128xbf16, #tpu.memory_space<any>>, %arg1: memref<144x128xf32, #tpu.memory_space<vmem>>, %arg2: memref<39x1x128xf32, #tpu.memory_space<vmem>>, %arg3: memref<144x128xf32, #tpu.memory_space<vmem>>, %arg4: memref<2x144xf32, #tpu.memory_space<vmem>>, %arg5: memref<128x8xbf16, #tpu.memory_space<vmem>>, %arg6: memref<1x8xf32, #tpu.memory_space<vmem>>, %arg7: memref<128x128xbf16, #tpu.memory_space<vmem>>, %arg8: memref<1x128xf32, #tpu.memory_space<vmem>>, %arg9: memref<3x144x32xf32, #tpu.memory_space<vmem>>, %arg10: memref<1x32xf32, #tpu.memory_space<vmem>>, %arg11: memref<32x8xf32, #tpu.memory_space<vmem>>, %arg12: memref<1x8xf32, #tpu.memory_space<vmem>>, %arg13: memref<144x896xf32, #tpu.memory_space<vmem>>, %arg14: memref<896x7xf32, #tpu.memory_space<vmem>>, %arg15: memref<1x7xf32, #tpu.memory_space<vmem>>, %arg16: memref<2x7xf32, #tpu.memory_space<vmem>>, %arg17: memref<2x1xf32, #tpu.memory_space<vmem>>, %arg18: memref<2x1152x128xbf16, #tpu.memory_space<vmem>>, %arg19: memref<144x1152xbf16, #tpu.memory_space<vmem>>, %arg20: memref<2x!tpu.dma_semaphore, #tpu.memory_space<semaphore_mem>>) attributes {dimension_semantics = [], scalar_prefetch = 0 : i64, scratch_operands = 3 : i64, tpu.core_type = #tpu.core_type<tc>} {
    %c0_i32 = arith.constant 0 : i32
    %c0_i32_0 = arith.constant 0 : i32
    %c0_i32_1 = arith.constant 0 : i32
    %c0_i32_2 = arith.constant 0 : i32
    %c0_i32_3 = arith.constant 0 : i32
    %0 = tpu.memref_slice %arg0[%c0_i32, %c0_i32_2, %c0_i32_3] : memref<39x1152x128xbf16, #tpu.memory_space<any>> -> memref<1x1152x128xbf16, #tpu.memory_space<any>>
    %1 = tpu.memref_squeeze %0 : memref<1x1152x128xbf16, #tpu.memory_space<any>> -> memref<1152x128xbf16, #tpu.memory_space<any>>
    %c0_i32_4 = arith.constant 0 : i32
    %c0_i32_5 = arith.constant 0 : i32
    %2 = tpu.memref_slice %arg18[%c0_i32_0, %c0_i32_4, %c0_i32_5] : memref<2x1152x128xbf16, #tpu.memory_space<vmem>> -> memref<1x1152x128xbf16, #tpu.memory_space<vmem>>
    %3 = tpu.memref_squeeze %2 : memref<1x1152x128xbf16, #tpu.memory_space<vmem>> -> memref<1152x128xbf16, #tpu.memory_space<vmem>>
    %4 = tpu.memref_slice %arg20[%c0_i32_1] : memref<2x!tpu.dma_semaphore, #tpu.memory_space<semaphore_mem>> -> memref<1x!tpu.dma_semaphore, #tpu.memory_space<semaphore_mem>>
    %5 = tpu.memref_squeeze %4 : memref<1x!tpu.dma_semaphore, #tpu.memory_space<semaphore_mem>> -> memref<!tpu.dma_semaphore, #tpu.memory_space<semaphore_mem>>
    tpu.enqueue_dma source(%1 : memref<1152x128xbf16, #tpu.memory_space<any>>) target(%3 : memref<1152x128xbf16, #tpu.memory_space<vmem>>) target_semaphore(%5 : memref<!tpu.dma_semaphore, #tpu.memory_space<semaphore_mem>>)
    %c0 = arith.constant 0 : index
    %c0_6 = arith.constant 0 : index
    %6 = vector.load %arg1[%c0, %c0_6] : memref<144x128xf32, #tpu.memory_space<vmem>>, vector<144x128xf32>
    %c1_i32 = arith.constant 1 : i32
    %c1_i32_7 = arith.constant 1 : i32
    %c1_i32_8 = arith.constant 1 : i32
    %c0_i32_9 = arith.constant 0 : i32
    %c0_i32_10 = arith.constant 0 : i32
    %7 = tpu.memref_slice %arg0[%c1_i32, %c0_i32_9, %c0_i32_10] : memref<39x1152x128xbf16, #tpu.memory_space<any>> -> memref<1x1152x128xbf16, #tpu.memory_space<any>>
    %8 = tpu.memref_squeeze %7 : memref<1x1152x128xbf16, #tpu.memory_space<any>> -> memref<1152x128xbf16, #tpu.memory_space<any>>
    %c0_i32_11 = arith.constant 0 : i32
    %c0_i32_12 = arith.constant 0 : i32
    %9 = tpu.memref_slice %arg18[%c1_i32_7, %c0_i32_11, %c0_i32_12] : memref<2x1152x128xbf16, #tpu.memory_space<vmem>> -> memref<1x1152x128xbf16, #tpu.memory_space<vmem>>
    %10 = tpu.memref_squeeze %9 : memref<1x1152x128xbf16, #tpu.memory_space<vmem>> -> memref<1152x128xbf16, #tpu.memory_space<vmem>>
    %11 = tpu.memref_slice %arg20[%c1_i32_8] : memref<2x!tpu.dma_semaphore, #tpu.memory_space<semaphore_mem>> -> memref<1x!tpu.dma_semaphore, #tpu.memory_space<semaphore_mem>>
    %12 = tpu.memref_squeeze %11 : memref<1x!tpu.dma_semaphore, #tpu.memory_space<semaphore_mem>> -> memref<!tpu.dma_semaphore, #tpu.memory_space<semaphore_mem>>
    tpu.enqueue_dma source(%8 : memref<1152x128xbf16, #tpu.memory_space<any>>) target(%10 : memref<1152x128xbf16, #tpu.memory_space<vmem>>) target_semaphore(%12 : memref<!tpu.dma_semaphore, #tpu.memory_space<semaphore_mem>>)
    %c0_i32_13 = arith.constant 0 : i32
    %c0_i32_14 = arith.constant 0 : i32
    %c0_i32_15 = arith.constant 0 : i32
    %c0_i32_16 = arith.constant 0 : i32
    %c0_i32_17 = arith.constant 0 : i32
    %13 = tpu.memref_slice %arg0[%c0_i32_13, %c0_i32_16, %c0_i32_17] : memref<39x1152x128xbf16, #tpu.memory_space<any>> -> memref<1x1152x128xbf16, #tpu.memory_space<any>>
    %14 = tpu.memref_squeeze %13 : memref<1x1152x128xbf16, #tpu.memory_space<any>> -> memref<1152x128xbf16, #tpu.memory_space<any>>
    %c0_i32_18 = arith.constant 0 : i32
    %c0_i32_19 = arith.constant 0 : i32
    %15 = tpu.memref_slice %arg18[%c0_i32_14, %c0_i32_18, %c0_i32_19] : memref<2x1152x128xbf16, #tpu.memory_space<vmem>> -> memref<1x1152x128xbf16, #tpu.memory_space<vmem>>
    %16 = tpu.memref_squeeze %15 : memref<1x1152x128xbf16, #tpu.memory_space<vmem>> -> memref<1152x128xbf16, #tpu.memory_space<vmem>>
    %17 = tpu.memref_slice %arg20[%c0_i32_15] : memref<2x!tpu.dma_semaphore, #tpu.memory_space<semaphore_mem>> -> memref<1x!tpu.dma_semaphore, #tpu.memory_space<semaphore_mem>>
    %18 = tpu.memref_squeeze %17 : memref<1x!tpu.dma_semaphore, #tpu.memory_space<semaphore_mem>> -> memref<!tpu.dma_semaphore, #tpu.memory_space<semaphore_mem>>
    tpu.wait_dma2 semaphore(%18 : memref<!tpu.dma_semaphore, #tpu.memory_space<semaphore_mem>>) src(%14 : memref<1152x128xbf16, #tpu.memory_space<any>>) dst(%16 : memref<1152x128xbf16, #tpu.memory_space<vmem>>)
    %c10_i32 = arith.constant 10 : i32
    %19 = tpu.dynamic_rotate %6 by %c10_i32 dim 0 : vector<144x128xf32>, i32 -> vector<144x128xf32>
    %20 = arith.truncf %19 : vector<144x128xf32> to vector<144x128xbf16>
    %c0_20 = arith.constant 0 : index
    %c0_21 = arith.constant 0 : index
    %21 = vector.load %arg19[%c0_20, %c0_21] : memref<144x1152xbf16, #tpu.memory_space<vmem>>, vector<144x128xbf16>
    tpu.vector_store %arg19[%c0_20, %c0_21], %20 {strides = array<i32>} : memref<144x1152xbf16, #tpu.memory_space<vmem>>, vector<144x128xbf16>,
    %c9_i32 = arith.constant 9 : i32
    %22 = tpu.dynamic_rotate %6 by %c9_i32 dim 0 : vector<144x128xf32>, i32 -> vector<144x128xf32>
    %23 = arith.truncf %22 : vector<144x128xf32> to vector<144x128xbf16>
    %c0_22 = arith.constant 0 : index
    %c128 = arith.constant 128 : index
    %24 = vector.load %arg19[%c0_22, %c128] : memref<144x1152xbf16, #tpu.memory_space<vmem>>, vector<144x128xbf16>
    tpu.vector_store %arg19[%c0_22, %c128], %23 {strides = array<i32>} : memref<144x1152xbf16, #tpu.memory_space<vmem>>, vector<144x128xbf16>,
    %c8_i32 = arith.constant 8 : i32
    %25 = tpu.dynamic_rotate %6 by %c8_i32 dim 0 : vector<144x128xf32>, i32 -> vector<144x128xf32>
    %26 = arith.truncf %25 : vector<144x128xf32> to vector<144x128xbf16>
    %c0_23 = arith.constant 0 : index
    %c256 = arith.constant 256 : index
    %27 = vector.load %arg19[%c0_23, %c256] : memref<144x1152xbf16, #tpu.memory_space<vmem>>, vector<144x128xbf16>
    tpu.vector_store %arg19[%c0_23, %c256], %26 {strides = array<i32>} : memref<144x1152xbf16, #tpu.memory_space<vmem>>, vector<144x128xbf16>,
    %c1_i32_24 = arith.constant 1 : i32
    %28 = tpu.dynamic_rotate %6 by %c1_i32_24 dim 0 : vector<144x128xf32>, i32 -> vector<144x128xf32>
    %29 = arith.truncf %28 : vector<144x128xf32> to vector<144x128xbf16>
    %c0_25 = arith.constant 0 : index
    %c384 = arith.constant 384 : index
    %30 = vector.load %arg19[%c0_25, %c384] : memref<144x1152xbf16, #tpu.memory_space<vmem>>, vector<144x128xbf16>
    tpu.vector_store %arg19[%c0_25, %c384], %29 {strides = array<i32>} : memref<144x1152xbf16, #tpu.memory_space<vmem>>, vector<144x128xbf16>,
    %31 = arith.truncf %6 : vector<144x128xf32> to vector<144x128xbf16>
    %c0_26 = arith.constant 0 : index
    %c512 = arith.constant 512 : index
    %32 = vector.load %arg19[%c0_26, %c512] : memref<144x1152xbf16, #tpu.memory_space<vmem>>, vector<144x128xbf16>
    tpu.vector_store %arg19[%c0_26, %c512], %31 {strides = array<i32>} : memref<144x1152xbf16, #tpu.memory_space<vmem>>, vector<144x128xbf16>,
    %c143_i32 = arith.constant 143 : i32
    %33 = tpu.dynamic_rotate %6 by %c143_i32 dim 0 : vector<144x128xf32>, i32 -> vector<144x128xf32>
    %34 = arith.truncf %33 : vector<144x128xf32> to vector<144x128xbf16>
    %c0_27 = arith.constant 0 : index
    %c640 = arith.constant 640 : index
    %35 = vector.load %arg19[%c0_27, %c640] : memref<144x1152xbf16, #tpu.memory_space<vmem>>, vector<144x128xbf16>
    tpu.vector_store %arg19[%c0_27, %c640], %34 {strides = array<i32>} : memref<144x1152xbf16, #tpu.memory_space<vmem>>, vector<144x128xbf16>,
    %c136_i32 = arith.constant 136 : i32
    %36 = tpu.dynamic_rotate %6 by %c136_i32 dim 0 : vector<144x128xf32>, i32 -> vector<144x128xf32>
    %37 = arith.truncf %36 : vector<144x128xf32> to vector<144x128xbf16>
    %c0_28 = arith.constant 0 : index
    %c768 = arith.constant 768 : index
    %38 = vector.load %arg19[%c0_28, %c768] : memref<144x1152xbf16, #tpu.memory_space<vmem>>, vector<144x128xbf16>
    tpu.vector_store %arg19[%c0_28, %c768], %37 {strides = array<i32>} : memref<144x1152xbf16, #tpu.memory_space<vmem>>, vector<144x128xbf16>,
    %c135_i32 = arith.constant 135 : i32
    %39 = tpu.dynamic_rotate %6 by %c135_i32 dim 0 : vector<144x128xf32>, i32 -> vector<144x128xf32>
    %40 = arith.truncf %39 : vector<144x128xf32> to vector<144x128xbf16>
    %c0_29 = arith.constant 0 : index
    %c896 = arith.constant 896 : index
    %41 = vector.load %arg19[%c0_29, %c896] : memref<144x1152xbf16, #tpu.memory_space<vmem>>, vector<144x128xbf16>
    tpu.vector_store %arg19[%c0_29, %c896], %40 {strides = array<i32>} : memref<144x1152xbf16, #tpu.memory_space<vmem>>, vector<144x128xbf16>,
    %c134_i32 = arith.constant 134 : i32
    %42 = tpu.dynamic_rotate %6 by %c134_i32 dim 0 : vector<144x128xf32>, i32 -> vector<144x128xf32>
    %43 = arith.truncf %42 : vector<144x128xf32> to vector<144x128xbf16>
    %c0_30 = arith.constant 0 : index
    %c1024 = arith.constant 1024 : index
    %44 = vector.load %arg19[%c0_30, %c1024] : memref<144x1152xbf16, #tpu.memory_space<vmem>>, vector<144x128xbf16>
    tpu.vector_store %arg19[%c0_30, %c1024], %43 {strides = array<i32>} : memref<144x1152xbf16, #tpu.memory_space<vmem>>, vector<144x128xbf16>,
    %c0_31 = arith.constant 0 : index
    %c0_32 = arith.constant 0 : index
    %45 = vector.load %arg19[%c0_31, %c0_32] : memref<144x1152xbf16, #tpu.memory_space<vmem>>, vector<144x1152xbf16>
    %c0_33 = arith.constant 0 : index
    %c0_34 = arith.constant 0 : index
    %c0_35 = arith.constant 0 : index
    %46 = vector.load %arg18[%c0_33, %c0_34, %c0_35] : memref<2x1152x128xbf16, #tpu.memory_space<vmem>>, vector<1x1152x128xbf16>
    %47 = vector.shape_cast %46 : vector<1x1152x128xbf16> to vector<1152x128xbf16>
    %cst = arith.constant dense<0.000000e+00> : vector<144x128xf32>
    %48 = tpu.matmul %45, %47, %cst {dimension_numbers = #tpu.dot_dimension_numbers<[1], [0], [0], [1], [0, 0, 1, 1], [], []>} : vector<144x1152xbf16>, vector<1152x128xbf16>, vector<144x128xf32> -> vector<144x128xf32>
    %c0_36 = arith.constant 0 : index
    %c0_37 = arith.constant 0 : index
    %c0_38 = arith.constant 0 : index
    %49 = vector.load %arg2[%c0_36, %c0_37, %c0_38] : memref<39x1x128xf32, #tpu.memory_space<vmem>>, vector<1x1x128xf32>
    %50 = vector.shape_cast %49 : vector<1x1x128xf32> to vector<1x128xf32>
    %51 = vector.broadcast %50 : vector<1x128xf32> to vector<144x128xf32>
    %52 = arith.addf %48, %51 : vector<144x128xf32>
    %cst_39 = arith.constant 0.000000e+00 : f32
    %53 = vector.broadcast %cst_39 : f32 to vector<144x128xf32>
    %54 = arith.maximumf %52, %53 : vector<144x128xf32>
    %c0_40 = arith.constant 0 : index
    %c0_41 = arith.constant 0 : index
    %55 = vector.load %arg3[%c0_40, %c0_41] : memref<144x128xf32, #tpu.memory_space<vmem>>, vector<144x128xf32>
    %56 = arith.mulf %54, %55 : vector<144x128xf32>
    %c0_i32_42 = arith.constant 0 : i32
    %c19_i32 = arith.constant 19 : i32
    %57 = arith.addi %c0_i32_42, %c19_i32 : i32
    %c1_i32_43 = arith.constant 1 : i32
    %58 = scf.for %arg21 = %c0_i32_42 to %57 step %c1_i32_43 iter_args(%arg22 = %56) -> (vector<144x128xf32>)  : i32 {
      %c2_i32 = arith.constant 2 : i32
      %126 = arith.muli %c2_i32, %arg21 : i32
      %c1_i32_91 = arith.constant 1 : i32
      %127 = arith.addi %c1_i32_91, %126 : i32
      %c2_i32_92 = arith.constant 2 : i32
      %128 = arith.muli %c2_i32_92, %arg21 : i32
      %c2_i32_93 = arith.constant 2 : i32
      %129 = arith.addi %c2_i32_93, %128 : i32
      %c0_i32_94 = arith.constant 0 : i32
      %c0_i32_95 = arith.constant 0 : i32
      %c0_i32_96 = arith.constant 0 : i32
      %c0_i32_97 = arith.constant 0 : i32
      %130 = tpu.memref_slice %arg0[%129, %c0_i32_96, %c0_i32_97] : memref<39x1152x128xbf16, #tpu.memory_space<any>> -> memref<1x1152x128xbf16, #tpu.memory_space<any>>
      %131 = tpu.memref_squeeze %130 : memref<1x1152x128xbf16, #tpu.memory_space<any>> -> memref<1152x128xbf16, #tpu.memory_space<any>>
      %c0_i32_98 = arith.constant 0 : i32
      %c0_i32_99 = arith.constant 0 : i32
      %132 = tpu.memref_slice %arg18[%c0_i32_94, %c0_i32_98, %c0_i32_99] : memref<2x1152x128xbf16, #tpu.memory_space<vmem>> -> memref<1x1152x128xbf16, #tpu.memory_space<vmem>>
      %133 = tpu.memref_squeeze %132 : memref<1x1152x128xbf16, #tpu.memory_space<vmem>> -> memref<1152x128xbf16, #tpu.memory_space<vmem>>
      %134 = tpu.memref_slice %arg20[%c0_i32_95] : memref<2x!tpu.dma_semaphore, #tpu.memory_space<semaphore_mem>> -> memref<1x!tpu.dma_semaphore, #tpu.memory_space<semaphore_mem>>
      %135 = tpu.memref_squeeze %134 : memref<1x!tpu.dma_semaphore, #tpu.memory_space<semaphore_mem>> -> memref<!tpu.dma_semaphore, #tpu.memory_space<semaphore_mem>>
      tpu.enqueue_dma source(%131 : memref<1152x128xbf16, #tpu.memory_space<any>>) target(%133 : memref<1152x128xbf16, #tpu.memory_space<vmem>>) target_semaphore(%135 : memref<!tpu.dma_semaphore, #tpu.memory_space<semaphore_mem>>)
      %c0_i32_100 = arith.constant 0 : i32
      %c1_i32_101 = arith.constant 1 : i32
      %c1_i32_102 = arith.constant 1 : i32
      %c0_i32_103 = arith.constant 0 : i32
      %c0_i32_104 = arith.constant 0 : i32
      %136 = tpu.memref_slice %arg0[%c0_i32_100, %c0_i32_103, %c0_i32_104] : memref<39x1152x128xbf16, #tpu.memory_space<any>> -> memref<1x1152x128xbf16, #tpu.memory_space<any>>
      %137 = tpu.memref_squeeze %136 : memref<1x1152x128xbf16, #tpu.memory_space<any>> -> memref<1152x128xbf16, #tpu.memory_space<any>>
      %c0_i32_105 = arith.constant 0 : i32
      %c0_i32_106 = arith.constant 0 : i32
      %138 = tpu.memref_slice %arg18[%c1_i32_101, %c0_i32_105, %c0_i32_106] : memref<2x1152x128xbf16, #tpu.memory_space<vmem>> -> memref<1x1152x128xbf16, #tpu.memory_space<vmem>>
      %139 = tpu.memref_squeeze %138 : memref<1x1152x128xbf16, #tpu.memory_space<vmem>> -> memref<1152x128xbf16, #tpu.memory_space<vmem>>
      %140 = tpu.memref_slice %arg20[%c1_i32_102] : memref<2x!tpu.dma_semaphore, #tpu.memory_space<semaphore_mem>> -> memref<1x!tpu.dma_semaphore, #tpu.memory_space<semaphore_mem>>
      %141 = tpu.memref_squeeze %140 : memref<1x!tpu.dma_semaphore, #tpu.memory_space<semaphore_mem>> -> memref<!tpu.dma_semaphore, #tpu.memory_space<semaphore_mem>>
      tpu.wait_dma2 semaphore(%141 : memref<!tpu.dma_semaphore, #tpu.memory_space<semaphore_mem>>) src(%137 : memref<1152x128xbf16, #tpu.memory_space<any>>) dst(%139 : memref<1152x128xbf16, #tpu.memory_space<vmem>>)
      %c10_i32_107 = arith.constant 10 : i32
      %142 = tpu.dynamic_rotate %arg22 by %c10_i32_107 dim 0 : vector<144x128xf32>, i32 -> vector<144x128xf32>
      %143 = arith.truncf %142 : vector<144x128xf32> to vector<144x128xbf16>
      %c0_108 = arith.constant 0 : index
      %c0_109 = arith.constant 0 : index
      %144 = vector.load %arg19[%c0_108, %c0_109] : memref<144x1152xbf16, #tpu.memory_space<vmem>>, vector<144x128xbf16>
      tpu.vector_store %arg19[%c0_108, %c0_109], %143 {strides = array<i32>} : memref<144x1152xbf16, #tpu.memory_space<vmem>>, vector<144x128xbf16>,
      %c9_i32_110 = arith.constant 9 : i32
      %145 = tpu.dynamic_rotate %arg22 by %c9_i32_110 dim 0 : vector<144x128xf32>, i32 -> vector<144x128xf32>
      %146 = arith.truncf %145 : vector<144x128xf32> to vector<144x128xbf16>
      %c0_111 = arith.constant 0 : index
      %c128_112 = arith.constant 128 : index
      %147 = vector.load %arg19[%c0_111, %c128_112] : memref<144x1152xbf16, #tpu.memory_space<vmem>>, vector<144x128xbf16>
      tpu.vector_store %arg19[%c0_111, %c128_112], %146 {strides = array<i32>} : memref<144x1152xbf16, #tpu.memory_space<vmem>>, vector<144x128xbf16>,
      %c8_i32_113 = arith.constant 8 : i32
      %148 = tpu.dynamic_rotate %arg22 by %c8_i32_113 dim 0 : vector<144x128xf32>, i32 -> vector<144x128xf32>
      %149 = arith.truncf %148 : vector<144x128xf32> to vector<144x128xbf16>
      %c0_114 = arith.constant 0 : index
      %c256_115 = arith.constant 256 : index
      %150 = vector.load %arg19[%c0_114, %c256_115] : memref<144x1152xbf16, #tpu.memory_space<vmem>>, vector<144x128xbf16>
      tpu.vector_store %arg19[%c0_114, %c256_115], %149 {strides = array<i32>} : memref<144x1152xbf16, #tpu.memory_space<vmem>>, vector<144x128xbf16>,
      %c1_i32_116 = arith.constant 1 : i32
      %151 = tpu.dynamic_rotate %arg22 by %c1_i32_116 dim 0 : vector<144x128xf32>, i32 -> vector<144x128xf32>
      %152 = arith.truncf %151 : vector<144x128xf32> to vector<144x128xbf16>
      %c0_117 = arith.constant 0 : index
      %c384_118 = arith.constant 384 : index
      %153 = vector.load %arg19[%c0_117, %c384_118] : memref<144x1152xbf16, #tpu.memory_space<vmem>>, vector<144x128xbf16>
      tpu.vector_store %arg19[%c0_117, %c384_118], %152 {strides = array<i32>} : memref<144x1152xbf16, #tpu.memory_space<vmem>>, vector<144x128xbf16>,
      %154 = arith.truncf %arg22 : vector<144x128xf32> to vector<144x128xbf16>
      %c0_119 = arith.constant 0 : index
      %c512_120 = arith.constant 512 : index
      %155 = vector.load %arg19[%c0_119, %c512_120] : memref<144x1152xbf16, #tpu.memory_space<vmem>>, vector<144x128xbf16>
      tpu.vector_store %arg19[%c0_119, %c512_120], %154 {strides = array<i32>} : memref<144x1152xbf16, #tpu.memory_space<vmem>>, vector<144x128xbf16>,
      %c143_i32_121 = arith.constant 143 : i32
      %156 = tpu.dynamic_rotate %arg22 by %c143_i32_121 dim 0 : vector<144x128xf32>, i32 -> vector<144x128xf32>
      %157 = arith.truncf %156 : vector<144x128xf32> to vector<144x128xbf16>
      %c0_122 = arith.constant 0 : index
      %c640_123 = arith.constant 640 : index
      %158 = vector.load %arg19[%c0_122, %c640_123] : memref<144x1152xbf16, #tpu.memory_space<vmem>>, vector<144x128xbf16>
      tpu.vector_store %arg19[%c0_122, %c640_123], %157 {strides = array<i32>} : memref<144x1152xbf16, #tpu.memory_space<vmem>>, vector<144x128xbf16>,
      %c136_i32_124 = arith.constant 136 : i32
      %159 = tpu.dynamic_rotate %arg22 by %c136_i32_124 dim 0 : vector<144x128xf32>, i32 -> vector<144x128xf32>
      %160 = arith.truncf %159 : vector<144x128xf32> to vector<144x128xbf16>
      %c0_125 = arith.constant 0 : index
      %c768_126 = arith.constant 768 : index
      %161 = vector.load %arg19[%c0_125, %c768_126] : memref<144x1152xbf16, #tpu.memory_space<vmem>>, vector<144x128xbf16>
      tpu.vector_store %arg19[%c0_125, %c768_126], %160 {strides = array<i32>} : memref<144x1152xbf16, #tpu.memory_space<vmem>>, vector<144x128xbf16>,
      %c135_i32_127 = arith.constant 135 : i32
      %162 = tpu.dynamic_rotate %arg22 by %c135_i32_127 dim 0 : vector<144x128xf32>, i32 -> vector<144x128xf32>
      %163 = arith.truncf %162 : vector<144x128xf32> to vector<144x128xbf16>
      %c0_128 = arith.constant 0 : index
      %c896_129 = arith.constant 896 : index
      %164 = vector.load %arg19[%c0_128, %c896_129] : memref<144x1152xbf16, #tpu.memory_space<vmem>>, vector<144x128xbf16>
      tpu.vector_store %arg19[%c0_128, %c896_129], %163 {strides = array<i32>} : memref<144x1152xbf16, #tpu.memory_space<vmem>>, vector<144x128xbf16>,
      %c134_i32_130 = arith.constant 134 : i32
      %165 = tpu.dynamic_rotate %arg22 by %c134_i32_130 dim 0 : vector<144x128xf32>, i32 -> vector<144x128xf32>
      %166 = arith.truncf %165 : vector<144x128xf32> to vector<144x128xbf16>
      %c0_131 = arith.constant 0 : index
      %c1024_132 = arith.constant 1024 : index
      %167 = vector.load %arg19[%c0_131, %c1024_132] : memref<144x1152xbf16, #tpu.memory_space<vmem>>, vector<144x128xbf16>
      tpu.vector_store %arg19[%c0_131, %c1024_132], %166 {strides = array<i32>} : memref<144x1152xbf16, #tpu.memory_space<vmem>>, vector<144x128xbf16>,
      %c0_133 = arith.constant 0 : index
      %c0_134 = arith.constant 0 : index
      %168 = vector.load %arg19[%c0_133, %c0_134] : memref<144x1152xbf16, #tpu.memory_space<vmem>>, vector<144x1152xbf16>
      %c1_135 = arith.constant 1 : index
      %c0_136 = arith.constant 0 : index
      %c0_137 = arith.constant 0 : index
      %169 = vector.load %arg18[%c1_135, %c0_136, %c0_137] : memref<2x1152x128xbf16, #tpu.memory_space<vmem>>, vector<1x1152x128xbf16>
      %170 = vector.shape_cast %169 : vector<1x1152x128xbf16> to vector<1152x128xbf16>
      %cst_138 = arith.constant dense<0.000000e+00> : vector<144x128xf32>
      %171 = tpu.matmul %168, %170, %cst_138 {dimension_numbers = #tpu.dot_dimension_numbers<[1], [0], [0], [1], [0, 0, 1, 1], [], []>} : vector<144x1152xbf16>, vector<1152x128xbf16>, vector<144x128xf32> -> vector<144x128xf32>
      %172 = arith.index_cast %127 : i32 to index
      %c0_139 = arith.constant 0 : index
      %c0_140 = arith.constant 0 : index
      %173 = vector.load %arg2[%172, %c0_139, %c0_140] : memref<39x1x128xf32, #tpu.memory_space<vmem>>, vector<1x1x128xf32>
      %174 = vector.shape_cast %173 : vector<1x1x128xf32> to vector<1x128xf32>
      %175 = vector.broadcast %174 : vector<1x128xf32> to vector<144x128xf32>
      %176 = arith.addf %171, %175 : vector<144x128xf32>
      %cst_141 = arith.constant 0.000000e+00 : f32
      %177 = vector.broadcast %cst_141 : f32 to vector<144x128xf32>
      %178 = arith.maximumf %176, %177 : vector<144x128xf32>
      %c0_142 = arith.constant 0 : index
      %c0_143 = arith.constant 0 : index
      %179 = vector.load %arg3[%c0_142, %c0_143] : memref<144x128xf32, #tpu.memory_space<vmem>>, vector<144x128xf32>
      %180 = arith.mulf %178, %179 : vector<144x128xf32>
      %c2_i32_144 = arith.constant 2 : i32
      %181 = arith.muli %c2_i32_144, %arg21 : i32
      %c2_i32_145 = arith.constant 2 : i32
      %182 = arith.addi %c2_i32_145, %181 : i32
      %c2_i32_146 = arith.constant 2 : i32
      %183 = arith.muli %c2_i32_146, %arg21 : i32
      %c3_i32 = arith.constant 3 : i32
      %184 = arith.addi %c3_i32, %183 : i32
      %c18_i32 = arith.constant 18 : i32
      %185 = arith.cmpi slt, %arg21, %c18_i32 : i32
      %186 = arith.extui %185 : i1 to i32
      %c0_i32_147 = arith.constant 0 : i32
      %187 = arith.cmpi ne, %186, %c0_i32_147 : i32
      scf.if %187 {
        %c1_i32_192 = arith.constant 1 : i32
        %c1_i32_193 = arith.constant 1 : i32
        %c0_i32_194 = arith.constant 0 : i32
        %c0_i32_195 = arith.constant 0 : i32
        %234 = tpu.memref_slice %arg0[%184, %c0_i32_194, %c0_i32_195] : memref<39x1152x128xbf16, #tpu.memory_space<any>> -> memref<1x1152x128xbf16, #tpu.memory_space<any>>
        %235 = tpu.memref_squeeze %234 : memref<1x1152x128xbf16, #tpu.memory_space<any>> -> memref<1152x128xbf16, #tpu.memory_space<any>>
        %c0_i32_196 = arith.constant 0 : i32
        %c0_i32_197 = arith.constant 0 : i32
        %236 = tpu.memref_slice %arg18[%c1_i32_192, %c0_i32_196, %c0_i32_197] : memref<2x1152x128xbf16, #tpu.memory_space<vmem>> -> memref<1x1152x128xbf16, #tpu.memory_space<vmem>>
        %237 = tpu.memref_squeeze %236 : memref<1x1152x128xbf16, #tpu.memory_space<vmem>> -> memref<1152x128xbf16, #tpu.memory_space<vmem>>
        %238 = tpu.memref_slice %arg20[%c1_i32_193] : memref<2x!tpu.dma_semaphore, #tpu.memory_space<semaphore_mem>> -> memref<1x!tpu.dma_semaphore, #tpu.memory_space<semaphore_mem>>
        %239 = tpu.memref_squeeze %238 : memref<1x!tpu.dma_semaphore, #tpu.memory_space<semaphore_mem>> -> memref<!tpu.dma_semaphore, #tpu.memory_space<semaphore_mem>>
        tpu.enqueue_dma source(%235 : memref<1152x128xbf16, #tpu.memory_space<any>>) target(%237 : memref<1152x128xbf16, #tpu.memory_space<vmem>>) target_semaphore(%239 : memref<!tpu.dma_semaphore, #tpu.memory_space<semaphore_mem>>)
      } else {
      }
      %c0_i32_148 = arith.constant 0 : i32
      %c0_i32_149 = arith.constant 0 : i32
      %c0_i32_150 = arith.constant 0 : i32
      %c0_i32_151 = arith.constant 0 : i32
      %c0_i32_152 = arith.constant 0 : i32
      %188 = tpu.memref_slice %arg0[%c0_i32_148, %c0_i32_151, %c0_i32_152] : memref<39x1152x128xbf16, #tpu.memory_space<any>> -> memref<1x1152x128xbf16, #tpu.memory_space<any>>
      %189 = tpu.memref_squeeze %188 : memref<1x1152x128xbf16, #tpu.memory_space<any>> -> memref<1152x128xbf16, #tpu.memory_space<any>>
      %c0_i32_153 = arith.constant 0 : i32
      %c0_i32_154 = arith.constant 0 : i32
      %190 = tpu.memref_slice %arg18[%c0_i32_149, %c0_i32_153, %c0_i32_154] : memref<2x1152x128xbf16, #tpu.memory_space<vmem>> -> memref<1x1152x128xbf16, #tpu.memory_space<vmem>>
      %191 = tpu.memref_squeeze %190 : memref<1x1152x128xbf16, #tpu.memory_space<vmem>> -> memref<1152x128xbf16, #tpu.memory_space<vmem>>
      %192 = tpu.memref_slice %arg20[%c0_i32_150] : memref<2x!tpu.dma_semaphore, #tpu.memory_space<semaphore_mem>> -> memref<1x!tpu.dma_semaphore, #tpu.memory_space<semaphore_mem>>
      %193 = tpu.memref_squeeze %192 : memref<1x!tpu.dma_semaphore, #tpu.memory_space<semaphore_mem>> -> memref<!tpu.dma_semaphore, #tpu.memory_space<semaphore_mem>>
      tpu.wait_dma2 semaphore(%193 : memref<!tpu.dma_semaphore, #tpu.memory_space<semaphore_mem>>) src(%189 : memref<1152x128xbf16, #tpu.memory_space<any>>) dst(%191 : memref<1152x128xbf16, #tpu.memory_space<vmem>>)
      %c10_i32_155 = arith.constant 10 : i32
      %194 = tpu.dynamic_rotate %180 by %c10_i32_155 dim 0 : vector<144x128xf32>, i32 -> vector<144x128xf32>
      %195 = arith.truncf %194 : vector<144x128xf32> to vector<144x128xbf16>
      %c0_156 = arith.constant 0 : index
      %c0_157 = arith.constant 0 : index
      %196 = vector.load %arg19[%c0_156, %c0_157] : memref<144x1152xbf16, #tpu.memory_space<vmem>>, vector<144x128xbf16>
      tpu.vector_store %arg19[%c0_156, %c0_157], %195 {strides = array<i32>} : memref<144x1152xbf16, #tpu.memory_space<vmem>>, vector<144x128xbf16>,
      %c9_i32_158 = arith.constant 9 : i32
      %197 = tpu.dynamic_rotate %180 by %c9_i32_158 dim 0 : vector<144x128xf32>, i32 -> vector<144x128xf32>
      %198 = arith.truncf %197 : vector<144x128xf32> to vector<144x128xbf16>
      %c0_159 = arith.constant 0 : index
      %c128_160 = arith.constant 128 : index
      %199 = vector.load %arg19[%c0_159, %c128_160] : memref<144x1152xbf16, #tpu.memory_space<vmem>>, vector<144x128xbf16>
      tpu.vector_store %arg19[%c0_159, %c128_160], %198 {strides = array<i32>} : memref<144x1152xbf16, #tpu.memory_space<vmem>>, vector<144x128xbf16>,
      %c8_i32_161 = arith.constant 8 : i32
      %200 = tpu.dynamic_rotate %180 by %c8_i32_161 dim 0 : vector<144x128xf32>, i32 -> vector<144x128xf32>
      %201 = arith.truncf %200 : vector<144x128xf32> to vector<144x128xbf16>
      %c0_162 = arith.constant 0 : index
      %c256_163 = arith.constant 256 : index
      %202 = vector.load %arg19[%c0_162, %c256_163] : memref<144x1152xbf16, #tpu.memory_space<vmem>>, vector<144x128xbf16>
      tpu.vector_store %arg19[%c0_162, %c256_163], %201 {strides = array<i32>} : memref<144x1152xbf16, #tpu.memory_space<vmem>>, vector<144x128xbf16>,
      %c1_i32_164 = arith.constant 1 : i32
      %203 = tpu.dynamic_rotate %180 by %c1_i32_164 dim 0 : vector<144x128xf32>, i32 -> vector<144x128xf32>
      %204 = arith.truncf %203 : vector<144x128xf32> to vector<144x128xbf16>
      %c0_165 = arith.constant 0 : index
      %c384_166 = arith.constant 384 : index
      %205 = vector.load %arg19[%c0_165, %c384_166] : memref<144x1152xbf16, #tpu.memory_space<vmem>>, vector<144x128xbf16>
      tpu.vector_store %arg19[%c0_165, %c384_166], %204 {strides = array<i32>} : memref<144x1152xbf16, #tpu.memory_space<vmem>>, vector<144x128xbf16>,
      %206 = arith.truncf %180 : vector<144x128xf32> to vector<144x128xbf16>
      %c0_167 = arith.constant 0 : index
      %c512_168 = arith.constant 512 : index
      %207 = vector.load %arg19[%c0_167, %c512_168] : memref<144x1152xbf16, #tpu.memory_space<vmem>>, vector<144x128xbf16>
      tpu.vector_store %arg19[%c0_167, %c512_168], %206 {strides = array<i32>} : memref<144x1152xbf16, #tpu.memory_space<vmem>>, vector<144x128xbf16>,
      %c143_i32_169 = arith.constant 143 : i32
      %208 = tpu.dynamic_rotate %180 by %c143_i32_169 dim 0 : vector<144x128xf32>, i32 -> vector<144x128xf32>
      %209 = arith.truncf %208 : vector<144x128xf32> to vector<144x128xbf16>
      %c0_170 = arith.constant 0 : index
      %c640_171 = arith.constant 640 : index
      %210 = vector.load %arg19[%c0_170, %c640_171] : memref<144x1152xbf16, #tpu.memory_space<vmem>>, vector<144x128xbf16>
      tpu.vector_store %arg19[%c0_170, %c640_171], %209 {strides = array<i32>} : memref<144x1152xbf16, #tpu.memory_space<vmem>>, vector<144x128xbf16>,
      %c136_i32_172 = arith.constant 136 : i32
      %211 = tpu.dynamic_rotate %180 by %c136_i32_172 dim 0 : vector<144x128xf32>, i32 -> vector<144x128xf32>
      %212 = arith.truncf %211 : vector<144x128xf32> to vector<144x128xbf16>
      %c0_173 = arith.constant 0 : index
      %c768_174 = arith.constant 768 : index
      %213 = vector.load %arg19[%c0_173, %c768_174] : memref<144x1152xbf16, #tpu.memory_space<vmem>>, vector<144x128xbf16>
      tpu.vector_store %arg19[%c0_173, %c768_174], %212 {strides = array<i32>} : memref<144x1152xbf16, #tpu.memory_space<vmem>>, vector<144x128xbf16>,
      %c135_i32_175 = arith.constant 135 : i32
      %214 = tpu.dynamic_rotate %180 by %c135_i32_175 dim 0 : vector<144x128xf32>, i32 -> vector<144x128xf32>
      %215 = arith.truncf %214 : vector<144x128xf32> to vector<144x128xbf16>
      %c0_176 = arith.constant 0 : index
      %c896_177 = arith.constant 896 : index
      %216 = vector.load %arg19[%c0_176, %c896_177] : memref<144x1152xbf16, #tpu.memory_space<vmem>>, vector<144x128xbf16>
      tpu.vector_store %arg19[%c0_176, %c896_177], %215 {strides = array<i32>} : memref<144x1152xbf16, #tpu.memory_space<vmem>>, vector<144x128xbf16>,
      %c134_i32_178 = arith.constant 134 : i32
      %217 = tpu.dynamic_rotate %180 by %c134_i32_178 dim 0 : vector<144x128xf32>, i32 -> vector<144x128xf32>
      %218 = arith.truncf %217 : vector<144x128xf32> to vector<144x128xbf16>
      %c0_179 = arith.constant 0 : index
      %c1024_180 = arith.constant 1024 : index
      %219 = vector.load %arg19[%c0_179, %c1024_180] : memref<144x1152xbf16, #tpu.memory_space<vmem>>, vector<144x128xbf16>
      tpu.vector_store %arg19[%c0_179, %c1024_180], %218 {strides = array<i32>} : memref<144x1152xbf16, #tpu.memory_space<vmem>>, vector<144x128xbf16>,
      %c0_181 = arith.constant 0 : index
      %c0_182 = arith.constant 0 : index
      %220 = vector.load %arg19[%c0_181, %c0_182] : memref<144x1152xbf16, #tpu.memory_space<vmem>>, vector<144x1152xbf16>
      %c0_183 = arith.constant 0 : index
      %c0_184 = arith.constant 0 : index
      %c0_185 = arith.constant 0 : index
      %221 = vector.load %arg18[%c0_183, %c0_184, %c0_185] : memref<2x1152x128xbf16, #tpu.memory_space<vmem>>, vector<1x1152x128xbf16>
      %222 = vector.shape_cast %221 : vector<1x1152x128xbf16> to vector<1152x128xbf16>
      %cst_186 = arith.constant dense<0.000000e+00> : vector<144x128xf32>
      %223 = tpu.matmul %220, %222, %cst_186 {dimension_numbers = #tpu.dot_dimension_numbers<[1], [0], [0], [1], [0, 0, 1, 1], [], []>} : vector<144x1152xbf16>, vector<1152x128xbf16>, vector<144x128xf32> -> vector<144x128xf32>
      %224 = arith.index_cast %182 : i32 to index
      %c0_187 = arith.constant 0 : index
      %c0_188 = arith.constant 0 : index
      %225 = vector.load %arg2[%224, %c0_187, %c0_188] : memref<39x1x128xf32, #tpu.memory_space<vmem>>, vector<1x1x128xf32>
      %226 = vector.shape_cast %225 : vector<1x1x128xf32> to vector<1x128xf32>
      %227 = vector.broadcast %226 : vector<1x128xf32> to vector<144x128xf32>
      %228 = arith.addf %223, %227 : vector<144x128xf32>
      %229 = arith.addf %228, %arg22 : vector<144x128xf32>
      %cst_189 = arith.constant 0.000000e+00 : f32
      %230 = vector.broadcast %cst_189 : f32 to vector<144x128xf32>
      %231 = arith.maximumf %229, %230 : vector<144x128xf32>
      %c0_190 = arith.constant 0 : index
      %c0_191 = arith.constant 0 : index
      %232 = vector.load %arg3[%c0_190, %c0_191] : memref<144x128xf32, #tpu.memory_space<vmem>>, vector<144x128xf32>
      %233 = arith.mulf %231, %232 : vector<144x128xf32>
      scf.yield %233 : vector<144x128xf32>
    }
    %c19_i32_44 = arith.constant 19 : i32
    %59 = arith.truncf %58 : vector<144x128xf32> to vector<144x128xbf16>
    %c0_45 = arith.constant 0 : index
    %c0_46 = arith.constant 0 : index
    %60 = vector.load %arg5[%c0_45, %c0_46] : memref<128x8xbf16, #tpu.memory_space<vmem>>, vector<128x8xbf16>
    %cst_47 = arith.constant dense<0.000000e+00> : vector<144x8xf32>
    %61 = tpu.matmul %59, %60, %cst_47 {dimension_numbers = #tpu.dot_dimension_numbers<[1], [0], [0], [1], [0, 0, 1, 1], [], []>} : vector<144x128xbf16>, vector<128x8xbf16>, vector<144x8xf32> -> vector<144x8xf32>
    %c0_48 = arith.constant 0 : index
    %c0_49 = arith.constant 0 : index
    %62 = vector.load %arg6[%c0_48, %c0_49] : memref<1x8xf32, #tpu.memory_space<vmem>>, vector<1x8xf32>
    %63 = vector.broadcast %62 : vector<1x8xf32> to vector<144x8xf32>
    %64 = arith.addf %61, %63 : vector<144x8xf32>
    %cst_50 = arith.constant 0.000000e+00 : f32
    %65 = vector.broadcast %cst_50 : f32 to vector<144x8xf32>
    %66 = arith.maximumf %64, %65 : vector<144x8xf32>
    %c0_51 = arith.constant 0 : index
    %c0_52 = arith.constant 0 : index
    %67 = vector.load %arg7[%c0_51, %c0_52] : memref<128x128xbf16, #tpu.memory_space<vmem>>, vector<128x128xbf16>
    %cst_53 = arith.constant dense<0.000000e+00> : vector<144x128xf32>
    %68 = tpu.matmul %59, %67, %cst_53 {dimension_numbers = #tpu.dot_dimension_numbers<[1], [0], [0], [1], [0, 0, 1, 1], [], []>} : vector<144x128xbf16>, vector<128x128xbf16>, vector<144x128xf32> -> vector<144x128xf32>
    %c0_54 = arith.constant 0 : index
    %c0_55 = arith.constant 0 : index
    %69 = vector.load %arg8[%c0_54, %c0_55] : memref<1x128xf32, #tpu.memory_space<vmem>>, vector<1x128xf32>
    %70 = vector.broadcast %69 : vector<1x128xf32> to vector<144x128xf32>
    %71 = arith.addf %68, %70 : vector<144x128xf32>
    %cst_56 = arith.constant 0.000000e+00 : f32
    %72 = vector.broadcast %cst_56 : f32 to vector<144x128xf32>
    %73 = arith.maximumf %71, %72 : vector<144x128xf32>
    %74 = vector.extract_strided_slice %66 {offsets = [0, 0], sizes = [144, 1], strides = [1, 1]} : vector<144x8xf32> to vector<144x1xf32>
    %c0_57 = arith.constant 0 : index
    %c0_58 = arith.constant 0 : index
    %c0_59 = arith.constant 0 : index
    %75 = vector.load %arg9[%c0_57, %c0_58, %c0_59] : memref<3x144x32xf32, #tpu.memory_space<vmem>>, vector<1x144x32xf32>
    %76 = vector.shape_cast %75 : vector<1x144x32xf32> to vector<144x32xf32>
    %77 = vector.broadcast %74 : vector<144x1xf32> to vector<144x32xf32>
    %78 = arith.mulf %77, %76 : vector<144x32xf32>
    %79 = vector.extract_strided_slice %66 {offsets = [0, 1], sizes = [144, 1], strides = [1, 1]} : vector<144x8xf32> to vector<144x1xf32>
    %c1 = arith.constant 1 : index
    %c0_60 = arith.constant 0 : index
    %c0_61 = arith.constant 0 : index
    %80 = vector.load %arg9[%c1, %c0_60, %c0_61] : memref<3x144x32xf32, #tpu.memory_space<vmem>>, vector<1x144x32xf32>
    %81 = vector.shape_cast %80 : vector<1x144x32xf32> to vector<144x32xf32>
    %82 = vector.broadcast %79 : vector<144x1xf32> to vector<144x32xf32>
    %83 = arith.mulf %82, %81 : vector<144x32xf32>
    %84 = arith.addf %78, %83 : vector<144x32xf32>
    %85 = vector.extract_strided_slice %66 {offsets = [0, 2], sizes = [144, 1], strides = [1, 1]} : vector<144x8xf32> to vector<144x1xf32>
    %c2 = arith.constant 2 : index
    %c0_62 = arith.constant 0 : index
    %c0_63 = arith.constant 0 : index
    %86 = vector.load %arg9[%c2, %c0_62, %c0_63] : memref<3x144x32xf32, #tpu.memory_space<vmem>>, vector<1x144x32xf32>
    %87 = vector.shape_cast %86 : vector<1x144x32xf32> to vector<144x32xf32>
    %88 = vector.broadcast %85 : vector<144x1xf32> to vector<144x32xf32>
    %89 = arith.mulf %88, %87 : vector<144x32xf32>
    %90 = arith.addf %84, %89 : vector<144x32xf32>
    %c0_64 = arith.constant 0 : index
    %c0_65 = arith.constant 0 : index
    %91 = vector.load %arg4[%c0_64, %c0_65] : memref<2x144xf32, #tpu.memory_space<vmem>>, vector<2x144xf32>
    %cst_66 = arith.constant dense<0.000000e+00> : vector<2x32xf32>
    %92 = tpu.matmul %91, %90, %cst_66 {dimension_numbers = #tpu.dot_dimension_numbers<[1], [0], [0], [1], [0, 0, 1, 1], [], []>} : vector<2x144xf32>, vector<144x32xf32>, vector<2x32xf32> -> vector<2x32xf32>
    %c0_67 = arith.constant 0 : index
    %c0_68 = arith.constant 0 : index
    %93 = vector.load %arg10[%c0_67, %c0_68] : memref<1x32xf32, #tpu.memory_space<vmem>>, vector<1x32xf32>
    %94 = vector.broadcast %93 : vector<1x32xf32> to vector<2x32xf32>
    %95 = arith.addf %92, %94 : vector<2x32xf32>
    %cst_69 = arith.constant 0.000000e+00 : f32
    %96 = vector.broadcast %cst_69 : f32 to vector<2x32xf32>
    %97 = arith.maximumf %95, %96 : vector<2x32xf32>
    %c0_70 = arith.constant 0 : index
    %c0_71 = arith.constant 0 : index
    %98 = vector.load %arg11[%c0_70, %c0_71] : memref<32x8xf32, #tpu.memory_space<vmem>>, vector<32x8xf32>
    %cst_72 = arith.constant dense<0.000000e+00> : vector<2x8xf32>
    %99 = tpu.matmul %97, %98, %cst_72 {dimension_numbers = #tpu.dot_dimension_numbers<[1], [0], [0], [1], [0, 0, 1, 1], [], []>} : vector<2x32xf32>, vector<32x8xf32>, vector<2x8xf32> -> vector<2x8xf32>
    %c0_73 = arith.constant 0 : index
    %c0_74 = arith.constant 0 : index
    %100 = vector.load %arg12[%c0_73, %c0_74] : memref<1x8xf32, #tpu.memory_space<vmem>>, vector<1x8xf32>
    %101 = vector.broadcast %100 : vector<1x8xf32> to vector<2x8xf32>
    %102 = arith.addf %99, %101 : vector<2x8xf32>
    %103 = math.tanh %102 : vector<2x8xf32>
    %104 = vector.extract_strided_slice %103 {offsets = [0, 0], sizes = [2, 1], strides = [1, 1]} : vector<2x8xf32> to vector<2x1xf32>
    %c0_75 = arith.constant 0 : index
    %c0_76 = arith.constant 0 : index
    %105 = vector.load %arg17[%c0_75, %c0_76] : memref<2x1xf32, #tpu.memory_space<vmem>>, vector<2x1xf32>
    tpu.vector_store %arg17[%c0_75, %c0_76], %104 {strides = array<i32>} : memref<2x1xf32, #tpu.memory_space<vmem>>, vector<2x1xf32>,
    %106 = tpu.concatenate %73, %73, %73, %73, %73, %73, %73 in 1 : vector<144x128xf32>, vector<144x128xf32>, vector<144x128xf32>, vector<144x128xf32>, vector<144x128xf32>, vector<144x128xf32>, vector<144x128xf32> -> vector<144x896xf32>
    %c0_77 = arith.constant 0 : index
    %c0_78 = arith.constant 0 : index
    %107 = vector.load %arg13[%c0_77, %c0_78] : memref<144x896xf32, #tpu.memory_space<vmem>>, vector<144x896xf32>
    %108 = arith.mulf %106, %107 : vector<144x896xf32>
    %c0_79 = arith.constant 0 : index
    %c0_80 = arith.constant 0 : index
    %109 = vector.load %arg4[%c0_79, %c0_80] : memref<2x144xf32, #tpu.memory_space<vmem>>, vector<2x144xf32>
    %cst_81 = arith.constant dense<0.000000e+00> : vector<2x896xf32>
    %110 = tpu.matmul %109, %108, %cst_81 {dimension_numbers = #tpu.dot_dimension_numbers<[1], [0], [0], [1], [0, 0, 1, 1], [], []>} : vector<2x144xf32>, vector<144x896xf32>, vector<2x896xf32> -> vector<2x896xf32>
    %c0_82 = arith.constant 0 : index
    %c0_83 = arith.constant 0 : index
    %111 = vector.load %arg14[%c0_82, %c0_83] : memref<896x7xf32, #tpu.memory_space<vmem>>, vector<896x7xf32>
    %cst_84 = arith.constant dense<0.000000e+00> : vector<2x7xf32>
    %112 = tpu.matmul %110, %111, %cst_84 {dimension_numbers = #tpu.dot_dimension_numbers<[1], [0], [0], [1], [0, 0, 1, 1], [], []>} : vector<2x896xf32>, vector<896x7xf32>, vector<2x7xf32> -> vector<2x7xf32>
    %c0_85 = arith.constant 0 : index
    %c0_86 = arith.constant 0 : index
    %113 = vector.load %arg15[%c0_85, %c0_86] : memref<1x7xf32, #tpu.memory_space<vmem>>, vector<1x7xf32>
    %114 = vector.broadcast %113 : vector<1x7xf32> to vector<2x7xf32>
    %115 = arith.addf %112, %114 : vector<2x7xf32>
    %cst_87 = arith.constant dense<0xFF800000> : vector<2xf32>
    %116 = vector.multi_reduction <maximumf>, %115, %cst_87 [1] : vector<2x7xf32> to vector<2xf32>
    %117 = vector.shape_cast %116 : vector<2xf32> to vector<2x1xf32>
    %118 = vector.broadcast %117 : vector<2x1xf32> to vector<2x7xf32>
    %119 = arith.subf %115, %118 : vector<2x7xf32>
    %120 = math.exp %119 : vector<2x7xf32>
    %cst_88 = arith.constant dense<0.000000e+00> : vector<2xf32>
    %121 = vector.multi_reduction <add>, %120, %cst_88 [1] : vector<2x7xf32> to vector<2xf32>
    %122 = vector.shape_cast %121 : vector<2xf32> to vector<2x1xf32>
    %123 = vector.broadcast %122 : vector<2x1xf32> to vector<2x7xf32>
    %124 = arith.divf %120, %123 : vector<2x7xf32>
    %c0_89 = arith.constant 0 : index
    %c0_90 = arith.constant 0 : index
    %125 = vector.load %arg16[%c0_89, %c0_90] : memref<2x7xf32, #tpu.memory_space<vmem>>, vector<2x7xf32>
    tpu.vector_store %arg16[%c0_89, %c0_90], %124 {strides = array<i32>} : memref<2x7xf32, #tpu.memory_space<vmem>>, vector<2x7xf32>,
    return
  }
}

</mosaic_0001>

<bundles_post_ra>
// kernel: resnet_forward.1
= control target key start
LH: loop header
LB: loop body
LE: loop exit
PB: predicated region body
PF: predicated region fallthrough
CT: control target
= control target key end

     0   :  { %s13733_s0 = inlined_call_operand.vmem [shape: bf16[39,1152,128], index: 0, kind: input, shape index: {}]   ;;  %s13734_s1 = inlined_call_operand.vmem [shape: f32[144,128], index: 1, kind: input, shape index: {}]   ;;  %s13735_s2 = inlined_call_operand.vmem [shape: f32[39,1,128], index: 2, kind: input, shape index: {}]   ;;  %s13736_s3 = inlined_call_operand.vmem [shape: f32[144,128], index: 3, kind: input, shape index: {}]   ;;  %s13737_s4 = inlined_call_operand.vmem [shape: f32[2,144], index: 4, kind: input, shape index: {}]   ;;  %s13738_s5 = inlined_call_operand.vmem [shape: bf16[128,8], index: 5, kind: input, shape index: {}]   ;;  %s13739_s6 = inlined_call_operand.vmem [shape: f32[1,8], index: 6, kind: input, shape index: {}]   ;;  %s13740_s7 = inlined_call_operand.vmem [shape: bf16[128,128], index: 7, kind: input, shape index: {}]   ;;  %s13741_s8 = inlined_call_operand.vmem [shape: f32[1,128], index: 8, kind: input, shape index: {}]   ;;  %s13742_s9 = inlined_call_operand.vmem [shape: f32[3,144,32], index: 9, kind: input, shape index: {}]   ;;  %s13743_s10 = inlined_call_operand.vmem [shape: f32[1,32], index: 10, kind: input, shape index: {}]   ;;  %s13744_s11 = inlined_call_operand.vmem [shape: f32[32,8], index: 11, kind: input, shape index: {}]   ;;  %s13745_s12 = inlined_call_operand.vmem [shape: f32[1,8], index: 12, kind: input, shape index: {}]   ;;  %s13746_s13 = inlined_call_operand.vmem [shape: f32[144,896], index: 13, kind: input, shape index: {}]   ;;  %s13747_s14 = inlined_call_operand.vmem [shape: f32[896,7], index: 14, kind: input, shape index: {}]   ;;  %s13748_s15 = inlined_call_operand.vmem [shape: f32[1,7], index: 15, kind: input, shape index: {}]   ;;  %s13749_s16 = inlined_call_operand.hbm [shape: f32[2,7], index: 16, kind: output, shape index: {0}]   ;;  %s13750_s17 = inlined_call_operand.vmem [shape: f32[2,1], index: 17, kind: output, shape index: {1}]  }
   0x1   :  { %13911 = sst [smem:[#allocation99_spill]] %s13733_s0 }
   0x2   :  { %13912 = sst [smem:[#allocation100_spill]] %s13734_s1 }
   0x3   :  { %23 = vsyncpa [#allocation6], 0  ;;  %s13913_s26 = sld [smem:[#allocation99_spill]] }
   0x9   :  { %v87_v0 = vld [vmem:[%s13913_s26] sm:$0xff]  ;;  %v89_v1 = vld [vmem:[%s13913_s26 + $0x8] sm:$0xff]  ;;  %v91_v2 = vld [vmem:[%s13913_s26 + $0x10] sm:$0xff] }
   0xa   :  { %88 = vst [vmem:[#allocation2] sm:$0xff] %v87_v0  ;;  %90 = vst [vmem:[#allocation2 + $0x8] sm:$0xff] %v89_v1  ;;  %v93_v3 = vld [vmem:[%s13913_s26 + $0x18] sm:$0xff]  ;;  %v95_v4 = vld [vmem:[%s13913_s26 + $0x20] sm:$0xff] }
   0xb   :  { %92 = vst [vmem:[#allocation2 + $0x10] sm:$0xff] %v91_v2  ;;  %94 = vst [vmem:[#allocation2 + $0x18] sm:$0xff] %v93_v3  ;;  %v97_v5 = vld [vmem:[%s13913_s26 + $0x28] sm:$0xff]  ;;  %v99_v6 = vld [vmem:[%s13913_s26 + $0x30] sm:$0xff] }
   0xc   :  { %96 = vst [vmem:[#allocation2 + $0x20] sm:$0xff] %v95_v4  ;;  %v101_v7 = vld [vmem:[%s13913_s26 + $0x38] sm:$0xff]  ;;  %98 = vst [vmem:[#allocation2 + $0x28] sm:$0xff] %v97_v5  ;;  %v103_v8 = vld [vmem:[%s13913_s26 + $0x40] sm:$0xff] }
   0xd   :  { %100 = vst [vmem:[#allocation2 + $0x30] sm:$0xff] %v99_v6  ;;  %102 = vst [vmem:[#allocation2 + $0x38] sm:$0xff] %v101_v7  ;;  %v105_v9 = vld [vmem:[%s13913_s26 + $0x48] sm:$0xff]  ;;  %v107_v10 = vld [vmem:[%s13913_s26 + $0x50] sm:$0xff] }
   0xe   :  { %104 = vst [vmem:[#allocation2 + $0x40] sm:$0xff] %v103_v8  ;;  %106 = vst [vmem:[#allocation2 + $0x48] sm:$0xff] %v105_v9  ;;  %v109_v11 = vld [vmem:[%s13913_s26 + $0x58] sm:$0xff]  ;;  %v111_v12 = vld [vmem:[%s13913_s26 + $0x60] sm:$0xff] }
   0xf   :  { %108 = vst [vmem:[#allocation2 + $0x50] sm:$0xff] %v107_v10  ;;  %v113_v13 = vld [vmem:[%s13913_s26 + $0x68] sm:$0xff]  ;;  %110 = vst [vmem:[#allocation2 + $0x58] sm:$0xff] %v109_v11  ;;  %v115_v14 = vld [vmem:[%s13913_s26 + $0x70] sm:$0xff] }
  0x10   :  { %112 = vst [vmem:[#allocation2 + $0x60] sm:$0xff] %v111_v12  ;;  %114 = vst [vmem:[#allocation2 + $0x68] sm:$0xff] %v113_v13  ;;  %v117_v15 = vld [vmem:[%s13913_s26 + $0x78] sm:$0xff]  ;;  %v119_v16 = vld [vmem:[%s13913_s26 + $0x80] sm:$0xff] }
  0x11   :  { %116 = vst [vmem:[#allocation2 + $0x70] sm:$0xff] %v115_v14  ;;  %118 = vst [vmem:[#allocation2 + $0x78] sm:$0xff] %v117_v15  ;;  %v121_v17 = vld [vmem:[%s13913_s26 + $0x88] sm:$0xff]  ;;  %v123_v18 = vld [vmem:[%s13913_s26 + $0x90] sm:$0xff] }
  0x12   :  { %120 = vst [vmem:[#allocation2 + $0x80] sm:$0xff] %v119_v16  ;;  %v125_v19 = vld [vmem:[%s13913_s26 + $0x98] sm:$0xff]  ;;  %122 = vst [vmem:[#allocation2 + $0x88] sm:$0xff] %v121_v17  ;;  %v127_v20 = vld [vmem:[%s13913_s26 + $0xa0] sm:$0xff] }
  0x13   :  { %124 = vst [vmem:[#allocation2 + $0x90] sm:$0xff] %v123_v18  ;;  %126 = vst [vmem:[#allocation2 + $0x98] sm:$0xff] %v125_v19  ;;  %v129_v21 = vld [vmem:[%s13913_s26 + $0xa8] sm:$0xff]  ;;  %v131_v22 = vld [vmem:[%s13913_s26 + $0xb0] sm:$0xff] }
  0x14   :  { %128 = vst [vmem:[#allocation2 + $0xa0] sm:$0xff] %v127_v20  ;;  %130 = vst [vmem:[#allocation2 + $0xa8] sm:$0xff] %v129_v21  ;;  %v133_v23 = vld [vmem:[%s13913_s26 + $0xb8] sm:$0xff]  ;;  %v135_v24 = vld [vmem:[%s13913_s26 + $0xc0] sm:$0xff] }
  0x15   :  { %132 = vst [vmem:[#allocation2 + $0xb0] sm:$0xff] %v131_v22  ;;  %v137_v25 = vld [vmem:[%s13913_s26 + $0xc8] sm:$0xff]  ;;  %134 = vst [vmem:[#allocation2 + $0xb8] sm:$0xff] %v133_v23  ;;  %v139_v26 = vld [vmem:[%s13913_s26 + $0xd0] sm:$0xff] }
  0x16   :  { %136 = vst [vmem:[#allocation2 + $0xc0] sm:$0xff] %v135_v24  ;;  %138 = vst [vmem:[#allocation2 + $0xc8] sm:$0xff] %v137_v25  ;;  %v141_v27 = vld [vmem:[%s13913_s26 + $0xd8] sm:$0xff]  ;;  %v143_v28 = vld [vmem:[%s13913_s26 + $0xe0] sm:$0xff] }
  0x17   :  { %140 = vst [vmem:[#allocation2 + $0xd0] sm:$0xff] %v139_v26  ;;  %142 = vst [vmem:[#allocation2 + $0xd8] sm:$0xff] %v141_v27  ;;  %v145_v29 = vld [vmem:[%s13913_s26 + $0xe8] sm:$0xff]  ;;  %v147_v30 = vld [vmem:[%s13913_s26 + $0xf0] sm:$0xff] }
  0x18   :  { %144 = vst [vmem:[#allocation2 + $0xe0] sm:$0xff] %v143_v28  ;;  %v149_v31 = vld [vmem:[%s13913_s26 + $0xf8] sm:$0xff]  ;;  %146 = vst [vmem:[#allocation2 + $0xe8] sm:$0xff] %v145_v29  ;;  %v151_v32 = vld [vmem:[%s13913_s26 + $0x100] sm:$0xff] }
  0x19   :  { %148 = vst [vmem:[#allocation2 + $0xf0] sm:$0xff] %v147_v30  ;;  %150 = vst [vmem:[#allocation2 + $0xf8] sm:$0xff] %v149_v31  ;;  %v153_v33 = vld [vmem:[%s13913_s26 + $0x108] sm:$0xff]  ;;  %v155_v34 = vld [vmem:[%s13913_s26 + $0x110] sm:$0xff] }
  0x1a   :  { %152 = vst [vmem:[#allocation2 + $0x100] sm:$0xff] %v151_v32  ;;  %154 = vst [vmem:[#allocation2 + $0x108] sm:$0xff] %v153_v33  ;;  %v157_v35 = vld [vmem:[%s13913_s26 + $0x118] sm:$0xff]  ;;  %v159_v36 = vld [vmem:[%s13913_s26 + $0x120] sm:$0xff] }
  0x1b   :  { %156 = vst [vmem:[#allocation2 + $0x110] sm:$0xff] %v155_v34  ;;  %v161_v37 = vld [vmem:[%s13913_s26 + $0x128] sm:$0xff]  ;;  %158 = vst [vmem:[#allocation2 + $0x118] sm:$0xff] %v157_v35  ;;  %v163_v38 = vld [vmem:[%s13913_s26 + $0x130] sm:$0xff] }
  0x1c   :  { %160 = vst [vmem:[#allocation2 + $0x120] sm:$0xff] %v159_v36  ;;  %162 = vst [vmem:[#allocation2 + $0x128] sm:$0xff] %v161_v37  ;;  %v165_v39 = vld [vmem:[%s13913_s26 + $0x138] sm:$0xff]  ;;  %v167_v40 = vld [vmem:[%s13913_s26 + $0x140] sm:$0xff] }
  0x1d   :  { %164 = vst [vmem:[#allocation2 + $0x130] sm:$0xff] %v163_v38  ;;  %166 = vst [vmem:[#allocation2 + $0x138] sm:$0xff] %v165_v39  ;;  %v169_v41 = vld [vmem:[%s13913_s26 + $0x148] sm:$0xff]  ;;  %v171_v42 = vld [vmem:[%s13913_s26 + $0x150] sm:$0xff] }
  0x1e   :  { %168 = vst [vmem:[#allocation2 + $0x140] sm:$0xff] %v167_v40  ;;  %v173_v43 = vld [vmem:[%s13913_s26 + $0x158] sm:$0xff]  ;;  %170 = vst [vmem:[#allocation2 + $0x148] sm:$0xff] %v169_v41  ;;  %v175_v44 = vld [vmem:[%s13913_s26 + $0x160] sm:$0xff] }
  0x1f   :  { %172 = vst [vmem:[#allocation2 + $0x150] sm:$0xff] %v171_v42  ;;  %174 = vst [vmem:[#allocation2 + $0x158] sm:$0xff] %v173_v43  ;;  %v177_v45 = vld [vmem:[%s13913_s26 + $0x168] sm:$0xff]  ;;  %v179_v46 = vld [vmem:[%s13913_s26 + $0x170] sm:$0xff] }
  0x20   :  { %176 = vst [vmem:[#allocation2 + $0x160] sm:$0xff] %v175_v44  ;;  %178 = vst [vmem:[#allocation2 + $0x168] sm:$0xff] %v177_v45  ;;  %v181_v47 = vld [vmem:[%s13913_s26 + $0x178] sm:$0xff]  ;;  %v183_v48 = vld [vmem:[%s13913_s26 + $0x180] sm:$0xff] }
  0x21   :  { %180 = vst [vmem:[#allocation2 + $0x170] sm:$0xff] %v179_v46  ;;  %v185_v49 = vld [vmem:[%s13913_s26 + $0x188] sm:$0xff]  ;;  %182 = vst [vmem:[#allocation2 + $0x178] sm:$0xff] %v181_v47  ;;  %v187_v50 = vld [vmem:[%s13913_s26 + $0x190] sm:$0xff] }
  0x22   :  { %184 = vst [vmem:[#allocation2 + $0x180] sm:$0xff] %v183_v48  ;;  %186 = vst [vmem:[#allocation2 + $0x188] sm:$0xff] %v185_v49  ;;  %v189_v51 = vld [vmem:[%s13913_s26 + $0x198] sm:$0xff]  ;;  %v191_v52 = vld [vmem:[%s13913_s26 + $0x1a0] sm:$0xff] }
  0x23   :  { %188 = vst [vmem:[#allocation2 + $0x190] sm:$0xff] %v187_v50  ;;  %190 = vst [vmem:[#allocation2 + $0x198] sm:$0xff] %v189_v51  ;;  %v193_v53 = vld [vmem:[%s13913_s26 + $0x1a8] sm:$0xff]  ;;  %v195_v54 = vld [vmem:[%s13913_s26 + $0x1b0] sm:$0xff] }
  0x24   :  { %192 = vst [vmem:[#allocation2 + $0x1a0] sm:$0xff] %v191_v52  ;;  %v197_v55 = vld [vmem:[%s13913_s26 + $0x1b8] sm:$0xff]  ;;  %194 = vst [vmem:[#allocation2 + $0x1a8] sm:$0xff] %v193_v53  ;;  %v199_v56 = vld [vmem:[%s13913_s26 + $0x1c0] sm:$0xff] }
  0x25   :  { %196 = vst [vmem:[#allocation2 + $0x1b0] sm:$0xff] %v195_v54  ;;  %198 = vst [vmem:[#allocation2 + $0x1b8] sm:$0xff] %v197_v55  ;;  %v201_v57 = vld [vmem:[%s13913_s26 + $0x1c8] sm:$0xff]  ;;  %v203_v58 = vld [vmem:[%s13913_s26 + $0x1d0] sm:$0xff] }
  0x26   :  { %200 = vst [vmem:[#allocation2 + $0x1c0] sm:$0xff] %v199_v56  ;;  %202 = vst [vmem:[#allocation2 + $0x1c8] sm:$0xff] %v201_v57  ;;  %v205_v59 = vld [vmem:[%s13913_s26 + $0x1d8] sm:$0xff]  ;;  %v207_v60 = vld [vmem:[%s13913_s26 + $0x1e0] sm:$0xff] }
  0x27   :  { %204 = vst [vmem:[#allocation2 + $0x1d0] sm:$0xff] %v203_v58  ;;  %v209_v61 = vld [vmem:[%s13913_s26 + $0x1e8] sm:$0xff]  ;;  %206 = vst [vmem:[#allocation2 + $0x1d8] sm:$0xff] %v205_v59  ;;  %v211_v62 = vld [vmem:[%s13913_s26 + $0x1f0] sm:$0xff] }
  0x28   :  { %208 = vst [vmem:[#allocation2 + $0x1e0] sm:$0xff] %v207_v60  ;;  %210 = vst [vmem:[#allocation2 + $0x1e8] sm:$0xff] %v209_v61  ;;  %v213_v63 = vld [vmem:[%s13913_s26 + $0x1f8] sm:$0xff]  ;;  %v215_v0 = vld [vmem:[%s13913_s26 + $0x200] sm:$0xff] }
  0x29   :  { %212 = vst [vmem:[#allocation2 + $0x1f0] sm:$0xff] %v211_v62  ;;  %214 = vst [vmem:[#allocation2 + $0x1f8] sm:$0xff] %v213_v63  ;;  %v217_v1 = vld [vmem:[%s13913_s26 + $0x208] sm:$0xff]  ;;  %v219_v2 = vld [vmem:[%s13913_s26 + $0x210] sm:$0xff] }
  0x2a   :  { %216 = vst [vmem:[#allocation2 + $0x200] sm:$0xff] %v215_v0  ;;  %v221_v3 = vld [vmem:[%s13913_s26 + $0x218] sm:$0xff]  ;;  %218 = vst [vmem:[#allocation2 + $0x208] sm:$0xff] %v217_v1  ;;  %v223_v4 = vld [vmem:[%s13913_s26 + $0x220] sm:$0xff] }
  0x2b   :  { %220 = vst [vmem:[#allocation2 + $0x210] sm:$0xff] %v219_v2  ;;  %222 = vst [vmem:[#allocation2 + $0x218] sm:$0xff] %v221_v3  ;;  %v225_v5 = vld [vmem:[%s13913_s26 + $0x228] sm:$0xff]  ;;  %v227_v6 = vld [vmem:[%s13913_s26 + $0x230] sm:$0xff] }
  0x2c   :  { %224 = vst [vmem:[#allocation2 + $0x220] sm:$0xff] %v223_v4  ;;  %226 = vst [vmem:[#allocation2 + $0x228] sm:$0xff] %v225_v5  ;;  %v229_v7 = vld [vmem:[%s13913_s26 + $0x238] sm:$0xff] }
  0x2d   :  { %228 = vst [vmem:[#allocation2 + $0x230] sm:$0xff] %v227_v6  ;;  %230 = vst [vmem:[#allocation2 + $0x238] sm:$0xff] %v229_v7 }
  0x2e   :  { %238 = vsyncadd [#allocation4], 9216  ;;  %s13914_s30 = sld [smem:[#allocation100_spill]]  ;;  %v6045_v26 = vld [vmem:[%s13913_s26 + $0x240] sm:$0xff]  ;;  %v6046_v27 = vld [vmem:[%s13913_s26 + $0x248] sm:$0xff] }
  0x2f   :  { %293 = vst [vmem:[#allocation2 + $0x240] sm:$0xff] %v6045_v26  ;;  %295 = vst [vmem:[#allocation2 + $0x248] sm:$0xff] %v6046_v27  ;;  %v6047_v28 = vld [vmem:[%s13913_s26 + $0x250] sm:$0xff]  ;;  %v6048_v29 = vld [vmem:[%s13913_s26 + $0x258] sm:$0xff] }
  0x30   :  { %v6049_v30 = vld [vmem:[%s13913_s26 + $0x260] sm:$0xff]  ;;  %297 = vst [vmem:[#allocation2 + $0x250] sm:$0xff] %v6047_v28  ;;  %299 = vst [vmem:[#allocation2 + $0x258] sm:$0xff] %v6048_v29  ;;  %v6050_v31 = vld [vmem:[%s13913_s26 + $0x268] sm:$0xff] }
  0x31   :  { %301 = vst [vmem:[#allocation2 + $0x260] sm:$0xff] %v6049_v30  ;;  %v6051_v32 = vld [vmem:[%s13913_s26 + $0x270] sm:$0xff]  ;;  %v6052_v33 = vld [vmem:[%s13913_s26 + $0x278] sm:$0xff]  ;;  %303 = vst [vmem:[#allocation2 + $0x268] sm:$0xff] %v6050_v31 }
  0x32   :  { %305 = vst [vmem:[#allocation2 + $0x270] sm:$0xff] %v6051_v32  ;;  %307 = vst [vmem:[#allocation2 + $0x278] sm:$0xff] %v6052_v33  ;;  %v6053_v34 = vld [vmem:[%s13913_s26 + $0x280] sm:$0xff]  ;;  %v6054_v35 = vld [vmem:[%s13913_s26 + $0x288] sm:$0xff] }
  0x33   :  { %v6055_v36 = vld [vmem:[%s13913_s26 + $0x290] sm:$0xff]  ;;  %309 = vst [vmem:[#allocation2 + $0x280] sm:$0xff] %v6053_v34  ;;  %311 = vst [vmem:[#allocation2 + $0x288] sm:$0xff] %v6054_v35  ;;  %v6056_v37 = vld [vmem:[%s13913_s26 + $0x298] sm:$0xff] }
  0x34   :  { %v8733_v8 = vld [vmem:[%s13914_s30] sm:$0xff]  ;;  %v8738_v9 = vld [vmem:[%s13914_s30 + $0x8] sm:$0xff]  ;;  %v8743_v10 = vld [vmem:[%s13914_s30 + $0x10] sm:$0xff]  ;;  %313 = vst [vmem:[#allocation2 + $0x290] sm:$0xff] %v6055_v36 }
  0x35   :  { %v8748_v11 = vld [vmem:[%s13914_s30 + $0x18] sm:$0xff]  ;;  %v8753_v12 = vld [vmem:[%s13914_s30 + $0x20] sm:$0xff]  ;;  %v8758_v13 = vld [vmem:[%s13914_s30 + $0x28] sm:$0xff]  ;;  %315 = vst [vmem:[#allocation2 + $0x298] sm:$0xff] %v6056_v37 }
  0x36   :  { %v8763_v14 = vld [vmem:[%s13914_s30 + $0x30] sm:$0xff]  ;;  %v8768_v15 = vld [vmem:[%s13914_s30 + $0x38] sm:$0xff]  ;;  %v8773_v16 = vld [vmem:[%s13914_s30 + $0x40] sm:$0xff] }
  0x37   :  { %v8778_v17 = vld [vmem:[%s13914_s30 + $0x48] sm:$0xff]  ;;  %v8783_v18 = vld [vmem:[%s13914_s30 + $0x50] sm:$0xff]  ;;  %v8788_v19 = vld [vmem:[%s13914_s30 + $0x58] sm:$0xff] }
  0x38   :  { %v8793_v20 = vld [vmem:[%s13914_s30 + $0x60] sm:$0xff]  ;;  %v8798_v21 = vld [vmem:[%s13914_s30 + $0x68] sm:$0xff]  ;;  %v8803_v22 = vld [vmem:[%s13914_s30 + $0x70] sm:$0xff] }
  0x39   :  { %13915 = vst [vmem:[#allocation15_spill] sm:$0xff] %v8793_v20  ;;  %13916 = vst [vmem:[#allocation16_spill] sm:$0xff] %v8798_v21  ;;  %v8808_v23 = vld [vmem:[%s13914_s30 + $0x78] sm:$0xff]  ;;  %v8813_v24 = vld [vmem:[%s13914_s30 + $0x80] sm:$0xff] }
  0x3a   :  { %v8818_v25 = vld [vmem:[%s13914_s30 + $0x88] sm:$0xff]  ;;  %v6057_v38 = vld [vmem:[%s13913_s26 + $0x2a0] sm:$0xff]  ;;  %v6059_v40 = vld [vmem:[%s13913_s26 + $0x2b0] sm:$0xff] }
  0x3b   :  { %v6058_v39 = vld [vmem:[%s13913_s26 + $0x2a8] sm:$0xff]  ;;  %317 = vst [vmem:[#allocation2 + $0x2a0] sm:$0xff] %v6057_v38  ;;  %v6060_v41 = vld [vmem:[%s13913_s26 + $0x2b8] sm:$0xff]  ;;  %v6061_v42 = vld [vmem:[%s13913_s26 + $0x2c0] sm:$0xff] }
  0x3c   :  { %319 = vst [vmem:[#allocation2 + $0x2a8] sm:$0xff] %v6058_v39  ;;  %321 = vst [vmem:[#allocation2 + $0x2b0] sm:$0xff] %v6059_v40  ;;  %v6062_v43 = vld [vmem:[%s13913_s26 + $0x2c8] sm:$0xff]  ;;  %v6063_v44 = vld [vmem:[%s13913_s26 + $0x2d0] sm:$0xff] }
  0x3d   :  { %323 = vst [vmem:[#allocation2 + $0x2b8] sm:$0xff] %v6060_v41  ;;  %325 = vst [vmem:[#allocation2 + $0x2c0] sm:$0xff] %v6061_v42  ;;  %v6064_v45 = vld [vmem:[%s13913_s26 + $0x2d8] sm:$0xff]  ;;  %v6065_v46 = vld [vmem:[%s13913_s26 + $0x2e0] sm:$0xff] }
  0x3e   :  { %327 = vst [vmem:[#allocation2 + $0x2c8] sm:$0xff] %v6062_v43  ;;  %329 = vst [vmem:[#allocation2 + $0x2d0] sm:$0xff] %v6063_v44  ;;  %v6066_v47 = vld [vmem:[%s13913_s26 + $0x2e8] sm:$0xff]  ;;  %v6067_v48 = vld [vmem:[%s13913_s26 + $0x2f0] sm:$0xff] }
  0x3f   :  { %331 = vst [vmem:[#allocation2 + $0x2d8] sm:$0xff] %v6064_v45  ;;  %333 = vst [vmem:[#allocation2 + $0x2e0] sm:$0xff] %v6065_v46  ;;  %v6068_v49 = vld [vmem:[%s13913_s26 + $0x2f8] sm:$0xff]  ;;  %v6069_v50 = vld [vmem:[%s13913_s26 + $0x300] sm:$0xff] }
  0x40   :  { %335 = vst [vmem:[#allocation2 + $0x2e8] sm:$0xff] %v6066_v47  ;;  %337 = vst [vmem:[#allocation2 + $0x2f0] sm:$0xff] %v6067_v48  ;;  %v6070_v51 = vld [vmem:[%s13913_s26 + $0x308] sm:$0xff]  ;;  %v6071_v52 = vld [vmem:[%s13913_s26 + $0x310] sm:$0xff] }
  0x41   :  { %339 = vst [vmem:[#allocation2 + $0x2f8] sm:$0xff] %v6068_v49  ;;  %341 = vst [vmem:[#allocation2 + $0x300] sm:$0xff] %v6069_v50  ;;  %v6072_v53 = vld [vmem:[%s13913_s26 + $0x318] sm:$0xff]  ;;  %v6073_v54 = vld [vmem:[%s13913_s26 + $0x320] sm:$0xff] }
  0x42   :  { %343 = vst [vmem:[#allocation2 + $0x308] sm:$0xff] %v6070_v51  ;;  %345 = vst [vmem:[#allocation2 + $0x310] sm:$0xff] %v6071_v52  ;;  %v6074_v55 = vld [vmem:[%s13913_s26 + $0x328] sm:$0xff]  ;;  %v6075_v56 = vld [vmem:[%s13913_s26 + $0x330] sm:$0xff] }
  0x43   :  { %347 = vst [vmem:[#allocation2 + $0x318] sm:$0xff] %v6072_v53  ;;  %349 = vst [vmem:[#allocation2 + $0x320] sm:$0xff] %v6073_v54  ;;  %v6076_v57 = vld [vmem:[%s13913_s26 + $0x338] sm:$0xff]  ;;  %v6077_v58 = vld [vmem:[%s13913_s26 + $0x340] sm:$0xff] }
  0x44   :  { %351 = vst [vmem:[#allocation2 + $0x328] sm:$0xff] %v6074_v55  ;;  %353 = vst [vmem:[#allocation2 + $0x330] sm:$0xff] %v6075_v56  ;;  %v6078_v59 = vld [vmem:[%s13913_s26 + $0x348] sm:$0xff]  ;;  %v6079_v60 = vld [vmem:[%s13913_s26 + $0x350] sm:$0xff] }
  0x45   :  { %355 = vst [vmem:[#allocation2 + $0x338] sm:$0xff] %v6076_v57  ;;  %357 = vst [vmem:[#allocation2 + $0x340] sm:$0xff] %v6077_v58  ;;  %v6080_v61 = vld [vmem:[%s13913_s26 + $0x358] sm:$0xff]  ;;  %v6081_v62 = vld [vmem:[%s13913_s26 + $0x360] sm:$0xff] }
  0x46   :  { %359 = vst [vmem:[#allocation2 + $0x348] sm:$0xff] %v6078_v59  ;;  %361 = vst [vmem:[#allocation2 + $0x350] sm:$0xff] %v6079_v60  ;;  %v6082_v63 = vld [vmem:[%s13913_s26 + $0x368] sm:$0xff]  ;;  %v6083_v0 = vld [vmem:[%s13913_s26 + $0x370] sm:$0xff] }
  0x47   :  { %363 = vst [vmem:[#allocation2 + $0x358] sm:$0xff] %v6080_v61  ;;  %365 = vst [vmem:[#allocation2 + $0x360] sm:$0xff] %v6081_v62  ;;  %v6084_v1 = vld [vmem:[%s13913_s26 + $0x378] sm:$0xff]  ;;  %v6085_v2 = vld [vmem:[%s13913_s26 + $0x380] sm:$0xff] }
  0x48   :  { %367 = vst [vmem:[#allocation2 + $0x368] sm:$0xff] %v6082_v63  ;;  %369 = vst [vmem:[#allocation2 + $0x370] sm:$0xff] %v6083_v0  ;;  %v6086_v3 = vld [vmem:[%s13913_s26 + $0x388] sm:$0xff]  ;;  %v6087_v4 = vld [vmem:[%s13913_s26 + $0x390] sm:$0xff] }
  0x49   :  { %371 = vst [vmem:[#allocation2 + $0x378] sm:$0xff] %v6084_v1  ;;  %373 = vst [vmem:[#allocation2 + $0x380] sm:$0xff] %v6085_v2  ;;  %v6088_v5 = vld [vmem:[%s13913_s26 + $0x398] sm:$0xff]  ;;  %v6089_v6 = vld [vmem:[%s13913_s26 + $0x3a0] sm:$0xff] }
  0x4a   :  { %375 = vst [vmem:[#allocation2 + $0x388] sm:$0xff] %v6086_v3  ;;  %377 = vst [vmem:[#allocation2 + $0x390] sm:$0xff] %v6087_v4  ;;  %v6090_v7 = vld [vmem:[%s13913_s26 + $0x3a8] sm:$0xff]  ;;  %v6091_v26 = vld [vmem:[%s13913_s26 + $0x3b0] sm:$0xff] }
  0x4b   :  { %379 = vst [vmem:[#allocation2 + $0x398] sm:$0xff] %v6088_v5  ;;  %381 = vst [vmem:[#allocation2 + $0x3a0] sm:$0xff] %v6089_v6  ;;  %v6092_v27 = vld [vmem:[%s13913_s26 + $0x3b8] sm:$0xff]  ;;  %v6093_v28 = vld [vmem:[%s13913_s26 + $0x3c0] sm:$0xff] }
  0x4c   :  { %383 = vst [vmem:[#allocation2 + $0x3a8] sm:$0xff] %v6090_v7  ;;  %385 = vst [vmem:[#allocation2 + $0x3b0] sm:$0xff] %v6091_v26  ;;  %v6094_v29 = vld [vmem:[%s13913_s26 + $0x3c8] sm:$0xff]  ;;  %v6095_v30 = vld [vmem:[%s13913_s26 + $0x3d0] sm:$0xff] }
  0x4d   :  { %387 = vst [vmem:[#allocation2 + $0x3b8] sm:$0xff] %v6092_v27  ;;  %389 = vst [vmem:[#allocation2 + $0x3c0] sm:$0xff] %v6093_v28  ;;  %v6096_v31 = vld [vmem:[%s13913_s26 + $0x3d8] sm:$0xff]  ;;  %v6097_v32 = vld [vmem:[%s13913_s26 + $0x3e0] sm:$0xff] }
  0x4e   :  { %391 = vst [vmem:[#allocation2 + $0x3c8] sm:$0xff] %v6094_v29  ;;  %393 = vst [vmem:[#allocation2 + $0x3d0] sm:$0xff] %v6095_v30  ;;  %v6098_v33 = vld [vmem:[%s13913_s26 + $0x3e8] sm:$0xff]  ;;  %v6099_v34 = vld [vmem:[%s13913_s26 + $0x3f0] sm:$0xff] }
  0x4f   :  { %395 = vst [vmem:[#allocation2 + $0x3d8] sm:$0xff] %v6096_v31  ;;  %397 = vst [vmem:[#allocation2 + $0x3e0] sm:$0xff] %v6097_v32  ;;  %v6100_v35 = vld [vmem:[%s13913_s26 + $0x3f8] sm:$0xff]  ;;  %v6101_v36 = vld [vmem:[%s13913_s26 + $0x400] sm:$0xff] }
  0x50   :  { %399 = vst [vmem:[#allocation2 + $0x3e8] sm:$0xff] %v6098_v33  ;;  %401 = vst [vmem:[#allocation2 + $0x3f0] sm:$0xff] %v6099_v34  ;;  %v6102_v37 = vld [vmem:[%s13913_s26 + $0x408] sm:$0xff]  ;;  %v6103_v38 = vld [vmem:[%s13913_s26 + $0x410] sm:$0xff] }
  0x51   :  { %403 = vst [vmem:[#allocation2 + $0x3f8] sm:$0xff] %v6100_v35  ;;  %405 = vst [vmem:[#allocation2 + $0x400] sm:$0xff] %v6101_v36  ;;  %v6104_v39 = vld [vmem:[%s13913_s26 + $0x418] sm:$0xff]  ;;  %v6105_v40 = vld [vmem:[%s13913_s26 + $0x420] sm:$0xff] }
  0x52   :  { %407 = vst [vmem:[#allocation2 + $0x408] sm:$0xff] %v6102_v37  ;;  %409 = vst [vmem:[#allocation2 + $0x410] sm:$0xff] %v6103_v38  ;;  %v6106_v41 = vld [vmem:[%s13913_s26 + $0x428] sm:$0xff]  ;;  %v6107_v42 = vld [vmem:[%s13913_s26 + $0x430] sm:$0xff] }
  0x53   :  { %411 = vst [vmem:[#allocation2 + $0x418] sm:$0xff] %v6104_v39  ;;  %413 = vst [vmem:[#allocation2 + $0x420] sm:$0xff] %v6105_v40  ;;  %v6108_v43 = vld [vmem:[%s13913_s26 + $0x438] sm:$0xff]  ;;  %v6109_v44 = vld [vmem:[%s13913_s26 + $0x440] sm:$0xff] }
  0x54   :  { %415 = vst [vmem:[#allocation2 + $0x428] sm:$0xff] %v6106_v41  ;;  %417 = vst [vmem:[#allocation2 + $0x430] sm:$0xff] %v6107_v42  ;;  %v6110_v45 = vld [vmem:[%s13913_s26 + $0x448] sm:$0xff]  ;;  %v6111_v46 = vld [vmem:[%s13913_s26 + $0x450] sm:$0xff] }
  0x55   :  { %419 = vst [vmem:[#allocation2 + $0x438] sm:$0xff] %v6108_v43  ;;  %421 = vst [vmem:[#allocation2 + $0x440] sm:$0xff] %v6109_v44  ;;  %v6112_v47 = vld [vmem:[%s13913_s26 + $0x458] sm:$0xff]  ;;  %v6113_v48 = vld [vmem:[%s13913_s26 + $0x460] sm:$0xff] }
  0x56   :  { %423 = vst [vmem:[#allocation2 + $0x448] sm:$0xff] %v6110_v45  ;;  %425 = vst [vmem:[#allocation2 + $0x450] sm:$0xff] %v6111_v46  ;;  %v6114_v49 = vld [vmem:[%s13913_s26 + $0x468] sm:$0xff]  ;;  %v6115_v50 = vld [vmem:[%s13913_s26 + $0x470] sm:$0xff] }
  0x57   :  { %427 = vst [vmem:[#allocation2 + $0x458] sm:$0xff] %v6112_v47  ;;  %429 = vst [vmem:[#allocation2 + $0x460] sm:$0xff] %v6113_v48  ;;  %v6116_v51 = vld [vmem:[%s13913_s26 + $0x478] sm:$0xff] }
  0x58   :  { %431 = vst [vmem:[#allocation2 + $0x468] sm:$0xff] %v6114_v49  ;;  %433 = vst [vmem:[#allocation2 + $0x470] sm:$0xff] %v6115_v50 }
  0x59   :  { %435 = vst [vmem:[#allocation2 + $0x478] sm:$0xff] %v6116_v51 }
  0x5a   :  { %443 = vsyncadd [#allocation4 + $0x1], 9216 }
  0x5b   :  { %8331 = dma.done.wait [#allocation4], 9216 }
  0x5c   :  { %8332 = vsyncadd [#allocation4], 4294958080  ;;  %v466_v52 = vlaneseq  ;;  %v511_v53 = vrot.slane %v8763_v14, 7  ;;  %v512_v54 = vrot.slane %v8768_v15, 7  ;;  %v513_v55 = vrot.slane %v8773_v16, 7  ;;  %v840_v32 = vld [vmem:[#allocation2 + $0x40] sm:$0xff] }
  0x5d   :  { %v13753_v56 = vrot.slane %v8763_v14, 6  ;;  %v455_v57 = vrot.slane %v8768_v15, 6  ;;  %v456_v58 = vrot.slane %v8773_v16, 6  ;;  %v514_v59 = vrot.slane %v8778_v17, 7  ;;  %v832_v33 = vld [vmem:[#allocation2] sm:$0xff]  ;;  %v841_v34 = vld [vmem:[#allocation2 + $0x48] sm:$0xff]  ;;  %7989 = vmatprep.subr.bf16.mxu1 %v840_v32  ;;  %6343 = vmatprep.subr.bf16.mxu0 %v840_v32 }
  0x5e   :  { %v9043_v60 = vshrl.u32 %v466_v52, 7  ;;  %v515_v61 = vrot.slane %v8783_v18, 7  ;;  %v457_v62 = vrot.slane %v8778_v17, 6  ;;  %v458_v63 = vrot.slane %v8783_v18, 6  ;;  %7997 = vmatpush3.bf16.msra.mxu1 %v832_v33  ;;  %6344 = vmatpush3.bf16.msra.mxu0 %v832_v33  ;;  %v833_v47 = vld [vmem:[#allocation2 + $0x8] sm:$0xff]  ;;  %v842_v52 = vld [vmem:[#allocation2 + $0x50] sm:$0xff] }
  0x5f   :  { %v505_v0 = vrot.slane %v8733_v8, 7  ;;  %v521_v1 = vrot.slane %v8813_v24, 7  ;;  %v522_v2 = vrot.slane %v8818_v25, 7  ;;  %v448_v3 = vrot.slane %v8733_v8, 6  ;;  %7990 = vmatprep.subr.bf16.mxu1 %v841_v34  ;;  %6345 = vmatprep.subr.bf16.mxu0 %v841_v34  ;;  %v835_v33 = vld [vmem:[#allocation2 + $0x18] sm:$0xff]  ;;  %s10063_s22 = smov 0  }
  0x60   :  { %vm523_vm0 = vcmp.lt.s32.totalorder %v9043_v60, 1  ;;  %vm468_vm1 = vcmp.lt.s32.totalorder %v9043_v60, 2  ;;  %v464_v4 = vrot.slane %v8813_v24, 6  ;;  %v465_v5 = vrot.slane %v8818_v25, 6 }
  0x61   :  { %v9058_v6 = vsel %vm523_vm0, %v512_v54, %v513_v55  ;;  %v9064_v7 = vsel %vm523_vm0, %v511_v53, %v512_v54  ;;  %v9068_v26 = vsel %vm468_vm1, %v455_v57, %v456_v58  ;;  %v9074_v27 = vsel %vm468_vm1, %v13753_v56, %v455_v57 }
  0x62   :  { %13917 = vst [vmem:[#allocation17_spill] sm:$0xff] %v9058_v6  ;;  %13918 = vst [vmem:[#allocation18_spill] sm:$0xff] %v9064_v7  ;;  %v546_v28 = vpack.c.bf16 %v9058_v6, %v9064_v7  ;;  %v9082_v30 = vsel %vm523_vm0, %v514_v59, %v515_v61  ;;  %v9086_v31 = vsel %vm523_vm0, %v513_v55, %v514_v59  ;;  %v516_v42 = vrot.slane %v8788_v19, 7  ;;  %v839_v6 = vld [vmem:[#allocation2 + $0x38] sm:$0xff] }
  0x63   :  { %13919 = vst [vmem:[#allocation19_spill] sm:$0xff] %v9082_v30  ;;  %13920 = vst [vmem:[#allocation20_spill] sm:$0xff] %v9086_v31  ;;  %v9092_v36 = vsel %vm468_vm1, %v457_v62, %v458_v63  ;;  %v9096_v37 = vsel %vm468_vm1, %v456_v58, %v457_v62  ;;  %v9102_v38 = vsel %vm523_vm0, %v521_v1, %v522_v2  ;;  %v517_v45 = vrot.slane %v8793_v20, 7 }
  0x64   :  { %13921 = vst [vmem:[#allocation21_spill] sm:$0xff] %v9102_v38  ;;  %v9108_v40 = vsel %vm523_vm0, %v522_v2, %v505_v0  ;;  %v9114_v41 = vsel %vm468_vm1, %v464_v4, %v465_v5  ;;  %v9121_v44 = vsel %vm468_vm1, %v465_v5, %v448_v3  ;;  %v459_v46 = vrot.slane %v8788_v19, 6  ;;  %975 = vmatprep.mubr.bf16.mxu1 %v546_v28 }
  0x65   :  { %13922 = vst [vmem:[#allocation22_spill] sm:$0xff] %v9108_v40  ;;  %v542_v43 = vpack.c.bf16 %v9108_v40, %v9102_v38  ;;  %v9129_v49 = vsel %vm523_vm0, %v515_v61, %v516_v42  ;;  %v460_v50 = vrot.slane %v8793_v20, 6  ;;  %v506_v51 = vrot.slane %v8738_v9, 7  ;;  %7998 = vmatpush3.bf16.msra.mxu1 %v833_v47  ;;  %6346 = vmatpush3.bf16.msra.mxu0 %v833_v47 }
  0x66   :  { %v9135_v54 = vsel %vm523_vm0, %v516_v42, %v517_v45  ;;  %v9139_v55 = vsel %vm468_vm1, %v458_v63, %v459_v46  ;;  %v507_v57 = vrot.slane %v8743_v10, 7  ;;  %v449_v58 = vrot.slane %v8738_v9, 6  ;;  %7991 = vmatprep.subr.bf16.mxu1 %v842_v52  ;;  %6347 = vmatprep.subr.bf16.mxu0 %v842_v52 }
  0x67   :  { %943 = vmatprep.mubr.bf16.mxu0 %v542_v43  ;;  %v9147_v61 = vsel %vm468_vm1, %v459_v46, %v460_v50  ;;  %v9151_v62 = vsel %vm523_vm0, %v505_v0, %v506_v51  ;;  %v450_v2 = vrot.slane %v8743_v10, 6  ;;  %v518_v32 = vrot.slane %v8798_v21, 7  ;;  %v834_v0 = vld [vmem:[#allocation2 + $0x10] sm:$0xff]  ;;  %v843_v46 = vld [vmem:[#allocation2 + $0x58] sm:$0xff] }
  0x68   :  { %v9158_v5 = vsel %vm523_vm0, %v506_v51, %v507_v57  ;;  %v9162_v28 = vsel %vm468_vm1, %v448_v3, %v449_v58  ;;  %v519_v42 = vrot.slane %v8803_v22, 7  ;;  %v461_v43 = vrot.slane %v8798_v21, 6 }
  0x69   :  { %v9169_v34 = vsel %vm468_vm1, %v449_v58, %v450_v2  ;;  %v9177_v47 = vsel %vm523_vm0, %v517_v45, %v518_v32  ;;  %v462_v51 = vrot.slane %v8803_v22, 6  ;;  %v508_v52 = vrot.slane %v8748_v11, 7  ;;  %7999 = vmatpush3.bf16.msra.mxu1 %v834_v0  ;;  %6348 = vmatpush3.bf16.msra.mxu0 %v834_v0 }
  0x6a   :  { %13923 = vst [vmem:[#allocation23_spill] sm:$0xff] %v9177_v47  ;;  %v9183_v58 = vsel %vm523_vm0, %v518_v32, %v519_v42  ;;  %v9187_v63 = vsel %vm468_vm1, %v460_v50, %v461_v43  ;;  %v509_v59 = vrot.slane %v8753_v12, 7  ;;  %v451_v3 = vrot.slane %v8748_v11, 6  ;;  %7992 = vmatprep.subr.bf16.mxu1 %v843_v46  ;;  %6349 = vmatprep.subr.bf16.mxu0 %v843_v46  ;;  %v848_v47 = vld [vmem:[#allocation2 + $0x80] sm:$0xff] }
  0x6b   :  { %13924 = vst [vmem:[#allocation24_spill] sm:$0xff] %v9183_v58  ;;  %13925 = vst [vmem:[#allocation25_spill] sm:$0xff] %v9187_v63  ;;  %v9195_v39 = vsel %vm468_vm1, %v461_v43, %v462_v51  ;;  %v9199_v32 = vsel %vm523_vm0, %v507_v57, %v508_v52  ;;  %v452_v50 = vrot.slane %v8753_v12, 6  ;;  %v520_v45 = vrot.slane %v8808_v23, 7  ;;  %v844_v57 = vld [vmem:[#allocation2 + $0x60] sm:$0xff] }
  0x6c   :  { %13926 = vst [vmem:[#allocation26_spill] sm:$0xff] %v9195_v39  ;;  %v9206_v0 = vsel %vm523_vm0, %v508_v52, %v509_v59  ;;  %v9210_v43 = vsel %vm468_vm1, %v450_v2, %v451_v3  ;;  %v463_v35 = vrot.slane %v8808_v23, 6  ;;  %v510_v29 = vrot.slane %v8758_v13, 7 }
  0x6d   :  { %13927 = vst [vmem:[#allocation27_spill] sm:$0xff] %v9210_v43  ;;  %v9217_v46 = vsel %vm468_vm1, %v451_v3, %v452_v50  ;;  %v9227_v2 = vsel %vm523_vm0, %v520_v45, %v521_v1  ;;  %v9231_v48 = vsel %vm523_vm0, %v519_v42, %v520_v45  ;;  %v453_v3 = vrot.slane %v8758_v13, 6  ;;  %8000 = vmatpush3.bf16.msra.mxu1 %v835_v33  ;;  %v836_v45 = vld [vmem:[#allocation2 + $0x20] sm:$0xff] }
  0x6e   :  { %13928 = vst [vmem:[#allocation28_spill] sm:$0xff] %v9217_v46  ;;  %13929 = vst [vmem:[#allocation29_spill] sm:$0xff] %v9231_v48  ;;  %6350 = vmatpush3.bf16.msra.mxu0 %v835_v33  ;;  %v9240_v52 = vsel %vm468_vm1, %v463_v35, %v464_v4  ;;  %v9244_v1 = vsel %vm468_vm1, %v462_v51, %v463_v35  ;;  %7993 = vmatprep.subr.bf16.mxu1 %v844_v57  ;;  %v615_v35 = vrot.slane %v8738_v9, 1  ;;  %v845_v51 = vld [vmem:[#allocation2 + $0x68] sm:$0xff]  ;;  %v864_v48 = vld [vmem:[#allocation2 + $0x100] sm:$0xff]  ;;  %vm8416_vm4 = vmmov 0  }
  0x6f   :  { %13930 = vst [vmem:[#allocation30_spill] sm:$0xff] %v9240_v52  ;;  %13931 = vst [vmem:[#allocation31_spill] sm:$0xff] %v9244_v1  ;;  %6351 = vmatprep.subr.bf16.mxu0 %v844_v57  ;;  %v9253_v56 = vsel %vm523_vm0, %v510_v29, %v511_v53  ;;  %v9257_v4 = vsel %vm523_vm0, %v509_v59, %v510_v29  ;;  %v13934_v57 = vrot.slane %v8763_v14, 6  ;;  %v616_v42 = vrot.slane %v8743_v10, 1  ;;  %v837_v59 = vld [vmem:[#allocation2 + $0x28] sm:$0xff]  ;;  %v846_v52 = vld [vmem:[#allocation2 + $0x70] sm:$0xff] }
  0x70   :  { %13932 = vst [vmem:[#allocation32_spill] sm:$0xff] %v9253_v56  ;;  %13933 = vst [vmem:[#allocation33_spill] sm:$0xff] %v9257_v4  ;;  %v9270_v53 = vsel %vm468_vm1, %v452_v50, %v453_v3  ;;  %v9278_v1 = vpack.c.bf16 %v8733_v8, %v8818_v25  ;;  %vm632_vm2 = vcmp.lt.s32.totalorder %v9043_v60, 7  ;;  %v618_v40 = vrot.slane %v8753_v12, 1  ;;  %v872_v4 = vld [vmem:[#allocation2 + $0x140] sm:$0xff] }
  0x71   :  { %v9266_v33 = vsel %vm468_vm1, %v453_v3, %v13934_v57  ;;  %13936 = vst [vmem:[#allocation35_spill] sm:$0xff] %v9270_v53  ;;  %8001 = vmatpush3.bf16.msra.mxu1 %v836_v45  ;;  %v13938_v57 = vrot.slane %v8733_v8, 1  ;;  %v619_v3 = vrot.slane %v8758_v13, 1  ;;  %v622_v29 = vrot.slane %v8773_v16, 1 }
  0x72   :  { %13935 = vst [vmem:[#allocation34_spill] sm:$0xff] %v9266_v33  ;;  %13937 = vst [vmem:[#allocation36_spill] sm:$0xff] %v9278_v1  ;;  %6352 = vmatpush3.bf16.msra.mxu0 %v836_v45  ;;  %7994 = vmatprep.subr.bf16.mxu1 %v845_v51  ;;  %v9294_v1 = vsel %vm632_vm2, %v615_v35, %v616_v42  ;;  %v9298_v45 = vpack.c.bf16 %v8743_v10, %v8738_v9  ;;  %v621_v33 = vrot.slane %v8768_v15, 1 }
  0x73   :  { %v9286_v50 = vsel %vm632_vm2, %v13938_v57, %v615_v35  ;;  %6353 = vmatprep.subr.bf16.mxu0 %v845_v51  ;;  %v617_v57 = vrot.slane %v8748_v11, 1  ;;  %v9310_v35 = vpack.c.bf16 %v8753_v12, %v8748_v11  ;;  %v9339_v51 = vpack.c.bf16 %v8763_v14, %v8758_v13 }
  0x74   :  { %13939 = vst [vmem:[#allocation37_spill] sm:$0xff] %v9286_v50  ;;  %13940 = vst [vmem:[#allocation38_spill] sm:$0xff] %v9298_v45  ;;  %v620_v50 = vrot.slane %v8763_v14, 1  ;;  %v623_v7 = vrot.slane %v8778_v17, 1  ;;  %v624_v39 = vrot.slane %v8783_v18, 1  ;;  %v625_v63 = vrot.slane %v8788_v19, 1 }
  0x75   :  { %13941 = vst [vmem:[#allocation39_spill] sm:$0xff] %v9310_v35  ;;  %v9314_v45 = vsel %vm632_vm2, %v617_v57, %v618_v40  ;;  %v9318_v53 = vsel %vm632_vm2, %v616_v42, %v617_v57  ;;  %8002 = vmatpush3.bf16.msra.mxu1 %v837_v59  ;;  %v838_v42 = vld [vmem:[#allocation2 + $0x30] sm:$0xff]  ;;  %13942 = vst [vmem:[#allocation40_spill] sm:$0xff] %v9339_v51  ;;  %v847_v35 = vld [vmem:[#allocation2 + $0x78] sm:$0xff]  ;;  %v9358_v51 = vpack.c.bf16 %v8773_v16, %v8768_v15 }
  0x76   :  { %6354 = vmatpush3.bf16.msra.mxu0 %v837_v59  ;;  %7995 = vmatprep.subr.bf16.mxu1 %v846_v52  ;;  %v9331_v57 = vsel %vm632_vm2, %v619_v3, %v620_v50  ;;  %v9335_v59 = vsel %vm632_vm2, %v618_v40, %v619_v3  ;;  %v9354_v3 = vsel %vm632_vm2, %v621_v33, %v622_v29  ;;  %v626_v40 = vrot.slane %v8793_v20, 1 }
  0x77   :  { %6355 = vmatprep.subr.bf16.mxu0 %v846_v52  ;;  %v9346_v52 = vsel %vm632_vm2, %v620_v50, %v621_v33  ;;  %13943 = vst [vmem:[#allocation41_spill] sm:$0xff] %v9358_v51  ;;  %v9371_v51 = vsel %vm632_vm2, %v623_v7, %v624_v39  ;;  %v9379_v50 = vpack.c.bf16 %v8783_v18, %v8778_v17  ;;  %v856_v33 = vld [vmem:[#allocation2 + $0xc0] sm:$0xff]  ;;  %v627_v56 = vrot.slane %v8798_v21, 1 }
  0x78   :  { %v628_v46 = vrot.slane %v8803_v22, 1  ;;  %v629_v43 = vrot.slane %v8808_v23, 1  ;;  %vm714_vm3 = vcmp.lt.s32.totalorder %v9043_v60, 6 }
  0x79   :  { %8003 = vmatpush3.bf16.msra.mxu1 %v838_v42  ;;  %13944 = vst [vmem:[#allocation42_spill] sm:$0xff] %v9379_v50  ;;  %v9398_v50 = vpack.c.bf16 %v8793_v20, %v8788_v19  ;;  %v631_v20 = vrot.slane %v8818_v25, 1 }
  0x7a   :  { %6356 = vmatpush3.bf16.msra.mxu0 %v838_v42  ;;  %7996 = vmatprep.subr.bf16.mxu1 %v847_v35  ;;  %v9375_v42 = vsel %vm632_vm2, %v622_v29, %v623_v7  ;;  %v9394_v29 = vsel %vm632_vm2, %v625_v63, %v626_v40  ;;  %v630_v7 = vrot.slane %v8813_v24, 1 }
  0x7b   :  { %6357 = vmatprep.subr.bf16.mxu0 %v847_v35  ;;  %v9386_v35 = vsel %vm632_vm2, %v624_v39, %v625_v63  ;;  %13945 = vst [vmem:[#allocation43_spill] sm:$0xff] %v9398_v50  ;;  %v9411_v50 = vsel %vm632_vm2, %v627_v56, %v628_v46  ;;  %v9419_v39 = vpack.c.bf16 %v8803_v22, %v8798_v21  ;;  %v857_v63 = vld [vmem:[#allocation2 + $0xc8] sm:$0xff] }
  0x7c   :  { %v873_v21 = vld [vmem:[#allocation2 + $0x148] sm:$0xff] }
  0x7d   :  { %8004 = vmatpush3.bf16.msra.mxu1 %v839_v6  ;;  %13946 = vst [vmem:[#allocation44_spill] sm:$0xff] %v9419_v39  ;;  %v13948_v39 = vpack.c.bf16 %v9121_v44, %v9114_v41  ;;  %v858_v41 = vld [vmem:[#allocation2 + $0xd0] sm:$0xff] }
  0x7e   :  { %6358 = vmatpush3.bf16.msra.mxu0 %v839_v6  ;;  %6413 = vmatprep.subr.bf16.mxu1 %v856_v33  ;;  %v9415_v6 = vsel %vm632_vm2, %v626_v40, %v627_v56  ;;  %v13947_v40 = vpack.c.bf16 %v9068_v26, %v9074_v27  ;;  %v9440_v33 = vsel %vm632_vm2, %v629_v43, %v630_v7  ;;  %v699_v56 = vrot.slane %v8748_v11, 2  ;;  %v865_v27 = vld [vmem:[#allocation2 + $0x108] sm:$0xff] }
  0x7f   :  { %6483 = vmatprep.subr.bf16.mxu0 %v872_v4  ;;  %v9426_v4 = vsel %vm632_vm2, %v628_v46, %v629_v43  ;;  %v9444_v46 = vpack.c.bf16 %v8813_v24, %v8808_v23  ;;  %v13950_v26 = vpack.c.bf16 %v9082_v30, %v9086_v31  ;;  %v849_v43 = vld [vmem:[#allocation2 + $0x88] sm:$0xff]  ;;  %v702_v30 = vrot.slane %v8763_v14, 2 }
  0x80   :  { %976 = vmatmul.mubr.bf16.vlgmr.msra.gmra.mrb[0].mxu1 %v13947_v40  ;;  %v703_v31 = vrot.slane %v8768_v15, 2 }
  0x81   :  { %944 = vmatmul.mubr.bf16.vlgmr.msra.gmra.mrb[0].mxu0 %v13948_v39  ;;  %13949 = vst [vmem:[#allocation45_spill] sm:$0xff] %v9444_v46  ;;  %6414 = vmatpush3.bf16.msra.mxu1 %v848_v47  ;;  %v9459_v39 = vsel %vm632_vm2, %v630_v7, %v631_v20  ;;  %v13951_v47 = vrot.slane %v8733_v8, 1  ;;  %v701_v7 = vrot.slane %v8758_v13, 2  ;;  %v704_v46 = vrot.slane %v8773_v16, 2 }
  0x82   :  { %983 = vmatprep.mubr.bf16.mxu1 %v13950_v26  ;;  %6415 = vmatprep.subr.bf16.mxu1 %v857_v63  ;;  %v698_v26 = vrot.slane %v8743_v10, 2  ;;  %v700_v63 = vrot.slane %v8753_v12, 2 }
  0x83   :  { %6484 = vmatpush3.bf16.msra.mxu0 %v864_v48  ;;  %v9465_v40 = vsel %vm632_vm2, %v631_v20, %v13951_v47  ;;  %v13952_v48 = vpack.c.bf16 %v9158_v5, %v9151_v62  ;;  %v874_v47 = vld [vmem:[#allocation2 + $0x150] sm:$0xff]  ;;  %v705_v20 = vrot.slane %v8778_v17, 2 }
  0x84   :  { %6485 = vmatprep.subr.bf16.mxu0 %v873_v21  ;;  %v9480_v44 = vsel %vm714_vm3, %v698_v26, %v699_v56  ;;  %v13954_v21 = vrot.slane %v8738_v9, 2  ;;  %v9495_v38 = vsel %vm714_vm3, %v699_v56, %v700_v63  ;;  %v859_v56 = vld [vmem:[#allocation2 + $0xd8] sm:$0xff] }
  0x85   :  { %951 = vmatprep.mubr.bf16.mxu0 %v13952_v48  ;;  %13953 = vst [vmem:[#allocation46_spill] sm:$0xff] %v9480_v44  ;;  %6416 = vmatpush3.bf16.msra.mxu1 %v849_v43  ;;  %13956 = vst [vmem:[#allocation48_spill] sm:$0xff] %v9495_v38  ;;  %v13961_v43 = vpack.c.bf16 %v9169_v34, %v9162_v28  ;;  %v9527_v38 = vsel %vm714_vm3, %v704_v46, %v705_v20  ;;  %v851_v34 = vld [vmem:[#allocation2 + $0x98] sm:$0xff]  ;;  %v861_v28 = vld [vmem:[#allocation2 + $0xe8] sm:$0xff] }
  0x86   :  { %v9486_v48 = vsel %vm714_vm3, %v13954_v21, %v698_v26  ;;  %6417 = vmatprep.subr.bf16.mxu1 %v858_v41  ;;  %v850_v26 = vld [vmem:[#allocation2 + $0x90] sm:$0xff]  ;;  %v9501_v21 = vsel %vm714_vm3, %v700_v63, %v701_v7  ;;  %v9515_v41 = vsel %vm714_vm3, %v701_v7, %v702_v30  ;;  %v13960_v63 = vpack.c.bf16 %v9092_v36, %v9096_v37  ;;  %v860_v7 = vld [vmem:[#allocation2 + $0xe0] sm:$0xff] }
  0x87   :  { %13955 = vst [vmem:[#allocation47_spill] sm:$0xff] %v9486_v48  ;;  %6486 = vmatpush3.bf16.msra.mxu0 %v865_v27  ;;  %13957 = vst [vmem:[#allocation49_spill] sm:$0xff] %v9501_v21  ;;  %v866_v48 = vld [vmem:[#allocation2 + $0x110] sm:$0xff]  ;;  %v9511_v27 = vsel %vm714_vm3, %v702_v30, %v703_v31  ;;  %v9531_v30 = vsel %vm714_vm3, %v703_v31, %v704_v46  ;;  %v13964_v36 = vpack.c.bf16 %v9135_v54, %v9129_v49  ;;  %v876_v46 = vld [vmem:[#allocation2 + $0x160] sm:$0xff] }
  0x88   :  { %6487 = vmatprep.subr.bf16.mxu0 %v874_v47  ;;  %13958 = vst [vmem:[#allocation50_spill] sm:$0xff] %v9511_v27  ;;  %13959 = vst [vmem:[#allocation51_spill] sm:$0xff] %v9515_v41  ;;  %984 = vmatmul.mubr.bf16.gmra.mrb[4].mxu1 %v13960_v63  ;;  %v875_v47 = vld [vmem:[#allocation2 + $0x158] sm:$0xff]  ;;  %v13965_v31 = vpack.c.bf16 %v9206_v0, %v9199_v32  ;;  %v707_v63 = vrot.slane %v8788_v19, 2  ;;  %v13970_v37 = vld [vmem:[#allocation27_spill] sm:$0xff] }
  0x89   :  { %952 = vmatmul.mubr.bf16.gmra.mrb[4].mxu0 %v13961_v43  ;;  %13962 = vst [vmem:[#allocation52_spill] sm:$0xff] %v9527_v38  ;;  %13963 = vst [vmem:[#allocation53_spill] sm:$0xff] %v9531_v30  ;;  %6418 = vmatpush3.bf16.msra.mxu1 %v850_v26  ;;  %v867_v43 = vld [vmem:[#allocation2 + $0x118] sm:$0xff]  ;;  %v706_v26 = vrot.slane %v8783_v18, 2  ;;  %v13972_v30 = vld [vmem:[#allocation23_spill] sm:$0xff] }
  0x8a   :  { %991 = vmatprep.mubr.bf16.mxu1 %v13964_v36  ;;  %6419 = vmatprep.subr.bf16.mxu1 %v859_v56  ;;  %v852_v36 = vld [vmem:[#allocation2 + $0xa0] sm:$0xff]  ;;  %v13978_v44 = vld [vmem:[#allocation16_spill] sm:$0xff] }
  0x8b   :  { %6488 = vmatpush3.bf16.msra.mxu0 %v866_v48  ;;  %959 = vmatprep.mubr.bf16.mxu0 %v13965_v31  ;;  %v868_v56 = vld [vmem:[#allocation2 + $0x120] sm:$0xff]  ;;  %v9547_v48 = vsel %vm714_vm3, %v706_v26, %v707_v63  ;;  %v13969_v31 = vld [vmem:[#allocation28_spill] sm:$0xff] }
  0x8c   :  { %6489 = vmatprep.subr.bf16.mxu0 %v875_v47  ;;  %13966 = vst [vmem:[#allocation54_spill] sm:$0xff] %v9547_v48  ;;  %v9551_v47 = vsel %vm714_vm3, %v705_v20, %v706_v26  ;;  %v13973_v20 = vpack.c.bf16 %v9183_v58, %v13972_v30  ;;  %v853_v26 = vld [vmem:[#allocation2 + $0xa8] sm:$0xff]  ;;  %v854_v48 = vld [vmem:[#allocation2 + $0xb0] sm:$0xff]  ;;  %v13982_v41 = vld [vmem:[#allocation34_spill] sm:$0xff] }
  0x8d   :  { %6420 = vmatpush3.bf16.msra.mxu1 %v851_v34  ;;  %13967 = vst [vmem:[#allocation55_spill] sm:$0xff] %v9551_v47  ;;  %v13968_v34 = vpack.c.bf16 %v9147_v61, %v9139_v55  ;;  %v862_v55 = vld [vmem:[#allocation2 + $0xf0] sm:$0xff]  ;;  %v869_v61 = vld [vmem:[#allocation2 + $0x128] sm:$0xff] }
  0x8e   :  { %6421 = vmatprep.subr.bf16.mxu1 %v860_v7  ;;  %v13971_v7 = vpack.c.bf16 %v13969_v31, %v13970_v37  ;;  %v13974_v37 = vld [vmem:[#allocation32_spill] sm:$0xff]  ;;  %v13983_v27 = vld [vmem:[#allocation35_spill] sm:$0xff]  ;;  %v13985_v58 = vld [vmem:[#allocation29_spill] sm:$0xff] }
  0x8f   :  { %6490 = vmatpush3.bf16.msra.mxu0 %v867_v43  ;;  %v877_v43 = vld [vmem:[#allocation2 + $0x168] sm:$0xff] }
  0x90   :  { %6491 = vmatprep.subr.bf16.mxu0 %v876_v46  ;;  %992 = vmatmul.mubr.bf16.gmra.mrb[8].mxu1 %v13968_v34  ;;  %v13975_v34 = vld [vmem:[#allocation33_spill] sm:$0xff]  ;;  %v13977_v46 = vld [vmem:[#allocation15_spill] sm:$0xff] }
  0x91   :  { %960 = vmatmul.mubr.bf16.gmra.mrb[8].mxu0 %v13971_v7  ;;  %6422 = vmatpush3.bf16.msra.mxu1 %v852_v36  ;;  %v13976_v31 = vpack.c.bf16 %v13974_v37, %v13975_v34  ;;  %v878_v7 = vld [vmem:[#allocation2 + $0x170] sm:$0xff]  ;;  %v708_v47 = vrot.slane %v13977_v46, 2  ;;  %v709_v36 = vrot.slane %v13978_v44, 2  ;;  %v13986_v46 = vpack.c.bf16 %v9227_v2, %v13985_v58 }
  0x92   :  { %999 = vmatprep.mubr.bf16.mxu1 %v13973_v20  ;;  %6423 = vmatprep.subr.bf16.mxu1 %v861_v28  ;;  %v863_v28 = vld [vmem:[#allocation2 + $0xf8] sm:$0xff]  ;;  %v870_v20 = vld [vmem:[#allocation2 + $0x130] sm:$0xff] }
  0x93   :  { %6492 = vmatpush3.bf16.msra.mxu0 %v868_v56  ;;  %967 = vmatprep.mubr.bf16.mxu0 %v13976_v31  ;;  %v9573_v56 = vsel %vm714_vm3, %v708_v47, %v709_v36  ;;  %v13979_v31 = vld [vmem:[#allocation26_spill] sm:$0xff] }
  0x94   :  { %6493 = vmatprep.subr.bf16.mxu0 %v877_v43  ;;  %v9577_v43 = vsel %vm714_vm3, %v707_v63, %v708_v47  ;;  %v855_v63 = vld [vmem:[#allocation2 + $0xb8] sm:$0xff]  ;;  %v888_v47 = vld [vmem:[#allocation2 + $0x1c0] sm:$0xff] }
  0x95   :  { %6424 = vmatpush3.bf16.msra.mxu1 %v853_v26  ;;  %v13980_v26 = vld [vmem:[#allocation25_spill] sm:$0xff] }
  0x96   :  { %6425 = vmatprep.subr.bf16.mxu1 %v862_v55  ;;  %v13981_v38 = vpack.c.bf16 %v13979_v31, %v13980_v26  ;;  %v13984_v55 = vpack.c.bf16 %v13982_v41, %v13983_v27  ;;  %v13987_v27 = vld [vmem:[#allocation37_spill] sm:$0xff]  ;;  %v710_v31 = vrot.slane %v8803_v22, 2  ;;  %v711_v26 = vrot.slane %v8808_v23, 2 }
  0x97   :  { %6494 = vmatpush3.bf16.msra.mxu0 %v869_v61  ;;  %v879_v61 = vld [vmem:[#allocation2 + $0x178] sm:$0xff]  ;;  %v13988_v41 = vpack.c.bf16 %v9294_v1, %v13987_v27 }
  0x98   :  { %6495 = vmatprep.subr.bf16.mxu0 %v878_v7  ;;  %1000 = vmatmul.mubr.bf16.gmra.mrb[12].mxu1 %v13981_v38  ;;  %v871_v38 = vld [vmem:[#allocation2 + $0x138] sm:$0xff]  ;;  %v13994_v7 = vpack.c.bf16 %v8738_v9, %v8733_v8 }
  0x99   :  { %968 = vmatmul.mubr.bf16.gmra.mrb[12].mxu0 %v13984_v55  ;;  %1007 = vmatprep.mubr.bf16.mxu1 %v13986_v46  ;;  %v13802_v55 = vmov 0.0   ;;  %v9600_v46 = vsel %vm714_vm3, %v710_v31, %v711_v26 }
  0x9a   :  { %6426 = vmatpush3.bf16.msra.mxu1 %v854_v48  ;;  %1153 = vmatprep.mubr.bf16.mxu0 %v13988_v41  ;;  %v896_v48 = vld [vmem:[#allocation2 + $0x200] sm:$0xff] }
  0x9b   :  { %6427 = vmatprep.subr.bf16.mxu1 %v863_v28  ;;  %6496 = vmatpush3.bf16.msra.mxu0 %v870_v20  ;;  %v9604_v28 = vsel %vm714_vm3, %v709_v36, %v710_v31  ;;  %v13989_v20 = vld [vmem:[#allocation30_spill] sm:$0xff]  ;;  %v13995_v36 = vpack.c.bf16 %v9314_v45, %v9318_v53  ;;  %v897_v31 = vld [vmem:[#allocation2 + $0x208] sm:$0xff] }
  0x9c   :  { %6497 = vmatprep.subr.bf16.mxu0 %v879_v61  ;;  %v13990_v61 = vld [vmem:[#allocation31_spill] sm:$0xff]  ;;  %v13992_v41 = vld [vmem:[#allocation22_spill] sm:$0xff] }
  0x9d   :  { %v13993_v21 = vpack.c.bf16 %v9151_v62, %v13992_v41  ;;  %v889_v62 = vld [vmem:[#allocation2 + $0x1c8] sm:$0xff]  ;;  %v898_v41 = vld [vmem:[#allocation2 + $0x210] sm:$0xff] }
  0x9e   :  { %6428 = vmatpush3.bf16.msra.mxu1 %v855_v63  ;;  %v13991_v63 = vpack.c.bf16 %v13989_v20, %v13990_v61  ;;  %v712_v20 = vrot.slane %v8813_v24, 2  ;;  %v713_v61 = vrot.slane %v8818_v25, 2 }
  0x9f   :  { %6498 = vmatpush3.bf16.msra.mxu0 %v871_v38  ;;  %6553 = vmatprep.subr.bf16.mxu1 %v888_v47  ;;  %v13997_v47 = vpack.c.bf16 %v9199_v32, %v9158_v5  ;;  %v13998_v38 = vpack.c.bf16 %v8748_v11, %v8743_v10  ;;  %v882_v5 = vld [vmem:[#allocation2 + $0x190] sm:$0xff]  ;;  %v891_v32 = vld [vmem:[#allocation2 + $0x1d8] sm:$0xff]  ;;  %v14001_v10 = vrot.slane %v8738_v9, 2  ;;  %v14004_v9 = vpack.c.bf16 %v8758_v13, %v8753_v12 }
  0xa0   :  { %7395 = vmatprep.subr.bf16.mxu0 %v13802_v55  ;;  %1008 = vmatmul.mubr.bf16.gmra.mrb[16].mxu1 %v13991_v63  ;;  %v880_v63 = vld [vmem:[#allocation2 + $0x180] sm:$0xff]  ;;  %v902_v12 = vld [vmem:[#allocation2 + $0x230] sm:$0xff] }
  0xa1   :  { %1048 = vmatprep.mubr.bf16.mxu1 %v13993_v21  ;;  %v9628_v21 = vsel %vm714_vm3, %v712_v20, %v713_v61  ;;  %v14007_v13 = vld [vmem:[#allocation18_spill] sm:$0xff] }
  0xa2   :  { %1154 = vmatmul.mubr.bf16.vlgmr.msra.gmra.mrb[16].mxu0 %v13994_v7  ;;  %v9632_v7 = vsel %vm714_vm3, %v711_v26, %v712_v20  ;;  %v881_v26 = vld [vmem:[#allocation2 + $0x188] sm:$0xff]  ;;  %v13999_v20 = vpack.c.bf16 %v9331_v57, %v9335_v59 }
  0xa3   :  { %7396 = vmatpush3.bf16.msra.mxu0 %v896_v48  ;;  %1161 = vmatprep.mubr.bf16.mxu0 %v13995_v36  ;;  %v13996_v48 = vld [vmem:[#allocation36_spill] sm:$0xff]  ;;  %v14000_v36 = vmov 0.0  }
  0xa4   :  { %7397 = vmatprep.subr.bf16.mxu0 %v13802_v55 }
  0xa7   :  { %7398 = vmatpush3.bf16.msra.mxu0 %v897_v31  ;;  %v899_v31 = vld [vmem:[#allocation2 + $0x218] sm:$0xff] }
  0xa8   :  { %7399 = vmatprep.subr.bf16.mxu0 %v13802_v55  ;;  %1049 = vmatmul.mubr.bf16.vlgmr.msra.gmra.mrb[20].mxu1 %v13996_v48  ;;  %v890_v55 = vld [vmem:[#allocation2 + $0x1d0] sm:$0xff] }
  0xa9   :  { %6554 = vmatpush3.bf16.msra.mxu1 %v880_v63  ;;  %1056 = vmatprep.mubr.bf16.mxu1 %v13997_v47  ;;  %v696_v63 = vrot.slane %v8733_v8, 2  ;;  %v14002_v47 = vld [vmem:[#allocation38_spill] sm:$0xff] }
  0xaa   :  { %6555 = vmatprep.subr.bf16.mxu1 %v889_v62  ;;  %1162 = vmatmul.mubr.bf16.gmra.mrb[20].mxu0 %v13998_v38  ;;  %v900_v62 = vld [vmem:[#allocation2 + $0x220] sm:$0xff] }
  0xab   :  { %1169 = vmatprep.mubr.bf16.mxu0 %v13999_v20  ;;  %7400 = vmatpush3.bf16.msra.mxu0 %v898_v41  ;;  %v9654_v11 = vsel %vm714_vm3, %v696_v63, %v14001_v10  ;;  %v9658_v38 = vsel %vm714_vm3, %v713_v61, %v696_v63  ;;  %v883_v61 = vld [vmem:[#allocation2 + $0x198] sm:$0xff]  ;;  %v14005_v41 = vpack.c.bf16 %v9354_v3, %v9346_v52  ;;  %v14006_v20 = vld [vmem:[#allocation39_spill] sm:$0xff] }
  0xac   :  { %7401 = vmatprep.subr.bf16.mxu0 %v14000_v36  ;;  %v741_v8 = vpack.c.bf16 %v9654_v11, %v9658_v38  ;;  %v14008_v63 = vpack.c.bf16 %v14007_v13, %v13974_v37  ;;  %v14010_v10 = vpack.c.bf16 %v9371_v51, %v9375_v42  ;;  %v886_v37 = vld [vmem:[#allocation2 + $0x1b0] sm:$0xff] }
  0xad   :  { %6556 = vmatpush3.bf16.msra.mxu1 %v881_v26  ;;  %v901_v26 = vld [vmem:[#allocation2 + $0x228] sm:$0xff] }
  0xae   :  { %6557 = vmatprep.subr.bf16.mxu1 %v890_v55  ;;  %v14003_v55 = vpack.c.bf16 %v13975_v34, %v9206_v0  ;;  %v884_v0 = vld [vmem:[#allocation2 + $0x1a0] sm:$0xff]  ;;  %v893_v34 = vld [vmem:[#allocation2 + $0x1e8] sm:$0xff] }
  0xaf   :  { %7402 = vmatpush3.bf16.msra.mxu0 %v899_v31  ;;  %v892_v31 = vld [vmem:[#allocation2 + $0x1e0] sm:$0xff] }
  0xb0   :  { %1057 = vmatmul.mubr.bf16.gmra.mrb[24].mxu1 %v14002_v47  ;;  %7403 = vmatprep.subr.bf16.mxu0 %v14000_v36 }
  0xb1   :  { %1064 = vmatprep.mubr.bf16.mxu1 %v14003_v55  ;;  %6558 = vmatpush3.bf16.msra.mxu1 %v882_v5  ;;  %v14009_v5 = vpack.c.bf16 %v8768_v15, %v8763_v14  ;;  %v903_v55 = vld [vmem:[#allocation2 + $0x238] sm:$0xff]  ;;  %v14012_v14 = vld [vmem:[#allocation20_spill] sm:$0xff] }
  0xb2   :  { %1170 = vmatmul.mubr.bf16.gmra.mrb[24].mxu0 %v14004_v9  ;;  %6559 = vmatprep.subr.bf16.mxu1 %v891_v32  ;;  %v885_v32 = vld [vmem:[#allocation2 + $0x1a8] sm:$0xff]  ;;  %v895_v9 = vld [vmem:[#allocation2 + $0x1f8] sm:$0xff] }
  0xb3   :  { %1177 = vmatprep.mubr.bf16.mxu0 %v14005_v41  ;;  %7404 = vmatpush3.bf16.msra.mxu0 %v900_v62  ;;  %v894_v62 = vld [vmem:[#allocation2 + $0x1f0] sm:$0xff] }
  0xb4   :  { %7405 = vmatprep.subr.bf16.mxu0 %v14000_v36  ;;  %v14013_v15 = vld [vmem:[#allocation17_spill] sm:$0xff] }
  0xb5   :  { %6560 = vmatpush3.bf16.msra.mxu1 %v883_v61  ;;  %v14011_v61 = vld [vmem:[#allocation40_spill] sm:$0xff]  ;;  %v14014_v41 = vpack.c.bf16 %v14012_v14, %v14013_v15  ;;  %v14039_v14 = vld [vmem:[#allocation47_spill] sm:$0xff] }
  0xb6   :  { %6561 = vmatprep.subr.bf16.mxu1 %v892_v31  ;;  %v14015_v31 = vpack.c.bf16 %v8778_v17, %v8773_v16  ;;  %v14021_v16 = vpack.c.bf16 %v9411_v50, %v9415_v6  ;;  %v14022_v17 = vld [vmem:[#allocation42_spill] sm:$0xff] }
  0xb7   :  { %7406 = vmatpush3.bf16.msra.mxu0 %v901_v26  ;;  %v887_v26 = vld [vmem:[#allocation2 + $0x1b8] sm:$0xff] }
  0xb8   :  { %1065 = vmatmul.mubr.bf16.gmra.mrb[28].mxu1 %v14006_v20  ;;  %7407 = vmatprep.subr.bf16.mxu0 %v14000_v36 }
  0xb9   :  { %1072 = vmatprep.mubr.bf16.mxu1 %v14008_v63  ;;  %6562 = vmatpush3.bf16.msra.mxu1 %v884_v0  ;;  %v14016_v0 = vpack.c.bf16 %v9394_v29, %v9386_v35  ;;  %v14020_v63 = vpack.c.bf16 %v8788_v19, %v8783_v18  ;;  %v14027_v18 = vld [vmem:[#allocation43_spill] sm:$0xff]  ;;  %v14028_v19 = vld [vmem:[#allocation24_spill] sm:$0xff] }
  0xba   :  { %1178 = vmatmul.mubr.bf16.gmra.mrb[28].mxu0 %v14009_v5  ;;  %6563 = vmatprep.subr.bf16.mxu1 %v893_v34  ;;  %v14017_v34 = vld [vmem:[#allocation41_spill] sm:$0xff]  ;;  %v14023_v5 = vpack.c.bf16 %v13972_v30, %v9135_v54  ;;  %v14031_v54 = vpack.c.bf16 %v9465_v40, %v9459_v39 }
  0xbb   :  { %1185 = vmatprep.mubr.bf16.mxu0 %v14010_v10  ;;  %7408 = vmatpush3.bf16.msra.mxu0 %v902_v12  ;;  %v14018_v12 = vld [vmem:[#allocation19_spill] sm:$0xff]  ;;  %v14033_v30 = vld [vmem:[#allocation21_spill] sm:$0xff] }
  0xbc   :  { %7409 = vmatprep.subr.bf16.mxu0 %v14000_v36  ;;  %v14019_v13 = vpack.c.bf16 %v9129_v49, %v14018_v12  ;;  %v14026_v49 = vpack.c.bf16 %v9440_v33, %v9426_v4 }
  0xbd   :  { %6564 = vmatpush3.bf16.msra.mxu1 %v885_v32  ;;  %v14024_v32 = vld [vmem:[#allocation15_spill] sm:$0xff] }
  0xbe   :  { %6565 = vmatprep.subr.bf16.mxu1 %v894_v62  ;;  %v14025_v10 = vpack.c.bf16 %v13978_v44, %v14024_v32  ;;  %v14029_v62 = vpack.c.bf16 %v13985_v58, %v14028_v19  ;;  %v14032_v44 = vld [vmem:[#allocation44_spill] sm:$0xff]  ;;  %v14038_v58 = vld [vmem:[#allocation46_spill] sm:$0xff] }
  0xbf   :  { %7410 = vmatpush3.bf16.msra.mxu0 %v903_v55  ;;  %v14030_v55 = vpack.c.bf16 %v8808_v23, %v8803_v22  ;;  %v14036_v22 = vld [vmem:[#allocation45_spill] sm:$0xff]  ;;  %v14037_v23 = vpack.c.bf16 %v9318_v53, %v9294_v1  ;;  %v14040_v15 = vpack.c.bf16 %v14038_v58, %v14039_v14  ;;  %v14045_v1 = vpack.c.bf16 %v9346_v52, %v9331_v57  ;;  %v14046_v53 = vld [vmem:[#allocation50_spill] sm:$0xff] }
  0xc0   :  { %1073 = vmatmul.mubr.bf16.gmra.mrb[32].mxu1 %v14011_v61  ;;  %v14053_v57 = vpack.c.bf16 %v9386_v35, %v9371_v51  ;;  %v14054_v52 = vld [vmem:[#allocation54_spill] sm:$0xff]  ;;  %v14059_v51 = vpack.c.bf16 %v9426_v4, %v9411_v50  ;;  %v14060_v35 = vpack.c.bf16 %v9600_v46, %v9604_v28  ;;  %v14063_v50 = vpack.c.bf16 %v13987_v27, %v9465_v40 }
  0xc1   :  { %1080 = vmatprep.mubr.bf16.mxu1 %v14014_v41  ;;  %6566 = vmatpush3.bf16.msra.mxu1 %v886_v37  ;;  %v14034_v37 = vpack.c.bf16 %v14033_v30, %v9227_v2  ;;  %v14043_v2 = vld [vmem:[#allocation48_spill] sm:$0xff] }
  0xc2   :  { %1186 = vmatmul.mubr.bf16.gmra.mrb[32].mxu0 %v14015_v31  ;;  %6567 = vmatprep.subr.bf16.mxu1 %v895_v9  ;;  %v14035_v9 = vpack.c.bf16 %v8818_v25, %v8813_v24  ;;  %v14041_v24 = vpack.c.bf16 %v9335_v59, %v9314_v45  ;;  %v14042_v25 = vld [vmem:[#allocation49_spill] sm:$0xff]  ;;  %v14047_v31 = vld [vmem:[#allocation51_spill] sm:$0xff]  ;;  %v14049_v45 = vpack.c.bf16 %v9375_v42, %v9354_v3  ;;  %v14050_v59 = vld [vmem:[#allocation52_spill] sm:$0xff] }
  0xc3   :  { %1193 = vmatprep.mubr.bf16.mxu0 %v14016_v0  ;;  %v14044_v41 = vpack.c.bf16 %v14042_v25, %v14043_v2  ;;  %v14055_v0 = vld [vmem:[#allocation55_spill] sm:$0xff]  ;;  %v14057_v3 = vpack.c.bf16 %v9415_v6, %v9394_v29  ;;  %v14058_v42 = vpack.c.bf16 %v9573_v56, %v9577_v43  ;;  %v14061_v29 = vpack.c.bf16 %v9459_v39, %v9440_v33 }
  0xc4   :  { %v14062_v6 = vpack.c.bf16 %v9628_v21, %v9632_v7 }
  0xc5   :  { %6568 = vmatpush3.bf16.msra.mxu1 %v887_v26  ;;  %v14051_v26 = vld [vmem:[#allocation53_spill] sm:$0xff] }
  0xc8   :  { %1081 = vmatmul.mubr.bf16.gmra.mrb[36].mxu1 %v14017_v34 }
  0xc9   :  { %1088 = vmatprep.mubr.bf16.mxu1 %v14019_v13 }
  0xca   :  { %1194 = vmatmul.mubr.bf16.gmra.mrb[36].mxu0 %v14020_v63 }
  0xcb   :  { %1201 = vmatprep.mubr.bf16.mxu0 %v14021_v16 }
  0xd0   :  { %1089 = vmatmul.mubr.bf16.gmra.mrb[40].mxu1 %v14022_v17 }
  0xd1   :  { %1096 = vmatprep.mubr.bf16.mxu1 %v14023_v5 }
  0xd2   :  { %1202 = vmatmul.mubr.bf16.gmra.mrb[40].mxu0 %v14025_v10 }
  0xd3   :  { %1209 = vmatprep.mubr.bf16.mxu0 %v14026_v49 }
  0xd8   :  { %1097 = vmatmul.mubr.bf16.gmra.mrb[44].mxu1 %v14027_v18 }
  0xd9   :  { %1104 = vmatprep.mubr.bf16.mxu1 %v14029_v62 }
  0xda   :  { %1210 = vmatmul.mubr.bf16.gmra.mrb[44].mxu0 %v14030_v55 }
  0xdb   :  { %1217 = vmatprep.mubr.bf16.mxu0 %v14031_v54 }
  0xe0   :  { %1105 = vmatmul.mubr.bf16.gmra.mrb[48].mxu1 %v14032_v44 }
  0xe1   :  { %1112 = vmatprep.mubr.bf16.mxu1 %v14034_v37 }
  0xe2   :  { %1218 = vmatmul.mubr.bf16.gmra.mrb[48].mxu0 %v14035_v9 }
  0xe3   :  { %7411 = vmatprep.mubr.msk.bf16.mxu0 %vm8416_vm4, %v14000_v36 }
  0xe8   :  { %1113 = vmatmul.mubr.bf16.gmra.mrb[52].mxu1 %v14036_v22 }
  0xe9   :  { %1258 = vmatprep.mubr.bf16.mxu1 %v14037_v23 }
  0xea   :  { %7412 = vmatmul.mubr.bf16.vlgmr.msra.gmra.mrb[52].mxu0 %v14040_v15 }
  0xeb   :  { %7415 = vmatprep.mubr.msk.bf16.mxu0 %vm8416_vm4, %v14000_v36 }
  0xf0   :  { %1259 = vmatmul.mubr.bf16.vlgmr.msra.gmra.mrb[56].mxu1 %v14002_v47  ;;  %v14048_v47 = vpack.c.bf16 %v14046_v53, %v14047_v31 }
  0xf1   :  { %1266 = vmatprep.mubr.bf16.mxu1 %v14041_v24 }
  0xf2   :  { %7416 = vmatmul.mubr.bf16.gmra.mrb[56].mxu0 %v14044_v41 }
  0xf3   :  { %7419 = vmatprep.mubr.msk.bf16.mxu0 %vm8416_vm4, %v14000_v36 }
  0xf8   :  { %1267 = vmatmul.mubr.bf16.gmra.mrb[60].mxu1 %v14006_v20  ;;  %v14052_v20 = vpack.c.bf16 %v14050_v59, %v14051_v26 }
  0xf9   :  { %1274 = vmatprep.mubr.bf16.mxu1 %v14045_v1 }
  0xfa   :  { %7420 = vmatmul.mubr.bf16.gmra.mrb[60].mxu0 %v14048_v47 }
  0xfb   :  { %7423 = vmatprep.mubr.msk.bf16.mxu0 %vm8416_vm4, %v14000_v36 }
 0x100   :  { %1275 = vmatmul.mubr.bf16.gmra.mrb[64].mxu1 %v14011_v61  ;;  %v14056_v61 = vpack.c.bf16 %v14054_v52, %v14055_v0 }
 0x101   :  { %1282 = vmatprep.mubr.bf16.mxu1 %v14049_v45 }
 0x102   :  { %7424 = vmatmul.mubr.bf16.gmra.mrb[64].mxu0 %v14052_v20 }
 0x103   :  { %7427 = vmatprep.mubr.msk.bf16.mxu0 %vm8416_vm4, %v14000_v36 }
 0x108   :  { %1283 = vmatmul.mubr.bf16.gmra.mrb[68].mxu1 %v14017_v34 }
 0x109   :  { %1290 = vmatprep.mubr.bf16.mxu1 %v14053_v57 }
 0x10a   :  { %7428 = vmatmul.mubr.bf16.gmra.mrb[68].mxu0 %v14056_v61 }
 0x10b   :  { %7431 = vmatprep.mubr.msk.bf16.mxu0 %vm8416_vm4, %v14000_v36 }
 0x110   :  { %1291 = vmatmul.mubr.bf16.gmra.mrb[72].mxu1 %v14022_v17 }
 0x111   :  { %1298 = vmatprep.mubr.bf16.mxu1 %v14057_v3 }
 0x112   :  { %7432 = vmatmul.mubr.bf16.gmra.mrb[72].mxu0 %v14058_v42 }
 0x113   :  { %7435 = vmatprep.mubr.msk.bf16.mxu0 %vm8416_vm4, %v14000_v36 }
 0x118   :  { %1299 = vmatmul.mubr.bf16.gmra.mrb[76].mxu1 %v14027_v18 }
 0x119   :  { %1306 = vmatprep.mubr.bf16.mxu1 %v14059_v51 }
 0x11a   :  { %7436 = vmatmul.mubr.bf16.gmra.mrb[76].mxu0 %v14060_v35 }
 0x11b   :  { %7439 = vmatprep.mubr.msk.bf16.mxu0 %vm8416_vm4, %v14000_v36 }
 0x120   :  { %1307 = vmatmul.mubr.bf16.gmra.mrb[80].mxu1 %v14032_v44 }
 0x121   :  { %1314 = vmatprep.mubr.bf16.mxu1 %v14061_v29 }
 0x122   :  { %7440 = vmatmul.mubr.bf16.gmra.mrb[80].mxu0 %v14062_v6  ;;  %v9850_v6 = vld [vmem:[%s13735_s2] ss:$0 sm:$0xff] }
 0x123   :  { %7443 = vmatprep.mubr.msk.bf16.mxu0 %vm8416_vm4, %v14000_v36 }
 0x128   :  { %1315 = vmatmul.mubr.bf16.gmra.mrb[84].mxu1 %v14036_v22 }
 0x129   :  { %1322 = vmatprep.mubr.bf16.mxu1 %v14063_v50 }
 0x12a   :  { %7444 = vmatmul.mubr.bf16.gmra.mrb[84].mxu0 %v741_v8 }
 0x130   :  { %1323 = vmatmul.mubr.bf16.gmra.mrb[88].mxu1 %v13996_v48 }
 0x153   :  { %v6383_v33 = vpop.f32.mrb[0].mxu1 }
 0x154   :  { %v6359_v4 = vpop.f32.mrb[0].mxu0  ;;  %v6384_v39 = vpop.f32.mrb[1].mxu1 }
 0x155   :  { %v6360_v56 = vpop.f32.mrb[1].mxu0  ;;  %v9815_v43 = vadd.f32 %v6384_v39, %v6383_v33  ;;  %v6386_v46 = vpop.f32.mrb[2].mxu1 }
 0x156   :  { %v6361_v28 = vadd.f32 %v6360_v56, %v6359_v4  ;;  %v6362_v21 = vpop.f32.mrb[2].mxu0  ;;  %v6387_v7 = vpop.f32.mrb[3].mxu1 }
 0x157   :  { %v6363_v36 = vpop.f32.mrb[3].mxu0  ;;  %v9817_v34 = vadd.f32 %v6387_v7, %v6386_v46 }
 0x158   :  { %v6364_v40 = vadd.f32 %v6363_v36, %v6362_v21  ;;  %v946_v33 = vadd.f32 %v6361_v28, %v9850_v6 }
 0x15a   :  { %v949_v7 = vadd.f32 %v6364_v40, %v9850_v6 }
 0x15b   :  { %v6389_v27 = vpop.f32.mrb[4].mxu1 }
 0x15c   :  { %v6365_v12 = vpop.f32.mrb[4].mxu0  ;;  %v6390_v11 = vpop.f32.mrb[5].mxu1 }
 0x15d   :  { %v6366_v38 = vpop.f32.mrb[5].mxu0  ;;  %v9819_v8 = vadd.f32 %v6390_v11, %v6389_v27  ;;  %v6392_v48 = vpop.f32.mrb[6].mxu1 }
 0x15e   :  { %v9821_v13 = vadd.f32 %v6366_v38, %v6365_v12  ;;  %v6368_v63 = vpop.f32.mrb[6].mxu0  ;;  %v6393_v16 = vpop.f32.mrb[7].mxu1 }
 0x15f   :  { %v6369_v17 = vpop.f32.mrb[7].mxu0  ;;  %v9823_v5 = vadd.f32 %v6393_v16, %v6392_v48 }
 0x160   :  { %v9825_v32 = vadd.f32 %v6369_v17, %v6368_v63 }
 0x163   :  { %v6395_v10 = vpop.f32.mrb[8].mxu1 }
 0x164   :  { %v6371_v49 = vpop.f32.mrb[8].mxu0  ;;  %v6396_v18 = vpop.f32.mrb[9].mxu1 }
 0x165   :  { %v6372_v19 = vpop.f32.mrb[9].mxu0  ;;  %v9827_v62 = vadd.f32 %v6396_v18, %v6395_v10  ;;  %v6398_v55 = vpop.f32.mrb[10].mxu1 }
 0x166   :  { %v9829_v54 = vadd.f32 %v6372_v19, %v6371_v49  ;;  %v6374_v44 = vpop.f32.mrb[10].mxu0  ;;  %v6399_v30 = vpop.f32.mrb[11].mxu1  ;;  %v954_v49 = vadd.f32 %v9821_v13, %v9850_v6 }
 0x167   :  { %v6375_v37 = vpop.f32.mrb[11].mxu0  ;;  %v9831_v9 = vadd.f32 %v6399_v30, %v6398_v55  ;;  %v957_v30 = vadd.f32 %v9825_v32, %v9850_v6 }
 0x168   :  { %v9833_v22 = vadd.f32 %v6375_v37, %v6374_v44 }
 0x16b   :  { %v6401_v23 = vpop.f32.mrb[12].mxu1 }
 0x16c   :  { %v6377_v58 = vpop.f32.mrb[12].mxu0  ;;  %v6402_v14 = vpop.f32.mrb[13].mxu1 }
 0x16d   :  { %v6378_v15 = vpop.f32.mrb[13].mxu0  ;;  %v9835_v24 = vadd.f32 %v6402_v14, %v6401_v23  ;;  %v6404_v25 = vpop.f32.mrb[14].mxu1 }
 0x16e   :  { %v9837_v2 = vadd.f32 %v6378_v15, %v6377_v58  ;;  %v6380_v41 = vpop.f32.mrb[14].mxu0  ;;  %v6405_v1 = vpop.f32.mrb[15].mxu1 }
 0x16f   :  { %v6381_v53 = vpop.f32.mrb[15].mxu0  ;;  %v9839_v31 = vadd.f32 %v6405_v1, %v6404_v25 }
 0x170   :  { %v9841_v47 = vadd.f32 %v6381_v53, %v6380_v41 }
 0x173   :  { %v6407_v45 = vpop.f32.mrb[16].mxu1 }
 0x174   :  { %v6408_v59 = vpop.f32.mrb[17].mxu1 }
 0x175   :  { %v6499_v26 = vpop.f32.mrb[16].mxu0  ;;  %v9843_v20 = vadd.f32 %v6408_v59, %v6407_v45  ;;  %v6410_v57 = vpop.f32.mrb[18].mxu1  ;;  %v962_v59 = vadd.f32 %v9829_v54, %v9850_v6 }
 0x176   :  { %v6500_v52 = vpop.f32.mrb[17].mxu0  ;;  %v6411_v0 = vpop.f32.mrb[19].mxu1 }
 0x177   :  { %v6501_v61 = vadd.f32 %v6500_v52, %v6499_v26  ;;  %v6502_v3 = vpop.f32.mrb[18].mxu0  ;;  %v9845_v42 = vadd.f32 %v6411_v0, %v6410_v57 }
 0x178   :  { %v6503_v51 = vpop.f32.mrb[19].mxu0 }
 0x179   :  { %v6504_v35 = vadd.f32 %v6503_v51, %v6502_v3 }
 0x17b   :  { %v6429_v29 = vpop.f32.mrb[20].mxu1 }
 0x17c   :  { %v6430_v50 = vpop.f32.mrb[21].mxu1 }
 0x17d   :  { %v6431_v4 = vadd.f32 %v6430_v50, %v6429_v29  ;;  %v6432_v39 = vpop.f32.mrb[22].mxu1  ;;  %v6505_v56 = vpop.f32.mrb[20].mxu0 }
 0x17e   :  { %v6433_v46 = vpop.f32.mrb[23].mxu1  ;;  %v6506_v21 = vpop.f32.mrb[21].mxu0 }
 0x17f   :  { %v1051_v36 = vadd.f32 %v6431_v4, %v946_v33  ;;  %v6434_v27 = vadd.f32 %v6433_v46, %v6432_v39  ;;  %v6507_v12 = vadd.f32 %v6506_v21, %v6505_v56  ;;  %v6508_v11 = vpop.f32.mrb[22].mxu0  ;;  %v970_v21 = vadd.f32 %v9837_v2, %v9850_v6 }
 0x180   :  { %v6509_v38 = vpop.f32.mrb[23].mxu0 }
 0x181   :  { %v1054_v48 = vadd.f32 %v6434_v27, %v949_v7  ;;  %v9854_v63 = vadd.f32 %v6501_v61, %v1051_v36  ;;  %v6510_v16 = vadd.f32 %v6509_v38, %v6508_v11  ;;  %v965_v61 = vadd.f32 %v9833_v22, %v9850_v6 }
 0x182   :  { %v973_v11 = vadd.f32 %v9841_v47, %v9850_v6 }
 0x183   :  { %v9856_v17 = vadd.f32 %v6504_v35, %v1054_v48  ;;  %v6435_v10 = vpop.f32.mrb[24].mxu1 }
 0x184   :  { %v6436_v28 = vpop.f32.mrb[25].mxu1 }
 0x185   :  { %v6437_v18 = vadd.f32 %v6436_v28, %v6435_v10  ;;  %v6438_v19 = vpop.f32.mrb[26].mxu1  ;;  %v6511_v55 = vpop.f32.mrb[24].mxu0 }
 0x186   :  { %v6439_v40 = vpop.f32.mrb[27].mxu1  ;;  %v6512_v44 = vpop.f32.mrb[25].mxu0 }
 0x187   :  { %v1059_v37 = vadd.f32 %v6437_v18, %v954_v49  ;;  %v6440_v23 = vadd.f32 %v6439_v40, %v6438_v19  ;;  %v6513_v58 = vadd.f32 %v6512_v44, %v6511_v55  ;;  %v6514_v14 = vpop.f32.mrb[26].mxu0  ;;  %v978_v44 = vadd.f32 %v9815_v43, %v9850_v6 }
 0x188   :  { %v6515_v15 = vpop.f32.mrb[27].mxu0 }
 0x189   :  { %v1062_v25 = vadd.f32 %v6440_v23, %v957_v30  ;;  %v9862_v41 = vadd.f32 %v6507_v12, %v1059_v37  ;;  %v6516_v1 = vadd.f32 %v6515_v15, %v6514_v14  ;;  %v981_v14 = vadd.f32 %v9817_v34, %v9850_v6 }
 0x18b   :  { %v9864_v53 = vadd.f32 %v6510_v16, %v1062_v25  ;;  %v6441_v13 = vpop.f32.mrb[28].mxu1 }
 0x18c   :  { %v6442_v45 = vpop.f32.mrb[29].mxu1 }
 0x18d   :  { %v6443_v26 = vadd.f32 %v6442_v45, %v6441_v13  ;;  %v6444_v57 = vpop.f32.mrb[30].mxu1  ;;  %v6517_v52 = vpop.f32.mrb[28].mxu0 }
 0x18e   :  { %v6445_v32 = vpop.f32.mrb[31].mxu1  ;;  %v6518_v0 = vpop.f32.mrb[29].mxu0 }
 0x18f   :  { %v1067_v3 = vadd.f32 %v6443_v26, %v962_v59  ;;  %v6446_v51 = vadd.f32 %v6445_v32, %v6444_v57  ;;  %v6519_v35 = vadd.f32 %v6518_v0, %v6517_v52  ;;  %v6520_v29 = vpop.f32.mrb[30].mxu0  ;;  %v986_v0 = vadd.f32 %v9819_v8, %v9850_v6 }
 0x190   :  { %v6521_v50 = vpop.f32.mrb[31].mxu0 }
 0x191   :  { %v1070_v33 = vadd.f32 %v6446_v51, %v965_v61  ;;  %v9870_v4 = vadd.f32 %v6513_v58, %v1067_v3  ;;  %v6522_v39 = vadd.f32 %v6521_v50, %v6520_v29  ;;  %v989_v29 = vadd.f32 %v9823_v5, %v9850_v6 }
 0x193   :  { %v9872_v56 = vadd.f32 %v6516_v1, %v1070_v33  ;;  %v6447_v54 = vpop.f32.mrb[32].mxu1 }
 0x194   :  { %v6448_v46 = vpop.f32.mrb[33].mxu1 }
 0x195   :  { %v6449_v7 = vadd.f32 %v6448_v46, %v6447_v54  ;;  %v6450_v36 = vpop.f32.mrb[34].mxu1  ;;  %v6523_v27 = vpop.f32.mrb[32].mxu0 }
 0x196   :  { %v6451_v22 = vpop.f32.mrb[35].mxu1  ;;  %v6524_v12 = vpop.f32.mrb[33].mxu0 }
 0x197   :  { %v1075_v38 = vadd.f32 %v6449_v7, %v970_v21  ;;  %v6452_v48 = vadd.f32 %v6451_v22, %v6450_v36  ;;  %v6525_v16 = vadd.f32 %v6524_v12, %v6523_v27  ;;  %v6526_v10 = vpop.f32.mrb[34].mxu0  ;;  %v994_v12 = vadd.f32 %v9827_v62, %v9850_v6 }
 0x198   :  { %v6527_v28 = vpop.f32.mrb[35].mxu0 }
 0x199   :  { %v1078_v49 = vadd.f32 %v6452_v48, %v973_v11  ;;  %v9878_v18 = vadd.f32 %v6519_v35, %v1075_v38  ;;  %v6528_v19 = vadd.f32 %v6527_v28, %v6526_v10  ;;  %v997_v10 = vadd.f32 %v9831_v9, %v9850_v6 }
 0x19b   :  { %v9880_v55 = vadd.f32 %v6522_v39, %v1078_v49  ;;  %v6453_v2 = vpop.f32.mrb[36].mxu1 }
 0x19c   :  { %v6454_v40 = vpop.f32.mrb[37].mxu1 }
 0x19d   :  { %v6455_v30 = vadd.f32 %v6454_v40, %v6453_v2  ;;  %v6456_v37 = vpop.f32.mrb[38].mxu1  ;;  %v6529_v23 = vpop.f32.mrb[36].mxu0 }
 0x19e   :  { %v6457_v47 = vpop.f32.mrb[39].mxu1  ;;  %v6530_v58 = vpop.f32.mrb[37].mxu0 }
 0x19f   :  { %v1083_v15 = vadd.f32 %v6455_v30, %v978_v44  ;;  %v6458_v25 = vadd.f32 %v6457_v47, %v6456_v37  ;;  %v6531_v1 = vadd.f32 %v6530_v58, %v6529_v23  ;;  %v6532_v13 = vpop.f32.mrb[38].mxu0  ;;  %v1002_v58 = vadd.f32 %v9835_v24, %v9850_v6 }
 0x1a0   :  { %v6533_v45 = vpop.f32.mrb[39].mxu0 }
 0x1a1   :  { %v1086_v59 = vadd.f32 %v6458_v25, %v981_v14  ;;  %v9886_v26 = vadd.f32 %v6525_v16, %v1083_v15  ;;  %v6534_v57 = vadd.f32 %v6533_v45, %v6532_v13  ;;  %v1005_v13 = vadd.f32 %v9839_v31, %v9850_v6 }
 0x1a3   :  { %v9888_v52 = vadd.f32 %v6528_v19, %v1086_v59  ;;  %v6459_v43 = vpop.f32.mrb[40].mxu1 }
 0x1a4   :  { %v6460_v32 = vpop.f32.mrb[41].mxu1 }
 0x1a5   :  { %v6461_v61 = vadd.f32 %v6460_v32, %v6459_v43  ;;  %v6462_v3 = vpop.f32.mrb[42].mxu1  ;;  %v6535_v51 = vpop.f32.mrb[40].mxu0 }
 0x1a6   :  { %v6463_v34 = vpop.f32.mrb[43].mxu1  ;;  %v6536_v35 = vpop.f32.mrb[41].mxu0 }
 0x1a7   :  { %v1091_v50 = vadd.f32 %v6461_v61, %v986_v0  ;;  %v6464_v33 = vadd.f32 %v6463_v34, %v6462_v3  ;;  %v6537_v39 = vadd.f32 %v6536_v35, %v6535_v51  ;;  %v6538_v54 = vpop.f32.mrb[42].mxu0  ;;  %v1010_v35 = vadd.f32 %v9843_v20, %v9850_v6 }
 0x1a8   :  { %v6539_v46 = vpop.f32.mrb[43].mxu0 }
 0x1a9   :  { %v1094_v21 = vadd.f32 %v6464_v33, %v989_v29  ;;  %v9894_v7 = vadd.f32 %v6531_v1, %v1091_v50  ;;  %v6540_v36 = vadd.f32 %v6539_v46, %v6538_v54  ;;  %v1013_v54 = vadd.f32 %v9845_v42, %v9850_v6 }
 0x1ab   :  { %v9896_v27 = vadd.f32 %v6534_v57, %v1094_v21  ;;  %v6465_v8 = vpop.f32.mrb[44].mxu1 }
 0x1ac   :  { %v6466_v22 = vpop.f32.mrb[45].mxu1 }
 0x1ad   :  { %v6467_v11 = vadd.f32 %v6466_v22, %v6465_v8  ;;  %v6468_v38 = vpop.f32.mrb[46].mxu1  ;;  %v6541_v48 = vpop.f32.mrb[44].mxu0 }
 0x1ae   :  { %v6469_v5 = vpop.f32.mrb[47].mxu1  ;;  %v6542_v16 = vpop.f32.mrb[45].mxu0 }
 0x1af   :  { %v1099_v28 = vadd.f32 %v6467_v11, %v994_v12  ;;  %v6470_v49 = vadd.f32 %v6469_v5, %v6468_v38  ;;  %v6543_v19 = vadd.f32 %v6542_v16, %v6541_v48  ;;  %v6544_v2 = vpop.f32.mrb[46].mxu0 }
 0x1b0   :  { %v6545_v40 = vpop.f32.mrb[47].mxu0 }
 0x1b1   :  { %v1102_v44 = vadd.f32 %v6470_v49, %v997_v10  ;;  %v9902_v30 = vadd.f32 %v6537_v39, %v1099_v28  ;;  %v6546_v37 = vadd.f32 %v6545_v40, %v6544_v2 }
 0x1b3   :  { %v9904_v23 = vadd.f32 %v6540_v36, %v1102_v44  ;;  %v6471_v62 = vpop.f32.mrb[48].mxu1  ;;  %v1454_v44 = vld [vmem:[%s13736_s3] sm:$0xff] }
 0x1b4   :  { %v6472_v47 = vpop.f32.mrb[49].mxu1 }
 0x1b5   :  { %v6473_v14 = vadd.f32 %v6472_v47, %v6471_v62  ;;  %v6474_v15 = vpop.f32.mrb[50].mxu1  ;;  %v6547_v25 = vpop.f32.mrb[48].mxu0 }
 0x1b6   :  { %v6475_v9 = vpop.f32.mrb[51].mxu1  ;;  %v6548_v1 = vpop.f32.mrb[49].mxu0 }
 0x1b7   :  { %v1107_v45 = vadd.f32 %v6473_v14, %v1002_v58  ;;  %v6476_v59 = vadd.f32 %v6475_v9, %v6474_v15  ;;  %v6549_v57 = vadd.f32 %v6548_v1, %v6547_v25  ;;  %v6550_v43 = vpop.f32.mrb[50].mxu0  ;;  %v1455_v58 = vld [vmem:[%s13736_s3 + $0x8] sm:$0xff] }
 0x1b8   :  { %v6551_v32 = vpop.f32.mrb[51].mxu0 }
 0x1b9   :  { %v1110_v0 = vadd.f32 %v6476_v59, %v1005_v13  ;;  %v9910_v61 = vadd.f32 %v6543_v19, %v1107_v45  ;;  %v6552_v3 = vadd.f32 %v6551_v32, %v6550_v43 }
 0x1bb   :  { %v9912_v51 = vadd.f32 %v6546_v37, %v1110_v0  ;;  %v6477_v24 = vpop.f32.mrb[52].mxu1 }
 0x1bc   :  { %v6478_v34 = vpop.f32.mrb[53].mxu1 }
 0x1bd   :  { %v6479_v29 = vadd.f32 %v6478_v34, %v6477_v24  ;;  %v6480_v50 = vpop.f32.mrb[54].mxu1  ;;  %v1365_v33 = vpop.f32.mrb[52].mxu0  ;;  %v1456_v24 = vld [vmem:[%s13736_s3 + $0x10] sm:$0xff] }
 0x1be   :  { %v6481_v31 = vpop.f32.mrb[55].mxu1  ;;  %v7413_v39 = vpop.f32.mrb[53].mxu0 }
 0x1bf   :  { %v1115_v46 = vadd.f32 %v6479_v29, %v1010_v35  ;;  %v6482_v21 = vadd.f32 %v6481_v31, %v6480_v50  ;;  %v1368_v36 = vpop.f32.mrb[54].mxu0  ;;  %v1457_v50 = vld [vmem:[%s13736_s3 + $0x18] sm:$0xff] }
 0x1c0   :  { %v7414_v8 = vpop.f32.mrb[55].mxu0 }
 0x1c1   :  { %v1118_v22 = vadd.f32 %v6482_v21, %v1013_v54  ;;  %v9918_v12 = vadd.f32 %v6549_v57, %v1115_v46 }
 0x1c3   :  { %v9920_v11 = vadd.f32 %v6552_v3, %v1118_v22  ;;  %v6569_v38 = vpop.f32.mrb[56].mxu1 }
 0x1c4   :  { %v6570_v48 = vpop.f32.mrb[57].mxu1 }
 0x1c5   :  { %v6571_v20 = vadd.f32 %v6570_v48, %v6569_v38  ;;  %v6572_v5 = vpop.f32.mrb[58].mxu1  ;;  %v1373_v16 = vpop.f32.mrb[56].mxu0 }
 0x1c6   :  { %v6573_v10 = vpop.f32.mrb[59].mxu1  ;;  %v7417_v28 = vpop.f32.mrb[57].mxu0 }
 0x1c7   :  { %v6574_v49 = vadd.f32 %v6573_v10, %v6572_v5  ;;  %v1261_v19 = vadd.f32 %v6571_v20, %v9854_v63  ;;  %v1376_v42 = vpop.f32.mrb[58].mxu0 }
 0x1c8   :  { %v7418_v6 = vpop.f32.mrb[59].mxu0 }
 0x1c9   :  { %v1366_v2 = vadd.f32 %v1365_v33, %v1261_v19  ;;  %v1264_v40 = vadd.f32 %v6574_v49, %v9856_v17  ;;  %v1459_v19 = vld [vmem:[%s13736_s3 + $0x28] sm:$0xff] }
 0x1cb   :  { %v1436_v37 = vmax.f32 %v1366_v2, 0.0  ;;  %v1369_v62 = vadd.f32 %v1368_v36, %v1264_v40  ;;  %v6575_v47 = vpop.f32.mrb[60].mxu1 }
 0x1cc   :  { %v6576_v14 = vpop.f32.mrb[61].mxu1 }
 0x1cd   :  { %v9930_v15 = vmul.f32 %v1454_v44, %v1436_v37   ;;  %v1437_v63 = vmax.f32 %v1369_v62, 0.0  ;;  %v6577_v25 = vadd.f32 %v6576_v14, %v6575_v47  ;;  %v6578_v9 = vpop.f32.mrb[62].mxu1  ;;  %v1381_v1 = vpop.f32.mrb[60].mxu0 }
 0x1ce   :  { %v6579_v13 = vpop.f32.mrb[63].mxu1  ;;  %v7421_v17 = vpop.f32.mrb[61].mxu0 }
 0x1cf   :  { %v9932_v45 = vmul.f32 %v1455_v58, %v1437_v63   ;;  %v6580_v59 = vadd.f32 %v6579_v13, %v6578_v9  ;;  %v1269_v57 = vadd.f32 %v6577_v25, %v9862_v41  ;;  %v1384_v43 = vpop.f32.mrb[62].mxu0 }
 0x1d0   :  { %v7422_v32 = vpop.f32.mrb[63].mxu0 }
 0x1d1   :  { %v1374_v0 = vadd.f32 %v1373_v16, %v1269_v57  ;;  %v1272_v3 = vadd.f32 %v6580_v59, %v9864_v53  ;;  %v1458_v16 = vld [vmem:[%s13736_s3 + $0x20] sm:$0xff]  ;;  %v1461_v57 = vld [vmem:[%s13736_s3 + $0x38] sm:$0xff] }
 0x1d3   :  { %v1438_v34 = vmax.f32 %v1374_v0, 0.0  ;;  %v1377_v35 = vadd.f32 %v1376_v42, %v1272_v3  ;;  %v6581_v29 = vpop.f32.mrb[64].mxu1 }
 0x1d4   :  { %v6582_v33 = vpop.f32.mrb[65].mxu1 }
 0x1d5   :  { %v9942_v31 = vmul.f32 %v1456_v24, %v1438_v34   ;;  %v1439_v41 = vmax.f32 %v1377_v35, 0.0  ;;  %v6583_v39 = vadd.f32 %v6582_v33, %v6581_v29  ;;  %v6584_v54 = vpop.f32.mrb[66].mxu1  ;;  %v1389_v46 = vpop.f32.mrb[64].mxu0 }
 0x1d6   :  { %v6585_v21 = vpop.f32.mrb[67].mxu1  ;;  %v7425_v53 = vpop.f32.mrb[65].mxu0 }
 0x1d7   :  { %v9944_v36 = vmul.f32 %v1457_v50, %v1439_v41   ;;  %v6586_v8 = vadd.f32 %v6585_v21, %v6584_v54  ;;  %v1277_v22 = vadd.f32 %v6583_v39, %v9870_v4  ;;  %v1392_v38 = vpop.f32.mrb[66].mxu0 }
 0x1d8   :  { %v7426_v48 = vpop.f32.mrb[67].mxu0 }
 0x1d9   :  { %v1382_v20 = vadd.f32 %v1381_v1, %v1277_v22  ;;  %v1280_v5 = vadd.f32 %v6586_v8, %v9872_v56  ;;  %v1460_v1 = vld [vmem:[%s13736_s3 + $0x30] sm:$0xff]  ;;  %v1463_v22 = vld [vmem:[%s13736_s3 + $0x48] sm:$0xff] }
 0x1db   :  { %v1440_v10 = vmax.f32 %v1382_v20, 0.0  ;;  %v1385_v28 = vadd.f32 %v1384_v43, %v1280_v5  ;;  %v6587_v49 = vpop.f32.mrb[68].mxu1 }
 0x1dc   :  { %v6588_v42 = vpop.f32.mrb[69].mxu1 }
 0x1dd   :  { %v9954_v6 = vmul.f32 %v1458_v16, %v1440_v10   ;;  %v1441_v4 = vmax.f32 %v1385_v28, 0.0  ;;  %v6589_v2 = vadd.f32 %v6588_v42, %v6587_v49  ;;  %v6590_v40 = vpop.f32.mrb[70].mxu1  ;;  %v1397_v44 = vpop.f32.mrb[68].mxu0 }
 0x1de   :  { %v6591_v37 = vpop.f32.mrb[71].mxu1  ;;  %v7429_v56 = vpop.f32.mrb[69].mxu0 }
 0x1df   :  { %v9956_v62 = vmul.f32 %v1459_v19, %v1441_v4   ;;  %v6592_v47 = vadd.f32 %v6591_v37, %v6590_v40  ;;  %v1285_v58 = vadd.f32 %v6589_v2, %v9878_v18  ;;  %v1400_v14 = vpop.f32.mrb[70].mxu0 }
 0x1e0   :  { %v7430_v63 = vpop.f32.mrb[71].mxu0 }
 0x1e1   :  { %v1390_v25 = vadd.f32 %v1389_v46, %v1285_v58  ;;  %v1288_v9 = vadd.f32 %v6592_v47, %v9880_v55  ;;  %v1462_v46 = vld [vmem:[%s13736_s3 + $0x40] sm:$0xff]  ;;  %v1465_v58 = vld [vmem:[%s13736_s3 + $0x58] sm:$0xff] }
 0x1e3   :  { %v1442_v13 = vmax.f32 %v1390_v25, 0.0  ;;  %v1393_v17 = vadd.f32 %v1392_v38, %v1288_v9  ;;  %v6593_v59 = vpop.f32.mrb[72].mxu1 }
 0x1e4   :  { %v6594_v43 = vpop.f32.mrb[73].mxu1 }
 0x1e5   :  { %v9966_v32 = vmul.f32 %v1460_v1, %v1442_v13   ;;  %v1443_v18 = vmax.f32 %v1393_v17, 0.0  ;;  %v6595_v0 = vadd.f32 %v6594_v43, %v6593_v59  ;;  %v6596_v3 = vpop.f32.mrb[74].mxu1  ;;  %v1405_v24 = vpop.f32.mrb[72].mxu0 }
 0x1e6   :  { %v6597_v34 = vpop.f32.mrb[75].mxu1  ;;  %v7433_v55 = vpop.f32.mrb[73].mxu0 }
 0x1e7   :  { %v9968_v35 = vmul.f32 %v1461_v57, %v1443_v18   ;;  %v6598_v29 = vadd.f32 %v6597_v34, %v6596_v3  ;;  %v1293_v50 = vadd.f32 %v6595_v0, %v9886_v26  ;;  %v1408_v33 = vpop.f32.mrb[74].mxu0 }
 0x1e8   :  { %v7434_v41 = vpop.f32.mrb[75].mxu0 }
 0x1e9   :  { %v1398_v39 = vadd.f32 %v1397_v44, %v1293_v50  ;;  %v1296_v54 = vadd.f32 %v6598_v29, %v9888_v52  ;;  %v1464_v44 = vld [vmem:[%s13736_s3 + $0x50] sm:$0xff]  ;;  %v1467_v50 = vld [vmem:[%s13736_s3 + $0x68] sm:$0xff] }
 0x1eb   :  { %v1444_v21 = vmax.f32 %v1398_v39, 0.0  ;;  %v1401_v53 = vadd.f32 %v1400_v14, %v1296_v54  ;;  %v6599_v8 = vpop.f32.mrb[76].mxu1 }
 0x1ec   :  { %v6600_v38 = vpop.f32.mrb[77].mxu1 }
 0x1ed   :  { %v9978_v48 = vmul.f32 %v1462_v46, %v1444_v21   ;;  %v1445_v26 = vmax.f32 %v1401_v53, 0.0  ;;  %v6601_v20 = vadd.f32 %v6600_v38, %v6599_v8  ;;  %v6602_v5 = vpop.f32.mrb[78].mxu1  ;;  %v1413_v16 = vpop.f32.mrb[76].mxu0 }
 0x1ee   :  { %v6603_v10 = vpop.f32.mrb[79].mxu1  ;;  %v7437_v52 = vpop.f32.mrb[77].mxu0 }
 0x1ef   :  { %v9980_v28 = vmul.f32 %v1463_v22, %v1445_v26   ;;  %v6604_v49 = vadd.f32 %v6603_v10, %v6602_v5  ;;  %v1301_v19 = vadd.f32 %v6601_v20, %v9894_v7  ;;  %v1416_v42 = vpop.f32.mrb[78].mxu0 }
 0x1f0   :  { %v7438_v4 = vpop.f32.mrb[79].mxu0 }
 0x1f1   :  { %v1406_v2 = vadd.f32 %v1405_v24, %v1301_v19  ;;  %v1304_v40 = vadd.f32 %v6604_v49, %v9896_v27  ;;  %v1466_v24 = vld [vmem:[%s13736_s3 + $0x60] sm:$0xff]  ;;  %v1469_v19 = vld [vmem:[%s13736_s3 + $0x78] sm:$0xff] }
 0x1f3   :  { %v1446_v37 = vmax.f32 %v1406_v2, 0.0  ;;  %v1409_v56 = vadd.f32 %v1408_v33, %v1304_v40  ;;  %v6605_v47 = vpop.f32.mrb[80].mxu1 }
 0x1f4   :  { %v6606_v14 = vpop.f32.mrb[81].mxu1 }
 0x1f5   :  { %v9990_v63 = vmul.f32 %v1464_v44, %v1446_v37   ;;  %v1447_v7 = vmax.f32 %v1409_v56, 0.0  ;;  %v6607_v25 = vadd.f32 %v6606_v14, %v6605_v47  ;;  %v6608_v9 = vpop.f32.mrb[82].mxu1  ;;  %v1421_v1 = vpop.f32.mrb[80].mxu0  ;;  %v1470_v14 = vld [vmem:[%s13736_s3 + $0x80] sm:$0xff] }
 0x1f6   :  { %v6609_v13 = vpop.f32.mrb[83].mxu1  ;;  %v7441_v27 = vpop.f32.mrb[81].mxu0 }
 0x1f7   :  { %v1483_v17 = vmul.f32 %v1465_v58, %v1447_v7   ;;  %v6610_v59 = vadd.f32 %v6609_v13, %v6608_v9  ;;  %v1309_v57 = vadd.f32 %v6607_v25, %v9902_v30  ;;  %v1424_v43 = vpop.f32.mrb[82].mxu0  ;;  %v1471_v9 = vld [vmem:[%s13736_s3 + $0x88] sm:$0xff] }
 0x1f8   :  { %v7442_v18 = vpop.f32.mrb[83].mxu0 }
 0x1f9   :  { %v1414_v0 = vadd.f32 %v1413_v16, %v1309_v57  ;;  %v1312_v3 = vadd.f32 %v6610_v59, %v9904_v23  ;;  %v1468_v16 = vld [vmem:[%s13736_s3 + $0x70] sm:$0xff] }
 0x1fb   :  { %v1448_v34 = vmax.f32 %v1414_v0, 0.0  ;;  %v1417_v55 = vadd.f32 %v1416_v42, %v1312_v3  ;;  %v6611_v29 = vpop.f32.mrb[84].mxu1 }
 0x1fc   :  { %v6612_v33 = vpop.f32.mrb[85].mxu1 }
 0x1fd   :  { %v1484_v41 = vmul.f32 %v1466_v24, %v1448_v34   ;;  %v1449_v39 = vmax.f32 %v1417_v55, 0.0  ;;  %v6613_v30 = vadd.f32 %v6612_v33, %v6611_v29  ;;  %v6614_v54 = vpop.f32.mrb[86].mxu1  ;;  %v1429_v46 = vpop.f32.mrb[84].mxu0 }
 0x1fe   :  { %v6615_v21 = vpop.f32.mrb[87].mxu1  ;;  %v7445_v53 = vpop.f32.mrb[85].mxu0 }
 0x1ff   :  { %v1485_v23 = vmul.f32 %v1467_v50, %v1449_v39   ;;  %v6616_v8 = vadd.f32 %v6615_v21, %v6614_v54  ;;  %v1317_v22 = vadd.f32 %v6613_v30, %v9910_v61  ;;  %v1432_v38 = vpop.f32.mrb[86].mxu0 }
 0x200   :  { %v7446_v26 = vpop.f32.mrb[87].mxu0 }
 0x201   :  { %v1422_v20 = vadd.f32 %v1421_v1, %v1317_v22  ;;  %v1320_v5 = vadd.f32 %v6616_v8, %v9912_v51 }
 0x203   :  { %v1450_v10 = vmax.f32 %v1422_v20, 0.0  ;;  %v1425_v52 = vadd.f32 %v1424_v43, %v1320_v5  ;;  %v6617_v49 = vpop.f32.mrb[88].mxu1 }
 0x204   :  { %v6618_v42 = vpop.f32.mrb[89].mxu1 }
 0x205   :  { %v1486_v4 = vmul.f32 %v1468_v16, %v1450_v10   ;;  %v1451_v2 = vmax.f32 %v1425_v52, 0.0  ;;  %v6619_v61 = vadd.f32 %v6618_v42, %v6617_v49  ;;  %v6620_v40 = vpop.f32.mrb[90].mxu1 }
 0x206   :  { %v6621_v44 = vpop.f32.mrb[91].mxu1 }
 0x207   :  { %v1487_v37 = vmul.f32 %v1469_v19, %v1451_v2   ;;  %v6622_v56 = vadd.f32 %v6621_v44, %v6620_v40  ;;  %v1325_v51 = vadd.f32 %v6619_v61, %v9918_v12 }
 0x209   :  { %v1430_v47 = vadd.f32 %v1429_v46, %v1325_v51  ;;  %v1328_v58 = vadd.f32 %v6622_v56, %v9920_v11 }
 0x20b   :  { %v1452_v7 = vmax.f32 %v1430_v47, 0.0  ;;  %v1433_v25 = vadd.f32 %v1432_v38, %v1328_v58 }
 0x20d   :  { %v1488_v1 = vmul.f32 %v1470_v14, %v1452_v7   ;;  %v1453_v13 = vmax.f32 %v1433_v25, 0.0 }
 0x20f   :  { %v1489_v27 = vmul.f32 %v1471_v9, %v1453_v13  }
 0x210 LB: > { %14064 = vst [vmem:[#allocation56_spill] sm:$0xff] %v8341_v27  ;;  %14065 = vst [vmem:[#allocation57_spill] sm:$0xff] %v8345_v1  ;;  %s6120_s23 = smul.u32 1152, %s8413_s22  ;;  %s14082_s27 = sld [smem:[#allocation99_spill]]  ;;  %s8413_s22 = sphi %s10063_s22, %s1495_s22   ;;  %v8409_v15 = vphi %v9930_v15, %v14378_v15   ;;  %v8405_v45 = vphi %v9932_v45, %v14377_v45   ;;  %v8401_v31 = vphi %v9942_v31, %v14376_v31   ;;  %v8397_v36 = vphi %v9944_v36, %v14375_v36   ;;  %v8393_v6 = vphi %v9954_v6, %v14374_v6   ;;  %v8389_v62 = vphi %v9956_v62, %v14373_v62   ;;  %v8385_v32 = vphi %v9966_v32, %v14372_v32   ;;  %v8381_v35 = vphi %v9968_v35, %v14371_v35   ;;  %v8377_v48 = vphi %v9978_v48, %v14370_v48   ;;  %v8373_v28 = vphi %v9980_v28, %v14369_v28   ;;  %v8369_v63 = vphi %v9990_v63, %v14368_v63   ;;  %v8365_v17 = vphi %v1483_v17, %v14367_v17   ;;  %v8361_v41 = vphi %v1484_v41, %v14366_v41   ;;  %v8357_v23 = vphi %v1485_v23, %v14365_v23   ;;  %v8353_v4 = vphi %v1486_v4, %v14364_v4   ;;  %v8349_v37 = vphi %v1487_v37, %v14363_v37   ;;  %v8345_v1 = vphi %v1488_v1, %v14362_v1   ;;  %v8341_v27 = vphi %v1489_v27, %v14361_v27  }
 0x211   : > { %14066 = vst [vmem:[#allocation58_spill] sm:$0xff] %v8349_v37  ;;  %14067 = vst [vmem:[#allocation59_spill] sm:$0xff] %v8353_v4 }
 0x212   : > { %14068 = vst [vmem:[#allocation60_spill] sm:$0xff] %v8357_v23  ;;  %14069 = vst [vmem:[#allocation61_spill] sm:$0xff] %v8361_v41 }
 0x213   : > { %14070 = vst [vmem:[#allocation62_spill] sm:$0xff] %v8365_v17  ;;  %14071 = vst [vmem:[#allocation63_spill] sm:$0xff] %v8369_v63 }
 0x214   : > { %14072 = vst [vmem:[#allocation64_spill] sm:$0xff] %v8373_v28  ;;  %14073 = vst [vmem:[#allocation65_spill] sm:$0xff] %v8377_v48 }
 0x215   : > { %14074 = vst [vmem:[#allocation66_spill] sm:$0xff] %v8381_v35  ;;  %14075 = vst [vmem:[#allocation67_spill] sm:$0xff] %v8385_v32 }
 0x216   : > { %14076 = vst [vmem:[#allocation68_spill] sm:$0xff] %v8389_v62  ;;  %14077 = vst [vmem:[#allocation69_spill] sm:$0xff] %v8393_v6  ;;  %s10126_s28 = scalar_lea.vmem %s14082_s27, %s6120_s23 }
 0x217   : > { %14078 = vst [vmem:[#allocation70_spill] sm:$0xff] %v8397_v36  ;;  %14079 = vst [vmem:[#allocation71_spill] sm:$0xff] %v8401_v31  ;;  %v6121_v12 = vld [vmem:[%s10126_s28 + $0x480] sm:$0xff]  ;;  %v6122_v11 = vld [vmem:[%s10126_s28 + $0x488] sm:$0xff] }
 0x218   : > { %14080 = vst [vmem:[#allocation72_spill] sm:$0xff] %v8405_v45  ;;  %14081 = vst [vmem:[#allocation73_spill] sm:$0xff] %v8409_v15  ;;  %v6123_v59 = vld [vmem:[%s10126_s28 + $0x490] sm:$0xff]  ;;  %v6124_v57 = vld [vmem:[%s10126_s28 + $0x498] sm:$0xff] }
 0x219   : > { %1553 = vst [vmem:[#allocation2] sm:$0xff] %v6121_v12  ;;  %1555 = vst [vmem:[#allocation2 + $0x8] sm:$0xff] %v6122_v11  ;;  %v6125_v43 = vld [vmem:[%s10126_s28 + $0x4a0] sm:$0xff]  ;;  %v6126_v18 = vld [vmem:[%s10126_s28 + $0x4a8] sm:$0xff] }
 0x21a   : > { %1557 = vst [vmem:[#allocation2 + $0x10] sm:$0xff] %v6123_v59  ;;  %1559 = vst [vmem:[#allocation2 + $0x18] sm:$0xff] %v6124_v57  ;;  %v6127_v0 = vld [vmem:[%s10126_s28 + $0x4b0] sm:$0xff]  ;;  %v6128_v3 = vld [vmem:[%s10126_s28 + $0x4b8] sm:$0xff] }
 0x21b   : > { %1561 = vst [vmem:[#allocation2 + $0x20] sm:$0xff] %v6125_v43  ;;  %1563 = vst [vmem:[#allocation2 + $0x28] sm:$0xff] %v6126_v18  ;;  %v6129_v24 = vld [vmem:[%s10126_s28 + $0x4c0] sm:$0xff]  ;;  %v6130_v34 = vld [vmem:[%s10126_s28 + $0x4c8] sm:$0xff] }
 0x21c   : > { %1565 = vst [vmem:[#allocation2 + $0x30] sm:$0xff] %v6127_v0  ;;  %1567 = vst [vmem:[#allocation2 + $0x38] sm:$0xff] %v6128_v3  ;;  %v6131_v55 = vld [vmem:[%s10126_s28 + $0x4d0] sm:$0xff]  ;;  %v6132_v29 = vld [vmem:[%s10126_s28 + $0x4d8] sm:$0xff] }
 0x21d   : > { %1569 = vst [vmem:[#allocation2 + $0x40] sm:$0xff] %v6129_v24  ;;  %1571 = vst [vmem:[#allocation2 + $0x48] sm:$0xff] %v6130_v34  ;;  %v6133_v50 = vld [vmem:[%s10126_s28 + $0x4e0] sm:$0xff]  ;;  %v6134_v33 = vld [vmem:[%s10126_s28 + $0x4e8] sm:$0xff] }
 0x21e   : > { %1573 = vst [vmem:[#allocation2 + $0x50] sm:$0xff] %v6131_v55  ;;  %1575 = vst [vmem:[#allocation2 + $0x58] sm:$0xff] %v6132_v29  ;;  %v6135_v39 = vld [vmem:[%s10126_s28 + $0x4f0] sm:$0xff]  ;;  %v6136_v30 = vld [vmem:[%s10126_s28 + $0x4f8] sm:$0xff] }
 0x21f   : > { %1577 = vst [vmem:[#allocation2 + $0x60] sm:$0xff] %v6133_v50  ;;  %1579 = vst [vmem:[#allocation2 + $0x68] sm:$0xff] %v6134_v33  ;;  %v6137_v54 = vld [vmem:[%s10126_s28 + $0x500] sm:$0xff]  ;;  %v6138_v46 = vld [vmem:[%s10126_s28 + $0x508] sm:$0xff] }
 0x220   : > { %1581 = vst [vmem:[#allocation2 + $0x70] sm:$0xff] %v6135_v39  ;;  %1583 = vst [vmem:[#allocation2 + $0x78] sm:$0xff] %v6136_v30  ;;  %v6139_v21 = vld [vmem:[%s10126_s28 + $0x510] sm:$0xff]  ;;  %v6140_v53 = vld [vmem:[%s10126_s28 + $0x518] sm:$0xff] }
 0x221   : > { %1585 = vst [vmem:[#allocation2 + $0x80] sm:$0xff] %v6137_v54  ;;  %1587 = vst [vmem:[#allocation2 + $0x88] sm:$0xff] %v6138_v46  ;;  %v6141_v8 = vld [vmem:[%s10126_s28 + $0x520] sm:$0xff]  ;;  %v6142_v22 = vld [vmem:[%s10126_s28 + $0x528] sm:$0xff] }
 0x222   : > { %1589 = vst [vmem:[#allocation2 + $0x90] sm:$0xff] %v6139_v21  ;;  %1591 = vst [vmem:[#allocation2 + $0x98] sm:$0xff] %v6140_v53  ;;  %v6143_v38 = vld [vmem:[%s10126_s28 + $0x530] sm:$0xff]  ;;  %v6144_v26 = vld [vmem:[%s10126_s28 + $0x538] sm:$0xff] }
 0x223   : > { %1593 = vst [vmem:[#allocation2 + $0xa0] sm:$0xff] %v6141_v8  ;;  %1595 = vst [vmem:[#allocation2 + $0xa8] sm:$0xff] %v6142_v22  ;;  %v6145_v20 = vld [vmem:[%s10126_s28 + $0x540] sm:$0xff]  ;;  %v6146_v5 = vld [vmem:[%s10126_s28 + $0x548] sm:$0xff] }
 0x224   : > { %1597 = vst [vmem:[#allocation2 + $0xb0] sm:$0xff] %v6143_v38  ;;  %1599 = vst [vmem:[#allocation2 + $0xb8] sm:$0xff] %v6144_v26  ;;  %v6147_v16 = vld [vmem:[%s10126_s28 + $0x550] sm:$0xff]  ;;  %v6148_v10 = vld [vmem:[%s10126_s28 + $0x558] sm:$0xff] }
 0x225   : > { %1601 = vst [vmem:[#allocation2 + $0xc0] sm:$0xff] %v6145_v20  ;;  %1603 = vst [vmem:[#allocation2 + $0xc8] sm:$0xff] %v6146_v5  ;;  %v6149_v52 = vld [vmem:[%s10126_s28 + $0x560] sm:$0xff]  ;;  %v6150_v49 = vld [vmem:[%s10126_s28 + $0x568] sm:$0xff] }
 0x226   : > { %1605 = vst [vmem:[#allocation2 + $0xd0] sm:$0xff] %v6147_v16  ;;  %1607 = vst [vmem:[#allocation2 + $0xd8] sm:$0xff] %v6148_v10  ;;  %v6151_v19 = vld [vmem:[%s10126_s28 + $0x570] sm:$0xff]  ;;  %v6152_v42 = vld [vmem:[%s10126_s28 + $0x578] sm:$0xff] }
 0x227   : > { %1609 = vst [vmem:[#allocation2 + $0xe0] sm:$0xff] %v6149_v52  ;;  %1611 = vst [vmem:[#allocation2 + $0xe8] sm:$0xff] %v6150_v49  ;;  %v6153_v2 = vld [vmem:[%s10126_s28 + $0x580] sm:$0xff]  ;;  %v6154_v61 = vld [vmem:[%s10126_s28 + $0x588] sm:$0xff] }
 0x228   : > { %1613 = vst [vmem:[#allocation2 + $0xf0] sm:$0xff] %v6151_v19  ;;  %1615 = vst [vmem:[#allocation2 + $0xf8] sm:$0xff] %v6152_v42  ;;  %v6155_v40 = vld [vmem:[%s10126_s28 + $0x590] sm:$0xff]  ;;  %v6156_v44 = vld [vmem:[%s10126_s28 + $0x598] sm:$0xff] }
 0x229   : > { %1617 = vst [vmem:[#allocation2 + $0x100] sm:$0xff] %v6153_v2  ;;  %1619 = vst [vmem:[#allocation2 + $0x108] sm:$0xff] %v6154_v61  ;;  %v6157_v56 = vld [vmem:[%s10126_s28 + $0x5a0] sm:$0xff]  ;;  %v6158_v51 = vld [vmem:[%s10126_s28 + $0x5a8] sm:$0xff] }
 0x22a   : > { %1621 = vst [vmem:[#allocation2 + $0x110] sm:$0xff] %v6155_v40  ;;  %1623 = vst [vmem:[#allocation2 + $0x118] sm:$0xff] %v6156_v44  ;;  %v6159_v47 = vld [vmem:[%s10126_s28 + $0x5b0] sm:$0xff]  ;;  %v6160_v58 = vld [vmem:[%s10126_s28 + $0x5b8] sm:$0xff] }
 0x22b   : > { %1625 = vst [vmem:[#allocation2 + $0x120] sm:$0xff] %v6157_v56  ;;  %1627 = vst [vmem:[#allocation2 + $0x128] sm:$0xff] %v6158_v51  ;;  %v6161_v14 = vld [vmem:[%s10126_s28 + $0x5c0] sm:$0xff]  ;;  %v6162_v7 = vld [vmem:[%s10126_s28 + $0x5c8] sm:$0xff] }
 0x22c   : > { %1629 = vst [vmem:[#allocation2 + $0x130] sm:$0xff] %v6159_v47  ;;  %1631 = vst [vmem:[#allocation2 + $0x138] sm:$0xff] %v6160_v58  ;;  %v6163_v25 = vld [vmem:[%s10126_s28 + $0x5d0] sm:$0xff]  ;;  %v6164_v9 = vld [vmem:[%s10126_s28 + $0x5d8] sm:$0xff] }
 0x22d   : > { %1633 = vst [vmem:[#allocation2 + $0x140] sm:$0xff] %v6161_v14  ;;  %1635 = vst [vmem:[#allocation2 + $0x148] sm:$0xff] %v6162_v7  ;;  %v6165_v13 = vld [vmem:[%s10126_s28 + $0x5e0] sm:$0xff]  ;;  %v6166_v12 = vld [vmem:[%s10126_s28 + $0x5e8] sm:$0xff] }
 0x22e   : > { %1637 = vst [vmem:[#allocation2 + $0x150] sm:$0xff] %v6163_v25  ;;  %1639 = vst [vmem:[#allocation2 + $0x158] sm:$0xff] %v6164_v9  ;;  %v6167_v11 = vld [vmem:[%s10126_s28 + $0x5f0] sm:$0xff]  ;;  %v6168_v59 = vld [vmem:[%s10126_s28 + $0x5f8] sm:$0xff] }
 0x22f   : > { %1641 = vst [vmem:[#allocation2 + $0x160] sm:$0xff] %v6165_v13  ;;  %1643 = vst [vmem:[#allocation2 + $0x168] sm:$0xff] %v6166_v12  ;;  %v6169_v57 = vld [vmem:[%s10126_s28 + $0x600] sm:$0xff]  ;;  %v6170_v43 = vld [vmem:[%s10126_s28 + $0x608] sm:$0xff] }
 0x230   : > { %1645 = vst [vmem:[#allocation2 + $0x170] sm:$0xff] %v6167_v11  ;;  %1647 = vst [vmem:[#allocation2 + $0x178] sm:$0xff] %v6168_v59  ;;  %v6171_v18 = vld [vmem:[%s10126_s28 + $0x610] sm:$0xff]  ;;  %v6172_v0 = vld [vmem:[%s10126_s28 + $0x618] sm:$0xff] }
 0x231   : > { %1649 = vst [vmem:[#allocation2 + $0x180] sm:$0xff] %v6169_v57  ;;  %1651 = vst [vmem:[#allocation2 + $0x188] sm:$0xff] %v6170_v43  ;;  %v6173_v3 = vld [vmem:[%s10126_s28 + $0x620] sm:$0xff]  ;;  %v6174_v24 = vld [vmem:[%s10126_s28 + $0x628] sm:$0xff] }
 0x232   : > { %1653 = vst [vmem:[#allocation2 + $0x190] sm:$0xff] %v6171_v18  ;;  %1655 = vst [vmem:[#allocation2 + $0x198] sm:$0xff] %v6172_v0  ;;  %v6175_v34 = vld [vmem:[%s10126_s28 + $0x630] sm:$0xff]  ;;  %v6176_v55 = vld [vmem:[%s10126_s28 + $0x638] sm:$0xff] }
 0x233   : > { %1657 = vst [vmem:[#allocation2 + $0x1a0] sm:$0xff] %v6173_v3  ;;  %1659 = vst [vmem:[#allocation2 + $0x1a8] sm:$0xff] %v6174_v24  ;;  %v6177_v29 = vld [vmem:[%s10126_s28 + $0x640] sm:$0xff]  ;;  %v6178_v50 = vld [vmem:[%s10126_s28 + $0x648] sm:$0xff] }
 0x234   : > { %1661 = vst [vmem:[#allocation2 + $0x1b0] sm:$0xff] %v6175_v34  ;;  %1663 = vst [vmem:[#allocation2 + $0x1b8] sm:$0xff] %v6176_v55  ;;  %v6179_v33 = vld [vmem:[%s10126_s28 + $0x650] sm:$0xff]  ;;  %v6180_v39 = vld [vmem:[%s10126_s28 + $0x658] sm:$0xff] }
 0x235   : > { %1665 = vst [vmem:[#allocation2 + $0x1c0] sm:$0xff] %v6177_v29  ;;  %1667 = vst [vmem:[#allocation2 + $0x1c8] sm:$0xff] %v6178_v50  ;;  %v6181_v30 = vld [vmem:[%s10126_s28 + $0x660] sm:$0xff]  ;;  %v6182_v54 = vld [vmem:[%s10126_s28 + $0x668] sm:$0xff] }
 0x236   : > { %1669 = vst [vmem:[#allocation2 + $0x1d0] sm:$0xff] %v6179_v33  ;;  %1671 = vst [vmem:[#allocation2 + $0x1d8] sm:$0xff] %v6180_v39  ;;  %v6183_v46 = vld [vmem:[%s10126_s28 + $0x670] sm:$0xff]  ;;  %v6184_v21 = vld [vmem:[%s10126_s28 + $0x678] sm:$0xff] }
 0x237   : > { %1673 = vst [vmem:[#allocation2 + $0x1e0] sm:$0xff] %v6181_v30  ;;  %1675 = vst [vmem:[#allocation2 + $0x1e8] sm:$0xff] %v6182_v54  ;;  %v6185_v53 = vld [vmem:[%s10126_s28 + $0x680] sm:$0xff]  ;;  %v6186_v8 = vld [vmem:[%s10126_s28 + $0x688] sm:$0xff] }
 0x238   : > { %1677 = vst [vmem:[#allocation2 + $0x1f0] sm:$0xff] %v6183_v46  ;;  %1679 = vst [vmem:[#allocation2 + $0x1f8] sm:$0xff] %v6184_v21  ;;  %v6187_v22 = vld [vmem:[%s10126_s28 + $0x690] sm:$0xff]  ;;  %v6188_v38 = vld [vmem:[%s10126_s28 + $0x698] sm:$0xff] }
 0x239   : > { %1681 = vst [vmem:[#allocation2 + $0x200] sm:$0xff] %v6185_v53  ;;  %1683 = vst [vmem:[#allocation2 + $0x208] sm:$0xff] %v6186_v8  ;;  %v6189_v26 = vld [vmem:[%s10126_s28 + $0x6a0] sm:$0xff]  ;;  %v6190_v20 = vld [vmem:[%s10126_s28 + $0x6a8] sm:$0xff] }
 0x23a   : > { %1685 = vst [vmem:[#allocation2 + $0x210] sm:$0xff] %v6187_v22  ;;  %1687 = vst [vmem:[#allocation2 + $0x218] sm:$0xff] %v6188_v38  ;;  %v6191_v5 = vld [vmem:[%s10126_s28 + $0x6b0] sm:$0xff]  ;;  %v6192_v16 = vld [vmem:[%s10126_s28 + $0x6b8] sm:$0xff] }
 0x23b   : > { %1689 = vst [vmem:[#allocation2 + $0x220] sm:$0xff] %v6189_v26  ;;  %1691 = vst [vmem:[#allocation2 + $0x228] sm:$0xff] %v6190_v20 }
 0x23c   : > { %1693 = vst [vmem:[#allocation2 + $0x230] sm:$0xff] %v6191_v5  ;;  %1695 = vst [vmem:[#allocation2 + $0x238] sm:$0xff] %v6192_v16 }
 0x23d   : > { %1703 = vsyncadd [#allocation4], 9216 }
 0x23e   : > { %8333 = dma.done.wait [#allocation4 + $0x1], 9216 }
 0x23f   : > { %8334 = vsyncadd [#allocation4 + $0x1], 4294958080  ;;  %v1760_v10 = vrot.slane %v8409_v15, 7  ;;  %v13806_v52 = vrot.slane %v8345_v1, 7  ;;  %v1777_v49 = vrot.slane %v8341_v27, 7  ;;  %v1706_v19 = vrot.slane %v8409_v15, 6 }
 0x240   : > { %v13805_v42 = vrot.slane %v8345_v1, 6  ;;  %v1723_v2 = vrot.slane %v8341_v27, 6  ;;  %v1761_v61 = vrot.slane %v8405_v45, 7  ;;  %v10209_v40 = vpack.c.bf16 %v8409_v15, %v8341_v27  ;;  %v2092_v55 = vld [vmem:[#allocation2 + $0x280] sm:$0xff]  ;;  %v2093_v21 = vld [vmem:[#allocation2 + $0x288] sm:$0xff]  ;;  %v2103_v20 = vld [vmem:[#allocation2 + $0x2d8] sm:$0xff] }
 0x241   : > { %v10215_v44 = vsel %vm523_vm0, %v13806_v52, %v1777_v49  ;;  %v1795_v56 = vsel %vm523_vm0, %v1777_v49, %v1760_v10  ;;  %v1762_v51 = vrot.slane %v8401_v31, 7  ;;  %v1707_v47 = vrot.slane %v8405_v45, 6  ;;  %v2084_v29 = vld [vmem:[#allocation2 + $0x240] sm:$0xff]  ;;  %6640 = vmatprep.subr.bf16.mxu0 %v2092_v55  ;;  %v2109_v26 = vld [vmem:[#allocation2 + $0x308] sm:$0xff]  ;;  %s6194_s29 = sshll.u32 %s8413_s22, 1  ;;  %p6197_p0 = scmp.ge.s32.totalorder %s8413_s22, 18 }
 0x242   : > { %14083 = vst [vmem:[#allocation74_spill] sm:$0xff] %v10215_v44  ;;  %v1796_v58 = vpack.c.bf16 %v1795_v56, %v10215_v44  ;;  %v10226_v14 = vsel %vm468_vm1, %v13805_v42, %v1723_v2  ;;  %v10230_v7 = vsel %vm468_vm1, %v1723_v2, %v1706_v19  ;;  %v10234_v25 = vsel %vm523_vm0, %v1760_v10, %v1761_v61  ;;  %v2108_v50 = vld [vmem:[#allocation2 + $0x300] sm:$0xff]  ;;  %v2085_v49 = vld [vmem:[#allocation2 + $0x248] sm:$0xff]  ;;  %v2111_v2 = vld [vmem:[#allocation2 + $0x318] sm:$0xff]  ;;  %s10965_s18 = scalar_lea.vmem %s13735_s2, %s6194_s29 }
 0x243   : > { %v1832_v13 = vpack.c.bf16 %v10234_v25, %v1795_v56  ;;  %v10241_v12 = vsel %vm523_vm0, %v1761_v61, %v1762_v51  ;;  %v1708_v11 = vrot.slane %v8401_v31, 6  ;;  %v10248_v57 = vsel %vm468_vm1, %v1706_v19, %v1707_v47  ;;  %6710 = vmatprep.subr.bf16.mxu1 %v2108_v50  ;;  %v2100_v46 = vld [vmem:[#allocation2 + $0x2c0] sm:$0xff]  ;;  %6641 = vmatpush3.bf16.msra.mxu0 %v2084_v29  ;;  %v2101_v19 = vld [vmem:[#allocation2 + $0x2c8] sm:$0xff] }
 0x244   : > { %2196 = vmatprep.mubr.bf16.mxu0 %v1796_v58  ;;  %v1763_v43 = vrot.slane %v8397_v36, 7  ;;  %v10253_v18 = vpack.c.bf16 %v8401_v31, %v8405_v45  ;;  %v1764_v3 = vrot.slane %v8393_v6, 7  ;;  %v1709_v24 = vrot.slane %v8397_v36, 6  ;;  %6711 = vmatpush3.bf16.msra.mxu1 %v2100_v46  ;;  %v2110_v58 = vld [vmem:[#allocation2 + $0x310] sm:$0xff]  ;;  %v2096_v53 = vld [vmem:[#allocation2 + $0x2a0] sm:$0xff]  ;;  %v2097_v42 = vld [vmem:[#allocation2 + $0x2a8] sm:$0xff] }
 0x245   : > { %2301 = vmatprep.mubr.bf16.mxu1 %v1832_v13  ;;  %v10257_v0 = vsel %vm468_vm1, %v1707_v47, %v1708_v11  ;;  %v1710_v34 = vrot.slane %v8393_v6, 6  ;;  %v1765_v30 = vrot.slane %v8389_v62, 7  ;;  %v10271_v54 = vpack.c.bf16 %v8393_v6, %v8397_v36  ;;  %6642 = vmatprep.subr.bf16.mxu0 %v2093_v21  ;;  %v2094_v47 = vld [vmem:[#allocation2 + $0x290] sm:$0xff]  ;;  %v2095_v13 = vld [vmem:[#allocation2 + $0x298] sm:$0xff]  ;;  %v2112_v59 = vld [vmem:[#allocation2 + $0x320] sm:$0xff] }
 0x246   : > { %v10266_v39 = vsel %vm523_vm0, %v1762_v51, %v1763_v43  ;;  %v10277_v8 = vsel %vm523_vm0, %v1763_v43, %v1764_v3  ;;  %v1766_v38 = vrot.slane %v8385_v32, 7  ;;  %v10288_v5 = vsel %vm468_vm1, %v1708_v11, %v1709_v24  ;;  %6712 = vmatprep.subr.bf16.mxu1 %v2109_v26  ;;  %v2086_v26 = vld [vmem:[#allocation2 + $0x250] sm:$0xff] }
 0x247   : > { %v10281_v22 = vsel %vm468_vm1, %v1709_v24, %v1710_v34  ;;  %v10292_v16 = vsel %vm523_vm0, %v1764_v3, %v1765_v30  ;;  %v1711_v10 = vrot.slane %v8389_v62, 6  ;;  %v1712_v51 = vrot.slane %v8385_v32, 6  ;;  %6643 = vmatpush3.bf16.msra.mxu0 %v2085_v49 }
 0x248   : > { %v10301_v56 = vsel %vm523_vm0, %v1765_v30, %v1766_v38  ;;  %v1767_v43 = vrot.slane %v8381_v35, 7  ;;  %v10313_v3 = vpack.c.bf16 %v8385_v32, %v8389_v62  ;;  %v1768_v55 = vrot.slane %v8377_v48, 7  ;;  %6713 = vmatpush3.bf16.msra.mxu1 %v2101_v19  ;;  %6644 = vmatprep.subr.bf16.mxu0 %v2094_v47 }
 0x249   : > { %v10308_v11 = vsel %vm468_vm1, %v1710_v34, %v1711_v10  ;;  %v10317_v24 = vsel %vm468_vm1, %v1711_v10, %v1712_v51  ;;  %v1713_v29 = vrot.slane %v8381_v35, 6  ;;  %v1714_v50 = vrot.slane %v8377_v48, 6  ;;  %6714 = vmatprep.subr.bf16.mxu1 %v2110_v58  ;;  %v2102_v10 = vld [vmem:[#allocation2 + $0x2d0] sm:$0xff] }
 0x24a   : > { %v10326_v30 = vsel %vm523_vm0, %v1766_v38, %v1767_v43  ;;  %v1769_v46 = vrot.slane %v8373_v28, 7  ;;  %v10331_v21 = vpack.c.bf16 %v8377_v48, %v8381_v35  ;;  %v10337_v19 = vsel %vm523_vm0, %v1767_v43, %v1768_v55 }
 0x24b   : > { %v10341_v38 = vsel %vm468_vm1, %v1713_v29, %v1714_v50  ;;  %v1770_v34 = vrot.slane %v8369_v63, 7  ;;  %v10348_v58 = vsel %vm468_vm1, %v1712_v51, %v1713_v29  ;;  %v1715_v43 = vrot.slane %v8373_v28, 6  ;;  %6645 = vmatpush3.bf16.msra.mxu0 %v2086_v26 }
 0x24c   : > { %v10352_v49 = vsel %vm523_vm0, %v1768_v55, %v1769_v46  ;;  %v1716_v47 = vrot.slane %v8369_v63, 6  ;;  %6715 = vmatpush3.bf16.msra.mxu1 %v2102_v10  ;;  %v1771_v29 = vrot.slane %v8365_v17, 7  ;;  %v10373_v61 = vpack.c.bf16 %v8369_v63, %v8373_v28  ;;  %6646 = vmatprep.subr.bf16.mxu0 %v2095_v13 }
 0x24d   : > { %v10361_v33 = vsel %vm523_vm0, %v1769_v46, %v1770_v34  ;;  %v10368_v55 = vsel %vm468_vm1, %v1714_v50, %v1715_v43  ;;  %v2087_v46 = vld [vmem:[#allocation2 + $0x258] sm:$0xff]  ;;  %6716 = vmatprep.subr.bf16.mxu1 %v2111_v2  ;;  %v1772_v10 = vrot.slane %v8361_v41, 7  ;;  %v1717_v51 = vrot.slane %v8365_v17, 6 }
 0x24e   : > { %14084 = vst [vmem:[#allocation75_spill] sm:$0xff] %v10368_v55  ;;  %14085 = vst [vmem:[#allocation76_spill] sm:$0xff] %v10373_v61  ;;  %v10377_v26 = vsel %vm468_vm1, %v1715_v43, %v1716_v47  ;;  %v1718_v50 = vrot.slane %v8361_v41, 6  ;;  %v10386_v13 = vsel %vm523_vm0, %v1770_v34, %v1771_v29  ;;  %v1773_v2 = vrot.slane %v8357_v23, 7  ;;  %v2088_v55 = vld [vmem:[#allocation2 + $0x260] sm:$0xff] }
 0x24f   : > { %14086 = vst [vmem:[#allocation77_spill] sm:$0xff] %v10377_v26  ;;  %v10391_v43 = vpack.c.bf16 %v8361_v41, %v8365_v17  ;;  %v10397_v52 = vsel %vm523_vm0, %v1771_v29, %v1772_v10  ;;  %v10405_v34 = vsel %vm468_vm1, %v1716_v47, %v1717_v51  ;;  %6647 = vmatpush3.bf16.msra.mxu0 %v2087_v46  ;;  %v1774_v61 = vrot.slane %v8353_v4, 7  ;;  %v2104_v26 = vld [vmem:[#allocation2 + $0x2e0] sm:$0xff] }
 0x250   : > { %14088 = vst [vmem:[#allocation79_spill] sm:$0xff] %v10397_v52  ;;  %v10401_v9 = vsel %vm468_vm1, %v1717_v51, %v1718_v50  ;;  %14090 = vst [vmem:[#allocation81_spill] sm:$0xff] %v10405_v34  ;;  %6717 = vmatpush3.bf16.msra.mxu1 %v2103_v20  ;;  %v10413_v29 = vsel %vm523_vm0, %v1772_v10, %v1773_v2  ;;  %6648 = vmatprep.subr.bf16.mxu0 %v2096_v53  ;;  %v1719_v20 = vrot.slane %v8357_v23, 6  ;;  %vm8418_vm5 = vmmov 0  }
 0x251   : > { %14087 = vst [vmem:[#allocation78_spill] sm:$0xff] %v10391_v43  ;;  %14089 = vst [vmem:[#allocation80_spill] sm:$0xff] %v10401_v9  ;;  %6718 = vmatprep.subr.bf16.mxu1 %v2112_v59  ;;  %v1720_v51 = vrot.slane %v8353_v4, 6  ;;  %v1775_v46 = vrot.slane %v8349_v37, 7  ;;  %v2113_v43 = vld [vmem:[#allocation2 + $0x328] sm:$0xff]  ;;  %v10423_v10 = vsel %vm523_vm0, %v1773_v2, %v1774_v61  ;;  %v10427_v53 = vpack.c.bf16 %v8353_v4, %v8357_v23 }
 0x252   : > { %14091 = vst [vmem:[#allocation82_spill] sm:$0xff] %v10413_v29  ;;  %14092 = vst [vmem:[#allocation83_spill] sm:$0xff] %v10423_v10  ;;  %v1721_v59 = vrot.slane %v8349_v37, 6  ;;  %v10432_v47 = vpack.c.bf16 %v8345_v1, %v8349_v37  ;;  %v10442_v2 = vsel %vm468_vm1, %v1718_v50, %v1719_v20  ;;  %v14098_v29 = vrot.slane %v8345_v1, 7 }
 0x253   : > { %14093 = vst [vmem:[#allocation84_spill] sm:$0xff] %v10427_v53  ;;  %v10438_v9 = vsel %vm468_vm1, %v1719_v20, %v1720_v51  ;;  %14096 = vst [vmem:[#allocation87_spill] sm:$0xff] %v10442_v2  ;;  %v10446_v53 = vsel %vm523_vm0, %v1774_v61, %v1775_v46  ;;  %6649 = vmatpush3.bf16.msra.mxu0 %v2088_v55  ;;  %v2089_v20 = vld [vmem:[#allocation2 + $0x268] sm:$0xff]  ;;  %v1870_v50 = vrot.slane %v8401_v31, 1  ;;  %v14103_v2 = vrot.slane %v8409_v15, 1  ;;  %v2099_v55 = vld [vmem:[#allocation2 + $0x2b8] sm:$0xff] }
 0x254   : > { %14094 = vst [vmem:[#allocation85_spill] sm:$0xff] %v10432_v47  ;;  %14095 = vst [vmem:[#allocation86_spill] sm:$0xff] %v10438_v9  ;;  %6719 = vmatpush3.bf16.msra.mxu1 %v2104_v26  ;;  %v10456_v52 = vsel %vm523_vm0, %v1775_v46, %v14098_v29  ;;  %6650 = vmatprep.subr.bf16.mxu0 %v2097_v42  ;;  %v2105_v61 = vld [vmem:[#allocation2 + $0x2e8] sm:$0xff]  ;;  %v14100_v26 = vrot.slane %v8345_v1, 6  ;;  %v10469_v34 = vsel %vm468_vm1, %v1720_v51, %v1721_v59  ;;  %v2098_v46 = vld [vmem:[#allocation2 + $0x2b0] sm:$0xff] }
 0x255   : > { %14097 = vst [vmem:[#allocation88_spill] sm:$0xff] %v10446_v53  ;;  %14099 = vst [vmem:[#allocation89_spill] sm:$0xff] %v10456_v52  ;;  %6720 = vmatprep.subr.bf16.mxu1 %v2113_v43  ;;  %v1869_v29 = vrot.slane %v8405_v45, 1  ;;  %v2114_v42 = vld [vmem:[#allocation2 + $0x330] sm:$0xff]  ;;  %v1872_v9 = vrot.slane %v8393_v6, 1  ;;  %v2115_v52 = vld [vmem:[#allocation2 + $0x338] sm:$0xff] }
 0x256   : > { %v10465_v47 = vsel %vm468_vm1, %v1721_v59, %v14100_v26  ;;  %14102 = vst [vmem:[#allocation91_spill] sm:$0xff] %v10469_v34  ;;  %v1871_v59 = vrot.slane %v8397_v36, 1  ;;  %v1873_v26 = vrot.slane %v8389_v62, 1  ;;  %v1874_v34 = vrot.slane %v8385_v32, 1  ;;  %v2091_v53 = vld [vmem:[#allocation2 + $0x278] sm:$0xff] }
 0x257   : > { %14101 = vst [vmem:[#allocation90_spill] sm:$0xff] %v10465_v47  ;;  %v10483_v51 = vsel %vm632_vm2, %v14103_v2, %v1869_v29  ;;  %6651 = vmatpush3.bf16.msra.mxu0 %v2089_v20  ;;  %v10489_v43 = vsel %vm632_vm2, %v1869_v29, %v1870_v50  ;;  %v2090_v2 = vld [vmem:[#allocation2 + $0x270] sm:$0xff]  ;;  %v1875_v29 = vrot.slane %v8381_v35, 1 }
 0x258   : > { %6721 = vmatpush3.bf16.msra.mxu1 %v2105_v61  ;;  %14104 = vst [vmem:[#allocation92_spill] sm:$0xff] %v10489_v43  ;;  %6652 = vmatprep.subr.bf16.mxu0 %v2098_v46  ;;  %v2106_v47 = vld [vmem:[#allocation2 + $0x2f0] sm:$0xff]  ;;  %v10499_v20 = vsel %vm632_vm2, %v1870_v50, %v1871_v59  ;;  %v10503_v61 = vsel %vm632_vm2, %v1871_v59, %v1872_v9  ;;  %v2107_v46 = vld [vmem:[#allocation2 + $0x2f8] sm:$0xff]  ;;  %v1882_v43 = vrot.slane %v8353_v4, 1 }
 0x259   : > { %6722 = vmatprep.subr.bf16.mxu1 %v2114_v42  ;;  %14105 = vst [vmem:[#allocation93_spill] sm:$0xff] %v10499_v20  ;;  %14106 = vst [vmem:[#allocation94_spill] sm:$0xff] %v10503_v61  ;;  %v10512_v44 = vsel %vm632_vm2, %v1872_v9, %v1873_v26  ;;  %v10516_v50 = vsel %vm632_vm2, %v1873_v26, %v1874_v34  ;;  %v10526_v42 = vsel %vm632_vm2, %v1874_v34, %v1875_v29  ;;  %v2124_v9 = vld [vmem:[#allocation2 + $0x380] sm:$0xff] }
 0x25a   : > { %14107 = vst [vmem:[#allocation95_spill] sm:$0xff] %v10512_v44  ;;  %14108 = vst [vmem:[#allocation96_spill] sm:$0xff] %v10516_v50  ;;  %v1876_v26 = vrot.slane %v8377_v48, 1  ;;  %v1877_v61 = vrot.slane %v8373_v28, 1  ;;  %v1878_v44 = vrot.slane %v8369_v63, 1  ;;  %v2140_v50 = vld [vmem:[#allocation2 + $0x400] sm:$0xff] }
 0x25b   : > { %6653 = vmatpush3.bf16.msra.mxu0 %v2090_v2  ;;  %v1880_v2 = vrot.slane %v8361_v41, 1  ;;  %v1881_v20 = vrot.slane %v8357_v23, 1 }
 0x25c   : > { %6723 = vmatpush3.bf16.msra.mxu1 %v2106_v47  ;;  %6654 = vmatprep.subr.bf16.mxu0 %v2099_v55  ;;  %v1879_v47 = vrot.slane %v8365_v17, 1  ;;  %v10541_v59 = vsel %vm632_vm2, %v1875_v29, %v1876_v26  ;;  %v10545_v55 = vsel %vm632_vm2, %v1876_v26, %v1877_v61  ;;  %v10556_v10 = vsel %vm632_vm2, %v1877_v61, %v1878_v44  ;;  %v2116_v61 = vld [vmem:[#allocation2 + $0x340] sm:$0xff]  ;;  %v2125_v26 = vld [vmem:[#allocation2 + $0x388] sm:$0xff] }
 0x25d   : > { %6724 = vmatprep.subr.bf16.mxu1 %v2115_v52  ;;  %v1883_v52 = vrot.slane %v8349_v37, 1 }
 0x25e   : > { %v10560_v29 = vsel %vm632_vm2, %v1878_v44, %v1879_v47  ;;  %v10568_v34 = vsel %vm632_vm2, %v1879_v47, %v1880_v2  ;;  %v14112_v44 = vpack.c.bf16 %v10241_v12, %v10234_v25  ;;  %v2142_v25 = vld [vmem:[#allocation2 + $0x410] sm:$0xff] }
 0x25f   : > { %14109 = vst [vmem:[#allocation97_spill] sm:$0xff] %v10560_v29  ;;  %6655 = vmatpush3.bf16.msra.mxu0 %v2091_v53  ;;  %14110 = vst [vmem:[#allocation98_spill] sm:$0xff] %v10568_v34  ;;  %v10575_v53 = vsel %vm632_vm2, %v1880_v2, %v1881_v20  ;;  %v14111_v2 = vpack.c.bf16 %v10230_v7, %v10226_v14  ;;  %v10597_v47 = vsel %vm632_vm2, %v1882_v43, %v1883_v52  ;;  %v2141_v34 = vld [vmem:[#allocation2 + $0x408] sm:$0xff] }
 0x260   : > { %6725 = vmatpush3.bf16.msra.mxu1 %v2107_v46  ;;  %6780 = vmatprep.subr.bf16.mxu0 %v2124_v9  ;;  %v10584_v9 = vsel %vm632_vm2, %v1881_v20, %v1882_v43  ;;  %v2132_v46 = vld [vmem:[#allocation2 + $0x3c0] sm:$0xff]  ;;  %v1885_v20 = vrot.slane %v8341_v27, 1  ;;  %v14113_v43 = vpack.c.bf16 %v10266_v39, %v10241_v12  ;;  %v14114_v14 = vrot.slane %v8409_v15, 1 }
 0x261   : > { %6850 = vmatprep.subr.bf16.mxu1 %v2140_v50  ;;  %v1884_v50 = vrot.slane %v8345_v1, 1  ;;  %v1951_v29 = vrot.slane %v8401_v31, 2 }
 0x262   : > { %2197 = vmatmul.mubr.bf16.vlgmr.msra.gmra.mrb[0].mxu0 %v14111_v2  ;;  %v2126_v2 = vld [vmem:[#allocation2 + $0x390] sm:$0xff] }
 0x263   : > { %2302 = vmatmul.mubr.bf16.vlgmr.msra.gmra.mrb[0].mxu1 %v10209_v40  ;;  %6781 = vmatpush3.bf16.msra.mxu0 %v2116_v61  ;;  %v10607_v7 = vsel %vm632_vm2, %v1883_v52, %v1884_v50  ;;  %v2117_v61 = vld [vmem:[#allocation2 + $0x348] sm:$0xff]  ;;  %v10624_v52 = vsel %vm632_vm2, %v1885_v20, %v14114_v14  ;;  %v2134_v14 = vld [vmem:[#allocation2 + $0x3d0] sm:$0xff] }
 0x264   : > { %2204 = vmatprep.mubr.bf16.mxu0 %v14112_v44  ;;  %2309 = vmatprep.mubr.bf16.mxu1 %v14113_v43  ;;  %v10618_v44 = vsel %vm632_vm2, %v1884_v50, %v1885_v20  ;;  %v2133_v43 = vld [vmem:[#allocation2 + $0x3c8] sm:$0xff]  ;;  %v2118_v50 = vld [vmem:[#allocation2 + $0x350] sm:$0xff]  ;;  %v14115_v20 = vpack.c.bf16 %v10257_v0, %v10248_v57  ;;  %v1952_v57 = vrot.slane %v8397_v36, 2  ;;  %v2119_v0 = vld [vmem:[#allocation2 + $0x358] sm:$0xff] }
 0x265   : > { %6782 = vmatprep.subr.bf16.mxu0 %v2125_v26  ;;  %6851 = vmatpush3.bf16.msra.mxu1 %v2132_v46  ;;  %v2127_v46 = vld [vmem:[#allocation2 + $0x398] sm:$0xff] }
 0x266   : > { %6852 = vmatprep.subr.bf16.mxu1 %v2141_v34  ;;  %v14116_v34 = vpack.c.bf16 %v10277_v8, %v10266_v39  ;;  %v10647_v39 = vsel %vm714_vm3, %v1951_v29, %v1952_v57  ;;  %v14149_v26 = vld [vmem:[#allocation74_spill] sm:$0xff] }
 0x267   : > { %6783 = vmatpush3.bf16.msra.mxu0 %v2117_v61  ;;  %v2143_v61 = vld [vmem:[#allocation2 + $0x418] sm:$0xff] }
 0x268   : > { %6784 = vmatprep.subr.bf16.mxu0 %v2126_v2  ;;  %v14117_v2 = vpack.c.bf16 %v10292_v16, %v10277_v8 }
 0x269   : > { %6853 = vmatpush3.bf16.msra.mxu1 %v2133_v43  ;;  %v13844_v43 = vrot.slane %v8405_v45, 2 }
 0x26a   : > { %2205 = vmatmul.mubr.bf16.gmra.mrb[4].mxu0 %v14115_v20  ;;  %6854 = vmatprep.subr.bf16.mxu1 %v2142_v25  ;;  %v2128_v20 = vld [vmem:[#allocation2 + $0x3a0] sm:$0xff] }
 0x26b   : > { %2310 = vmatmul.mubr.bf16.gmra.mrb[4].mxu1 %v10253_v18  ;;  %2212 = vmatprep.mubr.bf16.mxu0 %v14116_v34  ;;  %v10653_v8 = vsel %vm714_vm3, %v13844_v43, %v1951_v29  ;;  %v2135_v34 = vld [vmem:[#allocation2 + $0x3d8] sm:$0xff]  ;;  %v2120_v25 = vld [vmem:[#allocation2 + $0x360] sm:$0xff] }
 0x26c   : > { %2317 = vmatprep.mubr.bf16.mxu1 %v14117_v2  ;;  %6785 = vmatpush3.bf16.msra.mxu0 %v2118_v50  ;;  %v2129_v2 = vld [vmem:[#allocation2 + $0x3a8] sm:$0xff]  ;;  %v2136_v29 = vld [vmem:[#allocation2 + $0x3e0] sm:$0xff]  ;;  %v14120_v50 = vpack.c.bf16 %v10326_v30, %v10301_v56  ;;  %v14159_v43 = vld [vmem:[#allocation93_spill] sm:$0xff] }
 0x26d   : > { %6786 = vmatprep.subr.bf16.mxu0 %v2127_v46  ;;  %6855 = vmatpush3.bf16.msra.mxu1 %v2134_v14  ;;  %v2144_v46 = vld [vmem:[#allocation2 + $0x420] sm:$0xff]  ;;  %v14118_v14 = vpack.c.bf16 %v10281_v22, %v10288_v5  ;;  %v2121_v22 = vld [vmem:[#allocation2 + $0x368] sm:$0xff] }
 0x26e   : > { %6856 = vmatprep.subr.bf16.mxu1 %v2143_v61  ;;  %v14119_v61 = vpack.c.bf16 %v10301_v56, %v10292_v16  ;;  %v2130_v56 = vld [vmem:[#allocation2 + $0x3b0] sm:$0xff] }
 0x270   : > { %6787 = vmatpush3.bf16.msra.mxu0 %v2119_v0  ;;  %v2145_v0 = vld [vmem:[#allocation2 + $0x428] sm:$0xff] }
 0x271   : > { %6788 = vmatprep.subr.bf16.mxu0 %v2128_v20  ;;  %6857 = vmatpush3.bf16.msra.mxu1 %v2135_v34  ;;  %v1953_v20 = vrot.slane %v8393_v6, 2  ;;  %v1954_v34 = vrot.slane %v8389_v62, 2 }
 0x272   : > { %2213 = vmatmul.mubr.bf16.gmra.mrb[8].mxu0 %v14118_v14  ;;  %6858 = vmatprep.subr.bf16.mxu1 %v2144_v46  ;;  %v2146_v46 = vld [vmem:[#allocation2 + $0x430] sm:$0xff] }
 0x273   : > { %2318 = vmatmul.mubr.bf16.gmra.mrb[8].mxu1 %v10271_v54  ;;  %2220 = vmatprep.mubr.bf16.mxu0 %v14119_v61  ;;  %v10671_v5 = vsel %vm714_vm3, %v1953_v20, %v1954_v34  ;;  %v10675_v16 = vsel %vm714_vm3, %v1952_v57, %v1953_v20  ;;  %v2138_v57 = vld [vmem:[#allocation2 + $0x3f0] sm:$0xff]  ;;  %v14122_v61 = vpack.c.bf16 %v10337_v19, %v10326_v30  ;;  %v2147_v20 = vld [vmem:[#allocation2 + $0x438] sm:$0xff] }
 0x274   : > { %2325 = vmatprep.mubr.bf16.mxu1 %v14120_v50  ;;  %6789 = vmatpush3.bf16.msra.mxu0 %v2120_v25  ;;  %v2137_v50 = vld [vmem:[#allocation2 + $0x3e8] sm:$0xff]  ;;  %v2122_v25 = vld [vmem:[#allocation2 + $0x370] sm:$0xff] }
 0x275   : > { %6790 = vmatprep.subr.bf16.mxu0 %v2129_v2  ;;  %6859 = vmatpush3.bf16.msra.mxu1 %v2136_v29  ;;  %v14121_v2 = vpack.c.bf16 %v10317_v24, %v10308_v11  ;;  %v2131_v29 = vld [vmem:[#allocation2 + $0x3b8] sm:$0xff] }
 0x276   : > { %6860 = vmatprep.subr.bf16.mxu1 %v2145_v0  ;;  %v14123_v0 = vpack.c.bf16 %v10352_v49, %v10337_v19  ;;  %v2123_v11 = vld [vmem:[#allocation2 + $0x378] sm:$0xff] }
 0x277   : > { %v2139_v19 = vld [vmem:[#allocation2 + $0x3f8] sm:$0xff] }
 0x278   : > { %6791 = vmatpush3.bf16.msra.mxu0 %v2121_v22  ;;  %v1955_v22 = vrot.slane %v8385_v32, 2 }
 0x279   : > { %6792 = vmatprep.subr.bf16.mxu0 %v2130_v56  ;;  %6861 = vmatpush3.bf16.msra.mxu1 %v2137_v50  ;;  %v1956_v56 = vrot.slane %v8381_v35, 2 }
 0x27a   : > { %2221 = vmatmul.mubr.bf16.gmra.mrb[12].mxu0 %v14121_v2  ;;  %6862 = vmatprep.subr.bf16.mxu1 %v2146_v46  ;;  %v10697_v30 = vsel %vm714_vm3, %v1954_v34, %v1955_v22  ;;  %v14124_v46 = vpack.c.bf16 %v10341_v38, %v10348_v58  ;;  %v14125_v34 = vpack.c.bf16 %v10361_v33, %v10352_v49  ;;  %v14127_v58 = vld [vmem:[#allocation77_spill] sm:$0xff]  ;;  %v14141_v49 = vld [vmem:[#allocation88_spill] sm:$0xff] }
 0x27b   : > { %2326 = vmatmul.mubr.bf16.gmra.mrb[12].mxu1 %v10313_v3  ;;  %2228 = vmatprep.mubr.bf16.mxu0 %v14122_v61  ;;  %v10693_v24 = vsel %vm714_vm3, %v1955_v22, %v1956_v56  ;;  %v14126_v2 = vpack.c.bf16 %v10386_v13, %v10361_v33  ;;  %v14130_v33 = vld [vmem:[#allocation76_spill] sm:$0xff]  ;;  %v14131_v22 = vld [vmem:[#allocation79_spill] sm:$0xff] }
 0x27c   : > { %2333 = vmatprep.mubr.bf16.mxu1 %v14123_v0  ;;  %6793 = vmatpush3.bf16.msra.mxu0 %v2122_v25  ;;  %v13845_v25 = vmov 0.0   ;;  %v14128_v0 = vld [vmem:[#allocation75_spill] sm:$0xff] }
 0x27d   : > { %6794 = vmatprep.subr.bf16.mxu0 %v2131_v29  ;;  %6863 = vmatpush3.bf16.msra.mxu1 %v2138_v57  ;;  %v1957_v29 = vrot.slane %v8377_v48, 2  ;;  %v1958_v57 = vrot.slane %v8373_v28, 2 }
 0x27e   : > { %6864 = vmatprep.subr.bf16.mxu1 %v2147_v20  ;;  %v14129_v20 = vpack.c.bf16 %v14127_v58, %v14128_v0  ;;  %v14135_v58 = vld [vmem:[#allocation80_spill] sm:$0xff]  ;;  %v14136_v0 = vld [vmem:[#allocation81_spill] sm:$0xff] }
 0x27f   : > { %v10716_v61 = vsel %vm714_vm3, %v1957_v29, %v1958_v57  ;;  %v10720_v38 = vsel %vm714_vm3, %v1956_v56, %v1957_v29  ;;  %v1959_v56 = vrot.slane %v8369_v63, 2 }
 0x280   : > { %6795 = vmatpush3.bf16.msra.mxu0 %v2123_v11  ;;  %v14132_v11 = vpack.c.bf16 %v14131_v22, %v10386_v13 }
 0x281   : > { %6865 = vmatpush3.bf16.msra.mxu1 %v2139_v19  ;;  %7447 = vmatprep.subr.bf16.mxu0 %v13845_v25  ;;  %v14133_v19 = vld [vmem:[#allocation82_spill] sm:$0xff]  ;;  %v10742_v29 = vsel %vm714_vm3, %v1958_v57, %v1959_v56  ;;  %v1961_v57 = vrot.slane %v8361_v41, 2 }
 0x282   : > { %2229 = vmatmul.mubr.bf16.gmra.mrb[16].mxu0 %v14124_v46  ;;  %v14134_v46 = vpack.c.bf16 %v14133_v19, %v14131_v22  ;;  %v14138_v22 = vld [vmem:[#allocation78_spill] sm:$0xff] }
 0x283   : > { %2334 = vmatmul.mubr.bf16.gmra.mrb[16].mxu1 %v10331_v21  ;;  %2236 = vmatprep.mubr.bf16.mxu0 %v14125_v34  ;;  %v1960_v34 = vrot.slane %v8365_v17, 2 }
 0x284   : > { %2341 = vmatprep.mubr.bf16.mxu1 %v14126_v2 }
 0x285   : > { %v10738_v2 = vsel %vm714_vm3, %v1959_v56, %v1960_v34  ;;  %v1962_v56 = vrot.slane %v8357_v23, 2 }
 0x287   : > { %v10760_v13 = vsel %vm714_vm3, %v1961_v57, %v1962_v56 }
 0x28a   : > { %2237 = vmatmul.mubr.bf16.gmra.mrb[20].mxu0 %v14129_v20  ;;  %v14137_v20 = vpack.c.bf16 %v14135_v58, %v14136_v0  ;;  %v10764_v58 = vsel %vm714_vm3, %v1960_v34, %v1961_v57  ;;  %v14143_v0 = vld [vmem:[#allocation86_spill] sm:$0xff]  ;;  %v1963_v34 = vrot.slane %v8353_v4, 2  ;;  %v1964_v57 = vrot.slane %v8349_v37, 2 }
 0x28b   : > { %2342 = vmatmul.mubr.bf16.gmra.mrb[20].mxu1 %v14130_v33  ;;  %2244 = vmatprep.mubr.bf16.mxu0 %v14132_v11  ;;  %v14139_v11 = vld [vmem:[#allocation83_spill] sm:$0xff] }
 0x28c   : > { %2349 = vmatprep.mubr.bf16.mxu1 %v14134_v46  ;;  %v14140_v46 = vpack.c.bf16 %v14139_v11, %v14133_v19  ;;  %v14142_v50 = vpack.c.bf16 %v14141_v49, %v14139_v11  ;;  %v14147_v11 = vld [vmem:[#allocation89_spill] sm:$0xff]  ;;  %v10782_v19 = vsel %vm714_vm3, %v1963_v34, %v1964_v57 }
 0x28d   : > { %v14148_v14 = vpack.c.bf16 %v14147_v11, %v14141_v49  ;;  %v14150_v12 = vpack.c.bf16 %v14149_v26, %v14147_v11  ;;  %14151 = vst [vmem:[#allocation77_spill] sm:$0xff] %v10782_v19  ;;  %v14157_v26 = vld [vmem:[#allocation92_spill] sm:$0xff]  ;;  %v14165_v19 = vld [vmem:[#allocation95_spill] sm:$0xff] }
 0x28e   : > { %v14158_v11 = vpack.c.bf16 %v14157_v26, %v10483_v51  ;;  %v14160_v25 = vpack.c.bf16 %v14159_v43, %v14157_v26  ;;  %v14162_v26 = vpack.c.bf16 %v8405_v45, %v8409_v15 }
 0x292   : > { %2245 = vmatmul.mubr.bf16.gmra.mrb[24].mxu0 %v14137_v20  ;;  %v14144_v20 = vld [vmem:[#allocation87_spill] sm:$0xff] }
 0x293   : > { %2350 = vmatmul.mubr.bf16.gmra.mrb[24].mxu1 %v14138_v22  ;;  %2252 = vmatprep.mubr.bf16.mxu0 %v14140_v46  ;;  %v14145_v46 = vpack.c.bf16 %v14143_v0, %v14144_v20  ;;  %v10786_v0 = vsel %vm714_vm3, %v1962_v56, %v1963_v34  ;;  %v14154_v20 = vld [vmem:[#allocation91_spill] sm:$0xff]  ;;  %v1965_v56 = vrot.slane %v8345_v1, 2  ;;  %v1966_v34 = vrot.slane %v8341_v27, 2 }
 0x294   : > { %2357 = vmatprep.mubr.bf16.mxu1 %v14142_v50  ;;  %v14146_v50 = vld [vmem:[#allocation84_spill] sm:$0xff]  ;;  %14152 = vst [vmem:[#allocation75_spill] sm:$0xff] %v10786_v0  ;;  %v1949_v0 = vrot.slane %v8409_v15, 2 }
 0x295   : > { %v10804_v49 = vsel %vm714_vm3, %v1965_v56, %v1966_v34 }
 0x29a   : > { %2253 = vmatmul.mubr.bf16.gmra.mrb[28].mxu0 %v14145_v46 }
 0x29b   : > { %2358 = vmatmul.mubr.bf16.gmra.mrb[28].mxu1 %v14146_v50  ;;  %2260 = vmatprep.mubr.bf16.mxu0 %v14148_v14  ;;  %v14153_v14 = vld [vmem:[#allocation90_spill] sm:$0xff] }
 0x29c   : > { %2365 = vmatprep.mubr.bf16.mxu1 %v14150_v12  ;;  %v14155_v46 = vpack.c.bf16 %v14153_v14, %v14154_v20  ;;  %v14156_v12 = vld [vmem:[#allocation85_spill] sm:$0xff]  ;;  %v10808_v14 = vsel %vm714_vm3, %v1964_v57, %v1965_v56  ;;  %v14167_v56 = vmov 0.0   ;;  %v2149_v20 = vld [vmem:[#allocation2 + $0x448] sm:$0xff] }
 0x29d   : > { %14161 = vst [vmem:[#allocation76_spill] sm:$0xff] %v10808_v14  ;;  %v14168_v14 = vrot.slane %v8405_v45, 2 }
 0x2a2   : > { %2261 = vmatmul.mubr.bf16.gmra.mrb[32].mxu0 %v14155_v46  ;;  %v2148_v46 = vld [vmem:[#allocation2 + $0x440] sm:$0xff] }
 0x2a3   : > { %2366 = vmatmul.mubr.bf16.gmra.mrb[32].mxu1 %v14156_v12  ;;  %2406 = vmatprep.mubr.bf16.mxu0 %v14158_v11 }
 0x2a4   : > { %2511 = vmatprep.mubr.bf16.mxu1 %v14160_v25  ;;  %v14163_v25 = vld [vmem:[#allocation94_spill] sm:$0xff] }
 0x2a5   : > { %v14164_v11 = vpack.c.bf16 %v14163_v25, %v14159_v43  ;;  %v14166_v57 = vpack.c.bf16 %v14165_v19, %v14163_v25  ;;  %v14169_v25 = vpack.c.bf16 %v8397_v36, %v8401_v31 }
 0x2aa   : > { %2407 = vmatmul.mubr.bf16.vlgmr.msra.gmra.mrb[36].mxu0 %v14162_v26  ;;  %v10828_v26 = vsel %vm714_vm3, %v1949_v0, %v14168_v14 }
 0x2ab   : > { %2512 = vmatmul.mubr.bf16.vlgmr.msra.gmra.mrb[36].mxu1 %v10253_v18  ;;  %7448 = vmatpush3.bf16.msra.mxu0 %v2148_v46  ;;  %v10832_v18 = vsel %vm714_vm3, %v1966_v34, %v1949_v0  ;;  %v2150_v46 = vld [vmem:[#allocation2 + $0x450] sm:$0xff]  ;;  %v2151_v34 = vld [vmem:[#allocation2 + $0x458] sm:$0xff] }
 0x2ac   : > { %2414 = vmatprep.mubr.bf16.mxu0 %v14164_v11  ;;  %2519 = vmatprep.mubr.bf16.mxu1 %v14166_v57  ;;  %v1993_v43 = vpack.c.bf16 %v10828_v26, %v10832_v18  ;;  %v14170_v11 = vld [vmem:[#allocation96_spill] sm:$0xff]  ;;  %v14173_v57 = vpack.c.bf16 %v8389_v62, %v8393_v6 }
 0x2ad   : > { %7449 = vmatprep.subr.bf16.mxu0 %v14167_v56  ;;  %v14171_v14 = vpack.c.bf16 %v14170_v11, %v14165_v19  ;;  %v14172_v0 = vpack.c.bf16 %v10526_v42, %v14170_v11  ;;  %v14175_v19 = vpack.c.bf16 %v10545_v55, %v10541_v59  ;;  %v14176_v11 = vpack.c.bf16 %v8381_v35, %v8385_v32 }
 0x2af   : > { %7450 = vmatpush3.bf16.msra.mxu0 %v2149_v20  ;;  %v2152_v20 = vld [vmem:[#allocation2 + $0x460] sm:$0xff] }
 0x2b0   : > { %7451 = vmatprep.subr.bf16.mxu0 %v14167_v56 }
 0x2b2   : > { %2415 = vmatmul.mubr.bf16.gmra.mrb[40].mxu0 %v14169_v25  ;;  %v2154_v25 = vld [vmem:[#allocation2 + $0x470] sm:$0xff] }
 0x2b3   : > { %2520 = vmatmul.mubr.bf16.gmra.mrb[40].mxu1 %v10271_v54  ;;  %2422 = vmatprep.mubr.bf16.mxu0 %v14171_v14  ;;  %v14174_v54 = vpack.c.bf16 %v10541_v59, %v10526_v42  ;;  %v14178_v42 = vld [vmem:[#allocation97_spill] sm:$0xff] }
 0x2b4   : > { %2527 = vmatprep.mubr.bf16.mxu1 %v14172_v0  ;;  %7452 = vmatpush3.bf16.msra.mxu0 %v2150_v46  ;;  %v2153_v46 = vld [vmem:[#allocation2 + $0x468] sm:$0xff]  ;;  %v14179_v59 = vpack.c.bf16 %v14178_v42, %v10556_v10  ;;  %v2155_v14 = vld [vmem:[#allocation2 + $0x478] sm:$0xff]  ;;  %v14180_v0 = vpack.c.bf16 %v8373_v28, %v8377_v48 }
 0x2b5   : > { %7453 = vmatprep.subr.bf16.mxu0 %v14167_v56 }
 0x2b8   : > { %7454 = vmatpush3.bf16.msra.mxu0 %v2151_v34 }
 0x2b9   : > { %7455 = vmatprep.subr.bf16.mxu0 %v14167_v56 }
 0x2ba   : > { %2423 = vmatmul.mubr.bf16.gmra.mrb[44].mxu0 %v14173_v57  ;;  %v14187_v57 = vpack.c.bf16 %v8357_v23, %v8361_v41 }
 0x2bb   : > { %2528 = vmatmul.mubr.bf16.gmra.mrb[44].mxu1 %v10313_v3  ;;  %2430 = vmatprep.mubr.bf16.mxu0 %v14174_v54  ;;  %v14177_v3 = vpack.c.bf16 %v10556_v10, %v10545_v55  ;;  %v14184_v10 = vpack.c.bf16 %v8365_v17, %v8369_v63  ;;  %v14188_v54 = vpack.c.bf16 %v10607_v7, %v10597_v47 }
 0x2bc   : > { %2535 = vmatprep.mubr.bf16.mxu1 %v14175_v19  ;;  %7456 = vmatpush3.bf16.msra.mxu0 %v2152_v20  ;;  %v14185_v20 = vpack.c.bf16 %v10584_v9, %v10575_v53 }
 0x2bd   : > { %7457 = vmatprep.subr.bf16.mxu0 %v14167_v56 }
 0x2c0   : > { %7458 = vmatpush3.bf16.msra.mxu0 %v2153_v46 }
 0x2c1   : > { %7459 = vmatprep.subr.bf16.mxu0 %v14167_v56 }
 0x2c2   : > { %2431 = vmatmul.mubr.bf16.gmra.mrb[48].mxu0 %v14176_v11 }
 0x2c3   : > { %2536 = vmatmul.mubr.bf16.gmra.mrb[48].mxu1 %v10331_v21  ;;  %2438 = vmatprep.mubr.bf16.mxu0 %v14177_v3  ;;  %v14181_v21 = vld [vmem:[#allocation98_spill] sm:$0xff] }
 0x2c4   : > { %2543 = vmatprep.mubr.bf16.mxu1 %v14179_v59  ;;  %7460 = vmatpush3.bf16.msra.mxu0 %v2154_v25  ;;  %v14182_v34 = vpack.c.bf16 %v14181_v21, %v14178_v42  ;;  %v14183_v55 = vpack.c.bf16 %v10575_v53, %v14181_v21  ;;  %v14190_v53 = vpack.c.bf16 %v8349_v37, %v8353_v4 }
 0x2c5   : > { %7461 = vmatprep.subr.bf16.mxu0 %v14167_v56 }
 0x2c8   : > { %7462 = vmatpush3.bf16.msra.mxu0 %v2155_v14 }
 0x2ca   : > { %2439 = vmatmul.mubr.bf16.gmra.mrb[52].mxu0 %v14180_v0 }
 0x2cb   : > { %2544 = vmatmul.mubr.bf16.gmra.mrb[52].mxu1 %v14130_v33  ;;  %2446 = vmatprep.mubr.bf16.mxu0 %v14182_v34  ;;  %v14186_v33 = vpack.c.bf16 %v10597_v47, %v10584_v9  ;;  %v14191_v9 = vpack.c.bf16 %v10624_v52, %v10618_v44  ;;  %v14193_v47 = vpack.c.bf16 %v8341_v27, %v8345_v1 }
 0x2cc   : > { %2551 = vmatprep.mubr.bf16.mxu1 %v14183_v55 }
 0x2d2   : > { %2447 = vmatmul.mubr.bf16.gmra.mrb[56].mxu0 %v14184_v10 }
 0x2d3   : > { %2552 = vmatmul.mubr.bf16.gmra.mrb[56].mxu1 %v14138_v22  ;;  %2454 = vmatprep.mubr.bf16.mxu0 %v14185_v20  ;;  %v14189_v22 = vpack.c.bf16 %v10618_v44, %v10607_v7  ;;  %v14194_v7 = vpack.c.bf16 %v10647_v39, %v10653_v8  ;;  %v14197_v44 = vpack.c.bf16 %v10716_v61, %v10720_v38  ;;  %v14200_v8 = vld [vmem:[#allocation77_spill] sm:$0xff] }
 0x2d4   : > { %2559 = vmatprep.mubr.bf16.mxu1 %v14186_v33  ;;  %v14199_v39 = vpack.c.bf16 %v10760_v13, %v10764_v58 }
 0x2da   : > { %2455 = vmatmul.mubr.bf16.gmra.mrb[60].mxu0 %v14187_v57 }
 0x2db   : > { %2560 = vmatmul.mubr.bf16.gmra.mrb[60].mxu1 %v14146_v50  ;;  %2462 = vmatprep.mubr.bf16.mxu0 %v14188_v54  ;;  %v14192_v50 = vpack.c.bf16 %v10483_v51, %v10624_v52  ;;  %v14195_v51 = vpack.c.bf16 %v10671_v5, %v10675_v16  ;;  %v14198_v52 = vpack.c.bf16 %v10738_v2, %v10742_v29  ;;  %v14201_v5 = vld [vmem:[#allocation75_spill] sm:$0xff]  ;;  %v10968_v2 = vld [vmem:[%s10965_s18 + $0x1] ss:$0 sm:$0xff] }
 0x2dc   : > { %2567 = vmatprep.mubr.bf16.mxu1 %v14189_v22  ;;  %v14202_v16 = vpack.c.bf16 %v14200_v8, %v14201_v5 }
 0x2e2   : > { %2463 = vmatmul.mubr.bf16.gmra.mrb[64].mxu0 %v14190_v53 }
 0x2e3   : > { %2568 = vmatmul.mubr.bf16.gmra.mrb[64].mxu1 %v14156_v12  ;;  %2470 = vmatprep.mubr.bf16.mxu0 %v14191_v9 }
 0x2e4   : > { %2575 = vmatprep.mubr.bf16.mxu1 %v14192_v50 }
 0x2ea   : > { %2471 = vmatmul.mubr.bf16.gmra.mrb[68].mxu0 %v14193_v47 }
 0x2eb   : > { %2576 = vmatmul.mubr.bf16.gmra.mrb[68].mxu1 %v10209_v40  ;;  %7463 = vmatprep.mubr.msk.bf16.mxu0 %vm8418_vm5, %v14167_v56  ;;  %v14196_v40 = vpack.c.bf16 %v10693_v24, %v10697_v30  ;;  %v14203_v24 = vld [vmem:[#allocation76_spill] sm:$0xff] }
 0x2ec   : > { %v14204_v30 = vpack.c.bf16 %v10804_v49, %v14203_v24 }
 0x2f2   : > { %7464 = vmatmul.mubr.bf16.vlgmr.msra.gmra.mrb[72].mxu0 %v14194_v7 }
 0x2f3   : > { %7467 = vmatprep.mubr.msk.bf16.mxu0 %vm8418_vm5, %v14167_v56 }
 0x2fa   : > { %7468 = vmatmul.mubr.bf16.gmra.mrb[76].mxu0 %v14195_v51 }
 0x2fb   : > { %7471 = vmatprep.mubr.msk.bf16.mxu0 %vm8418_vm5, %v14167_v56 }
 0x302   : > { %7472 = vmatmul.mubr.bf16.gmra.mrb[80].mxu0 %v14196_v40 }
 0x303   : > { %7475 = vmatprep.mubr.msk.bf16.mxu0 %vm8418_vm5, %v14167_v56 }
 0x30a   : > { %7476 = vmatmul.mubr.bf16.gmra.mrb[84].mxu0 %v14197_v44 }
 0x30b   : > { %7479 = vmatprep.mubr.msk.bf16.mxu0 %vm8418_vm5, %v14167_v56 }
 0x312   : > { %7480 = vmatmul.mubr.bf16.gmra.mrb[88].mxu0 %v14198_v52 }
 0x313   : > { %7483 = vmatprep.mubr.msk.bf16.mxu0 %vm8418_vm5, %v14167_v56 }
 0x31a   : > { %7484 = vmatmul.mubr.bf16.gmra.mrb[92].mxu0 %v14199_v39 }
 0x31b   : > { %7487 = vmatprep.mubr.msk.bf16.mxu0 %vm8418_vm5, %v14167_v56 }
 0x322   : > { %7488 = vmatmul.mubr.bf16.gmra.mrb[96].mxu0 %v14202_v16 }
 0x323   : > { %7491 = vmatprep.mubr.msk.bf16.mxu0 %vm8418_vm5, %v14167_v56 }
 0x32a   : > { %7492 = vmatmul.mubr.bf16.gmra.mrb[100].mxu0 %v14204_v30 }
 0x32b   : > { %7495 = vmatprep.mubr.msk.bf16.mxu0 %vm8418_vm5, %v14167_v56 }
 0x332   : > { %7496 = vmatmul.mubr.bf16.gmra.mrb[104].mxu0 %v1993_v43 }
 0x335   : > { %v6656_v61 = vpop.f32.mrb[0].mxu0 }
 0x336   : > { %v6726_v38 = vpop.f32.mrb[0].mxu1  ;;  %v6657_v29 = vpop.f32.mrb[1].mxu0 }
 0x337   : > { %v6727_v13 = vpop.f32.mrb[1].mxu1  ;;  %v6658_v58 = vadd.f32 %v6657_v29, %v6656_v61  ;;  %v6659_v49 = vpop.f32.mrb[2].mxu0 }
 0x338   : > { %v6728_v12 = vadd.f32 %v6727_v13, %v6726_v38  ;;  %v6729_v56 = vpop.f32.mrb[2].mxu1  ;;  %v6660_v19 = vpop.f32.mrb[3].mxu0 }
 0x339   : > { %v6730_v46 = vpop.f32.mrb[3].mxu1  ;;  %v2199_v26 = vadd.f32 %v6658_v58, %v10968_v2  ;;  %v6661_v18 = vadd.f32 %v6660_v19, %v6659_v49 }
 0x33a   : > { %v6731_v43 = vadd.f32 %v6730_v46, %v6729_v56 }
 0x33b   : > { %v2202_v25 = vadd.f32 %v6661_v18, %v10968_v2  ;;  %v10972_v11 = vadd.f32 %v6728_v12, %v2199_v26 }
 0x33d   : > { %v10974_v3 = vadd.f32 %v6731_v43, %v2202_v25  ;;  %v6662_v42 = vpop.f32.mrb[4].mxu0 }
 0x33e   : > { %v6732_v59 = vpop.f32.mrb[4].mxu1  ;;  %v6663_v14 = vpop.f32.mrb[5].mxu0 }
 0x33f   : > { %v6733_v0 = vpop.f32.mrb[5].mxu1  ;;  %v6664_v21 = vadd.f32 %v6663_v14, %v6662_v42  ;;  %v6665_v34 = vpop.f32.mrb[6].mxu0 }
 0x340   : > { %v6734_v55 = vadd.f32 %v6733_v0, %v6732_v59  ;;  %v6735_v10 = vpop.f32.mrb[6].mxu1  ;;  %v6666_v20 = vpop.f32.mrb[7].mxu0 }
 0x341   : > { %v6736_v33 = vpop.f32.mrb[7].mxu1  ;;  %v2207_v57 = vadd.f32 %v6664_v21, %v10968_v2  ;;  %v6667_v54 = vadd.f32 %v6666_v20, %v6665_v34 }
 0x342   : > { %v6737_v22 = vadd.f32 %v6736_v33, %v6735_v10 }
 0x343   : > { %v2210_v53 = vadd.f32 %v6667_v54, %v10968_v2  ;;  %v10978_v9 = vadd.f32 %v6734_v55, %v2207_v57 }
 0x345   : > { %v10980_v50 = vadd.f32 %v6737_v22, %v2210_v53  ;;  %v6668_v47 = vpop.f32.mrb[8].mxu0 }
 0x346   : > { %v6738_v7 = vpop.f32.mrb[8].mxu1  ;;  %v6669_v51 = vpop.f32.mrb[9].mxu0 }
 0x347   : > { %v6739_v40 = vpop.f32.mrb[9].mxu1  ;;  %v6670_v44 = vadd.f32 %v6669_v51, %v6668_v47  ;;  %v6671_v52 = vpop.f32.mrb[10].mxu0 }
 0x348   : > { %v6740_v39 = vadd.f32 %v6739_v40, %v6738_v7  ;;  %v6741_v8 = vpop.f32.mrb[10].mxu1  ;;  %v6672_v5 = vpop.f32.mrb[11].mxu0 }
 0x349   : > { %v6742_v16 = vpop.f32.mrb[11].mxu1  ;;  %v2215_v24 = vadd.f32 %v6670_v44, %v10968_v2  ;;  %v6673_v30 = vadd.f32 %v6672_v5, %v6671_v52 }
 0x34a   : > { %v6743_v61 = vadd.f32 %v6742_v16, %v6741_v8 }
 0x34b   : > { %v2218_v38 = vadd.f32 %v6673_v30, %v10968_v2  ;;  %v10984_v29 = vadd.f32 %v6740_v39, %v2215_v24 }
 0x34d   : > { %v10986_v13 = vadd.f32 %v6743_v61, %v2218_v38  ;;  %v6674_v58 = vpop.f32.mrb[12].mxu0 }
 0x34e   : > { %v6744_v49 = vpop.f32.mrb[12].mxu1  ;;  %v6675_v12 = vpop.f32.mrb[13].mxu0 }
 0x34f   : > { %v6745_v56 = vpop.f32.mrb[13].mxu1  ;;  %v6676_v19 = vadd.f32 %v6675_v12, %v6674_v58  ;;  %v6677_v46 = vpop.f32.mrb[14].mxu0 }
 0x350   : > { %v6746_v26 = vadd.f32 %v6745_v56, %v6744_v49  ;;  %v6747_v18 = vpop.f32.mrb[14].mxu1  ;;  %v6678_v43 = vpop.f32.mrb[15].mxu0 }
 0x351   : > { %v6748_v25 = vpop.f32.mrb[15].mxu1  ;;  %v2223_v42 = vadd.f32 %v6676_v19, %v10968_v2  ;;  %v6679_v59 = vadd.f32 %v6678_v43, %v6677_v46 }
 0x352   : > { %v6749_v14 = vadd.f32 %v6748_v25, %v6747_v18 }
 0x353   : > { %v2226_v0 = vadd.f32 %v6679_v59, %v10968_v2  ;;  %v10990_v21 = vadd.f32 %v6746_v26, %v2223_v42 }
 0x355   : > { %v10992_v34 = vadd.f32 %v6749_v14, %v2226_v0  ;;  %v6680_v55 = vpop.f32.mrb[16].mxu0 }
 0x356   : > { %v6750_v10 = vpop.f32.mrb[16].mxu1  ;;  %v6681_v20 = vpop.f32.mrb[17].mxu0 }
 0x357   : > { %v6751_v33 = vpop.f32.mrb[17].mxu1  ;;  %v6682_v57 = vadd.f32 %v6681_v20, %v6680_v55  ;;  %v6683_v54 = vpop.f32.mrb[18].mxu0 }
 0x358   : > { %v6752_v22 = vadd.f32 %v6751_v33, %v6750_v10  ;;  %v6753_v53 = vpop.f32.mrb[18].mxu1  ;;  %v6684_v47 = vpop.f32.mrb[19].mxu0 }
 0x359   : > { %v6754_v7 = vpop.f32.mrb[19].mxu1  ;;  %v2231_v51 = vadd.f32 %v6682_v57, %v10968_v2  ;;  %v6685_v40 = vadd.f32 %v6684_v47, %v6683_v54 }
 0x35a   : > { %v6755_v44 = vadd.f32 %v6754_v7, %v6753_v53 }
 0x35b   : > { %v2234_v52 = vadd.f32 %v6685_v40, %v10968_v2  ;;  %v10996_v39 = vadd.f32 %v6752_v22, %v2231_v51 }
 0x35d   : > { %v10998_v8 = vadd.f32 %v6755_v44, %v2234_v52  ;;  %v6686_v5 = vpop.f32.mrb[20].mxu0 }
 0x35e   : > { %v6756_v16 = vpop.f32.mrb[20].mxu1  ;;  %v6687_v24 = vpop.f32.mrb[21].mxu0 }
 0x35f   : > { %v6757_v30 = vpop.f32.mrb[21].mxu1  ;;  %v6688_v61 = vadd.f32 %v6687_v24, %v6686_v5  ;;  %v6689_v38 = vpop.f32.mrb[22].mxu0 }
 0x360   : > { %v6758_v58 = vadd.f32 %v6757_v30, %v6756_v16  ;;  %v6759_v49 = vpop.f32.mrb[22].mxu1  ;;  %v6690_v12 = vpop.f32.mrb[23].mxu0 }
 0x361   : > { %v6760_v56 = vpop.f32.mrb[23].mxu1  ;;  %v2239_v19 = vadd.f32 %v6688_v61, %v10968_v2  ;;  %v6691_v46 = vadd.f32 %v6690_v12, %v6689_v38 }
 0x362   : > { %v6761_v26 = vadd.f32 %v6760_v56, %v6759_v49 }
 0x363   : > { %v2242_v18 = vadd.f32 %v6691_v46, %v10968_v2  ;;  %v11002_v43 = vadd.f32 %v6758_v58, %v2239_v19 }
 0x365   : > { %v11004_v25 = vadd.f32 %v6761_v26, %v2242_v18  ;;  %v6692_v42 = vpop.f32.mrb[24].mxu0 }
 0x366   : > { %v6762_v59 = vpop.f32.mrb[24].mxu1  ;;  %v6693_v14 = vpop.f32.mrb[25].mxu0 }
 0x367   : > { %v6763_v0 = vpop.f32.mrb[25].mxu1  ;;  %v6694_v55 = vadd.f32 %v6693_v14, %v6692_v42  ;;  %v6695_v10 = vpop.f32.mrb[26].mxu0 }
 0x368   : > { %v6764_v20 = vadd.f32 %v6763_v0, %v6762_v59  ;;  %v6765_v33 = vpop.f32.mrb[26].mxu1  ;;  %v6696_v57 = vpop.f32.mrb[27].mxu0 }
 0x369   : > { %v6766_v54 = vpop.f32.mrb[27].mxu1  ;;  %v2247_v22 = vadd.f32 %v6694_v55, %v10968_v2  ;;  %v6697_v53 = vadd.f32 %v6696_v57, %v6695_v10 }
 0x36a   : > { %v6767_v47 = vadd.f32 %v6766_v54, %v6765_v33 }
 0x36b   : > { %v2250_v7 = vadd.f32 %v6697_v53, %v10968_v2  ;;  %v11008_v51 = vadd.f32 %v6764_v20, %v2247_v22 }
 0x36d   : > { %v11010_v40 = vadd.f32 %v6767_v47, %v2250_v7  ;;  %v6698_v44 = vpop.f32.mrb[28].mxu0 }
 0x36e   : > { %v6768_v52 = vpop.f32.mrb[28].mxu1  ;;  %v6699_v5 = vpop.f32.mrb[29].mxu0 }
 0x36f   : > { %v6769_v16 = vpop.f32.mrb[29].mxu1  ;;  %v6700_v24 = vadd.f32 %v6699_v5, %v6698_v44  ;;  %v6701_v30 = vpop.f32.mrb[30].mxu0 }
 0x370   : > { %v6770_v61 = vadd.f32 %v6769_v16, %v6768_v52  ;;  %v6771_v38 = vpop.f32.mrb[30].mxu1  ;;  %v6702_v58 = vpop.f32.mrb[31].mxu0 }
 0x371   : > { %v6772_v49 = vpop.f32.mrb[31].mxu1  ;;  %v2255_v12 = vadd.f32 %v6700_v24, %v10968_v2  ;;  %v6703_v56 = vadd.f32 %v6702_v58, %v6701_v30 }
 0x372   : > { %v6773_v19 = vadd.f32 %v6772_v49, %v6771_v38 }
 0x373   : > { %v2258_v46 = vadd.f32 %v6703_v56, %v10968_v2  ;;  %v11014_v26 = vadd.f32 %v6770_v61, %v2255_v12 }
 0x375   : > { %v11016_v18 = vadd.f32 %v6773_v19, %v2258_v46  ;;  %v6704_v42 = vpop.f32.mrb[32].mxu0 }
 0x376   : > { %v6774_v59 = vpop.f32.mrb[32].mxu1  ;;  %v6705_v14 = vpop.f32.mrb[33].mxu0 }
 0x377   : > { %v6775_v0 = vpop.f32.mrb[33].mxu1  ;;  %v6706_v55 = vadd.f32 %v6705_v14, %v6704_v42  ;;  %v6707_v10 = vpop.f32.mrb[34].mxu0 }
 0x378   : > { %v6776_v20 = vadd.f32 %v6775_v0, %v6774_v59  ;;  %v6777_v33 = vpop.f32.mrb[34].mxu1  ;;  %v6708_v57 = vpop.f32.mrb[35].mxu0 }
 0x379   : > { %v6778_v54 = vpop.f32.mrb[35].mxu1  ;;  %v2263_v22 = vadd.f32 %v6706_v55, %v10968_v2  ;;  %v6709_v53 = vadd.f32 %v6708_v57, %v6707_v10 }
 0x37a   : > { %v6779_v47 = vadd.f32 %v6778_v54, %v6777_v33 }
 0x37b   : > { %v2266_v7 = vadd.f32 %v6709_v53, %v10968_v2  ;;  %v11020_v44 = vadd.f32 %v6776_v20, %v2263_v22 }
 0x37d   : > { %v11022_v52 = vadd.f32 %v6779_v47, %v2266_v7  ;;  %v6796_v5 = vpop.f32.mrb[36].mxu0 }
 0x37e   : > { %v6866_v16 = vpop.f32.mrb[36].mxu1  ;;  %v6797_v24 = vpop.f32.mrb[37].mxu0 }
 0x37f   : > { %v6867_v30 = vpop.f32.mrb[37].mxu1  ;;  %v6798_v61 = vadd.f32 %v6797_v24, %v6796_v5  ;;  %v6799_v38 = vpop.f32.mrb[38].mxu0 }
 0x380   : > { %v6868_v58 = vadd.f32 %v6867_v30, %v6866_v16  ;;  %v6869_v49 = vpop.f32.mrb[38].mxu1  ;;  %v6800_v12 = vpop.f32.mrb[39].mxu0 }
 0x381   : > { %v6870_v56 = vpop.f32.mrb[39].mxu1  ;;  %v2409_v19 = vadd.f32 %v6798_v61, %v10972_v11  ;;  %v6801_v46 = vadd.f32 %v6800_v12, %v6799_v38 }
 0x382   : > { %v6871_v42 = vadd.f32 %v6870_v56, %v6869_v49 }
 0x383   : > { %v2412_v2 = vadd.f32 %v6801_v46, %v10974_v3  ;;  %v11026_v59 = vadd.f32 %v6868_v58, %v2409_v19 }
 0x385   : > { %v6802_v14 = vpop.f32.mrb[40].mxu0  ;;  %v11028_v55 = vadd.f32 %v6871_v42, %v2412_v2 }
 0x386   : > { %v6872_v0 = vpop.f32.mrb[40].mxu1  ;;  %v6803_v10 = vpop.f32.mrb[41].mxu0 }
 0x387   : > { %v6873_v20 = vpop.f32.mrb[41].mxu1  ;;  %v6804_v33 = vadd.f32 %v6803_v10, %v6802_v14  ;;  %v6805_v57 = vpop.f32.mrb[42].mxu0 }
 0x388   : > { %v6874_v54 = vadd.f32 %v6873_v20, %v6872_v0  ;;  %v6875_v22 = vpop.f32.mrb[42].mxu1  ;;  %v6806_v53 = vpop.f32.mrb[43].mxu0 }
 0x389   : > { %v6876_v47 = vpop.f32.mrb[43].mxu1  ;;  %v2417_v11 = vadd.f32 %v6804_v33, %v10978_v9  ;;  %v6807_v7 = vadd.f32 %v6806_v53, %v6805_v57 }
 0x38a   : > { %v6877_v5 = vadd.f32 %v6876_v47, %v6875_v22 }
 0x38b   : > { %v2420_v3 = vadd.f32 %v6807_v7, %v10980_v50  ;;  %v11032_v16 = vadd.f32 %v6874_v54, %v2417_v11 }
 0x38d   : > { %v6808_v24 = vpop.f32.mrb[44].mxu0  ;;  %v11034_v61 = vadd.f32 %v6877_v5, %v2420_v3 }
 0x38e   : > { %v6878_v30 = vpop.f32.mrb[44].mxu1  ;;  %v6809_v38 = vpop.f32.mrb[45].mxu0 }
 0x38f   : > { %v6879_v58 = vpop.f32.mrb[45].mxu1  ;;  %v6810_v49 = vadd.f32 %v6809_v38, %v6808_v24  ;;  %v6811_v12 = vpop.f32.mrb[46].mxu0 }
 0x390   : > { %v6880_v56 = vadd.f32 %v6879_v58, %v6878_v30  ;;  %v6881_v19 = vpop.f32.mrb[46].mxu1  ;;  %v6812_v46 = vpop.f32.mrb[47].mxu0 }
 0x391   : > { %v6882_v42 = vpop.f32.mrb[47].mxu1  ;;  %v2425_v9 = vadd.f32 %v6810_v49, %v10984_v29  ;;  %v6813_v2 = vadd.f32 %v6812_v46, %v6811_v12 }
 0x392   : > { %v6883_v14 = vadd.f32 %v6882_v42, %v6881_v19 }
 0x393   : > { %v2428_v50 = vadd.f32 %v6813_v2, %v10986_v13  ;;  %v11038_v0 = vadd.f32 %v6880_v56, %v2425_v9 }
 0x395   : > { %v6814_v10 = vpop.f32.mrb[48].mxu0  ;;  %v11040_v33 = vadd.f32 %v6883_v14, %v2428_v50 }
 0x396   : > { %v6884_v20 = vpop.f32.mrb[48].mxu1  ;;  %v6815_v57 = vpop.f32.mrb[49].mxu0 }
 0x397   : > { %v6885_v54 = vpop.f32.mrb[49].mxu1  ;;  %v6816_v22 = vadd.f32 %v6815_v57, %v6814_v10  ;;  %v6817_v53 = vpop.f32.mrb[50].mxu0 }
 0x398   : > { %v6886_v47 = vadd.f32 %v6885_v54, %v6884_v20  ;;  %v6887_v11 = vpop.f32.mrb[50].mxu1  ;;  %v6818_v7 = vpop.f32.mrb[51].mxu0 }
 0x399   : > { %v6888_v5 = vpop.f32.mrb[51].mxu1  ;;  %v2433_v29 = vadd.f32 %v6816_v22, %v10990_v21  ;;  %v6819_v3 = vadd.f32 %v6818_v7, %v6817_v53 }
 0x39a   : > { %v6889_v24 = vadd.f32 %v6888_v5, %v6887_v11 }
 0x39b   : > { %v2436_v13 = vadd.f32 %v6819_v3, %v10992_v34  ;;  %v11044_v30 = vadd.f32 %v6886_v47, %v2433_v29 }
 0x39d   : > { %v6820_v38 = vpop.f32.mrb[52].mxu0  ;;  %v11046_v49 = vadd.f32 %v6889_v24, %v2436_v13 }
 0x39e   : > { %v6890_v58 = vpop.f32.mrb[52].mxu1  ;;  %v6821_v12 = vpop.f32.mrb[53].mxu0 }
 0x39f   : > { %v6891_v56 = vpop.f32.mrb[53].mxu1  ;;  %v6822_v19 = vadd.f32 %v6821_v12, %v6820_v38  ;;  %v6823_v46 = vpop.f32.mrb[54].mxu0 }
 0x3a0   : > { %v6892_v42 = vadd.f32 %v6891_v56, %v6890_v58  ;;  %v6893_v9 = vpop.f32.mrb[54].mxu1  ;;  %v6824_v2 = vpop.f32.mrb[55].mxu0 }
 0x3a1   : > { %v6894_v14 = vpop.f32.mrb[55].mxu1  ;;  %v2441_v21 = vadd.f32 %v6822_v19, %v10996_v39  ;;  %v6825_v50 = vadd.f32 %v6824_v2, %v6823_v46 }
 0x3a2   : > { %v6895_v10 = vadd.f32 %v6894_v14, %v6893_v9 }
 0x3a3   : > { %v2444_v34 = vadd.f32 %v6825_v50, %v10998_v8  ;;  %v11050_v20 = vadd.f32 %v6892_v42, %v2441_v21 }
 0x3a5   : > { %v6826_v57 = vpop.f32.mrb[56].mxu0  ;;  %v11052_v22 = vadd.f32 %v6895_v10, %v2444_v34 }
 0x3a6   : > { %v6896_v54 = vpop.f32.mrb[56].mxu1  ;;  %v6827_v53 = vpop.f32.mrb[57].mxu0 }
 0x3a7   : > { %v6897_v47 = vpop.f32.mrb[57].mxu1  ;;  %v6828_v11 = vadd.f32 %v6827_v53, %v6826_v57  ;;  %v6829_v7 = vpop.f32.mrb[58].mxu0 }
 0x3a8   : > { %v6898_v5 = vadd.f32 %v6897_v47, %v6896_v54  ;;  %v6899_v29 = vpop.f32.mrb[58].mxu1  ;;  %v6830_v3 = vpop.f32.mrb[59].mxu0 }
 0x3a9   : > { %v6900_v24 = vpop.f32.mrb[59].mxu1  ;;  %v2449_v39 = vadd.f32 %v6828_v11, %v11002_v43  ;;  %v6831_v13 = vadd.f32 %v6830_v3, %v6829_v7 }
 0x3aa   : > { %v6901_v38 = vadd.f32 %v6900_v24, %v6899_v29 }
 0x3ab   : > { %v2452_v8 = vadd.f32 %v6831_v13, %v11004_v25  ;;  %v11056_v58 = vadd.f32 %v6898_v5, %v2449_v39 }
 0x3ad   : > { %v6832_v12 = vpop.f32.mrb[60].mxu0  ;;  %v11058_v19 = vadd.f32 %v6901_v38, %v2452_v8 }
 0x3ae   : > { %v6902_v56 = vpop.f32.mrb[60].mxu1  ;;  %v6833_v46 = vpop.f32.mrb[61].mxu0 }
 0x3af   : > { %v6903_v42 = vpop.f32.mrb[61].mxu1  ;;  %v6834_v9 = vadd.f32 %v6833_v46, %v6832_v12  ;;  %v6835_v2 = vpop.f32.mrb[62].mxu0 }
 0x3b0   : > { %v6904_v14 = vadd.f32 %v6903_v42, %v6902_v56  ;;  %v6905_v21 = vpop.f32.mrb[62].mxu1  ;;  %v6836_v50 = vpop.f32.mrb[63].mxu0 }
 0x3b1   : > { %v6906_v10 = vpop.f32.mrb[63].mxu1  ;;  %v2457_v43 = vadd.f32 %v6834_v9, %v11008_v51  ;;  %v6837_v34 = vadd.f32 %v6836_v50, %v6835_v2 }
 0x3b2   : > { %v6907_v57 = vadd.f32 %v6906_v10, %v6905_v21 }
 0x3b3   : > { %v2460_v25 = vadd.f32 %v6837_v34, %v11010_v40  ;;  %v11062_v54 = vadd.f32 %v6904_v14, %v2457_v43 }
 0x3b5   : > { %v6838_v53 = vpop.f32.mrb[64].mxu0  ;;  %v11064_v11 = vadd.f32 %v6907_v57, %v2460_v25 }
 0x3b6   : > { %v6908_v47 = vpop.f32.mrb[64].mxu1  ;;  %v6839_v7 = vpop.f32.mrb[65].mxu0 }
 0x3b7   : > { %v6909_v5 = vpop.f32.mrb[65].mxu1  ;;  %v6840_v29 = vadd.f32 %v6839_v7, %v6838_v53  ;;  %v6841_v3 = vpop.f32.mrb[66].mxu0 }
 0x3b8   : > { %v6910_v24 = vadd.f32 %v6909_v5, %v6908_v47  ;;  %v6911_v39 = vpop.f32.mrb[66].mxu1  ;;  %v6842_v13 = vpop.f32.mrb[67].mxu0 }
 0x3b9   : > { %v6912_v38 = vpop.f32.mrb[67].mxu1  ;;  %v2465_v51 = vadd.f32 %v6840_v29, %v11014_v26  ;;  %v6843_v8 = vadd.f32 %v6842_v13, %v6841_v3 }
 0x3ba   : > { %v6913_v12 = vadd.f32 %v6912_v38, %v6911_v39 }
 0x3bb   : > { %v2468_v40 = vadd.f32 %v6843_v8, %v11016_v18  ;;  %v11068_v56 = vadd.f32 %v6910_v24, %v2465_v51  ;;  %v2707_v24 = vld [vmem:[%s13736_s3] sm:$0xff] }
 0x3bd   : > { %v6844_v46 = vpop.f32.mrb[68].mxu0  ;;  %v11070_v9 = vadd.f32 %v6913_v12, %v2468_v40 }
 0x3be   : > { %v6914_v42 = vpop.f32.mrb[68].mxu1  ;;  %v6845_v2 = vpop.f32.mrb[69].mxu0 }
 0x3bf   : > { %v6915_v14 = vpop.f32.mrb[69].mxu1  ;;  %v6846_v21 = vadd.f32 %v6845_v2, %v6844_v46  ;;  %v6847_v50 = vpop.f32.mrb[70].mxu0 }
 0x3c0   : > { %v6916_v10 = vadd.f32 %v6915_v14, %v6914_v42  ;;  %v6917_v43 = vpop.f32.mrb[70].mxu1  ;;  %v6848_v34 = vpop.f32.mrb[71].mxu0  ;;  %v2709_v42 = vld [vmem:[%s13736_s3 + $0x10] sm:$0xff] }
 0x3c1   : > { %v6918_v57 = vpop.f32.mrb[71].mxu1  ;;  %v2473_v26 = vadd.f32 %v6846_v21, %v11020_v44  ;;  %v6849_v25 = vadd.f32 %v6848_v34, %v6847_v50  ;;  %v2710_v50 = vld [vmem:[%s13736_s3 + $0x18] sm:$0xff] }
 0x3c2   : > { %v6919_v53 = vadd.f32 %v6918_v57, %v6917_v43 }
 0x3c3   : > { %v2476_v18 = vadd.f32 %v6849_v25, %v11022_v52  ;;  %v11074_v47 = vadd.f32 %v6916_v10, %v2473_v26  ;;  %v2708_v52 = vld [vmem:[%s13736_s3 + $0x8] sm:$0xff]  ;;  %v2711_v25 = vld [vmem:[%s13736_s3 + $0x20] sm:$0xff] }
 0x3c5   : > { %v2618_v7 = vpop.f32.mrb[72].mxu0  ;;  %v11076_v5 = vadd.f32 %v6919_v53, %v2476_v18 }
 0x3c6   : > { %v2619_v29 = vadd.f32 %v2618_v7, %v11026_v59  ;;  %v7465_v3 = vpop.f32.mrb[73].mxu0 }
 0x3c7   : > { %v2621_v39 = vpop.f32.mrb[74].mxu0 }
 0x3c8   : > { %v2689_v13 = vmax.f32 %v2619_v29, 0.0  ;;  %v2622_v44 = vadd.f32 %v2621_v39, %v11028_v55  ;;  %v7466_v38 = vpop.f32.mrb[75].mxu0  ;;  %v2712_v29 = vld [vmem:[%s13736_s3 + $0x28] sm:$0xff] }
 0x3c9   : > { %v2713_v38 = vld [vmem:[%s13736_s3 + $0x30] sm:$0xff] }
 0x3ca   : > { %v11086_v51 = vmul.f32 %v2707_v24, %v2689_v13  ;;  %v2690_v8 = vmax.f32 %v2622_v44, 0.0 }
 0x3cc   : > { %v11088_v12 = vmul.f32 %v2708_v52, %v2690_v8 }
 0x3cd   : > { %v2626_v59 = vpop.f32.mrb[76].mxu0 }
 0x3ce   : > { %v2627_v40 = vadd.f32 %v2626_v59, %v11032_v16  ;;  %v7469_v46 = vpop.f32.mrb[77].mxu0 }
 0x3cf   : > { %v2629_v2 = vpop.f32.mrb[78].mxu0 }
 0x3d0   : > { %v2691_v55 = vmax.f32 %v2627_v40, 0.0  ;;  %v2630_v14 = vadd.f32 %v2629_v2, %v11034_v61  ;;  %v7470_v21 = vpop.f32.mrb[79].mxu0  ;;  %v2714_v40 = vld [vmem:[%s13736_s3 + $0x38] sm:$0xff] }
 0x3d1   : > { %v2715_v21 = vld [vmem:[%s13736_s3 + $0x40] sm:$0xff] }
 0x3d2   : > { %v11098_v10 = vmul.f32 %v2709_v42, %v2691_v55  ;;  %v2692_v43 = vmax.f32 %v2630_v14, 0.0 }
 0x3d4   : > { %v11100_v34 = vmul.f32 %v2710_v50, %v2692_v43 }
 0x3d5   : > { %v2634_v16 = vpop.f32.mrb[80].mxu0 }
 0x3d6   : > { %v2635_v57 = vadd.f32 %v2634_v16, %v11038_v0  ;;  %v7473_v26 = vpop.f32.mrb[81].mxu0 }
 0x3d7   : > { %v2637_v53 = vpop.f32.mrb[82].mxu0 }
 0x3d8   : > { %v2693_v61 = vmax.f32 %v2635_v57, 0.0  ;;  %v2638_v18 = vadd.f32 %v2637_v53, %v11040_v33  ;;  %v7474_v7 = vpop.f32.mrb[83].mxu0  ;;  %v2716_v57 = vld [vmem:[%s13736_s3 + $0x48] sm:$0xff] }
 0x3d9   : > { %v2717_v7 = vld [vmem:[%s13736_s3 + $0x50] sm:$0xff] }
 0x3da   : > { %v11110_v3 = vmul.f32 %v2711_v25, %v2693_v61  ;;  %v2694_v24 = vmax.f32 %v2638_v18, 0.0 }
 0x3dc   : > { %v11112_v39 = vmul.f32 %v2712_v29, %v2694_v24 }
 0x3dd   : > { %v2642_v0 = vpop.f32.mrb[84].mxu0 }
 0x3de   : > { %v2643_v13 = vadd.f32 %v2642_v0, %v11044_v30  ;;  %v7477_v44 = vpop.f32.mrb[85].mxu0 }
 0x3df   : > { %v2645_v52 = vpop.f32.mrb[86].mxu0 }
 0x3e0   : > { %v2695_v33 = vmax.f32 %v2643_v13, 0.0  ;;  %v2646_v8 = vadd.f32 %v2645_v52, %v11046_v49  ;;  %v7478_v59 = vpop.f32.mrb[87].mxu0  ;;  %v2718_v13 = vld [vmem:[%s13736_s3 + $0x58] sm:$0xff] }
 0x3e1   : > { %v2719_v59 = vld [vmem:[%s13736_s3 + $0x60] sm:$0xff] }
 0x3e2   : > { %v11122_v46 = vmul.f32 %v2713_v38, %v2695_v33  ;;  %v2696_v42 = vmax.f32 %v2646_v8, 0.0 }
 0x3e4   : > { %v11124_v2 = vmul.f32 %v2714_v40, %v2696_v42 }
 0x3e5   : > { %v2650_v30 = vpop.f32.mrb[88].mxu0 }
 0x3e6   : > { %v2651_v55 = vadd.f32 %v2650_v30, %v11050_v20  ;;  %v7481_v14 = vpop.f32.mrb[89].mxu0 }
 0x3e7   : > { %v2653_v50 = vpop.f32.mrb[90].mxu0 }
 0x3e8   : > { %v2697_v49 = vmax.f32 %v2651_v55, 0.0  ;;  %v2654_v43 = vadd.f32 %v2653_v50, %v11052_v22  ;;  %v7482_v16 = vpop.f32.mrb[91].mxu0  ;;  %v2720_v55 = vld [vmem:[%s13736_s3 + $0x68] sm:$0xff] }
 0x3e9   : > { %v2721_v16 = vld [vmem:[%s13736_s3 + $0x70] sm:$0xff] }
 0x3ea   : > { %v11134_v26 = vmul.f32 %v2715_v21, %v2697_v49  ;;  %v2698_v25 = vmax.f32 %v2654_v43, 0.0 }
 0x3ec   : > { %v11136_v53 = vmul.f32 %v2716_v57, %v2698_v25 }
 0x3ed   : > { %v2658_v20 = vpop.f32.mrb[92].mxu0 }
 0x3ee   : > { %v2659_v61 = vadd.f32 %v2658_v20, %v11056_v58  ;;  %v7485_v18 = vpop.f32.mrb[93].mxu0 }
 0x3ef   : > { %v2661_v29 = vpop.f32.mrb[94].mxu0 }
 0x3f0   : > { %v2699_v22 = vmax.f32 %v2659_v61, 0.0  ;;  %v2662_v24 = vadd.f32 %v2661_v29, %v11058_v19  ;;  %v7486_v0 = vpop.f32.mrb[95].mxu0  ;;  %v2722_v61 = vld [vmem:[%s13736_s3 + $0x78] sm:$0xff] }
 0x3f1   : > { %v2723_v0 = vld [vmem:[%s13736_s3 + $0x80] sm:$0xff] }
 0x3f2   : > { %v11146_v44 = vmul.f32 %v2717_v7, %v2699_v22  ;;  %v2700_v38 = vmax.f32 %v2662_v24, 0.0 }
 0x3f4   : > { %v11148_v52 = vmul.f32 %v2718_v13, %v2700_v38 }
 0x3f5   : > { %v2666_v58 = vpop.f32.mrb[96].mxu0 }
 0x3f6   : > { %v2667_v33 = vadd.f32 %v2666_v58, %v11062_v54  ;;  %v7489_v8 = vpop.f32.mrb[97].mxu0 }
 0x3f7   : > { %v2669_v40 = vpop.f32.mrb[98].mxu0 }
 0x3f8   : > { %v2701_v19 = vmax.f32 %v2667_v33, 0.0  ;;  %v2670_v42 = vadd.f32 %v2669_v40, %v11064_v11  ;;  %v7490_v30 = vpop.f32.mrb[99].mxu0  ;;  %v2724_v33 = vld [vmem:[%s13736_s3 + $0x88] sm:$0xff] }
 0x3f9   : > { %v6204_v30 = vld [vmem:[%s10126_s28 + $0x6e0] sm:$0xff] (!%p6197_p0) }
 0x3fa   : > { %v11158_v14 = vmul.f32 %v2719_v59, %v2701_v19  ;;  %v2702_v21 = vmax.f32 %v2670_v42, 0.0  ;;  %v6202_v19 = vld [vmem:[%s10126_s28 + $0x6d0] sm:$0xff] (!%p6197_p0)  ;;  %v6203_v42 = vld [vmem:[%s10126_s28 + $0x6d8] sm:$0xff] (!%p6197_p0)  ;;  %2792 = vst [vmem:[#allocation2 + $0x260] sm:$0xff] (!%p6197_p0), %v6204_v30 }
 0x3fb   : > { %2788 = vst [vmem:[#allocation2 + $0x250] sm:$0xff] (!%p6197_p0), %v6202_v19  ;;  %2790 = vst [vmem:[#allocation2 + $0x258] sm:$0xff] (!%p6197_p0), %v6203_v42  ;;  %v6229_v19 = vld [vmem:[%s10126_s28 + $0x7a8] sm:$0xff] (!%p6197_p0)  ;;  %v6230_v42 = vld [vmem:[%s10126_s28 + $0x7b0] sm:$0xff] (!%p6197_p0) }
 0x3fc   : > { %v11160_v50 = vmul.f32 %v2720_v55, %v2702_v21  ;;  %v6205_v55 = vld [vmem:[%s10126_s28 + $0x6e8] sm:$0xff] (!%p6197_p0)  ;;  %v6206_v21 = vld [vmem:[%s10126_s28 + $0x6f0] sm:$0xff] (!%p6197_p0)  ;;  %2842 = vst [vmem:[#allocation2 + $0x328] sm:$0xff] (!%p6197_p0), %v6229_v19  ;;  %v6231_v30 = vld [vmem:[%s10126_s28 + $0x7b8] sm:$0xff] (!%p6197_p0) }
 0x3fd   : > { %v2674_v54 = vpop.f32.mrb[100].mxu0  ;;  %2794 = vst [vmem:[#allocation2 + $0x268] sm:$0xff] (!%p6197_p0), %v6205_v55  ;;  %2796 = vst [vmem:[#allocation2 + $0x270] sm:$0xff] (!%p6197_p0), %v6206_v21  ;;  %v6232_v55 = vld [vmem:[%s10126_s28 + $0x7c0] sm:$0xff] (!%p6197_p0)  ;;  %v6233_v21 = vld [vmem:[%s10126_s28 + $0x7c8] sm:$0xff] (!%p6197_p0) }
 0x3fe   : > { %v2675_v49 = vadd.f32 %v2674_v54, %v11068_v56  ;;  %v7493_v43 = vpop.f32.mrb[101].mxu0  ;;  %v6207_v54 = vld [vmem:[%s10126_s28 + $0x6f8] sm:$0xff] (!%p6197_p0)  ;;  %2844 = vst [vmem:[#allocation2 + $0x330] sm:$0xff] (!%p6197_p0), %v6230_v42  ;;  %2846 = vst [vmem:[#allocation2 + $0x338] sm:$0xff] (!%p6197_p0), %v6231_v30  ;;  %v6256_v19 = vld [vmem:[%s10126_s28 + $0x880] sm:$0xff] (!%p6197_p0) }
 0x3ff   : > { %v2677_v57 = vpop.f32.mrb[102].mxu0  ;;  %2798 = vst [vmem:[#allocation2 + $0x278] sm:$0xff] (!%p6197_p0), %v6207_v54  ;;  %v6209_v43 = vld [vmem:[%s10126_s28 + $0x708] sm:$0xff] (!%p6197_p0)  ;;  %2848 = vst [vmem:[#allocation2 + $0x340] sm:$0xff] (!%p6197_p0), %v6232_v55  ;;  %v6234_v54 = vld [vmem:[%s10126_s28 + $0x7d0] sm:$0xff] (!%p6197_p0) }
 0x400   : > { %v2703_v11 = vmax.f32 %v2675_v49, 0.0  ;;  %v2678_v25 = vadd.f32 %v2677_v57, %v11070_v9  ;;  %v7494_v20 = vpop.f32.mrb[103].mxu0  ;;  %v6208_v49 = vld [vmem:[%s10126_s28 + $0x700] sm:$0xff] (!%p6197_p0)  ;;  %v6211_v57 = vld [vmem:[%s10126_s28 + $0x718] sm:$0xff] (!%p6197_p0)  ;;  %2802 = vst [vmem:[#allocation2 + $0x288] sm:$0xff] (!%p6197_p0), %v6209_v43  ;;  %2850 = vst [vmem:[#allocation2 + $0x348] sm:$0xff] (!%p6197_p0), %v6233_v21 }
 0x401   : > { %2800 = vst [vmem:[#allocation2 + $0x280] sm:$0xff] (!%p6197_p0), %v6208_v49  ;;  %2806 = vst [vmem:[#allocation2 + $0x298] sm:$0xff] (!%p6197_p0), %v6211_v57  ;;  %v6214_v20 = vld [vmem:[%s10126_s28 + $0x730] sm:$0xff] (!%p6197_p0)  ;;  %v6235_v49 = vld [vmem:[%s10126_s28 + $0x7d8] sm:$0xff] (!%p6197_p0) }
 0x402   : > { %v11170_v18 = vmul.f32 %v2721_v16, %v2703_v11  ;;  %v2704_v7 = vmax.f32 %v2678_v25, 0.0  ;;  %v6210_v16 = vld [vmem:[%s10126_s28 + $0x710] sm:$0xff] (!%p6197_p0)  ;;  %v6212_v11 = vld [vmem:[%s10126_s28 + $0x720] sm:$0xff] (!%p6197_p0)  ;;  %v6213_v25 = vld [vmem:[%s10126_s28 + $0x728] sm:$0xff] (!%p6197_p0)  ;;  %2812 = vst [vmem:[#allocation2 + $0x2b0] sm:$0xff] (!%p6197_p0), %v6214_v20 }
 0x403   : > { %2804 = vst [vmem:[#allocation2 + $0x290] sm:$0xff] (!%p6197_p0), %v6210_v16  ;;  %2808 = vst [vmem:[#allocation2 + $0x2a0] sm:$0xff] (!%p6197_p0), %v6212_v11  ;;  %v6236_v43 = vld [vmem:[%s10126_s28 + $0x7e0] sm:$0xff] (!%p6197_p0)  ;;  %v6237_v16 = vld [vmem:[%s10126_s28 + $0x7e8] sm:$0xff] (!%p6197_p0) }
 0x404   : > { %v11172_v29 = vmul.f32 %v2722_v61, %v2704_v7  ;;  %2810 = vst [vmem:[#allocation2 + $0x2a8] sm:$0xff] (!%p6197_p0), %v6213_v25  ;;  %v6215_v61 = vld [vmem:[%s10126_s28 + $0x738] sm:$0xff] (!%p6197_p0)  ;;  %v6216_v7 = vld [vmem:[%s10126_s28 + $0x740] sm:$0xff] (!%p6197_p0)  ;;  %2852 = vst [vmem:[#allocation2 + $0x350] sm:$0xff] (!%p6197_p0), %v6234_v54 }
 0x405   : > { %v2682_v56 = vpop.f32.mrb[104].mxu0  ;;  %2814 = vst [vmem:[#allocation2 + $0x2b8] sm:$0xff] (!%p6197_p0), %v6215_v61  ;;  %2816 = vst [vmem:[#allocation2 + $0x2c0] sm:$0xff] (!%p6197_p0), %v6216_v7  ;;  %v6238_v57 = vld [vmem:[%s10126_s28 + $0x7f0] sm:$0xff] (!%p6197_p0)  ;;  %v6239_v11 = vld [vmem:[%s10126_s28 + $0x7f8] sm:$0xff] (!%p6197_p0) }
 0x406   : > { %v2683_v22 = vadd.f32 %v2682_v56, %v11074_v47  ;;  %v7497_v24 = vpop.f32.mrb[105].mxu0  ;;  %2747 = sbr.rel (%p6197_p0) target bundleno = 1058 (0x422), region = 174  ;;  %v6200_v47 = vld [vmem:[%s10126_s28 + $0x6c0] sm:$0xff] (!%p6197_p0)  ;;  %v6217_v56 = vld [vmem:[%s10126_s28 + $0x748] sm:$0xff] (!%p6197_p0)  ;;  %2854 = vst [vmem:[#allocation2 + $0x358] sm:$0xff] (!%p6197_p0), %v6235_v49  ;;  %2856 = vst [vmem:[#allocation2 + $0x360] sm:$0xff] (!%p6197_p0), %v6236_v43 }
 0x407   : > { %v2685_v13 = vpop.f32.mrb[106].mxu0  ;;  %2784 = vst [vmem:[#allocation2 + $0x240] sm:$0xff] (!%p6197_p0), %v6200_v47  ;;  %2818 = vst [vmem:[#allocation2 + $0x2c8] sm:$0xff] (!%p6197_p0), %v6217_v56  ;;  %v6219_v24 = vld [vmem:[%s10126_s28 + $0x758] sm:$0xff] (!%p6197_p0)  ;;  %v6240_v25 = vld [vmem:[%s10126_s28 + $0x800] sm:$0xff] (!%p6197_p0) }
 0x408   : > { %v2705_v9 = vmax.f32 %v2683_v22, 0.0  ;;  %v2686_v38 = vadd.f32 %v2685_v13, %v11076_v5  ;;  %v7498_v58 = vpop.f32.mrb[107].mxu0  ;;  %v6201_v5 = vld [vmem:[%s10126_s28 + $0x6c8] sm:$0xff] (!%p6197_p0)  ;;  %v6218_v22 = vld [vmem:[%s10126_s28 + $0x750] sm:$0xff] (!%p6197_p0)  ;;  %2822 = vst [vmem:[#allocation2 + $0x2d8] sm:$0xff] (!%p6197_p0), %v6219_v24  ;;  %v6227_v47 = vld [vmem:[%s10126_s28 + $0x798] sm:$0xff] (!%p6197_p0) }
 0x409   : > { %2786 = vst [vmem:[#allocation2 + $0x248] sm:$0xff] (!%p6197_p0), %v6201_v5  ;;  %2820 = vst [vmem:[#allocation2 + $0x2d0] sm:$0xff] (!%p6197_p0), %v6218_v22  ;;  %v6221_v13 = vld [vmem:[%s10126_s28 + $0x768] sm:$0xff] (!%p6197_p0)  ;;  %v6224_v58 = vld [vmem:[%s10126_s28 + $0x780] sm:$0xff] (!%p6197_p0) }
 0x40a   : > { %v11182_v8 = vmul.f32 %v2723_v0, %v2705_v9  ;;  %v2706_v59 = vmax.f32 %v2686_v38, 0.0  ;;  %v6220_v0 = vld [vmem:[%s10126_s28 + $0x760] sm:$0xff] (!%p6197_p0)  ;;  %v6222_v9 = vld [vmem:[%s10126_s28 + $0x770] sm:$0xff] (!%p6197_p0)  ;;  %v6223_v38 = vld [vmem:[%s10126_s28 + $0x778] sm:$0xff] (!%p6197_p0)  ;;  %2826 = vst [vmem:[#allocation2 + $0x2e8] sm:$0xff] (!%p6197_p0), %v6221_v13 }
 0x40b   : > { %2824 = vst [vmem:[#allocation2 + $0x2e0] sm:$0xff] (!%p6197_p0), %v6220_v0  ;;  %2828 = vst [vmem:[#allocation2 + $0x2f0] sm:$0xff] (!%p6197_p0), %v6222_v9  ;;  %v6228_v5 = vld [vmem:[%s10126_s28 + $0x7a0] sm:$0xff] (!%p6197_p0)  ;;  %v6241_v20 = vld [vmem:[%s10126_s28 + $0x808] sm:$0xff] (!%p6197_p0) }
 0x40c   : > { %v11184_v40 = vmul.f32 %v2724_v33, %v2706_v59  ;;  %2830 = vst [vmem:[#allocation2 + $0x2f8] sm:$0xff] (!%p6197_p0), %v6223_v38  ;;  %v6225_v33 = vld [vmem:[%s10126_s28 + $0x788] sm:$0xff] (!%p6197_p0)  ;;  %v6226_v59 = vld [vmem:[%s10126_s28 + $0x790] sm:$0xff] (!%p6197_p0)  ;;  %2832 = vst [vmem:[#allocation2 + $0x300] sm:$0xff] (!%p6197_p0), %v6224_v58 }
 0x40d   : > { %2834 = vst [vmem:[#allocation2 + $0x308] sm:$0xff] %v6225_v33  ;;  %2836 = vst [vmem:[#allocation2 + $0x310] sm:$0xff] %v6226_v59  ;;  %v6242_v61 = vld [vmem:[%s10126_s28 + $0x810] sm:$0xff]  ;;  %v6243_v7 = vld [vmem:[%s10126_s28 + $0x818] sm:$0xff] }
 0x40e   : > { %2838 = vst [vmem:[#allocation2 + $0x318] sm:$0xff] %v6227_v47  ;;  %2840 = vst [vmem:[#allocation2 + $0x320] sm:$0xff] %v6228_v5  ;;  %v6244_v56 = vld [vmem:[%s10126_s28 + $0x820] sm:$0xff]  ;;  %v6245_v22 = vld [vmem:[%s10126_s28 + $0x828] sm:$0xff] }
 0x40f   : > { %2858 = vst [vmem:[#allocation2 + $0x368] sm:$0xff] %v6237_v16  ;;  %2860 = vst [vmem:[#allocation2 + $0x370] sm:$0xff] %v6238_v57  ;;  %v6246_v24 = vld [vmem:[%s10126_s28 + $0x830] sm:$0xff]  ;;  %v6247_v0 = vld [vmem:[%s10126_s28 + $0x838] sm:$0xff] }
 0x410   : > { %2862 = vst [vmem:[#allocation2 + $0x378] sm:$0xff] %v6239_v11  ;;  %2864 = vst [vmem:[#allocation2 + $0x380] sm:$0xff] %v6240_v25  ;;  %v6248_v13 = vld [vmem:[%s10126_s28 + $0x840] sm:$0xff]  ;;  %v6249_v9 = vld [vmem:[%s10126_s28 + $0x848] sm:$0xff] }
 0x411   : > { %2866 = vst [vmem:[#allocation2 + $0x388] sm:$0xff] %v6241_v20  ;;  %2868 = vst [vmem:[#allocation2 + $0x390] sm:$0xff] %v6242_v61  ;;  %v6250_v38 = vld [vmem:[%s10126_s28 + $0x850] sm:$0xff]  ;;  %v6251_v58 = vld [vmem:[%s10126_s28 + $0x858] sm:$0xff] }
 0x412   : > { %2870 = vst [vmem:[#allocation2 + $0x398] sm:$0xff] %v6243_v7  ;;  %2872 = vst [vmem:[#allocation2 + $0x3a0] sm:$0xff] %v6244_v56  ;;  %v6252_v33 = vld [vmem:[%s10126_s28 + $0x860] sm:$0xff]  ;;  %v6253_v59 = vld [vmem:[%s10126_s28 + $0x868] sm:$0xff] }
 0x413   : > { %2874 = vst [vmem:[#allocation2 + $0x3a8] sm:$0xff] %v6245_v22  ;;  %2876 = vst [vmem:[#allocation2 + $0x3b0] sm:$0xff] %v6246_v24  ;;  %v6254_v47 = vld [vmem:[%s10126_s28 + $0x870] sm:$0xff]  ;;  %v6255_v5 = vld [vmem:[%s10126_s28 + $0x878] sm:$0xff] }
 0x414   : > { %2878 = vst [vmem:[#allocation2 + $0x3b8] sm:$0xff] %v6247_v0  ;;  %2880 = vst [vmem:[#allocation2 + $0x3c0] sm:$0xff] %v6248_v13  ;;  %v6257_v42 = vld [vmem:[%s10126_s28 + $0x888] sm:$0xff]  ;;  %v6258_v30 = vld [vmem:[%s10126_s28 + $0x890] sm:$0xff] }
 0x415   : > { %2882 = vst [vmem:[#allocation2 + $0x3c8] sm:$0xff] %v6249_v9  ;;  %2884 = vst [vmem:[#allocation2 + $0x3d0] sm:$0xff] %v6250_v38  ;;  %v6259_v55 = vld [vmem:[%s10126_s28 + $0x898] sm:$0xff]  ;;  %v6260_v21 = vld [vmem:[%s10126_s28 + $0x8a0] sm:$0xff] }
 0x416   : > { %2886 = vst [vmem:[#allocation2 + $0x3d8] sm:$0xff] %v6251_v58  ;;  %2888 = vst [vmem:[#allocation2 + $0x3e0] sm:$0xff] %v6252_v33  ;;  %v6261_v54 = vld [vmem:[%s10126_s28 + $0x8a8] sm:$0xff]  ;;  %v6262_v49 = vld [vmem:[%s10126_s28 + $0x8b0] sm:$0xff] }
 0x417   : > { %2890 = vst [vmem:[#allocation2 + $0x3e8] sm:$0xff] %v6253_v59  ;;  %2892 = vst [vmem:[#allocation2 + $0x3f0] sm:$0xff] %v6254_v47  ;;  %v6263_v43 = vld [vmem:[%s10126_s28 + $0x8b8] sm:$0xff]  ;;  %v6264_v16 = vld [vmem:[%s10126_s28 + $0x8c0] sm:$0xff] }
 0x418   : > { %2894 = vst [vmem:[#allocation2 + $0x3f8] sm:$0xff] %v6255_v5  ;;  %2896 = vst [vmem:[#allocation2 + $0x400] sm:$0xff] %v6256_v19  ;;  %v6265_v57 = vld [vmem:[%s10126_s28 + $0x8c8] sm:$0xff]  ;;  %v6266_v11 = vld [vmem:[%s10126_s28 + $0x8d0] sm:$0xff] }
 0x419   : > { %2898 = vst [vmem:[#allocation2 + $0x408] sm:$0xff] %v6257_v42  ;;  %2900 = vst [vmem:[#allocation2 + $0x410] sm:$0xff] %v6258_v30  ;;  %v6267_v25 = vld [vmem:[%s10126_s28 + $0x8d8] sm:$0xff]  ;;  %v6268_v20 = vld [vmem:[%s10126_s28 + $0x8e0] sm:$0xff] }
 0x41a   : > { %2902 = vst [vmem:[#allocation2 + $0x418] sm:$0xff] %v6259_v55  ;;  %2904 = vst [vmem:[#allocation2 + $0x420] sm:$0xff] %v6260_v21  ;;  %v6269_v61 = vld [vmem:[%s10126_s28 + $0x8e8] sm:$0xff]  ;;  %v6270_v7 = vld [vmem:[%s10126_s28 + $0x8f0] sm:$0xff] }
 0x41b   : > { %2906 = vst [vmem:[#allocation2 + $0x428] sm:$0xff] %v6261_v54  ;;  %2908 = vst [vmem:[#allocation2 + $0x430] sm:$0xff] %v6262_v49  ;;  %v6271_v56 = vld [vmem:[%s10126_s28 + $0x8f8] sm:$0xff] }
 0x41c   : > { %2910 = vst [vmem:[#allocation2 + $0x438] sm:$0xff] %v6263_v43  ;;  %2912 = vst [vmem:[#allocation2 + $0x440] sm:$0xff] %v6264_v16 }
 0x41d   : > { %2914 = vst [vmem:[#allocation2 + $0x448] sm:$0xff] %v6265_v57  ;;  %2916 = vst [vmem:[#allocation2 + $0x450] sm:$0xff] %v6266_v11 }
 0x41e   : > { %2918 = vst [vmem:[#allocation2 + $0x458] sm:$0xff] %v6267_v25  ;;  %2920 = vst [vmem:[#allocation2 + $0x460] sm:$0xff] %v6268_v20 }
 0x41f   : > { %2922 = vst [vmem:[#allocation2 + $0x468] sm:$0xff] %v6269_v61  ;;  %2924 = vst [vmem:[#allocation2 + $0x470] sm:$0xff] %v6270_v7 }
 0x420   : > { %2926 = vst [vmem:[#allocation2 + $0x478] sm:$0xff] %v6271_v56 }
 0x421   : > { %2934 = vsyncadd [#allocation4 + $0x1], 9216 }
 0x422 PF: > { %8335 = dma.done.wait [#allocation4], 9216 }
 0x423   : > { %8336 = vsyncadd [#allocation4], 4294958080  ;;  %v2991_v22 = vrot.slane %v11086_v51, 7  ;;  %v13852_v24 = vrot.slane %v11182_v8, 7  ;;  %v3008_v0 = vrot.slane %v11184_v40, 7  ;;  %v2937_v13 = vrot.slane %v11086_v51, 6 }
 0x424   : > { %v13851_v9 = vrot.slane %v11182_v8, 6  ;;  %v2954_v38 = vrot.slane %v11184_v40, 6  ;;  %v2992_v58 = vrot.slane %v11088_v12, 7  ;;  %v11268_v33 = vpack.c.bf16 %v11086_v51, %v11184_v40  ;;  %v3324_v57 = vld [vmem:[#allocation2 + $0x48] sm:$0xff]  ;;  %v3317_v17 = vld [vmem:[#allocation2 + $0x10] sm:$0xff]  ;;  %v3326_v28 = vld [vmem:[#allocation2 + $0x58] sm:$0xff] }
 0x425   : > { %v11274_v59 = vsel %vm523_vm0, %v13852_v24, %v3008_v0  ;;  %v3026_v47 = vsel %vm523_vm0, %v3008_v0, %v2991_v22  ;;  %v2993_v5 = vrot.slane %v11098_v10, 7  ;;  %v2938_v19 = vrot.slane %v11088_v12, 6  ;;  %v3323_v0 = vld [vmem:[#allocation2 + $0x40] sm:$0xff]  ;;  %v3340_v24 = vld [vmem:[#allocation2 + $0xc8] sm:$0xff]  ;;  %v3333_v63 = vld [vmem:[#allocation2 + $0x90] sm:$0xff]  ;;  %s1495_s22 = sadd.s32 1, %s8413_s22  }
 0x426   : > { %14205 = vst [vmem:[#allocation79_spill] sm:$0xff] %v11274_v59  ;;  %v3027_v42 = vpack.c.bf16 %v3026_v47, %v11274_v59  ;;  %v11285_v30 = vsel %vm468_vm1, %v13851_v9, %v2954_v38  ;;  %v11289_v55 = vsel %vm468_vm1, %v2954_v38, %v2937_v13  ;;  %v11293_v21 = vsel %vm523_vm0, %v2991_v22, %v2992_v58  ;;  %v3339_v38 = vld [vmem:[#allocation2 + $0xc0] sm:$0xff]  ;;  %v3316_v27 = vld [vmem:[#allocation2 + $0x8] sm:$0xff]  ;;  %v3342_v48 = vld [vmem:[#allocation2 + $0xd8] sm:$0xff]  ;;  %p12258_p1 = scmp.ge.s32.totalorder %s1495_s22, 19  }
 0x427   : > { %v3063_v49 = vpack.c.bf16 %v11293_v21, %v3026_v47  ;;  %v11300_v43 = vsel %vm523_vm0, %v2992_v58, %v2993_v5  ;;  %v2939_v16 = vrot.slane %v11098_v10, 6  ;;  %v11307_v11 = vsel %vm468_vm1, %v2937_v13, %v2938_v19  ;;  %v3315_v13 = vld [vmem:[#allocation2] sm:$0xff]  ;;  %6937 = vmatprep.subr.bf16.mxu1 %v3323_v0  ;;  %7007 = vmatprep.subr.bf16.mxu0 %v3339_v38  ;;  %v3332_v1 = vld [vmem:[#allocation2 + $0x88] sm:$0xff]  ;;  %v3341_v0 = vld [vmem:[#allocation2 + $0xd0] sm:$0xff] }
 0x428   : > { %3427 = vmatprep.mubr.bf16.mxu1 %v3027_v42  ;;  %v2994_v25 = vrot.slane %v11100_v34, 7  ;;  %v11312_v20 = vpack.c.bf16 %v11098_v10, %v11088_v12  ;;  %v2995_v7 = vrot.slane %v11110_v3, 7  ;;  %v2940_v56 = vrot.slane %v11100_v34, 6  ;;  %6938 = vmatpush3.bf16.msra.mxu1 %v3315_v13  ;;  %v3334_v32 = vld [vmem:[#allocation2 + $0x98] sm:$0xff]  ;;  %v3327_v6 = vld [vmem:[#allocation2 + $0x60] sm:$0xff]  ;;  %v3328_v45 = vld [vmem:[#allocation2 + $0x68] sm:$0xff] }
 0x429   : > { %3532 = vmatprep.mubr.bf16.mxu0 %v3063_v49  ;;  %v11316_v61 = vsel %vm468_vm1, %v2938_v19, %v2939_v16  ;;  %v2941_v22 = vrot.slane %v11110_v3, 6  ;;  %v2996_v42 = vrot.slane %v11112_v39, 7  ;;  %v11330_v19 = vpack.c.bf16 %v11110_v3, %v11100_v34  ;;  %v3331_v49 = vld [vmem:[#allocation2 + $0x80] sm:$0xff]  ;;  %6939 = vmatprep.subr.bf16.mxu1 %v3324_v57  ;;  %v3337_v59 = vld [vmem:[#allocation2 + $0xb0] sm:$0xff] }
 0x42a   : > { %v11325_v47 = vsel %vm523_vm0, %v2993_v5, %v2994_v25  ;;  %v11336_v58 = vsel %vm523_vm0, %v2994_v25, %v2995_v7  ;;  %v2997_v9 = vrot.slane %v11122_v46, 7  ;;  %7008 = vmatpush3.bf16.msra.mxu0 %v3331_v49  ;;  %v11347_v38 = vsel %vm468_vm1, %v2939_v16, %v2940_v56  ;;  %v3343_v36 = vld [vmem:[#allocation2 + $0xe0] sm:$0xff]  ;;  %v8212_v60 = vld [vmem:[%s13738_s5 + $0x10] sm:$0xff] (%p12258_p1)  }
 0x42b   : > { %v11340_v5 = vsel %vm468_vm1, %v2940_v56, %v2941_v22  ;;  %v11351_v25 = vsel %vm523_vm0, %v2995_v7, %v2996_v42  ;;  %v2942_v54 = vrot.slane %v11112_v39, 6  ;;  %7009 = vmatprep.subr.bf16.mxu0 %v3340_v24  ;;  %v2943_v56 = vrot.slane %v11122_v46, 6  ;;  %v3325_v7 = vld [vmem:[#allocation2 + $0x50] sm:$0xff] }
 0x42c   : > { %v11360_v16 = vsel %vm523_vm0, %v2996_v42, %v2997_v9  ;;  %v2998_v13 = vrot.slane %v11124_v2, 7  ;;  %v11372_v49 = vpack.c.bf16 %v11122_v46, %v11112_v39  ;;  %v2999_v37 = vrot.slane %v11134_v26, 7  ;;  %6940 = vmatpush3.bf16.msra.mxu1 %v3316_v27 }
 0x42d   : > { %v11367_v24 = vsel %vm468_vm1, %v2941_v22, %v2942_v54  ;;  %v11376_v42 = vsel %vm468_vm1, %v2942_v54, %v2943_v56  ;;  %v2944_v4 = vrot.slane %v11124_v2, 6  ;;  %v2945_v57 = vrot.slane %v11134_v26, 6  ;;  %6941 = vmatprep.subr.bf16.mxu1 %v3325_v7 }
 0x42e   : > { %7010 = vmatpush3.bf16.msra.mxu0 %v3332_v1  ;;  %v11385_v23 = vsel %vm523_vm0, %v2997_v9, %v2998_v13  ;;  %v3000_v41 = vrot.slane %v11136_v53, 7  ;;  %v11390_v54 = vpack.c.bf16 %v11134_v26, %v11124_v2  ;;  %v11396_v27 = vsel %vm523_vm0, %v2998_v13, %v2999_v37 }
 0x42f   : > { %7011 = vmatprep.subr.bf16.mxu0 %v3341_v0  ;;  %v11400_v9 = vsel %vm468_vm1, %v2944_v4, %v2945_v57  ;;  %v3001_v22 = vrot.slane %v11146_v44, 7  ;;  %v11407_v0 = vsel %vm468_vm1, %v2943_v56, %v2944_v4  ;;  %v2946_v13 = vrot.slane %v11136_v53, 6 }
 0x430   : > { %v11411_v1 = vsel %vm523_vm0, %v2999_v37, %v3000_v41  ;;  %v2947_v7 = vrot.slane %v11146_v44, 6  ;;  %6942 = vmatpush3.bf16.msra.mxu1 %v3317_v17  ;;  %v3002_v56 = vrot.slane %v11148_v52, 7  ;;  %v11432_v35 = vpack.c.bf16 %v11146_v44, %v11136_v53 }
 0x431   : > { %v11420_v62 = vsel %vm523_vm0, %v3000_v41, %v3001_v22  ;;  %v11427_v37 = vsel %vm468_vm1, %v2945_v57, %v2946_v13  ;;  %6943 = vmatprep.subr.bf16.mxu1 %v3326_v28  ;;  %v3318_v41 = vld [vmem:[#allocation2 + $0x18] sm:$0xff]  ;;  %v3003_v17 = vrot.slane %v11158_v14, 7  ;;  %v2948_v4 = vrot.slane %v11148_v52, 6 }
 0x432   : > { %7012 = vmatpush3.bf16.msra.mxu0 %v3333_v63  ;;  %14206 = vst [vmem:[#allocation82_spill] sm:$0xff] %v11427_v37  ;;  %14207 = vst [vmem:[#allocation80_spill] sm:$0xff] %v11432_v35  ;;  %v11436_v63 = vsel %vm468_vm1, %v2946_v13, %v2947_v7  ;;  %v2949_v57 = vrot.slane %v11158_v14, 6  ;;  %v11445_v28 = vsel %vm523_vm0, %v3001_v22, %v3002_v56  ;;  %v3005_v35 = vrot.slane %v11170_v18, 7  ;;  %v3319_v37 = vld [vmem:[#allocation2 + $0x20] sm:$0xff] }
 0x433   : > { %7013 = vmatprep.subr.bf16.mxu0 %v3342_v48  ;;  %14208 = vst [vmem:[#allocation81_spill] sm:$0xff] %v11436_v63  ;;  %v3004_v48 = vrot.slane %v11160_v50, 7  ;;  %v11450_v13 = vpack.c.bf16 %v11158_v14, %v11148_v52  ;;  %v11456_v15 = vsel %vm523_vm0, %v3002_v56, %v3003_v17  ;;  %v11464_v22 = vsel %vm468_vm1, %v2947_v7, %v2948_v4  ;;  %v3335_v63 = vld [vmem:[#allocation2 + $0xa0] sm:$0xff] }
 0x434   : > { %14210 = vst [vmem:[#allocation83_spill] sm:$0xff] %v11456_v15  ;;  %v11460_v31 = vsel %vm468_vm1, %v2948_v4, %v2949_v57  ;;  %14212 = vst [vmem:[#allocation86_spill] sm:$0xff] %v11464_v22  ;;  %6944 = vmatpush3.bf16.msra.mxu1 %v3318_v41  ;;  %v2951_v4 = vrot.slane %v11170_v18, 6  ;;  %v3006_v41 = vrot.slane %v11172_v29, 7  ;;  %v11491_v7 = vpack.c.bf16 %v11182_v8, %v11172_v29 }
 0x435   : > { %14209 = vst [vmem:[#allocation78_spill] sm:$0xff] %v11450_v13  ;;  %14211 = vst [vmem:[#allocation88_spill] sm:$0xff] %v11460_v31  ;;  %v11472_v56 = vsel %vm523_vm0, %v3003_v17, %v3004_v48  ;;  %6945 = vmatprep.subr.bf16.mxu1 %v3327_v6  ;;  %v3344_v13 = vld [vmem:[#allocation2 + $0xe8] sm:$0xff]  ;;  %v11482_v17 = vsel %vm523_vm0, %v3004_v48, %v3005_v35  ;;  %v11486_v6 = vpack.c.bf16 %v11170_v18, %v11160_v50  ;;  %vm4787_vm6 = vcmask (%p12258_p1), 130048  }
 0x436   : > { %7014 = vmatpush3.bf16.msra.mxu0 %v3334_v32  ;;  %14213 = vst [vmem:[#allocation87_spill] sm:$0xff] %v11472_v56  ;;  %v2950_v32 = vrot.slane %v11160_v50, 6  ;;  %14215 = vst [vmem:[#allocation89_spill] sm:$0xff] %v11491_v7  ;;  %v14219_v56 = vrot.slane %v11182_v8, 7  ;;  %vm4872_vm7 = vcmask (%p12258_p1), 261120   ;;  %vm4947_vm8 = vcmask (%p12258_p1), 1024  }
 0x437   : > { %7015 = vmatprep.subr.bf16.mxu0 %v3343_v36  ;;  %14214 = vst [vmem:[#allocation84_spill] sm:$0xff] %v11486_v6  ;;  %v2952_v36 = vrot.slane %v11172_v29, 6  ;;  %v11505_v6 = vsel %vm523_vm0, %v3005_v35, %v3006_v41  ;;  %v3336_v35 = vld [vmem:[#allocation2 + $0xa8] sm:$0xff]  ;;  %vm5896_vm9 = vcmask (%p12258_p1), 50176  }
 0x438   : > { %v11497_v31 = vsel %vm468_vm1, %v2950_v32, %v2951_v4  ;;  %v11501_v48 = vsel %vm468_vm1, %v2949_v57, %v2950_v32  ;;  %14218 = vst [vmem:[#allocation91_spill] sm:$0xff] %v11505_v6  ;;  %6946 = vmatpush3.bf16.msra.mxu1 %v3319_v37  ;;  %v11515_v15 = vsel %vm523_vm0, %v3006_v41, %v14219_v56  ;;  %v3320_v32 = vld [vmem:[#allocation2 + $0x28] sm:$0xff]  ;;  %v3100_v56 = vrot.slane %v11088_v12, 1  ;;  %v3329_v41 = vld [vmem:[#allocation2 + $0x70] sm:$0xff]  ;;  %v3346_v6 = vld [vmem:[#allocation2 + $0xf8] sm:$0xff] }
 0x439   : > { %14216 = vst [vmem:[#allocation74_spill] sm:$0xff] %v11497_v31  ;;  %14217 = vst [vmem:[#allocation90_spill] sm:$0xff] %v11501_v48  ;;  %6947 = vmatprep.subr.bf16.mxu1 %v3328_v45  ;;  %v11528_v22 = vsel %vm468_vm1, %v2951_v4, %v2952_v36  ;;  %v3345_v45 = vld [vmem:[#allocation2 + $0xf0] sm:$0xff]  ;;  %v3101_v57 = vrot.slane %v11098_v10, 1  ;;  %v14224_v48 = vrot.slane %v11086_v51, 1  ;;  %v3103_v31 = vrot.slane %v11110_v3, 1 }
 0x43a   : > { %7016 = vmatpush3.bf16.msra.mxu0 %v3335_v63  ;;  %14220 = vst [vmem:[#allocation85_spill] sm:$0xff] %v11515_v15  ;;  %v14221_v63 = vrot.slane %v11182_v8, 6  ;;  %14223 = vst [vmem:[#allocation93_spill] sm:$0xff] %v11528_v22  ;;  %v3105_v22 = vrot.slane %v11122_v46, 1  ;;  %v3330_v15 = vld [vmem:[#allocation2 + $0x78] sm:$0xff] }
 0x43b   : > { %7017 = vmatprep.subr.bf16.mxu0 %v3344_v13  ;;  %v11542_v4 = vsel %vm632_vm2, %v14224_v48, %v3100_v56  ;;  %v11550_v37 = vsel %vm632_vm2, %v3100_v56, %v3101_v57  ;;  %v3106_v56 = vrot.slane %v11124_v2, 1  ;;  %v3322_v13 = vld [vmem:[#allocation2 + $0x38] sm:$0xff] }
 0x43c   : > { %v11524_v7 = vsel %vm468_vm1, %v2952_v36, %v14221_v63  ;;  %v3102_v36 = vrot.slane %v11100_v34, 1  ;;  %6948 = vmatpush3.bf16.msra.mxu1 %v3320_v32  ;;  %14225 = vst [vmem:[#allocation94_spill] sm:$0xff] %v11550_v37  ;;  %v3104_v63 = vrot.slane %v11112_v39, 1  ;;  %v3113_v37 = vrot.slane %v11170_v18, 1 }
 0x43d   : > { %14222 = vst [vmem:[#allocation92_spill] sm:$0xff] %v11524_v7  ;;  %6949 = vmatprep.subr.bf16.mxu1 %v3329_v41  ;;  %v3321_v7 = vld [vmem:[#allocation2 + $0x30] sm:$0xff]  ;;  %v11585_v41 = vsel %vm632_vm2, %v3105_v22, %v3106_v56 }
 0x43e   : > { %7018 = vmatpush3.bf16.msra.mxu0 %v3336_v35  ;;  %v11560_v32 = vsel %vm632_vm2, %v3101_v57, %v3102_v36  ;;  %v11564_v35 = vsel %vm632_vm2, %v3102_v36, %v3103_v31  ;;  %v11573_v48 = vsel %vm632_vm2, %v3103_v31, %v3104_v63  ;;  %v11577_v57 = vsel %vm632_vm2, %v3104_v63, %v3105_v22  ;;  %v3355_v63 = vld [vmem:[#allocation2 + $0x140] sm:$0xff] }
 0x43f   : > { %7019 = vmatprep.subr.bf16.mxu0 %v3345_v45  ;;  %14226 = vst [vmem:[#allocation95_spill] sm:$0xff] %v11560_v32  ;;  %14227 = vst [vmem:[#allocation96_spill] sm:$0xff] %v11564_v35  ;;  %v3107_v45 = vrot.slane %v11134_v26, 1  ;;  %v3108_v32 = vrot.slane %v11136_v53, 1  ;;  %v3109_v36 = vrot.slane %v11146_v44, 1  ;;  %v3111_v31 = vrot.slane %v11158_v14, 1 }
 0x440   : > { %14228 = vst [vmem:[#allocation97_spill] sm:$0xff] %v11573_v48  ;;  %14229 = vst [vmem:[#allocation98_spill] sm:$0xff] %v11577_v57  ;;  %6950 = vmatpush3.bf16.msra.mxu1 %v3321_v7  ;;  %v3338_v48 = vld [vmem:[#allocation2 + $0xb8] sm:$0xff]  ;;  %v3110_v7 = vrot.slane %v11148_v52, 1  ;;  %v3371_v57 = vld [vmem:[#allocation2 + $0x1c0] sm:$0xff] }
 0x441   : > { %6951 = vmatprep.subr.bf16.mxu1 %v3330_v15  ;;  %v11596_v22 = vsel %vm632_vm2, %v3106_v56, %v3107_v45  ;;  %v11606_v15 = vsel %vm632_vm2, %v3107_v45, %v3108_v32 }
 0x442   : > { %7020 = vmatpush3.bf16.msra.mxu0 %v3337_v59  ;;  %14230 = vst [vmem:[#allocation77_spill] sm:$0xff] %v11606_v15  ;;  %v11620_v35 = vsel %vm632_vm2, %v3109_v36, %v3110_v7  ;;  %v11624_v45 = vsel %vm632_vm2, %v3110_v7, %v3111_v31  ;;  %v3112_v59 = vrot.slane %v11160_v50, 1  ;;  %v3347_v15 = vld [vmem:[#allocation2 + $0x100] sm:$0xff]  ;;  %v3114_v7 = vrot.slane %v11172_v29, 1 }
 0x443   : > { %7021 = vmatprep.subr.bf16.mxu0 %v3346_v6  ;;  %v11610_v6 = vsel %vm632_vm2, %v3108_v32, %v3109_v36  ;;  %14232 = vst [vmem:[#allocation76_spill] sm:$0xff] %v11620_v35  ;;  %v3356_v32 = vld [vmem:[#allocation2 + $0x148] sm:$0xff]  ;;  %v14233_v36 = vpack.c.bf16 %v11289_v55, %v11285_v30  ;;  %v3363_v35 = vld [vmem:[#allocation2 + $0x180] sm:$0xff]  ;;  %v14236_v55 = vrot.slane %v11086_v51, 1 }
 0x444   : > { %14231 = vst [vmem:[#allocation75_spill] sm:$0xff] %v11610_v6  ;;  %6952 = vmatpush3.bf16.msra.mxu1 %v3322_v13  ;;  %v3115_v13 = vrot.slane %v11182_v8, 1  ;;  %v11640_v56 = vsel %vm632_vm2, %v3111_v31, %v3112_v59  ;;  %v11657_v6 = vsel %vm632_vm2, %v3113_v37, %v3114_v7  ;;  %v3372_v30 = vld [vmem:[#allocation2 + $0x1c8] sm:$0xff] }
 0x445   : > { %7077 = vmatprep.subr.bf16.mxu1 %v3355_v63  ;;  %v11644_v63 = vsel %vm632_vm2, %v3112_v59, %v3113_v37  ;;  %v14234_v59 = vpack.c.bf16 %v11300_v43, %v11293_v21  ;;  %v14235_v37 = vpack.c.bf16 %v11325_v47, %v11300_v43  ;;  %v3349_v21 = vld [vmem:[#allocation2 + $0x110] sm:$0xff] }
 0x446   : > { %7022 = vmatpush3.bf16.msra.mxu0 %v3338_v48  ;;  %v14281_v43 = vld [vmem:[#allocation95_spill] sm:$0xff] }
 0x447   : > { %7147 = vmatprep.subr.bf16.mxu0 %v3371_v57  ;;  %v3116_v57 = vrot.slane %v11184_v40, 1  ;;  %3428 = vmatmul.mubr.bf16.vlgmr.msra.gmra.mrb[72].mxu1 %v14233_v36  ;;  %v11666_v36 = vsel %vm632_vm2, %v3114_v7, %v3115_v13 }
 0x448   : > { %7078 = vmatpush3.bf16.msra.mxu1 %v3347_v15  ;;  %3435 = vmatprep.mubr.bf16.mxu1 %v14234_v59  ;;  %v3348_v15 = vld [vmem:[#allocation2 + $0x108] sm:$0xff]  ;;  %v3373_v59 = vld [vmem:[#allocation2 + $0x1d0] sm:$0xff] }
 0x449   : > { %3533 = vmatmul.mubr.bf16.vlgmr.msra.gmra.mrb[108].mxu0 %v11268_v33  ;;  %v11670_v31 = vsel %vm632_vm2, %v3115_v13, %v3116_v57  ;;  %7079 = vmatprep.subr.bf16.mxu1 %v3356_v32  ;;  %v11683_v7 = vsel %vm632_vm2, %v3116_v57, %v14236_v55  ;;  %v3357_v13 = vld [vmem:[#allocation2 + $0x150] sm:$0xff]  ;;  %v14237_v57 = vpack.c.bf16 %v11316_v61, %v11307_v11  ;;  %v3182_v32 = vrot.slane %v11098_v10, 2  ;;  %v3350_v61 = vld [vmem:[#allocation2 + $0x118] sm:$0xff] }
 0x44a   : > { %3540 = vmatprep.mubr.bf16.mxu0 %v14235_v37  ;;  %7148 = vmatpush3.bf16.msra.mxu0 %v3363_v35  ;;  %v3364_v37 = vld [vmem:[#allocation2 + $0x188] sm:$0xff]  ;;  %v3358_v35 = vld [vmem:[#allocation2 + $0x158] sm:$0xff]  ;;  %v3365_v55 = vld [vmem:[#allocation2 + $0x190] sm:$0xff]  ;;  %v3183_v11 = vrot.slane %v11100_v34, 2 }
 0x44b   : > { %7149 = vmatprep.subr.bf16.mxu0 %v3372_v30  ;;  %v14238_v30 = vpack.c.bf16 %v11336_v58, %v11325_v47 }
 0x44c   : > { %7080 = vmatpush3.bf16.msra.mxu1 %v3348_v15  ;;  %v14239_v15 = vpack.c.bf16 %v11351_v25, %v11336_v58  ;;  %v11706_v47 = vsel %vm714_vm3, %v3182_v32, %v3183_v11 }
 0x44d   : > { %7081 = vmatprep.subr.bf16.mxu1 %v3357_v13  ;;  %v3374_v13 = vld [vmem:[#allocation2 + $0x1d8] sm:$0xff] }
 0x44e   : > { %7150 = vmatpush3.bf16.msra.mxu0 %v3364_v37  ;;  %v13908_v37 = vrot.slane %v11088_v12, 2 }
 0x44f   : > { %3436 = vmatmul.mubr.bf16.gmra.mrb[76].mxu1 %v14237_v57  ;;  %7151 = vmatprep.subr.bf16.mxu0 %v3373_v59  ;;  %v3359_v57 = vld [vmem:[#allocation2 + $0x160] sm:$0xff] }
 0x450   : > { %3443 = vmatprep.mubr.bf16.mxu1 %v14238_v30  ;;  %7082 = vmatpush3.bf16.msra.mxu1 %v3349_v21  ;;  %v11712_v58 = vsel %vm714_vm3, %v13908_v37, %v3182_v32  ;;  %v3366_v30 = vld [vmem:[#allocation2 + $0x198] sm:$0xff]  ;;  %v3351_v59 = vld [vmem:[#allocation2 + $0x120] sm:$0xff]  ;;  %v14242_v21 = vpack.c.bf16 %v11385_v23, %v11360_v16 }
 0x451   : > { %3541 = vmatmul.mubr.bf16.gmra.mrb[112].mxu0 %v11312_v20  ;;  %7083 = vmatprep.subr.bf16.mxu1 %v3358_v35  ;;  %v3375_v35 = vld [vmem:[#allocation2 + $0x1e0] sm:$0xff] }
 0x452   : > { %3548 = vmatprep.mubr.bf16.mxu0 %v14239_v15  ;;  %7152 = vmatpush3.bf16.msra.mxu0 %v3365_v55  ;;  %v14240_v55 = vpack.c.bf16 %v11340_v5, %v11347_v38  ;;  %v3360_v15 = vld [vmem:[#allocation2 + $0x168] sm:$0xff]  ;;  %v3367_v32 = vld [vmem:[#allocation2 + $0x1a0] sm:$0xff] }
 0x453   : > { %7153 = vmatprep.subr.bf16.mxu0 %v3374_v13  ;;  %v14241_v13 = vpack.c.bf16 %v11360_v16, %v11351_v25  ;;  %v3352_v5 = vld [vmem:[#allocation2 + $0x128] sm:$0xff]  ;;  %v3361_v16 = vld [vmem:[#allocation2 + $0x170] sm:$0xff] }
 0x454   : > { %7084 = vmatpush3.bf16.msra.mxu1 %v3350_v61  ;;  %v3376_v61 = vld [vmem:[#allocation2 + $0x1e8] sm:$0xff] }
 0x455   : > { %7085 = vmatprep.subr.bf16.mxu1 %v3359_v57  ;;  %v3184_v57 = vrot.slane %v11110_v3, 2 }
 0x456   : > { %7154 = vmatpush3.bf16.msra.mxu0 %v3366_v30  ;;  %v3185_v30 = vrot.slane %v11112_v39, 2 }
 0x457   : > { %3444 = vmatmul.mubr.bf16.gmra.mrb[80].mxu1 %v14240_v55  ;;  %7155 = vmatprep.subr.bf16.mxu0 %v3375_v35  ;;  %v11734_v25 = vsel %vm714_vm3, %v3183_v11, %v3184_v57  ;;  %v3377_v35 = vld [vmem:[#allocation2 + $0x1f0] sm:$0xff]  ;;  %v14271_v55 = vld [vmem:[#allocation79_spill] sm:$0xff] }
 0x458   : > { %3451 = vmatprep.mubr.bf16.mxu1 %v14241_v13  ;;  %7086 = vmatpush3.bf16.msra.mxu1 %v3351_v59  ;;  %v11730_v38 = vsel %vm714_vm3, %v3184_v57, %v3185_v30  ;;  %v3353_v59 = vld [vmem:[#allocation2 + $0x130] sm:$0xff]  ;;  %v14244_v13 = vpack.c.bf16 %v11396_v27, %v11385_v23  ;;  %v3378_v57 = vld [vmem:[#allocation2 + $0x1f8] sm:$0xff] }
 0x459   : > { %3549 = vmatmul.mubr.bf16.gmra.mrb[116].mxu0 %v11330_v19  ;;  %7087 = vmatprep.subr.bf16.mxu1 %v3360_v15  ;;  %v14243_v15 = vpack.c.bf16 %v11376_v42, %v11367_v24  ;;  %v3369_v11 = vld [vmem:[#allocation2 + $0x1b0] sm:$0xff]  ;;  %v3354_v24 = vld [vmem:[#allocation2 + $0x138] sm:$0xff] }
 0x45a   : > { %3556 = vmatprep.mubr.bf16.mxu0 %v14242_v21  ;;  %7156 = vmatpush3.bf16.msra.mxu0 %v3367_v32  ;;  %v3368_v21 = vld [vmem:[#allocation2 + $0x1a8] sm:$0xff]  ;;  %v3362_v32 = vld [vmem:[#allocation2 + $0x178] sm:$0xff] }
 0x45b   : > { %7157 = vmatprep.subr.bf16.mxu0 %v3376_v61  ;;  %v14245_v61 = vpack.c.bf16 %v11411_v1, %v11396_v27  ;;  %v3370_v27 = vld [vmem:[#allocation2 + $0x1b8] sm:$0xff] }
 0x45c   : > { %7088 = vmatpush3.bf16.msra.mxu1 %v3352_v5  ;;  %v3186_v5 = vrot.slane %v11122_v46, 2 }
 0x45d   : > { %7089 = vmatprep.subr.bf16.mxu1 %v3361_v16  ;;  %v3187_v16 = vrot.slane %v11124_v2, 2 }
 0x45e   : > { %7158 = vmatpush3.bf16.msra.mxu0 %v3368_v21  ;;  %v11756_v23 = vsel %vm714_vm3, %v3185_v30, %v3186_v5  ;;  %v14249_v30 = vpack.c.bf16 %v11445_v28, %v11420_v62 }
 0x45f   : > { %3452 = vmatmul.mubr.bf16.gmra.mrb[84].mxu1 %v14243_v15  ;;  %7159 = vmatprep.subr.bf16.mxu0 %v3377_v35  ;;  %v11752_v42 = vsel %vm714_vm3, %v3186_v5, %v3187_v16  ;;  %v14247_v35 = vpack.c.bf16 %v11400_v9, %v11407_v0  ;;  %v14248_v15 = vpack.c.bf16 %v11420_v62, %v11411_v1  ;;  %v14250_v0 = vld [vmem:[#allocation81_spill] sm:$0xff]  ;;  %v14253_v62 = vld [vmem:[#allocation80_spill] sm:$0xff]  ;;  %v14254_v5 = vld [vmem:[#allocation83_spill] sm:$0xff] }
 0x460   : > { %3459 = vmatprep.mubr.bf16.mxu1 %v14244_v13  ;;  %7090 = vmatpush3.bf16.msra.mxu1 %v3353_v59  ;;  %v14246_v59 = vmov 0.0  }
 0x461   : > { %3557 = vmatmul.mubr.bf16.gmra.mrb[120].mxu0 %v11372_v49  ;;  %7091 = vmatprep.subr.bf16.mxu1 %v3362_v32  ;;  %v3188_v32 = vrot.slane %v11134_v26, 2 }
 0x462   : > { %3564 = vmatprep.mubr.bf16.mxu0 %v14245_v61  ;;  %7160 = vmatpush3.bf16.msra.mxu0 %v3369_v11  ;;  %v3189_v11 = vrot.slane %v11136_v53, 2  ;;  %v14251_v61 = vld [vmem:[#allocation82_spill] sm:$0xff] }
 0x463   : > { %7161 = vmatprep.subr.bf16.mxu0 %v3378_v57  ;;  %v11779_v9 = vsel %vm714_vm3, %v3187_v16, %v3188_v32  ;;  %v14252_v57 = vpack.c.bf16 %v14250_v0, %v14251_v61  ;;  %v3190_v16 = vrot.slane %v11146_v44, 2  ;;  %v14258_v0 = vld [vmem:[#allocation88_spill] sm:$0xff]  ;;  %v14259_v61 = vld [vmem:[#allocation86_spill] sm:$0xff] }
 0x464   : > { %7092 = vmatpush3.bf16.msra.mxu1 %v3354_v24  ;;  %v11775_v13 = vsel %vm714_vm3, %v3188_v32, %v3189_v11  ;;  %v14255_v24 = vpack.c.bf16 %v14254_v5, %v11445_v28 }
 0x465   : > { %7499 = vmatprep.subr.bf16.mxu1 %v14246_v59  ;;  %v11801_v32 = vsel %vm714_vm3, %v3189_v11, %v3190_v16  ;;  %v3192_v11 = vrot.slane %v11158_v14, 2 }
 0x466   : > { %7162 = vmatpush3.bf16.msra.mxu0 %v3370_v27  ;;  %v14256_v27 = vld [vmem:[#allocation87_spill] sm:$0xff] }
 0x467   : > { %3460 = vmatmul.mubr.bf16.gmra.mrb[88].mxu1 %v14247_v35  ;;  %v14257_v35 = vpack.c.bf16 %v14256_v27, %v14254_v5  ;;  %v14261_v5 = vld [vmem:[#allocation78_spill] sm:$0xff] }
 0x468   : > { %3467 = vmatprep.mubr.bf16.mxu1 %v14248_v15  ;;  %v3191_v15 = vrot.slane %v11148_v52, 2 }
 0x469   : > { %3565 = vmatmul.mubr.bf16.gmra.mrb[124].mxu0 %v11390_v54 }
 0x46a   : > { %3572 = vmatprep.mubr.bf16.mxu0 %v14249_v30  ;;  %v11797_v30 = vsel %vm714_vm3, %v3190_v16, %v3191_v15  ;;  %v3193_v16 = vrot.slane %v11160_v50, 2 }
 0x46c   : > { %v11819_v28 = vsel %vm714_vm3, %v3192_v11, %v3193_v16 }
 0x46f   : > { %3468 = vmatmul.mubr.bf16.gmra.mrb[92].mxu1 %v14252_v57  ;;  %v14260_v57 = vpack.c.bf16 %v14258_v0, %v14259_v61  ;;  %v11823_v0 = vsel %vm714_vm3, %v3191_v15, %v3192_v11  ;;  %v14265_v61 = vld [vmem:[#allocation74_spill] sm:$0xff]  ;;  %v3194_v15 = vrot.slane %v11170_v18, 2  ;;  %v3195_v11 = vrot.slane %v11172_v29, 2 }
 0x470   : > { %3475 = vmatprep.mubr.bf16.mxu1 %v14255_v24  ;;  %v14262_v24 = vpack.c.bf16 %v11482_v17, %v14256_v27 }
 0x471   : > { %3573 = vmatmul.mubr.bf16.gmra.mrb[128].mxu0 %v14253_v62  ;;  %v11841_v27 = vsel %vm714_vm3, %v3194_v15, %v3195_v11 }
 0x472   : > { %3580 = vmatprep.mubr.bf16.mxu0 %v14257_v35  ;;  %v14263_v35 = vld [vmem:[#allocation91_spill] sm:$0xff]  ;;  %14273 = vst [vmem:[#allocation81_spill] sm:$0xff] %v11841_v27  ;;  %v14286_v27 = vld [vmem:[#allocation97_spill] sm:$0xff] }
 0x473   : > { %v14264_v1 = vpack.c.bf16 %v14263_v35, %v11482_v17  ;;  %v14268_v17 = vld [vmem:[#allocation84_spill] sm:$0xff] }
 0x477   : > { %3476 = vmatmul.mubr.bf16.gmra.mrb[96].mxu1 %v14260_v57  ;;  %v14266_v57 = vld [vmem:[#allocation90_spill] sm:$0xff] }
 0x478   : > { %3483 = vmatprep.mubr.bf16.mxu1 %v14262_v24  ;;  %v14267_v24 = vpack.c.bf16 %v14265_v61, %v14266_v57  ;;  %v11845_v61 = vsel %vm714_vm3, %v3193_v16, %v3194_v15  ;;  %v14276_v57 = vld [vmem:[#allocation93_spill] sm:$0xff]  ;;  %v3196_v16 = vrot.slane %v11182_v8, 2  ;;  %v3197_v15 = vrot.slane %v11184_v40, 2 }
 0x479   : > { %3581 = vmatmul.mubr.bf16.gmra.mrb[132].mxu0 %v14261_v5  ;;  %14274 = vst [vmem:[#allocation82_spill] sm:$0xff] %v11845_v61  ;;  %v3180_v61 = vrot.slane %v11086_v51, 2 }
 0x47a   : > { %3588 = vmatprep.mubr.bf16.mxu0 %v14264_v1  ;;  %v14269_v1 = vld [vmem:[#allocation85_spill] sm:$0xff] }
 0x47b   : > { %v14270_v21 = vpack.c.bf16 %v14269_v1, %v14263_v35  ;;  %v14272_v48 = vpack.c.bf16 %v14271_v55, %v14269_v1  ;;  %v14279_v55 = vld [vmem:[#allocation94_spill] sm:$0xff]  ;;  %v11863_v35 = vsel %vm714_vm3, %v3196_v16, %v3197_v15 }
 0x47c   : > { %v14280_v1 = vpack.c.bf16 %v14279_v55, %v11542_v4  ;;  %v14282_v37 = vpack.c.bf16 %v14281_v43, %v14279_v55  ;;  %v14283_v55 = vpack.c.bf16 %v11088_v12, %v11086_v51 }
 0x47f   : > { %3484 = vmatmul.mubr.bf16.gmra.mrb[100].mxu1 %v14267_v24 }
 0x480   : > { %3491 = vmatprep.mubr.bf16.mxu1 %v14270_v21  ;;  %v14275_v21 = vld [vmem:[#allocation92_spill] sm:$0xff] }
 0x481   : > { %3589 = vmatmul.mubr.bf16.gmra.mrb[136].mxu0 %v14268_v17  ;;  %v14277_v24 = vpack.c.bf16 %v14275_v21, %v14276_v57  ;;  %v11867_v21 = vsel %vm714_vm3, %v3195_v11, %v3196_v16  ;;  %v3380_v16 = vld [vmem:[#allocation2 + $0x208] sm:$0xff]  ;;  %v14288_v57 = vrot.slane %v11088_v12, 2  ;;  %v14290_v12 = vld [vmem:[#allocation98_spill] sm:$0xff] }
 0x482   : > { %3596 = vmatprep.mubr.bf16.mxu0 %v14272_v48  ;;  %v14278_v48 = vld [vmem:[#allocation89_spill] sm:$0xff] }
 0x487   : > { %3492 = vmatmul.mubr.bf16.gmra.mrb[104].mxu1 %v14277_v24  ;;  %v3379_v24 = vld [vmem:[#allocation2 + $0x200] sm:$0xff] }
 0x488   : > { %3637 = vmatprep.mubr.bf16.mxu1 %v14280_v1 }
 0x489   : > { %3597 = vmatmul.mubr.bf16.gmra.mrb[140].mxu0 %v14278_v48 }
 0x48a   : > { %3742 = vmatprep.mubr.bf16.mxu0 %v14282_v37  ;;  %v14284_v37 = vld [vmem:[#allocation96_spill] sm:$0xff] }
 0x48b   : > { %v14285_v1 = vpack.c.bf16 %v14284_v37, %v14281_v43  ;;  %v14287_v11 = vpack.c.bf16 %v14286_v27, %v14284_v37  ;;  %v3381_v43 = vld [vmem:[#allocation2 + $0x210] sm:$0xff]  ;;  %v3383_v37 = vld [vmem:[#allocation2 + $0x220] sm:$0xff] }
 0x48f   : > { %3638 = vmatmul.mubr.bf16.vlgmr.msra.gmra.mrb[108].mxu1 %v14283_v55  ;;  %v11887_v55 = vsel %vm714_vm3, %v3180_v61, %v14288_v57  ;;  %v14291_v57 = vpack.c.bf16 %v14290_v12, %v14286_v27 }
 0x490   : > { %7500 = vmatpush3.bf16.msra.mxu1 %v3379_v24  ;;  %3645 = vmatprep.mubr.bf16.mxu1 %v14285_v1  ;;  %v14289_v24 = vpack.c.bf16 %v11100_v34, %v11098_v10  ;;  %v14293_v10 = vpack.c.bf16 %v11112_v39, %v11110_v3  ;;  %v14294_v34 = vpack.c.bf16 %v11596_v22, %v11585_v41  ;;  %v3384_v1 = vld [vmem:[#allocation2 + $0x228] sm:$0xff] }
 0x491   : > { %3743 = vmatmul.mubr.bf16.vlgmr.msra.gmra.mrb[144].mxu0 %v11312_v20  ;;  %7501 = vmatprep.subr.bf16.mxu1 %v14246_v59  ;;  %v11891_v20 = vsel %vm714_vm3, %v3197_v15, %v3180_v61  ;;  %v14292_v61 = vpack.c.bf16 %v11585_v41, %v14290_v12  ;;  %v3382_v15 = vld [vmem:[#allocation2 + $0x218] sm:$0xff]  ;;  %v14297_v3 = vpack.c.bf16 %v11124_v2, %v11122_v46  ;;  %v14298_v39 = vld [vmem:[#allocation75_spill] sm:$0xff]  ;;  %v14300_v41 = vld [vmem:[#allocation76_spill] sm:$0xff] }
 0x492   : > { %3750 = vmatprep.mubr.bf16.mxu0 %v14287_v11  ;;  %v3224_v51 = vpack.c.bf16 %v11887_v55, %v11891_v20  ;;  %v3385_v11 = vld [vmem:[#allocation2 + $0x230] sm:$0xff]  ;;  %v14303_v46 = vpack.c.bf16 %v11624_v45, %v14300_v41  ;;  %v14304_v2 = vpack.c.bf16 %v11640_v56, %v11624_v45 }
 0x493   : > { %v14321_v45 = vld [vmem:[#allocation81_spill] sm:$0xff] }
 0x494   : > { %7502 = vmatpush3.bf16.msra.mxu1 %v3380_v16  ;;  %v3386_v16 = vld [vmem:[#allocation2 + $0x238] sm:$0xff] }
 0x495   : > { %7503 = vmatprep.subr.bf16.mxu1 %v14246_v59 }
 0x497   : > { %3646 = vmatmul.mubr.bf16.gmra.mrb[112].mxu1 %v14289_v24 }
 0x498   : > { %3653 = vmatprep.mubr.bf16.mxu1 %v14291_v57  ;;  %7504 = vmatpush3.bf16.msra.mxu1 %v3381_v43  ;;  %v14302_v43 = vpack.c.bf16 %v11136_v53, %v11134_v26  ;;  %v14306_v26 = vpack.c.bf16 %v11644_v63, %v11640_v56  ;;  %v14307_v53 = vpack.c.bf16 %v11657_v6, %v11644_v63  ;;  %v14322_v63 = vld [vmem:[#allocation82_spill] sm:$0xff] }
 0x499   : > { %3751 = vmatmul.mubr.bf16.gmra.mrb[148].mxu0 %v11330_v19  ;;  %7505 = vmatprep.subr.bf16.mxu1 %v14246_v59  ;;  %v14295_v19 = vld [vmem:[#allocation77_spill] sm:$0xff]  ;;  %v14311_v56 = vpack.c.bf16 %v11172_v29, %v11170_v18  ;;  %v14315_v18 = vpack.c.bf16 %v11706_v47, %v11712_v58  ;;  %v14316_v29 = vpack.c.bf16 %v11730_v38, %v11734_v25  ;;  %v12021_v58 = vld [vmem:[%s10965_s18 + $0x2] ss:$0 sm:$0xff] }
 0x49a   : > { %3758 = vmatprep.mubr.bf16.mxu0 %v14292_v61  ;;  %v14296_v27 = vpack.c.bf16 %v14295_v19, %v11596_v22  ;;  %v14301_v22 = vpack.c.bf16 %v14300_v41, %v14298_v39 }
 0x49c   : > { %7506 = vmatpush3.bf16.msra.mxu1 %v3382_v15 }
 0x49d   : > { %7507 = vmatprep.subr.bf16.mxu1 %v14246_v59 }
 0x49f   : > { %3654 = vmatmul.mubr.bf16.gmra.mrb[116].mxu1 %v14293_v10 }
 0x4a0   : > { %3661 = vmatprep.mubr.bf16.mxu1 %v14294_v34  ;;  %7508 = vmatpush3.bf16.msra.mxu1 %v3383_v37 }
 0x4a1   : > { %3759 = vmatmul.mubr.bf16.gmra.mrb[152].mxu0 %v11372_v49  ;;  %7509 = vmatprep.subr.bf16.mxu1 %v14246_v59  ;;  %v14299_v49 = vpack.c.bf16 %v14298_v39, %v14295_v19 }
 0x4a2   : > { %3766 = vmatprep.mubr.bf16.mxu0 %v14296_v27 }
 0x4a4   : > { %7510 = vmatpush3.bf16.msra.mxu1 %v3384_v1 }
 0x4a5   : > { %7511 = vmatprep.subr.bf16.mxu1 %v14246_v59 }
 0x4a7   : > { %3662 = vmatmul.mubr.bf16.gmra.mrb[120].mxu1 %v14297_v3 }
 0x4a8   : > { %3669 = vmatprep.mubr.bf16.mxu1 %v14299_v49  ;;  %7512 = vmatpush3.bf16.msra.mxu1 %v3385_v11 }
 0x4a9   : > { %3767 = vmatmul.mubr.bf16.gmra.mrb[156].mxu0 %v11390_v54  ;;  %7513 = vmatprep.subr.bf16.mxu1 %v14246_v59  ;;  %v14305_v54 = vpack.c.bf16 %v11148_v52, %v11146_v44  ;;  %v14309_v44 = vpack.c.bf16 %v11666_v36, %v11657_v6  ;;  %v14310_v52 = vpack.c.bf16 %v11670_v31, %v11666_v36 }
 0x4aa   : > { %3774 = vmatprep.mubr.bf16.mxu0 %v14301_v22  ;;  %v14314_v6 = vpack.c.bf16 %v11184_v40, %v11182_v8  ;;  %v14317_v8 = vpack.c.bf16 %v11752_v42, %v11756_v23  ;;  %v14318_v40 = vpack.c.bf16 %v11775_v13, %v11779_v9  ;;  %v14324_v36 = vpack.c.bf16 %v11863_v35, %v11867_v21 }
 0x4ac   : > { %7514 = vmatpush3.bf16.msra.mxu1 %v3386_v16 }
 0x4af   : > { %3670 = vmatmul.mubr.bf16.gmra.mrb[124].mxu1 %v14302_v43 }
 0x4b0   : > { %3677 = vmatprep.mubr.bf16.mxu1 %v14303_v46 }
 0x4b1   : > { %3775 = vmatmul.mubr.bf16.gmra.mrb[160].mxu0 %v14253_v62  ;;  %v14308_v62 = vpack.c.bf16 %v11160_v50, %v11158_v14  ;;  %v14312_v14 = vpack.c.bf16 %v11683_v7, %v11670_v31  ;;  %v14313_v50 = vpack.c.bf16 %v11542_v4, %v11683_v7  ;;  %v14320_v4 = vpack.c.bf16 %v11819_v28, %v11823_v0 }
 0x4b2   : > { %3782 = vmatprep.mubr.bf16.mxu0 %v14304_v2  ;;  %v14323_v31 = vpack.c.bf16 %v14321_v45, %v14322_v63 }
 0x4b7   : > { %3678 = vmatmul.mubr.bf16.gmra.mrb[128].mxu1 %v14305_v54 }
 0x4b8   : > { %3685 = vmatprep.mubr.bf16.mxu1 %v14306_v26 }
 0x4b9   : > { %3783 = vmatmul.mubr.bf16.gmra.mrb[164].mxu0 %v14261_v5 }
 0x4ba   : > { %3790 = vmatprep.mubr.bf16.mxu0 %v14307_v53 }
 0x4bf   : > { %3686 = vmatmul.mubr.bf16.gmra.mrb[132].mxu1 %v14308_v62 }
 0x4c0   : > { %3693 = vmatprep.mubr.bf16.mxu1 %v14309_v44 }
 0x4c1   : > { %3791 = vmatmul.mubr.bf16.gmra.mrb[168].mxu0 %v14268_v17 }
 0x4c2   : > { %3798 = vmatprep.mubr.bf16.mxu0 %v14310_v52 }
 0x4c7   : > { %3694 = vmatmul.mubr.bf16.gmra.mrb[136].mxu1 %v14311_v56 }
 0x4c8   : > { %3701 = vmatprep.mubr.bf16.mxu1 %v14312_v14 }
 0x4c9   : > { %3799 = vmatmul.mubr.bf16.gmra.mrb[172].mxu0 %v14278_v48 }
 0x4ca   : > { %3806 = vmatprep.mubr.bf16.mxu0 %v14313_v50 }
 0x4cf   : > { %3702 = vmatmul.mubr.bf16.gmra.mrb[140].mxu1 %v14314_v6 }
 0x4d0   : > { %7515 = vmatprep.mubr.msk.bf16.mxu1 %vm8418_vm5, %v14246_v59 }
 0x4d1   : > { %3807 = vmatmul.mubr.bf16.gmra.mrb[176].mxu0 %v11268_v33  ;;  %v14319_v33 = vpack.c.bf16 %v11797_v30, %v11801_v32 }
 0x4d7   : > { %7516 = vmatmul.mubr.bf16.vlgmr.msra.gmra.mrb[144].mxu1 %v14315_v18 }
 0x4d8   : > { %7519 = vmatprep.mubr.msk.bf16.mxu1 %vm8418_vm5, %v14246_v59 }
 0x4df   : > { %7520 = vmatmul.mubr.bf16.gmra.mrb[148].mxu1 %v14316_v29 }
 0x4e0   : > { %7523 = vmatprep.mubr.msk.bf16.mxu1 %vm8418_vm5, %v14246_v59 }
 0x4e7   : > { %7524 = vmatmul.mubr.bf16.gmra.mrb[152].mxu1 %v14317_v8 }
 0x4e8   : > { %7527 = vmatprep.mubr.msk.bf16.mxu1 %vm8418_vm5, %v14246_v59 }
 0x4ef   : > { %7528 = vmatmul.mubr.bf16.gmra.mrb[156].mxu1 %v14318_v40 }
 0x4f0   : > { %7531 = vmatprep.mubr.msk.bf16.mxu1 %vm8418_vm5, %v14246_v59 }
 0x4f7   : > { %7532 = vmatmul.mubr.bf16.gmra.mrb[160].mxu1 %v14319_v33 }
 0x4f8   : > { %7535 = vmatprep.mubr.msk.bf16.mxu1 %vm8418_vm5, %v14246_v59 }
 0x4ff   : > { %7536 = vmatmul.mubr.bf16.gmra.mrb[164].mxu1 %v14320_v4 }
 0x500   : > { %7539 = vmatprep.mubr.msk.bf16.mxu1 %vm8418_vm5, %v14246_v59 }
 0x507   : > { %7540 = vmatmul.mubr.bf16.gmra.mrb[168].mxu1 %v14323_v31 }
 0x508   : > { %7543 = vmatprep.mubr.msk.bf16.mxu1 %vm8418_vm5, %v14246_v59 }
 0x50f   : > { %7544 = vmatmul.mubr.bf16.gmra.mrb[172].mxu1 %v14324_v36 }
 0x510   : > { %7547 = vmatprep.mubr.msk.bf16.mxu1 %vm8418_vm5, %v14246_v59 }
 0x517   : > { %7548 = vmatmul.mubr.bf16.gmra.mrb[176].mxu1 %v3224_v51 }
 0x51a   : > { %v6953_v7 = vpop.f32.mrb[72].mxu1 }
 0x51b   : > { %v6954_v38 = vpop.f32.mrb[73].mxu1 }
 0x51c   : > { %v7023_v47 = vpop.f32.mrb[108].mxu0  ;;  %v6955_v42 = vadd.f32 %v6954_v38, %v6953_v7  ;;  %v6956_v23 = vpop.f32.mrb[74].mxu1 }
 0x51d   : > { %v7024_v25 = vpop.f32.mrb[109].mxu0  ;;  %v6957_v30 = vpop.f32.mrb[75].mxu1 }
 0x51e   : > { %v7025_v13 = vadd.f32 %v7024_v25, %v7023_v47  ;;  %v7026_v9 = vpop.f32.mrb[110].mxu0  ;;  %v3430_v28 = vadd.f32 %v6955_v42, %v12021_v58  ;;  %v6958_v5 = vadd.f32 %v6957_v30, %v6956_v23 }
 0x51f   : > { %v7027_v32 = vpop.f32.mrb[111].mxu0 }
 0x520   : > { %v7028_v59 = vadd.f32 %v7027_v32, %v7026_v9  ;;  %v3433_v0 = vadd.f32 %v6958_v5, %v12021_v58  ;;  %v12025_v17 = vadd.f32 %v7025_v13, %v3430_v28 }
 0x522   : > { %v12027_v35 = vadd.f32 %v7028_v59, %v3433_v0  ;;  %v6959_v48 = vpop.f32.mrb[76].mxu1 }
 0x523   : > { %v6960_v55 = vpop.f32.mrb[77].mxu1 }
 0x524   : > { %v7029_v21 = vpop.f32.mrb[112].mxu0  ;;  %v6961_v51 = vadd.f32 %v6960_v55, %v6959_v48  ;;  %v6962_v24 = vpop.f32.mrb[78].mxu1 }
 0x525   : > { %v7030_v20 = vpop.f32.mrb[113].mxu0  ;;  %v6963_v61 = vpop.f32.mrb[79].mxu1 }
 0x526   : > { %v7031_v12 = vadd.f32 %v7030_v20, %v7029_v21  ;;  %v7032_v57 = vpop.f32.mrb[114].mxu0  ;;  %v3438_v37 = vadd.f32 %v6961_v51, %v12021_v58  ;;  %v6964_v10 = vadd.f32 %v6963_v61, %v6962_v24 }
 0x527   : > { %v7033_v15 = vpop.f32.mrb[115].mxu0 }
 0x528   : > { %v7034_v34 = vadd.f32 %v7033_v15, %v7032_v57  ;;  %v3441_v19 = vadd.f32 %v6964_v10, %v12021_v58  ;;  %v12031_v27 = vadd.f32 %v7031_v12, %v3438_v37 }
 0x52a   : > { %v12033_v1 = vadd.f32 %v7034_v34, %v3441_v19  ;;  %v6965_v11 = vpop.f32.mrb[80].mxu1 }
 0x52b   : > { %v6966_v39 = vpop.f32.mrb[81].mxu1 }
 0x52c   : > { %v7035_v3 = vpop.f32.mrb[116].mxu0  ;;  %v6967_v41 = vadd.f32 %v6966_v39, %v6965_v11  ;;  %v6968_v22 = vpop.f32.mrb[82].mxu1 }
 0x52d   : > { %v7036_v49 = vpop.f32.mrb[117].mxu0  ;;  %v6969_v46 = vpop.f32.mrb[83].mxu1 }
 0x52e   : > { %v7037_v16 = vadd.f32 %v7036_v49, %v7035_v3  ;;  %v7038_v43 = vpop.f32.mrb[118].mxu0  ;;  %v3446_v54 = vadd.f32 %v6967_v41, %v12021_v58  ;;  %v6970_v26 = vadd.f32 %v6969_v46, %v6968_v22 }
 0x52f   : > { %v7039_v2 = vpop.f32.mrb[119].mxu0 }
 0x530   : > { %v7040_v53 = vadd.f32 %v7039_v2, %v7038_v43  ;;  %v3449_v62 = vadd.f32 %v6970_v26, %v12021_v58  ;;  %v12037_v44 = vadd.f32 %v7037_v16, %v3446_v54 }
 0x532   : > { %v12039_v52 = vadd.f32 %v7040_v53, %v3449_v62  ;;  %v6971_v56 = vpop.f32.mrb[84].mxu1 }
 0x533   : > { %v6972_v50 = vpop.f32.mrb[85].mxu1 }
 0x534   : > { %v7041_v14 = vpop.f32.mrb[120].mxu0  ;;  %v6973_v18 = vadd.f32 %v6972_v50, %v6971_v56  ;;  %v6974_v29 = vpop.f32.mrb[86].mxu1 }
 0x535   : > { %v7042_v6 = vpop.f32.mrb[121].mxu0  ;;  %v6975_v33 = vpop.f32.mrb[87].mxu1 }
 0x536   : > { %v7043_v8 = vadd.f32 %v7042_v6, %v7041_v14  ;;  %v7044_v40 = vpop.f32.mrb[122].mxu0  ;;  %v3454_v45 = vadd.f32 %v6973_v18, %v12021_v58  ;;  %v6976_v63 = vadd.f32 %v6975_v33, %v6974_v29 }
 0x537   : > { %v7045_v4 = vpop.f32.mrb[123].mxu0 }
 0x538   : > { %v7046_v31 = vadd.f32 %v7045_v4, %v7044_v40  ;;  %v3457_v36 = vadd.f32 %v6976_v63, %v12021_v58  ;;  %v12043_v7 = vadd.f32 %v7043_v8, %v3454_v45 }
 0x53a   : > { %v12045_v47 = vadd.f32 %v7046_v31, %v3457_v36  ;;  %v6977_v38 = vpop.f32.mrb[88].mxu1 }
 0x53b   : > { %v6978_v42 = vpop.f32.mrb[89].mxu1 }
 0x53c   : > { %v7047_v25 = vpop.f32.mrb[124].mxu0  ;;  %v6979_v13 = vadd.f32 %v6978_v42, %v6977_v38  ;;  %v6980_v9 = vpop.f32.mrb[90].mxu1 }
 0x53d   : > { %v7048_v23 = vpop.f32.mrb[125].mxu0  ;;  %v6981_v28 = vpop.f32.mrb[91].mxu1 }
 0x53e   : > { %v7049_v30 = vadd.f32 %v7048_v23, %v7047_v25  ;;  %v7050_v32 = vpop.f32.mrb[126].mxu0  ;;  %v3462_v59 = vadd.f32 %v6979_v13, %v12021_v58  ;;  %v6982_v0 = vadd.f32 %v6981_v28, %v6980_v9 }
 0x53f   : > { %v7051_v5 = vpop.f32.mrb[127].mxu0 }
 0x540   : > { %v7052_v48 = vadd.f32 %v7051_v5, %v7050_v32  ;;  %v3465_v21 = vadd.f32 %v6982_v0, %v12021_v58  ;;  %v12049_v55 = vadd.f32 %v7049_v30, %v3462_v59 }
 0x542   : > { %v12051_v20 = vadd.f32 %v7052_v48, %v3465_v21  ;;  %v6983_v51 = vpop.f32.mrb[92].mxu1 }
 0x543   : > { %v6984_v12 = vpop.f32.mrb[93].mxu1 }
 0x544   : > { %v7053_v24 = vpop.f32.mrb[128].mxu0  ;;  %v6985_v61 = vadd.f32 %v6984_v12, %v6983_v51  ;;  %v6986_v15 = vpop.f32.mrb[94].mxu1 }
 0x545   : > { %v7054_v57 = vpop.f32.mrb[129].mxu0  ;;  %v6987_v34 = vpop.f32.mrb[95].mxu1 }
 0x546   : > { %v7055_v37 = vadd.f32 %v7054_v57, %v7053_v24  ;;  %v7056_v10 = vpop.f32.mrb[130].mxu0  ;;  %v3470_v11 = vadd.f32 %v6985_v61, %v12021_v58  ;;  %v6988_v3 = vadd.f32 %v6987_v34, %v6986_v15 }
 0x547   : > { %v7057_v19 = vpop.f32.mrb[131].mxu0 }
 0x548   : > { %v7058_v39 = vadd.f32 %v7057_v19, %v7056_v10  ;;  %v3473_v49 = vadd.f32 %v6988_v3, %v12021_v58  ;;  %v12055_v41 = vadd.f32 %v7055_v37, %v3470_v11 }
 0x54a   : > { %v12057_v22 = vadd.f32 %v7058_v39, %v3473_v49  ;;  %v6989_v16 = vpop.f32.mrb[96].mxu1 }
 0x54b   : > { %v6990_v46 = vpop.f32.mrb[97].mxu1 }
 0x54c   : > { %v7059_v43 = vpop.f32.mrb[132].mxu0  ;;  %v6991_v54 = vadd.f32 %v6990_v46, %v6989_v16  ;;  %v6992_v26 = vpop.f32.mrb[98].mxu1 }
 0x54d   : > { %v7060_v2 = vpop.f32.mrb[133].mxu0  ;;  %v6993_v56 = vpop.f32.mrb[99].mxu1 }
 0x54e   : > { %v7061_v53 = vadd.f32 %v7060_v2, %v7059_v43  ;;  %v7062_v62 = vpop.f32.mrb[134].mxu0  ;;  %v3478_v50 = vadd.f32 %v6991_v54, %v12021_v58  ;;  %v6994_v6 = vadd.f32 %v6993_v56, %v6992_v26 }
 0x54f   : > { %v7063_v14 = vpop.f32.mrb[135].mxu0 }
 0x550   : > { %v7064_v18 = vadd.f32 %v7063_v14, %v7062_v62  ;;  %v3481_v29 = vadd.f32 %v6994_v6, %v12021_v58  ;;  %v12061_v8 = vadd.f32 %v7061_v53, %v3478_v50 }
 0x552   : > { %v12063_v40 = vadd.f32 %v7064_v18, %v3481_v29  ;;  %v6995_v33 = vpop.f32.mrb[100].mxu1 }
 0x553   : > { %v6996_v45 = vpop.f32.mrb[101].mxu1 }
 0x554   : > { %v7065_v4 = vpop.f32.mrb[136].mxu0  ;;  %v6997_v31 = vadd.f32 %v6996_v45, %v6995_v33  ;;  %v6998_v36 = vpop.f32.mrb[102].mxu1 }
 0x555   : > { %v7066_v63 = vpop.f32.mrb[137].mxu0  ;;  %v6999_v42 = vpop.f32.mrb[103].mxu1 }
 0x556   : > { %v7067_v38 = vadd.f32 %v7066_v63, %v7065_v4  ;;  %v7068_v25 = vpop.f32.mrb[138].mxu0  ;;  %v3486_v13 = vadd.f32 %v6997_v31, %v12021_v58  ;;  %v7000_v9 = vadd.f32 %v6999_v42, %v6998_v36 }
 0x557   : > { %v7069_v23 = vpop.f32.mrb[139].mxu0 }
 0x558   : > { %v7070_v30 = vadd.f32 %v7069_v23, %v7068_v25  ;;  %v3489_v32 = vadd.f32 %v7000_v9, %v12021_v58  ;;  %v12067_v28 = vadd.f32 %v7067_v38, %v3486_v13 }
 0x55a   : > { %v12069_v5 = vadd.f32 %v7070_v30, %v3489_v32  ;;  %v7001_v59 = vpop.f32.mrb[104].mxu1 }
 0x55b   : > { %v7002_v48 = vpop.f32.mrb[105].mxu1 }
 0x55c   : > { %v7071_v0 = vpop.f32.mrb[140].mxu0  ;;  %v7003_v51 = vadd.f32 %v7002_v48, %v7001_v59  ;;  %v7004_v24 = vpop.f32.mrb[106].mxu1 }
 0x55d   : > { %v7072_v21 = vpop.f32.mrb[141].mxu0  ;;  %v7005_v61 = vpop.f32.mrb[107].mxu1 }
 0x55e   : > { %v7073_v12 = vadd.f32 %v7072_v21, %v7071_v0  ;;  %v7074_v57 = vpop.f32.mrb[142].mxu0  ;;  %v3494_v37 = vadd.f32 %v7003_v51, %v12021_v58  ;;  %v7006_v10 = vadd.f32 %v7005_v61, %v7004_v24 }
 0x55f   : > { %v7075_v15 = vpop.f32.mrb[143].mxu0 }
 0x560   : > { %v7076_v34 = vadd.f32 %v7075_v15, %v7074_v57  ;;  %v3497_v19 = vadd.f32 %v7006_v10, %v12021_v58  ;;  %v12073_v11 = vadd.f32 %v7073_v12, %v3494_v37 }
 0x562   : > { %v12075_v3 = vadd.f32 %v7076_v34, %v3497_v19  ;;  %v7093_v39 = vpop.f32.mrb[108].mxu1 }
 0x563   : > { %v7094_v16 = vpop.f32.mrb[109].mxu1 }
 0x564   : > { %v7163_v49 = vpop.f32.mrb[144].mxu0  ;;  %v7095_v46 = vadd.f32 %v7094_v16, %v7093_v39  ;;  %v7096_v2 = vpop.f32.mrb[110].mxu1 }
 0x565   : > { %v7164_v43 = vpop.f32.mrb[145].mxu0  ;;  %v7097_v53 = vpop.f32.mrb[111].mxu1 }
 0x566   : > { %v7165_v54 = vadd.f32 %v7164_v43, %v7163_v49  ;;  %v7166_v26 = vpop.f32.mrb[146].mxu0  ;;  %v3640_v56 = vadd.f32 %v7095_v46, %v12025_v17  ;;  %v7098_v14 = vadd.f32 %v7097_v53, %v7096_v2 }
 0x567   : > { %v7167_v62 = vpop.f32.mrb[147].mxu0 }
 0x568   : > { %v7168_v50 = vadd.f32 %v7167_v62, %v7166_v26  ;;  %v3643_v58 = vadd.f32 %v7098_v14, %v12027_v35  ;;  %v12079_v6 = vadd.f32 %v7165_v54, %v3640_v56 }
 0x56a   : > { %v7099_v18 = vpop.f32.mrb[112].mxu1  ;;  %v12081_v33 = vadd.f32 %v7168_v50, %v3643_v58 }
 0x56b   : > { %v7100_v4 = vpop.f32.mrb[113].mxu1 }
 0x56c   : > { %v7169_v29 = vpop.f32.mrb[148].mxu0  ;;  %v7101_v63 = vadd.f32 %v7100_v4, %v7099_v18  ;;  %v7102_v31 = vpop.f32.mrb[114].mxu1 }
 0x56d   : > { %v7170_v45 = vpop.f32.mrb[149].mxu0  ;;  %v7103_v25 = vpop.f32.mrb[115].mxu1 }
 0x56e   : > { %v7171_v36 = vadd.f32 %v7170_v45, %v7169_v29  ;;  %v7172_v38 = vpop.f32.mrb[150].mxu0  ;;  %v3648_v17 = vadd.f32 %v7101_v63, %v12031_v27  ;;  %v7104_v23 = vadd.f32 %v7103_v25, %v7102_v31 }
 0x56f   : > { %v7173_v42 = vpop.f32.mrb[151].mxu0 }
 0x570   : > { %v7174_v13 = vadd.f32 %v7173_v42, %v7172_v38  ;;  %v3651_v35 = vadd.f32 %v7104_v23, %v12033_v1  ;;  %v12085_v9 = vadd.f32 %v7171_v36, %v3648_v17 }
 0x572   : > { %v7105_v30 = vpop.f32.mrb[116].mxu1  ;;  %v12087_v59 = vadd.f32 %v7174_v13, %v3651_v35 }
 0x573   : > { %v7106_v0 = vpop.f32.mrb[117].mxu1 }
 0x574   : > { %v7175_v32 = vpop.f32.mrb[152].mxu0  ;;  %v7107_v21 = vadd.f32 %v7106_v0, %v7105_v30  ;;  %v7108_v51 = vpop.f32.mrb[118].mxu1 }
 0x575   : > { %v7176_v48 = vpop.f32.mrb[153].mxu0  ;;  %v7109_v57 = vpop.f32.mrb[119].mxu1 }
 0x576   : > { %v7177_v24 = vadd.f32 %v7176_v48, %v7175_v32  ;;  %v7178_v12 = vpop.f32.mrb[154].mxu0  ;;  %v3656_v27 = vadd.f32 %v7107_v21, %v12037_v44  ;;  %v7110_v15 = vadd.f32 %v7109_v57, %v7108_v51 }
 0x577   : > { %v7179_v61 = vpop.f32.mrb[155].mxu0 }
 0x578   : > { %v7180_v37 = vadd.f32 %v7179_v61, %v7178_v12  ;;  %v3659_v1 = vadd.f32 %v7110_v15, %v12039_v52  ;;  %v12091_v10 = vadd.f32 %v7177_v24, %v3656_v27 }
 0x57a   : > { %v7111_v34 = vpop.f32.mrb[120].mxu1  ;;  %v12093_v39 = vadd.f32 %v7180_v37, %v3659_v1 }
 0x57b   : > { %v7112_v49 = vpop.f32.mrb[121].mxu1 }
 0x57c   : > { %v7181_v19 = vpop.f32.mrb[156].mxu0  ;;  %v7113_v43 = vadd.f32 %v7112_v49, %v7111_v34  ;;  %v7114_v46 = vpop.f32.mrb[122].mxu1 }
 0x57d   : > { %v7182_v16 = vpop.f32.mrb[157].mxu0  ;;  %v7115_v26 = vpop.f32.mrb[123].mxu1 }
 0x57e   : > { %v7183_v2 = vadd.f32 %v7182_v16, %v7181_v19  ;;  %v7184_v54 = vpop.f32.mrb[158].mxu0  ;;  %v3664_v44 = vadd.f32 %v7113_v43, %v12043_v7  ;;  %v7116_v62 = vadd.f32 %v7115_v26, %v7114_v46 }
 0x57f   : > { %v7185_v53 = vpop.f32.mrb[159].mxu0 }
 0x580   : > { %v7186_v56 = vadd.f32 %v7185_v53, %v7184_v54  ;;  %v3667_v52 = vadd.f32 %v7116_v62, %v12045_v47  ;;  %v12097_v14 = vadd.f32 %v7183_v2, %v3664_v44 }
 0x582   : > { %v7117_v50 = vpop.f32.mrb[124].mxu1  ;;  %v12099_v18 = vadd.f32 %v7186_v56, %v3667_v52 }
 0x583   : > { %v7118_v29 = vpop.f32.mrb[125].mxu1 }
 0x584   : > { %v7187_v58 = vpop.f32.mrb[160].mxu0  ;;  %v7119_v45 = vadd.f32 %v7118_v29, %v7117_v50  ;;  %v7120_v63 = vpop.f32.mrb[126].mxu1 }
 0x585   : > { %v7188_v4 = vpop.f32.mrb[161].mxu0  ;;  %v7121_v38 = vpop.f32.mrb[127].mxu1 }
 0x586   : > { %v7189_v31 = vadd.f32 %v7188_v4, %v7187_v58  ;;  %v7190_v36 = vpop.f32.mrb[162].mxu0  ;;  %v3672_v7 = vadd.f32 %v7119_v45, %v12049_v55  ;;  %v7122_v42 = vadd.f32 %v7121_v38, %v7120_v63 }
 0x587   : > { %v7191_v25 = vpop.f32.mrb[163].mxu0 }
 0x588   : > { %v7192_v17 = vadd.f32 %v7191_v25, %v7190_v36  ;;  %v3675_v47 = vadd.f32 %v7122_v42, %v12051_v20  ;;  %v12103_v23 = vadd.f32 %v7189_v31, %v3672_v7 }
 0x58a   : > { %v7123_v13 = vpop.f32.mrb[128].mxu1  ;;  %v12105_v30 = vadd.f32 %v7192_v17, %v3675_v47 }
 0x58b   : > { %v7124_v32 = vpop.f32.mrb[129].mxu1 }
 0x58c   : > { %v7193_v35 = vpop.f32.mrb[164].mxu0  ;;  %v7125_v48 = vadd.f32 %v7124_v32, %v7123_v13  ;;  %v7126_v21 = vpop.f32.mrb[130].mxu1 }
 0x58d   : > { %v7194_v0 = vpop.f32.mrb[165].mxu0  ;;  %v7127_v12 = vpop.f32.mrb[131].mxu1 }
 0x58e   : > { %v7195_v51 = vadd.f32 %v7194_v0, %v7193_v35  ;;  %v7196_v24 = vpop.f32.mrb[166].mxu0  ;;  %v3680_v55 = vadd.f32 %v7125_v48, %v12055_v41  ;;  %v7128_v61 = vadd.f32 %v7127_v12, %v7126_v21 }
 0x58f   : > { %v7197_v57 = vpop.f32.mrb[167].mxu0 }
 0x590   : > { %v7198_v27 = vadd.f32 %v7197_v57, %v7196_v24  ;;  %v3683_v20 = vadd.f32 %v7128_v61, %v12057_v22  ;;  %v12109_v15 = vadd.f32 %v7195_v51, %v3680_v55 }
 0x592   : > { %v7129_v37 = vpop.f32.mrb[132].mxu1  ;;  %v12111_v34 = vadd.f32 %v7198_v27, %v3683_v20 }
 0x593   : > { %v7130_v19 = vpop.f32.mrb[133].mxu1 }
 0x594   : > { %v7199_v1 = vpop.f32.mrb[168].mxu0  ;;  %v7131_v16 = vadd.f32 %v7130_v19, %v7129_v37  ;;  %v7132_v43 = vpop.f32.mrb[134].mxu1 }
 0x595   : > { %v7200_v49 = vpop.f32.mrb[169].mxu0  ;;  %v7133_v54 = vpop.f32.mrb[135].mxu1 }
 0x596   : > { %v7201_v46 = vadd.f32 %v7200_v49, %v7199_v1  ;;  %v7202_v2 = vpop.f32.mrb[170].mxu0  ;;  %v3688_v41 = vadd.f32 %v7131_v16, %v12061_v8  ;;  %v7134_v53 = vadd.f32 %v7133_v54, %v7132_v43  ;;  %v14325_v49 = vld [vmem:[#allocation73_spill] sm:$0xff] }
 0x597   : > { %v7203_v26 = vpop.f32.mrb[171].mxu0 }
 0x598   : > { %v7204_v44 = vadd.f32 %v7203_v26, %v7202_v2  ;;  %v3691_v22 = vadd.f32 %v7134_v53, %v12063_v40  ;;  %v12115_v62 = vadd.f32 %v7201_v46, %v3688_v41  ;;  %v3957_v26 = vld [vmem:[%s13736_s3 + $0x8] sm:$0xff] }
 0x59a   : > { %v7135_v56 = vpop.f32.mrb[136].mxu1  ;;  %v12117_v50 = vadd.f32 %v7204_v44, %v3691_v22 }
 0x59b   : > { %v7136_v58 = vpop.f32.mrb[137].mxu1 }
 0x59c   : > { %v7205_v52 = vpop.f32.mrb[172].mxu0  ;;  %v7137_v4 = vadd.f32 %v7136_v58, %v7135_v56  ;;  %v7138_v45 = vpop.f32.mrb[138].mxu1  ;;  %v14329_v58 = vld [vmem:[#allocation71_spill] sm:$0xff] }
 0x59d   : > { %v7206_v29 = vpop.f32.mrb[173].mxu0  ;;  %v7139_v36 = vpop.f32.mrb[139].mxu1 }
 0x59e   : > { %v7207_v63 = vadd.f32 %v7206_v29, %v7205_v52  ;;  %v7208_v31 = vpop.f32.mrb[174].mxu0  ;;  %v3696_v8 = vadd.f32 %v7137_v4, %v12067_v28  ;;  %v7140_v25 = vadd.f32 %v7139_v36, %v7138_v45 }
 0x59f   : > { %v7209_v38 = vpop.f32.mrb[175].mxu0 }
 0x5a0   : > { %v7210_v7 = vadd.f32 %v7209_v38, %v7208_v31  ;;  %v3699_v40 = vadd.f32 %v7140_v25, %v12069_v5  ;;  %v12121_v42 = vadd.f32 %v7207_v63, %v3696_v8  ;;  %v3958_v31 = vld [vmem:[%s13736_s3 + $0x10] sm:$0xff]  ;;  %v14330_v38 = vld [vmem:[#allocation70_spill] sm:$0xff] }
 0x5a2   : > { %v7141_v17 = vpop.f32.mrb[140].mxu1  ;;  %v12123_v13 = vadd.f32 %v7210_v7, %v3699_v40 }
 0x5a3   : > { %v7142_v35 = vpop.f32.mrb[141].mxu1 }
 0x5a4   : > { %v7211_v47 = vpop.f32.mrb[176].mxu0  ;;  %v7143_v0 = vadd.f32 %v7142_v35, %v7141_v17  ;;  %v7144_v48 = vpop.f32.mrb[142].mxu1  ;;  %v14333_v35 = vld [vmem:[#allocation69_spill] sm:$0xff] }
 0x5a5   : > { %v7212_v32 = vpop.f32.mrb[177].mxu0  ;;  %v7145_v24 = vpop.f32.mrb[143].mxu1 }
 0x5a6   : > { %v7213_v21 = vadd.f32 %v7212_v32, %v7211_v47  ;;  %v7214_v51 = vpop.f32.mrb[178].mxu0  ;;  %v3704_v28 = vadd.f32 %v7143_v0, %v12073_v11  ;;  %v7146_v57 = vadd.f32 %v7145_v24, %v7144_v48  ;;  %v3956_v11 = vld [vmem:[%s13736_s3] sm:$0xff]  ;;  %v14334_v24 = vld [vmem:[#allocation68_spill] sm:$0xff] }
 0x5a7   : > { %v7215_v12 = vpop.f32.mrb[179].mxu0 }
 0x5a8   : > { %v7216_v55 = vadd.f32 %v7215_v12, %v7214_v51  ;;  %v3707_v5 = vadd.f32 %v7146_v57, %v12075_v3  ;;  %v12127_v61 = vadd.f32 %v7213_v21, %v3704_v28  ;;  %v14326_v3 = vld [vmem:[#allocation72_spill] sm:$0xff]  ;;  %v3960_v21 = vld [vmem:[%s13736_s3 + $0x20] sm:$0xff] }
 0x5a9   : > { %v3961_v28 = vld [vmem:[%s13736_s3 + $0x28] sm:$0xff] }
 0x5aa   : > { %v3849_v27 = vpop.f32.mrb[144].mxu1  ;;  %v12129_v20 = vadd.f32 %v7216_v55, %v3707_v5 }
 0x5ab   : > { %v3850_v37 = vadd.f32 %v3849_v27, %v12079_v6  ;;  %v7517_v1 = vpop.f32.mrb[145].mxu1 }
 0x5ac   : > { %v3852_v19 = vpop.f32.mrb[146].mxu1  ;;  %v14336_v1 = vld [vmem:[#allocation67_spill] sm:$0xff] }
 0x5ad   : > { %v3920_v16 = vadd.f32 %v14325_v49, %v3850_v37  ;;  %v3853_v43 = vadd.f32 %v3852_v19, %v12081_v33  ;;  %v7518_v46 = vpop.f32.mrb[147].mxu1 }
 0x5af   : > { %v3938_v2 = vmax.f32 %v3920_v16, 0.0  ;;  %v3921_v54 = vadd.f32 %v14326_v3, %v3853_v43  ;;  %v3962_v43 = vld [vmem:[%s13736_s3 + $0x30] sm:$0xff]  ;;  %v3963_v3 = vld [vmem:[%s13736_s3 + $0x38] sm:$0xff] }
 0x5b1   : > { %v12141_v41 = vmul.f32 %v3956_v11, %v3938_v2   ;;  %v3939_v6 = vmax.f32 %v3921_v54, 0.0  ;;  %v14337_v11 = vld [vmem:[#allocation66_spill] sm:$0xff] }
 0x5b2   : > { %v3857_v44 = vpop.f32.mrb[148].mxu1 }
 0x5b3   : > { %v14327_v53 = vmov %v12141_v41  ;;  %v12143_v45 = vmul.f32 %v3957_v26, %v3939_v6   ;;  %v3858_v33 = vadd.f32 %v3857_v44, %v12085_v9  ;;  %v7521_v56 = vpop.f32.mrb[149].mxu1 }
 0x5b4   : > { %v3860_v52 = vpop.f32.mrb[150].mxu1 }
 0x5b5   : > { %v14328_v22 = vmov %v12143_v45  ;;  %v3922_v29 = vadd.f32 %v14329_v58, %v3858_v33  ;;  %v3861_v4 = vadd.f32 %v3860_v52, %v12087_v59  ;;  %v7522_v63 = vpop.f32.mrb[151].mxu1  ;;  %v3959_v45 = vld [vmem:[%s13736_s3 + $0x18] sm:$0xff] }
 0x5b6   : > { %v14340_v33 = vld [vmem:[#allocation65_spill] sm:$0xff]  ;;  %v14341_v63 = vld [vmem:[#allocation64_spill] sm:$0xff] }
 0x5b7   : > { %v3940_v36 = vmax.f32 %v3922_v29, 0.0  ;;  %v3923_v8 = vadd.f32 %v14330_v38, %v3861_v4  ;;  %v3964_v29 = vld [vmem:[%s13736_s3 + $0x40] sm:$0xff] }
 0x5b9   : > { %v12155_v31 = vmul.f32 %v3958_v31, %v3940_v36   ;;  %v3941_v25 = vmax.f32 %v3923_v8, 0.0 }
 0x5ba   : > { %v3865_v7 = vpop.f32.mrb[152].mxu1 }
 0x5bb   : > { %v14331_v9 = vmov %v12155_v31  ;;  %v12157_v36 = vmul.f32 %v3959_v45, %v3941_v25   ;;  %v3866_v59 = vadd.f32 %v3865_v7, %v12091_v10  ;;  %v7525_v17 = vpop.f32.mrb[153].mxu1 }
 0x5bc   : > { %v3868_v47 = vpop.f32.mrb[154].mxu1 }
 0x5bd   : > { %v14332_v40 = vmov %v12157_v36  ;;  %v3924_v32 = vadd.f32 %v14333_v35, %v3866_v59  ;;  %v3869_v0 = vadd.f32 %v3868_v47, %v12093_v39  ;;  %v7526_v48 = vpop.f32.mrb[155].mxu1  ;;  %v3965_v36 = vld [vmem:[%s13736_s3 + $0x48] sm:$0xff] }
 0x5be   : > { %v14344_v59 = vld [vmem:[#allocation63_spill] sm:$0xff] }
 0x5bf   : > { %v3942_v51 = vmax.f32 %v3924_v32, 0.0  ;;  %v3925_v12 = vadd.f32 %v14334_v24, %v3869_v0 }
 0x5c1   : > { %v12169_v6 = vmul.f32 %v3960_v21, %v3942_v51   ;;  %v3943_v57 = vmax.f32 %v3925_v12, 0.0  ;;  %v14345_v21 = vld [vmem:[#allocation62_spill] sm:$0xff] }
 0x5c2   : > { %v3873_v55 = vpop.f32.mrb[156].mxu1  ;;  %v3967_v51 = vld [vmem:[%s13736_s3 + $0x58] sm:$0xff] }
 0x5c3   : > { %v14335_v10 = vmov %v12169_v6  ;;  %v12171_v5 = vmul.f32 %v3961_v28, %v3943_v57   ;;  %v3874_v39 = vadd.f32 %v3873_v55, %v12097_v14  ;;  %v7529_v27 = vpop.f32.mrb[157].mxu1 }
 0x5c4   : > { %v3876_v37 = vpop.f32.mrb[158].mxu1 }
 0x5c5   : > { %v3926_v19 = vadd.f32 %v14336_v1, %v3874_v39  ;;  %v3877_v49 = vadd.f32 %v3876_v37, %v12099_v18  ;;  %v7530_v16 = vpop.f32.mrb[159].mxu1  ;;  %v14348_v39 = vld [vmem:[#allocation61_spill] sm:$0xff] }
 0x5c6   : > { %v14349_v16 = vld [vmem:[#allocation60_spill] sm:$0xff] }
 0x5c7   : > { %v3944_v46 = vmax.f32 %v3926_v19, 0.0  ;;  %v3927_v2 = vadd.f32 %v14337_v11, %v3877_v49  ;;  %v3968_v19 = vld [vmem:[%s13736_s3 + $0x60] sm:$0xff] }
 0x5c9   : > { %v12183_v32 = vmul.f32 %v3962_v43, %v3944_v46   ;;  %v3945_v54 = vmax.f32 %v3927_v2, 0.0  ;;  %v3969_v46 = vld [vmem:[%s13736_s3 + $0x68] sm:$0xff] }
 0x5ca   : > { %v3881_v26 = vpop.f32.mrb[160].mxu1 }
 0x5cb   : > { %v14338_v14 = vmov %v12183_v32  ;;  %v12185_v35 = vmul.f32 %v3963_v3, %v3945_v54   ;;  %v3882_v18 = vadd.f32 %v3881_v26, %v12103_v23  ;;  %v7533_v41 = vpop.f32.mrb[161].mxu1  ;;  %v3966_v32 = vld [vmem:[%s13736_s3 + $0x50] sm:$0xff] }
 0x5cc   : > { %v3884_v6 = vpop.f32.mrb[162].mxu1 }
 0x5cd   : > { %v14339_v44 = vmov %v12185_v35  ;;  %v3928_v56 = vadd.f32 %v14340_v33, %v3882_v18  ;;  %v3885_v52 = vadd.f32 %v3884_v6, %v12105_v30  ;;  %v7534_v58 = vpop.f32.mrb[163].mxu1  ;;  %v14352_v18 = vld [vmem:[#allocation59_spill] sm:$0xff] }
 0x5cf   : > { %v3946_v4 = vmax.f32 %v3928_v56, 0.0  ;;  %v3929_v31 = vadd.f32 %v14341_v63, %v3885_v52  ;;  %v3970_v52 = vld [vmem:[%s13736_s3 + $0x70] sm:$0xff] }
 0x5d1   : > { %v12197_v48 = vmul.f32 %v3964_v29, %v3946_v4   ;;  %v3947_v23 = vmax.f32 %v3929_v31, 0.0  ;;  %v14353_v29 = vld [vmem:[#allocation58_spill] sm:$0xff] }
 0x5d2   : > { %v3889_v8 = vpop.f32.mrb[164].mxu1  ;;  %v3971_v4 = vld [vmem:[%s13736_s3 + $0x78] sm:$0xff] }
 0x5d3   : > { %v14342_v38 = vmov %v12197_v48  ;;  %v12199_v28 = vmul.f32 %v3965_v36, %v3947_v23   ;;  %v3890_v30 = vadd.f32 %v3889_v8, %v12109_v15  ;;  %v7537_v45 = vpop.f32.mrb[165].mxu1 }
 0x5d4   : > { %v3892_v7 = vpop.f32.mrb[166].mxu1  ;;  %v14356_v45 = vld [vmem:[#allocation57_spill] sm:$0xff] }
 0x5d5   : > { %v14343_v25 = vmov %v12199_v28  ;;  %v3930_v17 = vadd.f32 %v14344_v59, %v3890_v30  ;;  %v3893_v47 = vadd.f32 %v3892_v7, %v12111_v34  ;;  %v7538_v35 = vpop.f32.mrb[167].mxu1 }
 0x5d7   : > { %v3948_v0 = vmax.f32 %v3930_v17, 0.0  ;;  %v3931_v48 = vadd.f32 %v14345_v21, %v3893_v47  ;;  %v3972_v47 = vld [vmem:[%s13736_s3 + $0x80] sm:$0xff]  ;;  %v3973_v21 = vld [vmem:[%s13736_s3 + $0x88] sm:$0xff] }
 0x5d9   : > { %v12211_v63 = vmul.f32 %v3966_v32, %v3948_v0   ;;  %v3949_v15 = vmax.f32 %v3931_v48, 0.0  ;;  %v14357_v32 = vld [vmem:[#allocation56_spill] sm:$0xff] }
 0x5da   : > { %v3897_v12 = vpop.f32.mrb[168].mxu1 }
 0x5db   : > { %v14346_v24 = vmov %v12211_v63  ;;  %v12213_v17 = vmul.f32 %v3967_v51, %v3949_v15   ;;  %v3898_v34 = vadd.f32 %v3897_v12, %v12115_v62  ;;  %v7541_v28 = vpop.f32.mrb[169].mxu1  ;;  %v14378_v15 = vmov %v14327_v53  ;;  %v8211_v12 = vld [vmem:[%s13738_s5 + $0x8] sm:$0xff] (%p12258_p1)  }
 0x5dc   : > { %v3900_v55 = vpop.f32.mrb[170].mxu1  ;;  %v14369_v28 = vmov %v14343_v25  ;;  %v8210_v15 = vld [vmem:[%s13738_s5] sm:$0xff] (%p12258_p1)  }
 0x5dd   : > { %v14347_v57 = vmov %v12213_v17  ;;  %v3932_v27 = vadd.f32 %v14348_v39, %v3898_v34  ;;  %v3901_v37 = vadd.f32 %v3900_v55, %v12117_v50  ;;  %v7542_v1 = vpop.f32.mrb[171].mxu1  ;;  %v8213_v34 = vld [vmem:[%s13738_s5 + $0x18] sm:$0xff] (%p12258_p1)   ;;  %v8214_v28 = vld [vmem:[%s13738_s5 + $0x20] sm:$0xff] (%p12258_p1)   ;;  %v8215_v55 = vld [vmem:[%s13738_s5 + $0x28] sm:$0xff] (%p12258_p1)  }
 0x5de   :  { %v8216_v39 = vld [vmem:[%s13738_s5 + $0x30] sm:$0xff] (%p12258_p1)  }
 0x5df   : > { %v3950_v49 = vmax.f32 %v3932_v27, 0.0  ;;  %v3933_v43 = vadd.f32 %v14349_v16, %v3901_v37 }
 0x5e1   : > { %v12225_v41 = vmul.f32 %v3968_v19, %v3950_v49   ;;  %v3951_v62 = vmax.f32 %v3933_v43, 0.0  ;;  %v12373_v19 = vpack.c.bf16 (%p12258_p1), %v12171_v5, %v14335_v10 }
 0x5e2   : > { %v3905_v2 = vpop.f32.mrb[172].mxu1 }
 0x5e3   : > { %v14350_v11 = vmov %v12225_v41  ;;  %v12227_v23 = vmul.f32 %v3969_v46, %v3951_v62   ;;  %v3906_v50 = vadd.f32 %v3905_v2, %v12121_v42  ;;  %v7545_v54 = vpop.f32.mrb[173].mxu1  ;;  %v14373_v62 = vmov %v12171_v5 }
 0x5e4   : > { %v3908_v26 = vpop.f32.mrb[174].mxu1  ;;  %v8421_v2 = vmov (%p12258_p1), 2  }
 0x5e5   : > { %v14351_v3 = vmov %v12227_v23  ;;  %v3934_v6 = vadd.f32 %v14352_v18, %v3906_v50  ;;  %v3909_v33 = vadd.f32 %v3908_v26, %v12123_v13  ;;  %v7546_v56 = vpop.f32.mrb[175].mxu1 }
 0x5e7   : > { %v3952_v58 = vmax.f32 %v3934_v6, 0.0  ;;  %v3935_v41 = vadd.f32 %v14353_v29, %v3909_v33  ;;  %v14374_v6 = vmov %v14335_v10 }
 0x5e9   : > { %v12239_v63 = vmul.f32 %v3970_v52, %v3952_v58   ;;  %v3953_v31 = vmax.f32 %v3935_v41, 0.0  ;;  %v14366_v41 = vmov %v14350_v11 }
 0x5ea   : > { %v3913_v36 = vpop.f32.mrb[176].mxu1  ;;  %v8422_v41 = vmov (%p12258_p1), 0.0|0.0  }
 0x5eb   : > { %v14354_v42 = vmov %v12239_v63  ;;  %v12241_v37 = vmul.f32 %v3971_v4, %v3953_v31   ;;  %v3914_v13 = vadd.f32 %v3913_v36, %v12127_v61  ;;  %v7549_v23 = vpop.f32.mrb[177].mxu1  ;;  %v14368_v63 = vmov %v14346_v24 }
 0x5ec   : > { %v3916_v30 = vpop.f32.mrb[178].mxu1  ;;  %v14364_v4 = vmov %v14354_v42  ;;  %v14365_v23 = vmov %v14351_v3  ;;  %v14375_v36 = vmov %v14332_v40  ;;  %v14376_v31 = vmov %v14331_v9 }
 0x5ed   : > { %v14355_v8 = vmov %v12241_v37  ;;  %v3936_v7 = vadd.f32 %v14356_v45, %v3914_v13  ;;  %v3917_v59 = vadd.f32 %v3916_v30, %v12129_v20  ;;  %v7550_v17 = vpop.f32.mrb[179].mxu1  ;;  %v14377_v45 = vmov %v14328_v22  ;;  %v8218_v31 = vld [vmem:[%s13740_s7] sm:$0xff] (%p12258_p1)   ;;  %v8219_v30 = vld [vmem:[%s13740_s7 + $0x8] sm:$0xff] (%p12258_p1)  }
 0x5ee   : > { %v14363_v37 = vmov %v14355_v8  ;;  %v14367_v17 = vmov %v14347_v57  ;;  %v14379_v20 = vmov (%p12258_p1), 0.0   ;;  %v12408_v10 = vpack.c.bf16 (%p12258_p1), %v14355_v8, %v14354_v42 }
 0x5ef   : > { %v3954_v35 = vmax.f32 %v3936_v7, 0.0  ;;  %v3937_v0 = vadd.f32 %v14357_v32, %v3917_v59  ;;  %v14372_v32 = vmov %v14338_v14  ;;  %7551 = vmatprep.subr.bf16.mxu0 (%p12258_p1), %v14379_v20  ;;  %7567 = vmatprep.mubr.msk.bf16.mxu0 (%p12258_p1), %vm8416_vm4, %v14379_v20  ;;  %v12359_v37 = vpack.c.bf16 (%p12258_p1), %v14328_v22, %v14327_v53 }
 0x5f0   :  { %1494 = sbr.rel (!%p12258_p1) target bundleno = 528 (0x210), region = 277  ;;  %7603 = vmatprep.subr.bf16.mxu1 (%p12258_p1), %v14379_v20  ;;  %7552 = vmatpush3.bf16.msra.mxu0 (%p12258_p1), %v8210_v15  ;;  %v12380_v53 = vpack.c.bf16 (%p12258_p1), %v14339_v44, %v14338_v14  ;;  %v12387_v22 = vpack.c.bf16 (%p12258_p1), %v14343_v25, %v14342_v38  ;;  %v8419_v14 = vmov (%p12258_p1), 1  }
 0x5f1   : > { %v12253_v1 = vmul.f32 %v3972_v47, %v3954_v35   ;;  %v3955_v48 = vmax.f32 %v3937_v0, 0.0  ;;  %v14371_v35 = vmov %v14339_v44  ;;  %7619 = vmatprep.mubr.msk.bf16.mxu1 (%p12258_p1), %vm8416_vm4, %v14379_v20  ;;  %7553 = vmatprep.subr.bf16.mxu0 (%p12258_p1), %v14379_v20  ;;  %v8420_v44 = vmov (%p12258_p1), 0   ;;  %v8220_v47 = vld [vmem:[%s13740_s7 + $0x10] sm:$0xff] (%p12258_p1)  }
 0x5f2   :  { %8167 = vset.pattern.permute.xlu1 (%p12258_p1), %v8419_v14  ;;  %8166 = vset.pattern.permute.xlu0 (%p12258_p1), %v8420_v44 }
 0x5f3   : > { %v14358_v61 = vmov %v12253_v1  ;;  %v12255_v27 = vmul.f32 %v3973_v21, %v3955_v48   ;;  %v14370_v48 = vmov %v14342_v38  ;;  %v12423_v38 = vld [vmem:[%s13739_s6] ss:$0 sm:$0xff] (%p12258_p1)  ;;  %7604 = vmatpush3.bf16.msra.mxu1 (%p12258_p1), %v8218_v31 }
 0x5f4   : > { %v14362_v1 = vmov %v14358_v61  ;;  %7554 = vmatpush3.bf16.msra.mxu0 (%p12258_p1), %v8211_v12  ;;  %7605 = vmatprep.subr.bf16.mxu1 (%p12258_p1), %v14379_v20  ;;  %v8222_v12 = vld [vmem:[%s13740_s7 + $0x20] sm:$0xff] (%p12258_p1)  }
 0x5f5   : > { %v14359_v51 = vmov %v12255_v27  ;;  %7555 = vmatprep.subr.bf16.mxu0 (%p12258_p1), %v14379_v20  ;;  %v12366_v1 = vpack.c.bf16 (%p12258_p1), %v14332_v40, %v14331_v9  ;;  %v12394_v9 = vpack.c.bf16 (%p12258_p1), %v14347_v57, %v14346_v24  ;;  %v12401_v40 = vpack.c.bf16 (%p12258_p1), %v14351_v3, %v14350_v11 }
 0x5f6   : > { %v14361_v27 = vmov %v14359_v51  ;;  %v12415_v5 = vpack.c.bf16 (%p12258_p1), %v14359_v51, %v14358_v61  ;;  %v8221_v61 = vld [vmem:[%s13740_s7 + $0x18] sm:$0xff] (%p12258_p1)  }
 0x5f7   :  { %v8217_v27 = vld [vmem:[%s13738_s5 + $0x38] sm:$0xff]   ;;  %7606 = vmatpush3.bf16.msra.mxu1 %v8219_v30  ;;  %v6312_v30 = vld [vmem:[%s13742_s9 + $0x120] sm:$0xff] }
 0x5f8   :  { %7556 = vmatpush3.bf16.msra.mxu0 %v8212_v60  ;;  %7607 = vmatprep.subr.bf16.mxu1 %v14379_v20 }
 0x5f9   :  { %7557 = vmatprep.subr.bf16.mxu0 %v14379_v20 }
 0x5fb   :  { %7608 = vmatpush3.bf16.msra.mxu1 %v8220_v47  ;;  %v6313_v47 = vld [vmem:[%s13742_s9 + $0x128] sm:$0xff] }
 0x5fc   :  { %7558 = vmatpush3.bf16.msra.mxu0 %v8213_v34  ;;  %7609 = vmatprep.subr.bf16.mxu1 %v14379_v20 }
 0x5fd   :  { %7559 = vmatprep.subr.bf16.mxu0 %v14379_v20 }
 0x5ff   :  { %7610 = vmatpush3.bf16.msra.mxu1 %v8221_v61 }
 0x600   :  { %7560 = vmatpush3.bf16.msra.mxu0 %v8214_v28  ;;  %7611 = vmatprep.subr.bf16.mxu1 %v14379_v20 }
 0x601   :  { %7561 = vmatprep.subr.bf16.mxu0 %v14379_v20 }
 0x603   :  { %7612 = vmatpush3.bf16.msra.mxu1 %v8222_v12 }
 0x604   :  { %7562 = vmatpush3.bf16.msra.mxu0 %v8215_v55  ;;  %7613 = vmatprep.subr.bf16.mxu1 %v14379_v20  ;;  %v8223_v55 = vld [vmem:[%s13740_s7 + $0x28] sm:$0xff]  }
 0x605   :  { %7563 = vmatprep.subr.bf16.mxu0 %v14379_v20 }
 0x607   :  { %7614 = vmatpush3.bf16.msra.mxu1 %v8223_v55 }
 0x608   :  { %7564 = vmatpush3.bf16.msra.mxu0 %v8216_v39  ;;  %7615 = vmatprep.subr.bf16.mxu1 %v14379_v20 }
 0x609   :  { %7565 = vmatprep.subr.bf16.mxu0 %v14379_v20 }
 0x60c   :  { %7566 = vmatpush3.bf16.msra.mxu0 %v8217_v27 }
 0x60d   :  { %7701 = vmatprep.subr.bf16.mxu0 %v8422_v41 }
 0x60f   :  { %7568 = vmatmul.mubr.bf16.vlgmr.msra.gmra.mrb[0].mxu0 %v12359_v37 }
 0x610   :  { %7571 = vmatprep.mubr.msk.bf16.mxu0 %vm8416_vm4, %v14379_v20 }
 0x617   :  { %7572 = vmatmul.mubr.bf16.gmra.mrb[4].mxu0 %v12366_v1 }
 0x618   :  { %7575 = vmatprep.mubr.msk.bf16.mxu0 %vm8416_vm4, %v14379_v20 }
 0x61f   :  { %7576 = vmatmul.mubr.bf16.gmra.mrb[8].mxu0 %v12373_v19 }
 0x620   :  { %7579 = vmatprep.mubr.msk.bf16.mxu0 %vm8416_vm4, %v14379_v20 }
 0x627   :  { %7580 = vmatmul.mubr.bf16.gmra.mrb[12].mxu0 %v12380_v53 }
 0x628   :  { %7583 = vmatprep.mubr.msk.bf16.mxu0 %vm8416_vm4, %v14379_v20 }
 0x62f   :  { %7584 = vmatmul.mubr.bf16.gmra.mrb[16].mxu0 %v12387_v22 }
 0x630   :  { %7587 = vmatprep.mubr.msk.bf16.mxu0 %vm8416_vm4, %v14379_v20 }
 0x637   :  { %7588 = vmatmul.mubr.bf16.gmra.mrb[20].mxu0 %v12394_v9 }
 0x638   :  { %7591 = vmatprep.mubr.msk.bf16.mxu0 %vm8416_vm4, %v14379_v20 }
 0x63f   :  { %7592 = vmatmul.mubr.bf16.gmra.mrb[24].mxu0 %v12401_v40 }
 0x640   :  { %7595 = vmatprep.mubr.msk.bf16.mxu0 %vm8416_vm4, %v14379_v20 }
 0x647   :  { %7596 = vmatmul.mubr.bf16.gmra.mrb[28].mxu0 %v12408_v10 }
 0x648   :  { %7599 = vmatprep.mubr.msk.bf16.mxu0 %vm8416_vm4, %v14379_v20 }
 0x64f   :  { %7600 = vmatmul.mubr.bf16.gmra.mrb[32].mxu0 %v12415_v5 }
 0x6e2   :  { %v4106_v25 = vpop.f32.mrb[0].mxu0 }
 0x6e3   :  { %v4107_v24 = vadd.f32 %v12423_v38, %v4106_v25  ;;  %v7569_v57 = vpop.f32.mrb[1].mxu0 }
 0x6e4   :  { %v4109_v49 = vpop.f32.mrb[2].mxu0  ;;  %v8224_v57 = vld [vmem:[%s13740_s7 + $0x30] sm:$0xff]  }
 0x6e5   :  { %v4177_v16 = vmax.f32 %v4107_v24, 0.0  ;;  %v4110_v43 = vadd.f32 %v12423_v38, %v4109_v49  ;;  %v7570_v46 = vpop.f32.mrb[3].mxu0  ;;  %7616 = vmatpush3.bf16.msra.mxu1 %v8224_v57 }
 0x6e6   :  { %7617 = vmatprep.subr.bf16.mxu1 %v14379_v20 }
 0x6e7   :  { %4535 = vperm.xlu1 %8167, %v4177_v16   ;;  %4409 = vperm.xlu0 %8166, %v4177_v16   ;;  %v4178_v11 = vmax.f32 %v4110_v43, 0.0 }
 0x6ea   :  { %v4114_v62 = vpop.f32.mrb[4].mxu0 }
 0x6eb   :  { %8168 = vset.pattern.permute.xlu0 %v8421_v2  ;;  %4539 = vperm.xlu1 %8167, %v4178_v11   ;;  %v7573_v3 = vpop.f32.mrb[5].mxu0  ;;  %v4115_v54 = vadd.f32 %v12423_v38, %v4114_v62 }
 0x6ec   :  { %4662 = vperm.xlu0 %8168, %v4177_v16   ;;  %v4117_v50 = vpop.f32.mrb[6].mxu0 }
 0x6ed   :  { %v7574_v26 = vpop.f32.mrb[7].mxu0  ;;  %v4179_v18 = vmax.f32 %v4115_v54, 0.0  ;;  %v4118_v52 = vadd.f32 %v12423_v38, %v4117_v50 }
 0x6ef   :  { %8170 = vset.pattern.permute.xlu1 %v8421_v2  ;;  %v4180_v4 = vmax.f32 %v4118_v52, 0.0 }
 0x6f0   :  { %8169 = vset.pattern.permute.xlu0 %v8420_v44  ;;  %4666 = vperm.xlu1 %8170, %v4178_v11  }
 0x6f1   :  { %4414 = vperm.xlu0 %8169, %v4178_v11   ;;  %v8225_v11 = vld [vmem:[%s13740_s7 + $0x38] sm:$0xff]  }
 0x6f2   :  { %v4122_v6 = vpop.f32.mrb[8].mxu0  ;;  %7618 = vmatpush3.bf16.msra.mxu1 %v8225_v11  ;;  %v6315_v11 = vld [vmem:[%s13742_s9 + $0x138] sm:$0xff] }
 0x6f3   :  { %v7577_v33 = vpop.f32.mrb[9].mxu0  ;;  %v4123_v29 = vadd.f32 %v12423_v38, %v4122_v6  ;;  %7728 = vmatprep.subr.bf16.mxu1 %v8422_v41 }
 0x6f4   :  { %8171 = vset.pattern.permute.xlu1 %v8420_v44  ;;  %v4125_v56 = vpop.f32.mrb[10].mxu0 }
 0x6f5   :  { %8173 = vset.pattern.permute.xlu0 %v8421_v2  ;;  %4419 = vperm.xlu1 %8171, %v4179_v18   ;;  %v7578_v58 = vpop.f32.mrb[11].mxu0  ;;  %v4181_v36 = vmax.f32 %v4123_v29, 0.0  ;;  %v4126_v13 = vadd.f32 %v12423_v38, %v4125_v56 }
 0x6f6   :  { %4670 = vperm.xlu0 %8173, %v4179_v18   ;;  %7620 = vmatmul.mubr.bf16.vlgmr.msra.gmra.mrb[0].mxu1 %v12359_v37 }
 0x6f7   :  { %v4182_v45 = vmax.f32 %v4126_v13, 0.0  ;;  %7623 = vmatprep.mubr.msk.bf16.mxu1 %vm8416_vm4, %v14379_v20 }
 0x6f9   :  { %8172 = vset.pattern.permute.xlu1 %v8419_v14 }
 0x6fa   :  { %8174 = vset.pattern.permute.xlu0 %v8420_v44  ;;  %4543 = vperm.xlu1 %8172, %v4179_v18   ;;  %v4130_v63 = vpop.f32.mrb[12].mxu0 }
 0x6fb   :  { %4424 = vperm.xlu0 %8174, %v4180_v4   ;;  %v7581_v42 = vpop.f32.mrb[13].mxu0  ;;  %v4131_v7 = vadd.f32 %v12423_v38, %v4130_v63 }
 0x6fc   :  { %v4133_v8 = vpop.f32.mrb[14].mxu0 }
 0x6fd   :  { %v7582_v23 = vpop.f32.mrb[15].mxu0  ;;  %v4183_v0 = vmax.f32 %v4131_v7, 0.0  ;;  %v4134_v21 = vadd.f32 %v12423_v38, %v4133_v8 }
 0x6fe   :  { %4547 = vperm.xlu1 %8172, %v4180_v4   ;;  %7624 = vmatmul.mubr.bf16.gmra.mrb[4].mxu1 %v12366_v1 }
 0x6ff   :  { %8178 = vset.pattern.permute.xlu0 %v8421_v2  ;;  %v12461_v51 = vmax.f32 %v4134_v21, 0.0  ;;  %7627 = vmatprep.mubr.msk.bf16.mxu1 %vm8416_vm4, %v14379_v20 }
 0x700   :  { %4678 = vperm.xlu0 %8178, %v4181_v36  }
 0x702   :  { %8175 = vset.pattern.permute.xlu1 %v8421_v2  ;;  %v4138_v59 = vpop.f32.mrb[16].mxu0 }
 0x703   :  { %4674 = vperm.xlu1 %8175, %v4180_v4   ;;  %v7585_v17 = vpop.f32.mrb[17].mxu0  ;;  %v4139_v60 = vadd.f32 %v12423_v38, %v4138_v59 }
 0x704   :  { %8179 = vset.pattern.permute.xlu0 %v8420_v44  ;;  %v4141_v35 = vpop.f32.mrb[18].mxu0 }
 0x705   :  { %4434 = vperm.xlu0 %8179, %v4182_v45   ;;  %v7586_v32 = vpop.f32.mrb[19].mxu0  ;;  %v12475_v39 = vmax.f32 %v4139_v60, 0.0  ;;  %v4142_v27 = vadd.f32 %v12423_v38, %v4141_v35 }
 0x706   :  { %7628 = vmatmul.mubr.bf16.gmra.mrb[8].mxu1 %v12373_v19 }
 0x707   :  { %8176 = vset.pattern.permute.xlu1 %v8420_v44  ;;  %v12485_v16 = vmax.f32 %v4142_v27, 0.0  ;;  %7631 = vmatprep.mubr.msk.bf16.mxu1 %vm8416_vm4, %v14379_v20  ;;  %v4391_v27 = vld [vmem:[%s13742_s9 + $0x10] sm:$0xff] }
 0x708   :  { %4429 = vperm.xlu1 %8176, %v4181_v36  }
 0x709   :  { %8183 = vset.pattern.permute.xlu0 %v8421_v2 }
 0x70a   :  { %4686 = vperm.xlu0 %8183, %v4183_v0   ;;  %v4146_v48 = vpop.f32.mrb[20].mxu0 }
 0x70b   :  { %v7589_v15 = vpop.f32.mrb[21].mxu0  ;;  %v4147_v46 = vadd.f32 %v12423_v38, %v4146_v48 }
 0x70c   :  { %8177 = vset.pattern.permute.xlu1 %v8419_v14  ;;  %v4149_v34 = vpop.f32.mrb[22].mxu0 }
 0x70d   :  { %4551 = vperm.xlu1 %8177, %v4181_v36   ;;  %v7590_v28 = vpop.f32.mrb[23].mxu0  ;;  %v12495_v62 = vmax.f32 %v4147_v46, 0.0  ;;  %v4150_v50 = vadd.f32 %v12423_v38, %v4149_v34  ;;  %v6314_v46 = vld [vmem:[%s13742_s9 + $0x130] sm:$0xff] }
 0x70e   :  { %8184 = vset.pattern.permute.xlu0 %v8420_v44  ;;  %7632 = vmatmul.mubr.bf16.gmra.mrb[12].mxu1 %v12380_v53 }
 0x70f   :  { %4444 = vperm.xlu0 %8184, %v12461_v51   ;;  %v4188_v6 = vmax.f32 %v4150_v50, 0.0  ;;  %7635 = vmatprep.mubr.msk.bf16.mxu1 %vm8416_vm4, %v14379_v20 }
 0x711   :  { %4555 = vperm.xlu1 %8177, %v4182_v45  }
 0x712   :  { %v4154_v25 = vpop.f32.mrb[24].mxu0 }
 0x713   :  { %8188 = vset.pattern.permute.xlu0 %v8421_v2  ;;  %v7593_v24 = vpop.f32.mrb[25].mxu0  ;;  %v4155_v33 = vadd.f32 %v12423_v38, %v4154_v25  ;;  %v6297_v25 = vld [vmem:[%s13742_s9 + $0xa8] sm:$0xff] }
 0x714   :  { %4694 = vperm.xlu0 %8188, %v12475_v39   ;;  %v4157_v49 = vpop.f32.mrb[26].mxu0 }
 0x715   :  { %8180 = vset.pattern.permute.xlu1 %v8421_v2  ;;  %v7594_v43 = vpop.f32.mrb[27].mxu0  ;;  %v4189_v58 = vmax.f32 %v4155_v33, 0.0  ;;  %v4158_v29 = vadd.f32 %v12423_v38, %v4157_v49 }
 0x716   :  { %4682 = vperm.xlu1 %8180, %v4182_v45   ;;  %7636 = vmatmul.mubr.bf16.gmra.mrb[16].mxu1 %v12387_v22  ;;  %v4390_v45 = vld [vmem:[%s13742_s9 + $0x8] sm:$0xff] }
 0x717   :  { %v4190_v63 = vmax.f32 %v4158_v29, 0.0  ;;  %7639 = vmatprep.mubr.msk.bf16.mxu1 %vm8416_vm4, %v14379_v20  ;;  %v12624_v29 = vld.sshfl [vmem:[%s13737_s4] sm:$0x33 pattern:$0x76325410] }
 0x718   :  { %8189 = vset.pattern.permute.xlu0 %v8420_v44 }
 0x719   :  { %4454 = vperm.xlu0 %8189, %v12485_v16  }
 0x71a   :  { %8181 = vset.pattern.permute.xlu1 %v8420_v44  ;;  %v4162_v3 = vpop.f32.mrb[28].mxu0 }
 0x71b   :  { %4439 = vperm.xlu1 %8181, %v4183_v0   ;;  %v7597_v54 = vpop.f32.mrb[29].mxu0  ;;  %v4163_v42 = vadd.f32 %v12423_v38, %v4162_v3 }
 0x71c   :  { %v4165_v26 = vpop.f32.mrb[30].mxu0 }
 0x71d   :  { %8193 = vset.pattern.permute.xlu0 %v8421_v2  ;;  %v7598_v18 = vpop.f32.mrb[31].mxu0  ;;  %v4191_v1 = vmax.f32 %v4163_v42, 0.0  ;;  %v4166_v31 = vadd.f32 %v12423_v38, %v4165_v26 }
 0x71e   :  { %4702 = vperm.xlu0 %8193, %v12495_v62   ;;  %7640 = vmatmul.mubr.bf16.gmra.mrb[20].mxu1 %v12394_v9 }
 0x71f   :  { %8182 = vset.pattern.permute.xlu1 %v8419_v14  ;;  %v12526_v36 = vmax.f32 %v4166_v31, 0.0  ;;  %7643 = vmatprep.mubr.msk.bf16.mxu1 %vm8416_vm4, %v14379_v20  ;;  %v4394_v31 = vld [vmem:[%s13742_s9 + $0x28] sm:$0xff] }
 0x720   :  { %4559 = vperm.xlu1 %8182, %v4183_v0  }
 0x722   :  { %8194 = vset.pattern.permute.xlu0 %v8420_v44  ;;  %v4170_v56 = vpop.f32.mrb[32].mxu0 }
 0x723   :  { %4464 = vperm.xlu0 %8194, %v4188_v6   ;;  %v7601_v52 = vpop.f32.mrb[33].mxu0  ;;  %v4171_v13 = vadd.f32 %v12423_v38, %v4170_v56 }
 0x724   :  { %4563 = vperm.xlu1 %8182, %v12461_v51   ;;  %v4173_v37 = vpop.f32.mrb[34].mxu0 }
 0x725   :  { %v7602_v4 = vpop.f32.mrb[35].mxu0  ;;  %v4174_v8 = vadd.f32 %v12423_v38, %v4173_v37  ;;  %v12541_v23 = vmax.f32 %v4171_v13, 0.0  ;;  %v6295_v38 = vld [vmem:[%s13742_s9 + $0x98] sm:$0xff]  ;;  %v6298_v37 = vld [vmem:[%s13742_s9 + $0xb0] sm:$0xff]  ;;  %v6316_v13 = vld [vmem:[%s13742_s9 + $0x140] sm:$0xff] }
 0x726   :  { %7644 = vmatmul.mubr.bf16.gmra.mrb[24].mxu1 %v12401_v40  ;;  %v12628_v4 = vcombine.high %v12624_v29, %v12624_v29 }
 0x727   :  { %8198 = vset.pattern.permute.xlu0 %v8421_v2  ;;  %v12533_v19 = vmax.f32 %v4174_v8, 0.0  ;;  %7647 = vmatprep.mubr.msk.bf16.mxu1 %vm8416_vm4, %v14379_v20 }
 0x728   :  { %8185 = vset.pattern.permute.xlu1 %v8421_v2  ;;  %4710 = vperm.xlu0 %8198, %v4189_v58  }
 0x729   :  { %4690 = vperm.xlu1 %8185, %v12461_v51   ;;  %6332 = vmatprep.mubr.msk.f32.mxu0 %vm4787_vm6, %v12628_v4 }
 0x72c   :  { %8199 = vset.pattern.permute.xlu0 %v8420_v44 }
 0x72d   :  { %8186 = vset.pattern.permute.xlu1 %v8420_v44  ;;  %4474 = vperm.xlu0 %8199, %v4190_v63  }
 0x72e   :  { %4449 = vperm.xlu1 %8186, %v12475_v39   ;;  %7648 = vmatmul.mubr.bf16.gmra.mrb[28].mxu1 %v12408_v10  ;;  %v6294_v10 = vld [vmem:[%s13742_s9 + $0x90] sm:$0xff] }
 0x72f   :  { %7651 = vmatprep.mubr.msk.bf16.mxu1 %vm8416_vm4, %v14379_v20 }
 0x731   :  { %8203 = vset.pattern.permute.xlu0 %v8421_v2 }
 0x732   :  { %8187 = vset.pattern.permute.xlu1 %v8419_v14  ;;  %4718 = vperm.xlu0 %8203, %v4191_v1  }
 0x733   :  { %4567 = vperm.xlu1 %8187, %v12475_v39   ;;  %v6296_v39 = vld [vmem:[%s13742_s9 + $0xa0] sm:$0xff] }
 0x736   :  { %8204 = vset.pattern.permute.xlu0 %v8420_v44  ;;  %7652 = vmatmul.mubr.bf16.gmra.mrb[32].mxu1 %v12415_v5  ;;  %v4389_v5 = vld [vmem:[%s13742_s9] sm:$0xff] }
 0x737   :  { %4571 = vperm.xlu1 %8187, %v12485_v16   ;;  %4484 = vperm.xlu0 %8204, %v12526_v36  }
 0x738   :  { %7663 = vmatprep.mubr.msk.f32.mxu1 %vm8416_vm4, %v14379_v20 }
 0x73b   :  { %8190 = vset.pattern.permute.xlu1 %v8421_v2  ;;  %4494 = vperm.xlu0 %8204, %v12533_v19  }
 0x73c   :  { %4698 = vperm.xlu1 %8190, %v12485_v16  }
 0x73f   :  { %8208 = vset.pattern.permute.xlu0 %v8421_v2 }
 0x740   :  { %8191 = vset.pattern.permute.xlu1 %v8420_v44  ;;  %4726 = vperm.xlu0 %8208, %v12541_v23  }
 0x741   :  { %4459 = vperm.xlu1 %8191, %v12495_v62  }
 0x745   :  { %8192 = vset.pattern.permute.xlu1 %v8419_v14 }
 0x746   :  { %4575 = vperm.xlu1 %8192, %v12495_v62  }
 0x74a   :  { %4579 = vperm.xlu1 %8192, %v4188_v6  }
 0x74e   :  { %8195 = vset.pattern.permute.xlu1 %v8421_v2 }
 0x74f   :  { %4706 = vperm.xlu1 %8195, %v4188_v6  }
 0x753   :  { %8196 = vset.pattern.permute.xlu1 %v8420_v44 }
 0x754   :  { %4469 = vperm.xlu1 %8196, %v4189_v58  }
 0x758   :  { %8197 = vset.pattern.permute.xlu1 %v8419_v14 }
 0x759   :  { %4583 = vperm.xlu1 %8197, %v4189_v58  }
 0x75d   :  { %4587 = vperm.xlu1 %8197, %v4190_v63  }
 0x761   :  { %8200 = vset.pattern.permute.xlu1 %v8421_v2 }
 0x762   :  { %4714 = vperm.xlu1 %8200, %v4190_v63   ;;  %v6299_v63 = vld [vmem:[%s13742_s9 + $0xb8] sm:$0xff] }
 0x766   :  { %v4536_v53 = vpop.permute.xlu1 %4535  ;;  %v4410_v22 = vpop.permute.xlu0 %4409  ;;  %8201 = vset.pattern.permute.xlu1 %v8420_v44 }
 0x767   :  { %4479 = vperm.xlu1 %8201, %v4191_v1   ;;  %v4606_v7 = vmul.f32 %v6294_v10, %v4536_v53  ;;  %v4497_v59 = vmul.f32 %v4410_v22, %v4389_v5 }
 0x769   :  { %v4624_v61 = vadd.f32 %v4606_v7, %v4497_v59 }
 0x76a   :  { %v4540_v9 = vpop.permute.xlu1 %4539 }
 0x76b   :  { %v4663_v40 = vpop.permute.xlu0 %4662  ;;  %8202 = vset.pattern.permute.xlu1 %v8419_v14  ;;  %v4607_v32 = vmul.f32 %v6295_v38, %v4540_v9  ;;  %v4861_v38 = vld [vmem:[%s13744_s11] sm:$0xff] }
 0x76c   :  { %4591 = vperm.xlu1 %8202, %v4191_v1   ;;  %v4733_v0 = vmul.f32 %v6312_v30, %v4663_v40  ;;  %v4862_v30 = vld [vmem:[%s13744_s11 + $0x8] sm:$0xff] }
 0x76e   :  { %v4751_v12 = vadd.f32 %v4733_v0, %v4624_v61  ;;  %v6300_v0 = vld [vmem:[%s13742_s9 + $0xc0] sm:$0xff]  ;;  %v6301_v61 = vld [vmem:[%s13742_s9 + $0xc8] sm:$0xff] }
 0x76f   :  { %v4667_v17 = vpop.permute.xlu1 %4666 }
 0x770   :  { %v4415_v35 = vpop.permute.xlu0 %4414  ;;  %4595 = vperm.xlu1 %8202, %v12526_v36   ;;  %v4734_v48 = vmul.f32 %v6313_v47, %v4667_v17 }
 0x771   :  { %v4498_v21 = vmul.f32 %v4415_v35, %v4390_v45  ;;  %v7729_v45 = vpack.c.bf16 %v4862_v30, %v4861_v38  ;;  %v6305_v38 = vld [vmem:[%s13742_s9 + $0xe8] sm:$0xff] }
 0x773   :  { %v4625_v51 = vadd.f32 %v4607_v32, %v4498_v21  ;;  %7730 = vmatpush3.bf16.msra.mxu1 %v7729_v45  ;;  %v4395_v21 = vld [vmem:[%s13742_s9 + $0x30] sm:$0xff] }
 0x774   :  { %v4420_v15 = vpop.permute.xlu1 %4419  ;;  %8205 = vset.pattern.permute.xlu1 %v8421_v2  ;;  %7731 = vmatprep.subr.bf16.mxu1 %v8422_v41 }
 0x775   :  { %v4752_v60 = vadd.f32 %v4734_v48, %v4625_v51  ;;  %4722 = vperm.xlu1 %8205, %v12526_v36   ;;  %v4671_v28 = vpop.permute.xlu0 %4670  ;;  %v4499_v16 = vmul.f32 %v4420_v15, %v4391_v27  ;;  %v4396_v15 = vld [vmem:[%s13742_s9 + $0x38] sm:$0xff] }
 0x776   :  { %v4735_v54 = vmul.f32 %v6314_v46, %v4671_v28  ;;  %v6318_v28 = vld [vmem:[%s13742_s9 + $0x150] sm:$0xff] }
 0x777   :  { %v7702_v34 = vpack.c.bf16 %v4752_v60, %v4751_v12 }
 0x779   :  { %7703 = vmatpush1.bf16.msra.mxu0 %v7702_v34  ;;  %v4544_v55 = vpop.permute.xlu1 %4543  ;;  %8206 = vset.pattern.permute.xlu1 %v8420_v44  ;;  %v4392_v44 = vld [vmem:[%s13742_s9 + $0x18] sm:$0xff] }
 0x77a   :  { %4489 = vperm.xlu1 %8206, %v12541_v23   ;;  %7704 = vmatprep.subr.bf16.mxu0 %v8422_v41  ;;  %v4608_v24 = vmul.f32 %v6296_v39, %v4544_v55  ;;  %v4425_v49 = vpop.permute.xlu0 %4424  ;;  %v6319_v55 = vld [vmem:[%s13742_s9 + $0x158] sm:$0xff] }
 0x77b   :  { %v4500_v3 = vmul.f32 %v4425_v49, %v4392_v44 }
 0x77c   :  { %v4626_v62 = vadd.f32 %v4608_v24, %v4499_v16 }
 0x77d   :  { %v4548_v57 = vpop.permute.xlu1 %4547 }
 0x77e   :  { %8207 = vset.pattern.permute.xlu1 %v8419_v14  ;;  %v4609_v43 = vmul.f32 %v6297_v25, %v4548_v57  ;;  %v4753_v14 = vadd.f32 %v4735_v54, %v4626_v62  ;;  %v6303_v54 = vld [vmem:[%s13742_s9 + $0xd8] sm:$0xff] }
 0x77f   :  { %4599 = vperm.xlu1 %8207, %v12541_v23   ;;  %v4679_v52 = vpop.permute.xlu0 %4678  ;;  %v6317_v23 = vld [vmem:[%s13742_s9 + $0x148] sm:$0xff] }
 0x780   :  { %v4627_v26 = vadd.f32 %v4609_v43, %v4500_v3  ;;  %v4737_v40 = vmul.f32 %v6316_v13, %v4679_v52  ;;  %v6302_v3 = vld [vmem:[%s13742_s9 + $0xd0] sm:$0xff]  ;;  %v6320_v52 = vld [vmem:[%s13742_s9 + $0x160] sm:$0xff] }
 0x782   :  { %v4675_v50 = vpop.permute.xlu1 %4674 }
 0x783   :  { %v4736_v18 = vmul.f32 %v6315_v11, %v4675_v50  ;;  %4603 = vperm.xlu1 %8207, %v12533_v19   ;;  %v4397_v50 = vld [vmem:[%s13742_s9 + $0x40] sm:$0xff] }
 0x784   :  { %v4435_v36 = vpop.permute.xlu0 %4434 }
 0x785   :  { %v4754_v6 = vadd.f32 %v4736_v18, %v4627_v26  ;;  %v4502_v53 = vmul.f32 %v4435_v36, %v4394_v31  ;;  %v4863_v36 = vld [vmem:[%s13744_s11 + $0x10] sm:$0xff] }
 0x787   :  { %v7705_v33 = vpack.c.bf16 %v4754_v6, %v4753_v14  ;;  %v4430_v56 = vpop.permute.xlu1 %4429  ;;  %8209 = vset.pattern.permute.xlu1 %v8421_v2  ;;  %v4393_v2 = vld [vmem:[%s13742_s9 + $0x20] sm:$0xff]  ;;  %v4398_v14 = vld [vmem:[%s13742_s9 + $0x48] sm:$0xff] }
 0x788   :  { %4730 = vperm.xlu1 %8209, %v12533_v19   ;;  %v4501_v8 = vmul.f32 %v4430_v56, %v4393_v2 }
 0x789   :  { %7706 = vmatpush1.bf16.msra.mxu0 %v7705_v33  ;;  %v4687_v35 = vpop.permute.xlu0 %4686 }
 0x78a   :  { %7707 = vmatprep.subr.bf16.mxu0 %v8422_v41  ;;  %v4739_v24 = vmul.f32 %v6318_v28, %v4687_v35  ;;  %v6322_v35 = vld [vmem:[%s13742_s9 + $0x170] sm:$0xff] }
 0x78c   :  { %v4552_v58 = vpop.permute.xlu1 %4551 }
 0x78d   :  { %v4610_v42 = vmul.f32 %v6298_v37, %v4552_v58  ;;  %v6321_v58 = vld [vmem:[%s13742_s9 + $0x168] sm:$0xff] }
 0x78e   :  { %v4445_v12 = vpop.permute.xlu0 %4444 }
 0x78f   :  { %v4628_v22 = vadd.f32 %v4610_v42, %v4501_v8  ;;  %v4504_v39 = vmul.f32 %v4445_v12, %v4396_v15  ;;  %v4864_v8 = vld [vmem:[%s13744_s11 + $0x18] sm:$0xff] }
 0x790   :  { %v4556_v1 = vpop.permute.xlu1 %4555 }
 0x791   :  { %v4611_v19 = vmul.f32 %v6299_v63, %v4556_v1  ;;  %v4755_v7 = vadd.f32 %v4737_v40, %v4628_v22 }
 0x793   :  { %v4629_v10 = vadd.f32 %v4611_v19, %v4502_v53  ;;  %v4695_v11 = vpop.permute.xlu0 %4694 }
 0x794   :  { %v4741_v42 = vmul.f32 %v6320_v52, %v4695_v11  ;;  %v6324_v11 = vld [vmem:[%s13742_s9 + $0x180] sm:$0xff] }
 0x795   :  { %v4683_v9 = vpop.permute.xlu1 %4682 }
 0x796   :  { %v4738_v5 = vmul.f32 %v6317_v23, %v4683_v9  ;;  %v7732_v23 = vpack.c.bf16 %v4864_v8, %v4863_v36  ;;  %v4404_v8 = vld [vmem:[%s13742_s9 + $0x78] sm:$0xff] }
 0x798   :  { %v4756_v59 = vadd.f32 %v4738_v5, %v4629_v10  ;;  %v4455_v6 = vpop.permute.xlu0 %4454  ;;  %7733 = vmatpush3.bf16.msra.mxu1 %v7732_v23  ;;  %v6304_v10 = vld [vmem:[%s13742_s9 + $0xe0] sm:$0xff]  ;;  %v4399_v5 = vld [vmem:[%s13742_s9 + $0x50] sm:$0xff] }
 0x799   :  { %v4506_v37 = vmul.f32 %v4455_v6, %v4398_v14 }
 0x79a   :  { %v7708_v17 = vpack.c.bf16 %v4756_v59, %v4755_v7  ;;  %v4440_v47 = vpop.permute.xlu1 %4439  ;;  %v4400_v7 = vld [vmem:[%s13742_s9 + $0x58] sm:$0xff] }
 0x79b   :  { %v4503_v60 = vmul.f32 %v4440_v47, %v4395_v21 }
 0x79c   :  { %7709 = vmatpush1.bf16.msra.mxu0 %v7708_v17 }
 0x79d   :  { %7710 = vmatprep.subr.bf16.mxu0 %v8422_v41  ;;  %v4703_v9 = vpop.permute.xlu0 %4702 }
 0x79f   :  { %v4560_v32 = vpop.permute.xlu1 %4559 }
 0x7a0   :  { %v4612_v48 = vmul.f32 %v6300_v0, %v4560_v32  ;;  %v6323_v32 = vld [vmem:[%s13742_s9 + $0x178] sm:$0xff] }
 0x7a2   :  { %v4630_v27 = vadd.f32 %v4612_v48, %v4503_v60  ;;  %v4465_v59 = vpop.permute.xlu0 %4464  ;;  %v4743_v48 = vmul.f32 %v6322_v35, %v4703_v9 }
 0x7a3   :  { %v4564_v51 = vpop.permute.xlu1 %4563  ;;  %v4508_v0 = vmul.f32 %v4465_v59, %v4400_v7  ;;  %v4952_v59 = vld [vmem:[%s13746_s13 + $0x18] sm:$0xff] }
 0x7a4   :  { %v4613_v34 = vmul.f32 %v6301_v61, %v4564_v51  ;;  %v4757_v49 = vadd.f32 %v4739_v24, %v4630_v27  ;;  %v6306_v27 = vld [vmem:[%s13742_s9 + $0xf0] sm:$0xff]  ;;  %v6307_v24 = vld [vmem:[%s13742_s9 + $0xf8] sm:$0xff] }
 0x7a6   :  { %v4631_v57 = vadd.f32 %v4613_v34, %v4504_v39 }
 0x7a8   :  { %v4691_v25 = vpop.permute.xlu1 %4690 }
 0x7a9   :  { %v4740_v44 = vmul.f32 %v6319_v55, %v4691_v25  ;;  %v4711_v55 = vpop.permute.xlu0 %4710  ;;  %v4401_v25 = vld [vmem:[%s13742_s9 + $0x60] sm:$0xff] }
 0x7ab   :  { %v4758_v16 = vadd.f32 %v4740_v44, %v4631_v57 }
 0x7ad   :  { %v7711_v43 = vpack.c.bf16 %v4758_v16, %v4757_v49  ;;  %v4450_v46 = vpop.permute.xlu1 %4449  ;;  %v4402_v49 = vld [vmem:[%s13742_s9 + $0x68] sm:$0xff]  ;;  %v4475_v16 = vpop.permute.xlu0 %4474 }
 0x7ae   :  { %v4505_v33 = vmul.f32 %v4450_v46, %v4397_v50 }
 0x7af   :  { %7712 = vmatpush1.bf16.msra.mxu0 %v7711_v43 }
 0x7b0   :  { %7713 = vmatprep.subr.bf16.mxu0 %v8422_v41 }
 0x7b2   :  { %v4568_v62 = vpop.permute.xlu1 %4567 }
 0x7b3   :  { %v4614_v26 = vmul.f32 %v6302_v3, %v4568_v62  ;;  %v6325_v62 = vld [vmem:[%s13742_s9 + $0x188] sm:$0xff]  ;;  %v4510_v3 = vmul.f32 %v4475_v16, %v4402_v49  ;;  %v4405_v49 = vld [vmem:[%s13742_s9 + $0x80] sm:$0xff]  ;;  %v6311_v16 = vld [vmem:[%s13742_s9 + $0x118] sm:$0xff] }
 0x7b5   :  { %v4632_v2 = vadd.f32 %v4614_v26, %v4505_v33  ;;  %v4745_v26 = vmul.f32 %v6324_v11, %v4711_v55 }
 0x7b6   :  { %v4572_v18 = vpop.permute.xlu1 %4571 }
 0x7b7   :  { %v4615_v56 = vmul.f32 %v6303_v54, %v4572_v18  ;;  %v4759_v19 = vadd.f32 %v4741_v42, %v4632_v2  ;;  %v6308_v2 = vld [vmem:[%s13742_s9 + $0x100] sm:$0xff]  ;;  %v6309_v42 = vld [vmem:[%s13742_s9 + $0x108] sm:$0xff] }
 0x7b9   :  { %v4633_v1 = vadd.f32 %v4615_v56, %v4506_v37 }
 0x7bb   :  { %v4699_v63 = vpop.permute.xlu1 %4698 }
 0x7bc   :  { %v4742_v31 = vmul.f32 %v6321_v58, %v4699_v63  ;;  %v4719_v58 = vpop.permute.xlu0 %4718  ;;  %v4403_v63 = vld [vmem:[%s13742_s9 + $0x70] sm:$0xff] }
 0x7be   :  { %v4760_v13 = vadd.f32 %v4742_v31, %v4633_v1  ;;  %v12749_v1 = vld [vmem:[%s13741_s8] ss:$0 sm:$0xff] }
 0x7c0   :  { %v7714_v53 = vpack.c.bf16 %v4760_v13, %v4759_v19  ;;  %v4460_v22 = vpop.permute.xlu1 %4459  ;;  %v4485_v19 = vpop.permute.xlu0 %4484 }
 0x7c1   :  { %v4507_v17 = vmul.f32 %v4460_v22, %v4399_v5 }
 0x7c2   :  { %7715 = vmatpush1.bf16.msra.mxu0 %v7714_v53 }
 0x7c3   :  { %7716 = vmatprep.subr.bf16.mxu0 %v8422_v41 }
 0x7c5   :  { %v4576_v40 = vpop.permute.xlu1 %4575 }
 0x7c6   :  { %v4616_v30 = vmul.f32 %v6304_v10, %v4576_v40  ;;  %v6326_v40 = vld [vmem:[%s13742_s9 + $0x190] sm:$0xff]  ;;  %v6327_v10 = vld [vmem:[%s13742_s9 + $0x198] sm:$0xff] }
 0x7c7   :  { %v4747_v35 = vmul.f32 %v6326_v40, %v4719_v58  ;;  %v4971_v40 = vld [vmem:[%s13746_s13 + $0xb0] sm:$0xff] }
 0x7c8   :  { %v4634_v21 = vadd.f32 %v4616_v30, %v4507_v17 }
 0x7c9   :  { %v4580_v45 = vpop.permute.xlu1 %4579  ;;  %v4300_v13 = vpop.f32.mrb[0].mxu1 }
 0x7ca   :  { %v4617_v47 = vmul.f32 %v6305_v38, %v4580_v45  ;;  %v4761_v12 = vadd.f32 %v4743_v48, %v4634_v21  ;;  %v4301_v22 = vadd.f32 %v12749_v1, %v4300_v13  ;;  %v7621_v9 = vpop.f32.mrb[1].mxu1  ;;  %v4512_v38 = vmul.f32 %v4485_v19, %v4404_v8  ;;  %v4959_v21 = vld [vmem:[%s13746_s13 + $0x50] sm:$0xff]  ;;  %v4956_v8 = vld [vmem:[%s13746_s13 + $0x38] sm:$0xff] }
 0x7cb   :  { %v4303_v5 = vpop.f32.mrb[2].mxu1  ;;  %v4964_v9 = vld [vmem:[%s13746_s13 + $0x78] sm:$0xff] }
 0x7cc   :  { %v4635_v51 = vadd.f32 %v4617_v47, %v4508_v0  ;;  %v4304_v45 = vadd.f32 %v12749_v1, %v4303_v5  ;;  %v7622_v7 = vpop.f32.mrb[3].mxu1  ;;  %v12765_v47 = vmax.f32 %v4301_v22, 0.0 }
 0x7ce   :  { %v4707_v61 = vpop.permute.xlu1 %4706  ;;  %v5078_v48 = vmul.f32 %v4952_v59, %v12765_v47 }
 0x7cf   :  { %v4744_v15 = vmul.f32 %v6323_v32, %v4707_v61  ;;  %v12770_v61 = vmax.f32 %v4304_v45, 0.0 }
 0x7d1   :  { %v4762_v60 = vadd.f32 %v4744_v15, %v4635_v51  ;;  %v5082_v7 = vmul.f32 %v4956_v8, %v12770_v61 }
 0x7d3   :  { %v7717_v34 = vpack.c.bf16 %v4762_v60, %v4761_v12  ;;  %v4470_v28 = vpop.permute.xlu1 %4469  ;;  %v4308_v12 = vpop.f32.mrb[4].mxu1  ;;  %v5085_v60 = vmul.f32 %v4959_v21, %v12770_v61  ;;  %v4963_v21 = vld [vmem:[%s13746_s13 + $0x70] sm:$0xff] }
 0x7d4   :  { %v4509_v43 = vmul.f32 %v4470_v28, %v4401_v25  ;;  %v7625_v55 = vpop.f32.mrb[5].mxu1 }
 0x7d5   :  { %7718 = vmatpush1.bf16.msra.mxu0 %v7717_v34 }
 0x7d6   :  { %7719 = vmatprep.subr.bf16.mxu0 %v8422_v41 }
 0x7d8   :  { %v4584_v39 = vpop.permute.xlu1 %4583 }
 0x7d9   :  { %v4618_v57 = vmul.f32 %v6306_v27, %v4584_v39  ;;  %v4311_v39 = vpop.f32.mrb[6].mxu1  ;;  %v7770_v27 = vpack.c.bf16 %v5085_v60, %v5078_v48  ;;  %v4970_v48 = vld [vmem:[%s13746_s13 + $0xa8] sm:$0xff] }
 0x7da   :  { %v7626_v25 = vpop.f32.mrb[7].mxu1 }
 0x7db   :  { %v4636_v50 = vadd.f32 %v4618_v57, %v4509_v43  ;;  %7771 = vmatprep.subr.bf16.mxu1 %v7770_v27  ;;  %v4495_v57 = vpop.permute.xlu0 %4494  ;;  %v4316_v43 = vpop.f32.mrb[8].mxu1  ;;  %v4978_v27 = vld [vmem:[%s13746_s13 + $0xe8] sm:$0xff]  ;;  %v4985_v25 = vld [vmem:[%s13746_s13 + $0x120] sm:$0xff] }
 0x7dc   :  { %v4588_v44 = vpop.permute.xlu1 %4587  ;;  %v4317_v13 = vadd.f32 %v12749_v1, %v4316_v43 }
 0x7dd   :  { %v4619_v46 = vmul.f32 %v6307_v24, %v4588_v44  ;;  %v4763_v6 = vadd.f32 %v4745_v26, %v4636_v50  ;;  %v6310_v44 = vld [vmem:[%s13742_s9 + $0x110] sm:$0xff]  ;;  %v7629_v50 = vpop.f32.mrb[9].mxu1 }
 0x7de   :  { %v4319_v26 = vpop.f32.mrb[10].mxu1  ;;  %v4992_v50 = vld [vmem:[%s13746_s13 + $0x158] sm:$0xff] }
 0x7df   :  { %v4637_v18 = vadd.f32 %v4619_v46, %v4510_v3  ;;  %v4312_v3 = vadd.f32 %v12749_v1, %v4311_v39  ;;  %v4727_v58 = vpop.permute.xlu0 %4726 }
 0x7e1   :  { %v4715_v54 = vpop.permute.xlu1 %4714 }
 0x7e2   :  { %v4746_v14 = vmul.f32 %v6325_v62, %v4715_v54  ;;  %v4309_v62 = vadd.f32 %v12749_v1, %v4308_v12  ;;  %v4406_v54 = vld [vmem:[%s13742_s9 + $0x88] sm:$0xff] }
 0x7e4   :  { %v4764_v33 = vadd.f32 %v4746_v14, %v4637_v18 }
 0x7e6   :  { %v7720_v56 = vpack.c.bf16 %v4764_v33, %v4763_v6  ;;  %v4480_v52 = vpop.permute.xlu1 %4479  ;;  %v7630_v6 = vpop.f32.mrb[11].mxu1  ;;  %v4950_v33 = vld [vmem:[%s13746_s13 + $0x8] sm:$0xff] }
 0x7e7   :  { %v4511_v23 = vmul.f32 %v4480_v52, %v4403_v63  ;;  %v6328_v52 = vld [vmem:[%s13742_s9 + $0x1a0] sm:$0xff] }
 0x7e8   :  { %7721 = vmatpush1.bf16.msra.mxu0 %v7720_v56  ;;  %v4957_v56 = vld [vmem:[%s13746_s13 + $0x40] sm:$0xff] }
 0x7e9   :  { %7722 = vmatprep.subr.bf16.mxu0 %v8422_v41  ;;  %v5083_v22 = vmul.f32 %v4957_v56, %v12770_v61 }
 0x7eb   :  { %v4592_v37 = vpop.permute.xlu1 %4591 }
 0x7ec   :  { %v4620_v31 = vmul.f32 %v6308_v2, %v4592_v37  ;;  %v6329_v37 = vld [vmem:[%s13742_s9 + $0x1a8] sm:$0xff]  ;;  %v4514_v2 = vmul.f32 %v4495_v57, %v4406_v54  ;;  %v4999_v54 = vld [vmem:[%s13746_s13 + $0x190] sm:$0xff] }
 0x7ee   :  { %v4638_v30 = vadd.f32 %v4620_v31, %v4511_v23  ;;  %v12803_v31 = vmax.f32 %v4312_v3, 0.0  ;;  %v4320_v23 = vadd.f32 %v12749_v1, %v4319_v26  ;;  %v4984_v3 = vld [vmem:[%s13746_s13 + $0x118] sm:$0xff] }
 0x7ef   :  { %v4596_v36 = vpop.permute.xlu1 %4595 }
 0x7f0   :  { %v4621_v53 = vmul.f32 %v6309_v42, %v4596_v36  ;;  %v4765_v51 = vadd.f32 %v4747_v35, %v4638_v30  ;;  %v12801_v42 = vmax.f32 %v4309_v62, 0.0  ;;  %v4949_v36 = vld [vmem:[%s13746_s13] sm:$0xff]  ;;  %v4324_v30 = vpop.f32.mrb[12].mxu1  ;;  %v5096_v57 = vmul.f32 %v4970_v48, %v12803_v31 }
 0x7f1   :  { %v5075_v45 = vmul.f32 %v4949_v36, %v12765_v47  ;;  %v7633_v35 = vpop.f32.mrb[13].mxu1  ;;  %v4325_v60 = vadd.f32 %v12749_v1, %v4324_v30  ;;  %v4977_v62 = vld [vmem:[%s13746_s13 + $0xe0] sm:$0xff]  ;;  %v4998_v36 = vld [vmem:[%s13746_s13 + $0x188] sm:$0xff] }
 0x7f2   :  { %v4639_v32 = vadd.f32 %v4621_v53, %v4512_v38  ;;  %v5076_v53 = vmul.f32 %v4950_v33, %v12765_v47  ;;  %v5005_v30 = vld [vmem:[%s13746_s13 + $0x1c0] sm:$0xff] }
 0x7f4   :  { %v4723_v17 = vpop.permute.xlu1 %4722  ;;  %v7734_v12 = vpack.c.bf16 %v5083_v22, %v5076_v53  ;;  %v5013_v53 = vld [vmem:[%s13746_s13 + $0x200] sm:$0xff] }
 0x7f5   :  { %v4748_v0 = vmul.f32 %v6327_v10, %v4723_v17  ;;  %v4749_v10 = vmul.f32 %v6328_v52, %v4727_v58 }
 0x7f7   :  { %v4766_v15 = vadd.f32 %v4748_v0, %v4639_v32  ;;  %v5090_v32 = vmul.f32 %v4964_v9, %v12801_v42  ;;  %v5097_v0 = vmul.f32 %v4971_v40, %v12803_v31 }
 0x7f9   :  { %v7723_v34 = vpack.c.bf16 %v4766_v15, %v4765_v51  ;;  %v4490_v28 = vpop.permute.xlu1 %4489  ;;  %v12831_v51 = vmax.f32 %v4317_v13, 0.0  ;;  %v12833_v15 = vmax.f32 %v4320_v23, 0.0  ;;  %v5006_v23 = vld [vmem:[%s13746_s13 + $0x1c8] sm:$0xff] }
 0x7fa   :  { %v4513_v18 = vmul.f32 %v4490_v28, %v4405_v49  ;;  %v7738_v49 = vpack.c.bf16 %v5097_v0, %v5090_v32 }
 0x7fb   :  { %7724 = vmatpush1.bf16.msra.mxu0 %v7723_v34  ;;  %v4327_v34 = vpop.f32.mrb[14].mxu1  ;;  %v5103_v33 = vmul.f32 %v4977_v62, %v12831_v51  ;;  %v5110_v56 = vmul.f32 %v4984_v3, %v12833_v15 }
 0x7fc   :  { %7725 = vmatprep.subr.bf16.mxu0 %v8422_v41  ;;  %v4328_v55 = vadd.f32 %v12749_v1, %v4327_v34  ;;  %v7634_v39 = vpop.f32.mrb[15].mxu1  ;;  %v5019_v34 = vld [vmem:[%s13746_s13 + $0x230] sm:$0xff] }
 0x7fd   :  { %v4332_v26 = vpop.f32.mrb[16].mxu1  ;;  %v7744_v9 = vpack.c.bf16 %v5110_v56, %v5103_v33 }
 0x7fe   :  { %v4600_v24 = vpop.permute.xlu1 %4599  ;;  %v12847_v43 = vmax.f32 %v4328_v55, 0.0  ;;  %v7637_v6 = vpop.f32.mrb[17].mxu1 }
 0x7ff   :  { %v4622_v46 = vmul.f32 %v6310_v44, %v4600_v24  ;;  %v5089_v24 = vmul.f32 %v4963_v21, %v12801_v42  ;;  %v7736_v44 = vpack.c.bf16 %v5082_v7, %v5075_v45  ;;  %v4335_v52 = vpop.f32.mrb[18].mxu1  ;;  %v5012_v45 = vld [vmem:[%s13746_s13 + $0x1f8] sm:$0xff]  ;;  %v5033_v6 = vld [vmem:[%s13746_s13 + $0x2a0] sm:$0xff] }
 0x800   :  { %v7638_v13 = vpop.f32.mrb[19].mxu1 }
 0x801   :  { %v4640_v63 = vadd.f32 %v4622_v46, %v4513_v18  ;;  %v5104_v46 = vmul.f32 %v4978_v27, %v12831_v51  ;;  %v7740_v18 = vpack.c.bf16 %v5096_v57, %v5089_v24  ;;  %v5027_v27 = vld [vmem:[%s13746_s13 + $0x270] sm:$0xff] }
 0x802   :  { %v4604_v11 = vpop.permute.xlu1 %4603 }
 0x803   :  { %v4623_v14 = vmul.f32 %v6311_v16, %v4604_v11  ;;  %v4767_v59 = vadd.f32 %v4749_v10, %v4640_v63  ;;  %v12845_v16 = vmax.f32 %v4325_v60, 0.0  ;;  %v5111_v11 = vmul.f32 %v4985_v25, %v12833_v15  ;;  %v4991_v63 = vld [vmem:[%s13746_s13 + $0x150] sm:$0xff]  ;;  %v5020_v60 = vld [vmem:[%s13746_s13 + $0x238] sm:$0xff]  ;;  %v5026_v25 = vld [vmem:[%s13746_s13 + $0x268] sm:$0xff] }
 0x804   :  { %v5124_v10 = vmul.f32 %v4998_v36, %v12847_v43 }
 0x805   :  { %v4641_v5 = vadd.f32 %v4623_v14, %v4514_v2  ;;  %v4333_v14 = vadd.f32 %v12749_v1, %v4332_v26  ;;  %v7742_v58 = vpack.c.bf16 %v5111_v11, %v5104_v46  ;;  %v5125_v2 = vmul.f32 %v4999_v54, %v12847_v43 }
 0x806   :  { %v5117_v40 = vmul.f32 %v4991_v63, %v12845_v16 }
 0x807   :  { %v4731_v19 = vpop.permute.xlu1 %4730  ;;  %v12877_v8 = vmax.f32 %v4333_v14, 0.0  ;;  %v5034_v14 = vld [vmem:[%s13746_s13 + $0x2a8] sm:$0xff] }
 0x808   :  { %v4750_v38 = vmul.f32 %v6329_v37, %v4731_v19  ;;  %v5118_v37 = vmul.f32 %v4992_v50, %v12845_v16  ;;  %v4336_v19 = vadd.f32 %v12749_v1, %v4335_v52  ;;  %v7748_v32 = vpack.c.bf16 %v5124_v10, %v5117_v40 }
 0x809   :  { %v5131_v0 = vmul.f32 %v5005_v30, %v12877_v8  ;;  %v5047_v30 = vld [vmem:[%s13746_s13 + $0x310] sm:$0xff] }
 0x80a   :  { %v4768_v17 = vadd.f32 %v4750_v38, %v4641_v5  ;;  %v12886_v22 = vmax.f32 %v4336_v19, 0.0  ;;  %v7746_v5 = vpack.c.bf16 %v5125_v2, %v5118_v37  ;;  %v5132_v38 = vmul.f32 %v5006_v23, %v12877_v8  ;;  %v5040_v37 = vld [vmem:[%s13746_s13 + $0x2d8] sm:$0xff] }
 0x80c   :  { %v7726_v28 = vpack.c.bf16 %v4768_v17, %v4767_v59  ;;  %v5139_v7 = vmul.f32 %v5013_v53, %v12886_v22  ;;  %v4340_v59 = vpop.f32.mrb[20].mxu1  ;;  %v5138_v21 = vmul.f32 %v5012_v45, %v12886_v22 }
 0x80d   :  { %v4341_v17 = vadd.f32 %v12749_v1, %v4340_v59  ;;  %v7641_v35 = vpop.f32.mrb[21].mxu1 }
 0x80e   :  { %7727 = vmatpush1.bf16.msra.mxu0 %v7726_v28  ;;  %v4343_v48 = vpop.f32.mrb[22].mxu1  ;;  %v7752_v57 = vpack.c.bf16 %v5138_v21, %v5131_v0  ;;  %v5054_v35 = vld [vmem:[%s13746_s13 + $0x348] sm:$0xff] }
 0x80f   :  { %7735 = vmatprep.subr.bf16.mxu0 %v7734_v12  ;;  %v7750_v12 = vpack.c.bf16 %v5139_v7, %v5132_v38  ;;  %v12907_v28 = vmax.f32 %v4341_v17, 0.0  ;;  %v4344_v55 = vadd.f32 %v12749_v1, %v4343_v48  ;;  %v7642_v39 = vpop.f32.mrb[23].mxu1  ;;  %v5048_v38 = vld [vmem:[%s13746_s13 + $0x318] sm:$0xff]  ;;  %v5055_v17 = vld [vmem:[%s13746_s13 + $0x350] sm:$0xff] }
 0x810   :  { %v4348_v62 = vpop.f32.mrb[24].mxu1 }
 0x811   :  { %4855 = vmatmul.mubr.f32.vlgmr.msra.gmra.mrb[36].mxu0 %v12624_v29  ;;  %v12916_v24 = vmax.f32 %v4344_v55, 0.0  ;;  %v4349_v3 = vadd.f32 %v12749_v1, %v4348_v62  ;;  %v7645_v50 = vpop.f32.mrb[25].mxu1 }
 0x812   :  { %7737 = vmatpush1.bf16.msra.mxu0 %v7736_v44  ;;  %6336 = vmatprep.mubr.msk.f32.mxu0 %vm4787_vm6, %v12628_v4  ;;  %v5146_v44 = vmul.f32 %v5020_v60, %v12907_v28  ;;  %v5069_v50 = vld [vmem:[%s13746_s13 + $0x3c0] sm:$0xff] }
 0x813   :  { %7739 = vmatprep.subr.bf16.mxu0 %v7738_v49  ;;  %v5145_v49 = vmul.f32 %v5019_v34, %v12907_v28  ;;  %v5153_v46 = vmul.f32 %v5027_v27, %v12916_v24  ;;  %v5152_v11 = vmul.f32 %v5026_v25, %v12916_v24  ;;  %v12929_v33 = vmax.f32 %v4349_v3, 0.0  ;;  %v4954_v25 = vld [vmem:[%s13746_s13 + $0x28] sm:$0xff] }
 0x815   :  { %v7754_v54 = vpack.c.bf16 %v5153_v46, %v5146_v44  ;;  %v7756_v26 = vpack.c.bf16 %v5152_v11, %v5145_v49  ;;  %v5160_v63 = vmul.f32 %v5034_v14, %v12929_v33  ;;  %v5159_v36 = vmul.f32 %v5033_v6, %v12929_v33  ;;  %v5062_v49 = vld [vmem:[%s13746_s13 + $0x388] sm:$0xff]  ;;  %v5061_v46 = vld [vmem:[%s13746_s13 + $0x380] sm:$0xff] }
 0x816   :  { %7741 = vmatpush1.bf16.msra.mxu0 %v7740_v18  ;;  %v4351_v18 = vpop.f32.mrb[26].mxu1 }
 0x817   :  { %7743 = vmatprep.subr.bf16.mxu0 %v7742_v58  ;;  %v4352_v56 = vadd.f32 %v12749_v1, %v4351_v18  ;;  %v7646_v52 = vpop.f32.mrb[27].mxu1  ;;  %v5041_v58 = vld [vmem:[%s13746_s13 + $0x2e0] sm:$0xff] }
 0x818   :  { %v4356_v23 = vpop.f32.mrb[28].mxu1  ;;  %v4960_v52 = vld [vmem:[%s13746_s13 + $0x58] sm:$0xff] }
 0x819   :  { %v12938_v2 = vmax.f32 %v4352_v56, 0.0  ;;  %v4357_v53 = vadd.f32 %v12749_v1, %v4356_v23  ;;  %v4953_v56 = vld [vmem:[%s13746_s13 + $0x20] sm:$0xff]  ;;  %v5086_v23 = vmul.f32 %v4960_v52, %v12770_v61 }
 0x81a   :  { %7745 = vmatpush1.bf16.msra.mxu0 %v7744_v9  ;;  %v7649_v9 = vpop.f32.mrb[29].mxu1 }
 0x81b   :  { %7747 = vmatprep.subr.bf16.mxu0 %v7746_v5  ;;  %v5167_v19 = vmul.f32 %v5041_v58, %v12938_v2  ;;  %v5166_v13 = vmul.f32 %v5040_v37, %v12938_v2  ;;  %v4359_v5 = vpop.f32.mrb[30].mxu1  ;;  %v12951_v45 = vmax.f32 %v4357_v53, 0.0  ;;  %v4968_v58 = vld [vmem:[%s13746_s13 + $0x98] sm:$0xff]  ;;  %v4975_v37 = vld [vmem:[%s13746_s13 + $0xd0] sm:$0xff] }
 0x81c   :  { %v4360_v7 = vadd.f32 %v12749_v1, %v4359_v5  ;;  %v7650_v59 = vpop.f32.mrb[31].mxu1  ;;  %v4967_v5 = vld [vmem:[%s13746_s13 + $0x90] sm:$0xff] }
 0x81d   :  { %v7758_v40 = vpack.c.bf16 %v5167_v19, %v5160_v63  ;;  %v7760_v10 = vpack.c.bf16 %v5166_v13, %v5159_v36  ;;  %v5174_v0 = vmul.f32 %v5048_v38, %v12951_v45  ;;  %v5173_v21 = vmul.f32 %v5047_v30, %v12951_v45  ;;  %v4364_v60 = vpop.f32.mrb[32].mxu1  ;;  %v4974_v38 = vld [vmem:[%s13746_s13 + $0xc8] sm:$0xff] }
 0x81e   :  { %7749 = vmatpush1.bf16.msra.mxu0 %v7748_v32  ;;  %v12960_v32 = vmax.f32 %v4360_v7, 0.0  ;;  %v4365_v34 = vadd.f32 %v12749_v1, %v4364_v60  ;;  %v7653_v55 = vpop.f32.mrb[33].mxu1  ;;  %v5079_v13 = vmul.f32 %v4953_v56, %v12765_v47  ;;  %v4982_v30 = vld [vmem:[%s13746_s13 + $0x108] sm:$0xff]  ;;  %v4989_v7 = vld [vmem:[%s13746_s13 + $0x140] sm:$0xff]  ;;  %v4988_v60 = vld [vmem:[%s13746_s13 + $0x138] sm:$0xff] }
 0x81f   :  { %7751 = vmatprep.subr.bf16.mxu0 %v7750_v12  ;;  %v4367_v44 = vpop.f32.mrb[34].mxu1  ;;  %v5003_v55 = vld [vmem:[%s13746_s13 + $0x1b0] sm:$0xff] }
 0x820   :  { %v5181_v48 = vmul.f32 %v5055_v17, %v12960_v32  ;;  %v5180_v12 = vmul.f32 %v5054_v35, %v12960_v32  ;;  %v12979_v11 = vmax.f32 %v4365_v34, 0.0  ;;  %v4368_v62 = vadd.f32 %v12749_v1, %v4367_v44  ;;  %v7654_v3 = vpop.f32.mrb[35].mxu1  ;;  %v4996_v34 = vld [vmem:[%s13746_s13 + $0x178] sm:$0xff] }
 0x821   :  { %v7808_v59 = vpack.c.bf16 %v5086_v23, %v5079_v13  ;;  %v5093_v17 = vmul.f32 %v4967_v5, %v12801_v42  ;;  %v5100_v35 = vmul.f32 %v4974_v38, %v12803_v31  ;;  %v5122_v44 = vmul.f32 %v4996_v34, %v12845_v16  ;;  %v5010_v3 = vld [vmem:[%s13746_s13 + $0x1e8] sm:$0xff]  ;;  %v5024_v23 = vld [vmem:[%s13746_s13 + $0x258] sm:$0xff] }
 0x822   :  { %7753 = vmatpush1.bf16.msra.mxu0 %v7752_v57  ;;  %v7762_v39 = vpack.c.bf16 %v5181_v48, %v5174_v0  ;;  %v7764_v27 = vpack.c.bf16 %v5180_v12, %v5173_v21  ;;  %v4961_v57 = vld [vmem:[%s13746_s13 + $0x60] sm:$0xff]  ;;  %v12990_v14 = vmax.f32 %v4368_v62, 0.0  ;;  %v5188_v6 = vmul.f32 %v5062_v49, %v12979_v11  ;;  %v5002_v62 = vld [vmem:[%s13746_s13 + $0x1a8] sm:$0xff] }
 0x823   :  { %7755 = vmatprep.subr.bf16.mxu0 %v7754_v54  ;;  %v5068_v54 = vld [vmem:[%s13746_s13 + $0x3b8] sm:$0xff]  ;;  %v5087_v18 = vmul.f32 %v4961_v57, %v12770_v61  ;;  %v5187_v1 = vmul.f32 %v5061_v46, %v12979_v11  ;;  %v5108_v21 = vmul.f32 %v4982_v30, %v12831_v51  ;;  %v5115_v48 = vmul.f32 %v4989_v7, %v12833_v15  ;;  %v4981_v12 = vld [vmem:[%s13746_s13 + $0x100] sm:$0xff]  ;;  %v4995_v46 = vld [vmem:[%s13746_s13 + $0x170] sm:$0xff] }
 0x824   :  { %v5195_v63 = vmul.f32 %v5069_v50, %v12990_v14  ;;  %v5194_v36 = vmul.f32 %v5068_v54, %v12990_v14  ;;  %v5129_v49 = vmul.f32 %v5003_v55, %v12847_v43  ;;  %v5017_v50 = vld [vmem:[%s13746_s13 + $0x220] sm:$0xff]  ;;  %v5030_v5 = vld [vmem:[%s13746_s13 + $0x288] sm:$0xff] }
 0x825   :  { %v7814_v57 = vpack.c.bf16 %v5115_v48, %v5108_v21  ;;  %v5143_v56 = vmul.f32 %v5017_v50, %v12886_v22  ;;  %v5156_v30 = vmul.f32 %v5030_v5, %v12916_v24  ;;  %v5037_v48 = vld [vmem:[%s13746_s13 + $0x2c0] sm:$0xff] }
 0x826   :  { %7757 = vmatpush1.bf16.msra.mxu0 %v7756_v26  ;;  %v5080_v26 = vmul.f32 %v4954_v25, %v12765_v47  ;;  %v7766_v53 = vpack.c.bf16 %v5195_v63, %v5188_v6  ;;  %v7768_v9 = vpack.c.bf16 %v5194_v36, %v5187_v1  ;;  %v5114_v25 = vmul.f32 %v4988_v60, %v12833_v15  ;;  %v5016_v63 = vld [vmem:[%s13746_s13 + $0x218] sm:$0xff] }
 0x827   :  { %7759 = vmatprep.subr.bf16.mxu0 %v7758_v40  ;;  %v5094_v40 = vmul.f32 %v4968_v58, %v12801_v42  ;;  %v7818_v6 = vpack.c.bf16 %v5129_v49, %v5122_v44  ;;  %v5136_v1 = vmul.f32 %v5010_v3, %v12877_v8  ;;  %v5163_v60 = vmul.f32 %v5037_v48, %v12929_v33  ;;  %v5051_v49 = vld [vmem:[%s13746_s13 + $0x330] sm:$0xff] }
 0x828   :  { %v7806_v19 = vpack.c.bf16 %v5087_v18, %v5080_v26  ;;  %v5121_v26 = vmul.f32 %v4995_v46, %v12845_v16  ;;  %v5128_v18 = vmul.f32 %v5002_v62, %v12847_v43  ;;  %v5058_v46 = vld [vmem:[%s13746_s13 + $0x368] sm:$0xff]  ;;  %v5177_v62 = vmul.f32 %v5051_v49, %v12951_v45  ;;  %v5519_v48 = vld [vmem:[%s13747_s14 + $0xb0] sm:$0xff]  ;;  %v5505_v49 = vld [vmem:[%s13747_s14 + $0x40] sm:$0xff] }
 0x829   :  { %v7822_v58 = vpack.c.bf16 %v5143_v56, %v5136_v1  ;;  %v5184_v3 = vmul.f32 %v5058_v46, %v12960_v32  ;;  %v5065_v56 = vld [vmem:[%s13746_s13 + $0x3a0] sm:$0xff]  ;;  %v5506_v46 = vld [vmem:[%s13747_s14 + $0x48] sm:$0xff] }
 0x82a   :  { %7761 = vmatpush1.bf16.msra.mxu0 %v7760_v10  ;;  %v5101_v10 = vmul.f32 %v4975_v37, %v12803_v31  ;;  %v7820_v52 = vpack.c.bf16 %v5128_v18, %v5121_v26  ;;  %v5009_v37 = vld [vmem:[%s13746_s13 + $0x1e0] sm:$0xff]  ;;  %v5066_v26 = vld [vmem:[%s13746_s13 + $0x3a8] sm:$0xff] }
 0x82b   :  { %7763 = vmatprep.subr.bf16.mxu0 %v7762_v39  ;;  %v7812_v39 = vpack.c.bf16 %v5100_v35, %v5093_v17  ;;  %v5135_v36 = vmul.f32 %v5009_v37, %v12877_v8  ;;  %v5038_v17 = vld [vmem:[%s13746_s13 + $0x2c8] sm:$0xff]  ;;  %v5045_v35 = vld [vmem:[%s13746_s13 + $0x300] sm:$0xff] }
 0x82c   :  { %v7810_v0 = vpack.c.bf16 %v5101_v10, %v5094_v40  ;;  %v5023_v10 = vld [vmem:[%s13746_s13 + $0x250] sm:$0xff]  ;;  %v5171_v21 = vmul.f32 %v5045_v35, %v12938_v2  ;;  %v5073_v18 = vld [vmem:[%s13746_s13 + $0x3e0] sm:$0xff] }
 0x82d   :  { %v5149_v38 = vmul.f32 %v5023_v10, %v12907_v28  ;;  %v5199_v1 = vmul.f32 %v5073_v18, %v12990_v14  ;;  %v5508_v18 = vld [vmem:[%s13747_s14 + $0x58] sm:$0xff] }
 0x82e   :  { %7765 = vmatpush1.bf16.msra.mxu0 %v7764_v27  ;;  %v5107_v27 = vmul.f32 %v4981_v12, %v12831_v51  ;;  %v5044_v12 = vld [vmem:[%s13746_s13 + $0x2f8] sm:$0xff] }
 0x82f   :  { %7767 = vmatprep.subr.bf16.mxu0 %v7766_v53  ;;  %v5031_v53 = vld [vmem:[%s13746_s13 + $0x290] sm:$0xff]  ;;  %v5170_v34 = vmul.f32 %v5044_v12, %v12938_v2  ;;  %v5520_v12 = vld [vmem:[%s13747_s14 + $0xb8] sm:$0xff] }
 0x830   :  { %v7816_v54 = vpack.c.bf16 %v5114_v25, %v5107_v27  ;;  %v5157_v40 = vmul.f32 %v5031_v53, %v12916_v24  ;;  %v5052_v27 = vld [vmem:[%s13746_s13 + $0x338] sm:$0xff]  ;;  %v5059_v25 = vld [vmem:[%s13746_s13 + $0x370] sm:$0xff] }
 0x831   :  { %v5185_v44 = vmul.f32 %v5059_v25, %v12960_v32  ;;  %v5522_v25 = vld [vmem:[%s13747_s14 + $0xc8] sm:$0xff] }
 0x832   :  { %7769 = vmatpush1.bf16.msra.mxu0 %v7768_v9  ;;  %v5150_v9 = vmul.f32 %v5024_v23, %v12907_v28  ;;  %v5497_v23 = vld [vmem:[%s13747_s14] sm:$0xff] }
 0x833   :  { %7807 = vmatprep.subr.bf16.mxu0 %v7806_v19  ;;  %v5142_v19 = vmul.f32 %v5016_v63, %v12886_v22 }
 0x834   :  { %v7826_v7 = vpack.c.bf16 %v5157_v40, %v5150_v9  ;;  %v5498_v9 = vld [vmem:[%s13747_s14 + $0x8] sm:$0xff]  ;;  %v5516_v40 = vld [vmem:[%s13747_s14 + $0x98] sm:$0xff] }
 0x835   :  { %5279 = vmatmul.mubr.f32.vlgmr.msra.gmra.mrb[38].mxu0 %v12624_v29  ;;  %v7824_v13 = vpack.c.bf16 %v5142_v19, %v5135_v36  ;;  %v5513_v19 = vld [vmem:[%s13747_s14 + $0x80] sm:$0xff]  ;;  %v7871_v10 = vpack.c.bf16 %v5498_v9, %v5497_v23  ;;  %v4966_v23 = vld [vmem:[%s13746_s13 + $0x88] sm:$0xff] }
 0x836   :  { %7809 = vmatpush1.bf16.msra.mxu0 %v7808_v59  ;;  %6338 = vmatprep.mubr.msk.f32.mxu0 %vm4787_vm6, %v12628_v4  ;;  %v7828_v59 = vpack.c.bf16 %v5156_v30, %v5149_v38  ;;  %v5499_v38 = vld [vmem:[%s13747_s14 + $0x10] sm:$0xff]  ;;  %v5500_v30 = vld [vmem:[%s13747_s14 + $0x18] sm:$0xff] }
 0x837   :  { %7811 = vmatprep.subr.bf16.mxu0 %v7810_v0  ;;  %v5164_v0 = vmul.f32 %v5038_v17, %v12929_v33  ;;  %v7875_v17 = vpack.c.bf16 %v5500_v30, %v5499_v38  ;;  %v5092_v38 = vmul.f32 %v4966_v23, %v12801_v42  ;;  %v5029_v23 = vld [vmem:[%s13746_s13 + $0x280] sm:$0xff] }
 0x839   :  { %v7830_v55 = vpack.c.bf16 %v5171_v21, %v5164_v0  ;;  %v5501_v0 = vld [vmem:[%s13747_s14 + $0x20] sm:$0xff]  ;;  %v5502_v21 = vld [vmem:[%s13747_s14 + $0x28] sm:$0xff] }
 0x83a   :  { %7813 = vmatpush1.bf16.msra.mxu0 %v7812_v39  ;;  %v7832_v39 = vpack.c.bf16 %v5170_v34, %v5163_v60  ;;  %v7879_v60 = vpack.c.bf16 %v5502_v21, %v5501_v0  ;;  %v7881_v34 = vpack.c.bf16 %v5520_v12, %v5519_v48 }
 0x83b   :  { %7815 = vmatprep.subr.bf16.mxu0 %v7814_v57  ;;  %v5178_v57 = vmul.f32 %v5052_v27, %v12951_v45  ;;  %v5521_v27 = vld [vmem:[%s13747_s14 + $0xc0] sm:$0xff] }
 0x83d   :  { %v7834_v50 = vpack.c.bf16 %v5185_v44, %v5178_v57  ;;  %v7885_v44 = vpack.c.bf16 %v5522_v25, %v5521_v27  ;;  %v4986_v27 = vld [vmem:[%s13746_s13 + $0x128] sm:$0xff] }
 0x83e   :  { %7817 = vmatpush1.bf16.msra.mxu0 %v7816_v54  ;;  %v7836_v54 = vpack.c.bf16 %v5184_v3, %v5177_v62  ;;  %v5523_v62 = vld [vmem:[%s13747_s14 + $0xd0] sm:$0xff]  ;;  %v5524_v3 = vld [vmem:[%s13747_s14 + $0xd8] sm:$0xff]  ;;  %v4994_v25 = vld [vmem:[%s13746_s13 + $0x168] sm:$0xff] }
 0x83f   :  { %7819 = vmatprep.subr.bf16.mxu0 %v7818_v6  ;;  %v5192_v6 = vmul.f32 %v5066_v26, %v12979_v11  ;;  %v5507_v26 = vld [vmem:[%s13747_s14 + $0x50] sm:$0xff] }
 0x841   :  { %v7838_v63 = vpack.c.bf16 %v5199_v1, %v5192_v6  ;;  %v5525_v6 = vld [vmem:[%s13747_s14 + $0xe0] sm:$0xff]  ;;  %v5526_v1 = vld [vmem:[%s13747_s14 + $0xe8] sm:$0xff] }
 0x842   :  { %7821 = vmatpush1.bf16.msra.mxu0 %v7820_v52  ;;  %v5072_v52 = vld [vmem:[%s13746_s13 + $0x3d8] sm:$0xff] }
 0x843   :  { %7823 = vmatprep.subr.bf16.mxu0 %v7822_v58  ;;  %v5191_v58 = vmul.f32 %v5065_v56, %v12979_v11  ;;  %v5198_v37 = vmul.f32 %v5072_v52, %v12990_v14  ;;  %v7891_v56 = vpack.c.bf16 %v5508_v18, %v5507_v26  ;;  %v7893_v52 = vpack.c.bf16 %v5526_v1, %v5525_v6  ;;  %v5000_v26 = vld [vmem:[%s13746_s13 + $0x198] sm:$0xff]  ;;  %v5015_v6 = vld [vmem:[%s13746_s13 + $0x210] sm:$0xff] }
 0x844   :  { %v5008_v18 = vld [vmem:[%s13746_s13 + $0x1d8] sm:$0xff] }
 0x845   :  { %v7840_v36 = vpack.c.bf16 %v5198_v37, %v5191_v58  ;;  %v5509_v58 = vld [vmem:[%s13747_s14 + $0x60] sm:$0xff]  ;;  %v5510_v37 = vld [vmem:[%s13747_s14 + $0x68] sm:$0xff] }
 0x846   :  { %7825 = vmatpush1.bf16.msra.mxu0 %v7824_v13  ;;  %v5514_v13 = vld [vmem:[%s13747_s14 + $0x88] sm:$0xff] }
 0x847   :  { %7827 = vmatprep.subr.bf16.mxu0 %v7826_v7  ;;  %v7869_v53 = vpack.c.bf16 %v5514_v13, %v5513_v19  ;;  %v5517_v7 = vld [vmem:[%s13747_s14 + $0xa0] sm:$0xff]  ;;  %v4958_v19 = vld [vmem:[%s13746_s13 + $0x48] sm:$0xff] }
 0x848   :  { %v6330_v13 = vld [vmem:[%s13743_s10] ss:$0 sm:$0xff] }
 0x84a   :  { %7829 = vmatpush1.bf16.msra.mxu0 %v7828_v59  ;;  %v5518_v59 = vld [vmem:[%s13747_s14 + $0xa8] sm:$0xff] }
 0x84b   :  { %7831 = vmatprep.subr.bf16.mxu0 %v7830_v55  ;;  %v7877_v35 = vpack.c.bf16 %v5518_v59, %v5517_v7  ;;  %v5503_v55 = vld [vmem:[%s13747_s14 + $0x30] sm:$0xff]  ;;  %v4965_v7 = vld [vmem:[%s13746_s13 + $0x80] sm:$0xff]  ;;  %v4972_v59 = vld [vmem:[%s13746_s13 + $0xb8] sm:$0xff] }
 0x84c   :  { %v5091_v48 = vmul.f32 %v4965_v7, %v12801_v42  ;;  %v5098_v12 = vmul.f32 %v4972_v59, %v12803_v31  ;;  %v5036_v7 = vld [vmem:[%s13746_s13 + $0x2b8] sm:$0xff]  ;;  %v5043_v59 = vld [vmem:[%s13746_s13 + $0x2f0] sm:$0xff] }
 0x84e   :  { %7833 = vmatpush1.bf16.msra.mxu0 %v7832_v39  ;;  %v5504_v39 = vld [vmem:[%s13747_s14 + $0x38] sm:$0xff] }
 0x84f   :  { %7835 = vmatprep.subr.bf16.mxu0 %v7834_v50  ;;  %v7883_v57 = vpack.c.bf16 %v5504_v39, %v5503_v55  ;;  %v7887_v50 = vpack.c.bf16 %v5506_v46, %v5505_v49  ;;  %v4979_v39 = vld [vmem:[%s13746_s13 + $0xf0] sm:$0xff]  ;;  %v5112_v46 = vmul.f32 %v4986_v27, %v12833_v15 }
 0x850   :  { %v5105_v49 = vmul.f32 %v4979_v39, %v12831_v51  ;;  %v5057_v39 = vld [vmem:[%s13746_s13 + $0x360] sm:$0xff] }
 0x852   :  { %7837 = vmatpush1.bf16.msra.mxu0 %v7836_v54  ;;  %v7889_v54 = vpack.c.bf16 %v5524_v3, %v5523_v62  ;;  %v5120_v3 = vmul.f32 %v4994_v25, %v12845_v16  ;;  %v7780_v1 = vpack.c.bf16 %v5112_v46, %v5105_v49  ;;  %v5183_v46 = vmul.f32 %v5057_v39, %v12960_v32 }
 0x853   :  { %7839 = vmatprep.subr.bf16.mxu0 %v7838_v63  ;;  %v7895_v63 = vpack.c.bf16 %v5510_v37, %v5509_v58  ;;  %v5134_v37 = vmul.f32 %v5008_v18, %v12877_v8 }
 0x856   :  { %7841 = vmatpush1.bf16.msra.mxu0 %v7840_v36  ;;  %v4951_v36 = vld [vmem:[%s13746_s13 + $0x10] sm:$0xff] }
 0x857   :  { %7870 = vmatprep.subr.bf16.mxu0 %v7869_v53  ;;  %v4973_v53 = vld [vmem:[%s13746_s13 + $0xc0] sm:$0xff] }
 0x858   :  { %v5099_v30 = vmul.f32 %v4973_v53, %v12803_v31 }
 0x859   :  { %5421 = vmatmul.mubr.f32.vlgmr.msra.gmra.mrb[40].mxu0 %v12624_v29  ;;  %v5515_v29 = vld [vmem:[%s13747_s14 + $0x90] sm:$0xff] }
 0x85a   :  { %v7873_v5 = vpack.c.bf16 %v5516_v40, %v5515_v29  ;;  %7872 = vmatpush3.bf16.msra.mxu0 %v7871_v10  ;;  %v5077_v29 = vmul.f32 %v4951_v36, %v12765_v47  ;;  %v5084_v40 = vmul.f32 %v4958_v19, %v12770_v61  ;;  %v5007_v36 = vld [vmem:[%s13746_s13 + $0x1d0] sm:$0xff]  ;;  %v5014_v19 = vld [vmem:[%s13746_s13 + $0x208] sm:$0xff] }
 0x85c   :  { %7874 = vmatprep.subr.bf16.mxu0 %v7873_v5  ;;  %v7772_v21 = vpack.c.bf16 %v5084_v40, %v5077_v29  ;;  %v5140_v29 = vmul.f32 %v5014_v19, %v12886_v22 }
 0x85e   :  { %7876 = vmatpush3.bf16.msra.mxu0 %v7875_v17  ;;  %v4980_v17 = vld [vmem:[%s13746_s13 + $0xf8] sm:$0xff] }
 0x85f   :  { %7878 = vmatprep.subr.bf16.mxu0 %v7877_v35  ;;  %v4987_v35 = vld [vmem:[%s13746_s13 + $0x130] sm:$0xff] }
 0x860   :  { %v5113_v55 = vmul.f32 %v4987_v35, %v12833_v15 }
 0x862   :  { %7880 = vmatpush3.bf16.msra.mxu0 %v7879_v60  ;;  %v7774_v60 = vpack.c.bf16 %v5099_v30, %v5092_v38  ;;  %v5021_v38 = vld [vmem:[%s13746_s13 + $0x240] sm:$0xff]  ;;  %v5028_v30 = vld [vmem:[%s13746_s13 + $0x278] sm:$0xff] }
 0x863   :  { %7882 = vmatprep.subr.bf16.mxu0 %v7881_v34  ;;  %v5106_v34 = vmul.f32 %v4980_v17, %v12831_v51  ;;  %v5147_v35 = vmul.f32 %v5021_v38, %v12907_v28 }
 0x865   :  { %v7778_v62 = vpack.c.bf16 %v5113_v55, %v5106_v34  ;;  %v5042_v34 = vld [vmem:[%s13746_s13 + $0x2e8] sm:$0xff] }
 0x866   :  { %7884 = vmatpush3.bf16.msra.mxu0 %v7883_v57  ;;  %v5001_v57 = vld [vmem:[%s13746_s13 + $0x1a0] sm:$0xff]  ;;  %v5050_v55 = vld [vmem:[%s13746_s13 + $0x328] sm:$0xff] }
 0x867   :  { %7886 = vmatprep.subr.bf16.mxu0 %v7885_v44  ;;  %v7776_v44 = vpack.c.bf16 %v5098_v12, %v5091_v48  ;;  %v5162_v48 = vmul.f32 %v5036_v7, %v12929_v33  ;;  %v5169_v12 = vmul.f32 %v5043_v59, %v12938_v2  ;;  %v5176_v49 = vmul.f32 %v5050_v55, %v12951_v45  ;;  %v4990_v59 = vld [vmem:[%s13746_s13 + $0x148] sm:$0xff] }
 0x86a   :  { %7888 = vmatpush3.bf16.msra.mxu0 %v7887_v50  ;;  %v5127_v50 = vmul.f32 %v5001_v57, %v12847_v43  ;;  %v5168_v57 = vmul.f32 %v5042_v34, %v12938_v2 }
 0x86b   :  { %7890 = vmatprep.subr.bf16.mxu0 %v7889_v54  ;;  %v4993_v54 = vld [vmem:[%s13746_s13 + $0x160] sm:$0xff] }
 0x86c   :  { %v7782_v58 = vpack.c.bf16 %v5127_v50, %v5120_v3  ;;  %v5056_v3 = vld [vmem:[%s13746_s13 + $0x358] sm:$0xff] }
 0x86d   :  { %v5064_v50 = vld [vmem:[%s13746_s13 + $0x398] sm:$0xff] }
 0x86e   :  { %7892 = vmatpush3.bf16.msra.mxu0 %v7891_v56  ;;  %v5119_v56 = vmul.f32 %v4993_v54, %v12845_v16  ;;  %v5071_v54 = vld [vmem:[%s13746_s13 + $0x3d0] sm:$0xff] }
 0x86f   :  { %7894 = vmatprep.subr.bf16.mxu0 %v7893_v52  ;;  %v5126_v52 = vmul.f32 %v5000_v26, %v12847_v43 }
 0x871   :  { %v7784_v53 = vpack.c.bf16 %v5126_v52, %v5119_v56  ;;  %v5190_v56 = vmul.f32 %v5064_v50, %v12979_v11  ;;  %v5197_v52 = vmul.f32 %v5071_v54, %v12990_v14 }
 0x872   :  { %7896 = vmatpush3.bf16.msra.mxu0 %v7895_v63  ;;  %v5141_v63 = vmul.f32 %v5015_v6, %v12886_v22  ;;  %v5182_v6 = vmul.f32 %v5056_v3, %v12960_v32 }
 0x874   :  { %v7786_v40 = vpack.c.bf16 %v5141_v63, %v5134_v37  ;;  %v5070_v37 = vld [vmem:[%s13746_s13 + $0x3c8] sm:$0xff] }
 0x875   :  { %v5196_v19 = vmul.f32 %v5070_v37, %v12990_v14  ;;  %v5530_v37 = vld [vmem:[%s13747_s14 + $0x108] sm:$0xff] }
 0x8e4   :  { %v4856_v9 = vpop.f32.mrb[36].mxu0 }
 0x8e5   :  { %v4857_v10 = vadd.f32 %v6330_v13, %v4856_v9  ;;  %v4858_v5 = vpop.f32.mrb[37].mxu0  ;;  %v5022_v13 = vld [vmem:[%s13746_s13 + $0x248] sm:$0xff]  ;;  %v5133_v9 = vmul.f32 %v5007_v36, %v12877_v8 }
 0x8e6   :  { %v5155_v5 = vmul.f32 %v5029_v23, %v12916_v24  ;;  %v4955_v23 = vld [vmem:[%s13746_s13 + $0x30] sm:$0xff] }
 0x8e7   :  { %v4860_v0 = vmax.f32 %v4857_v10, 0.0  ;;  %v5148_v10 = vmul.f32 %v5022_v13, %v12907_v28  ;;  %v7788_v17 = vpack.c.bf16 %v5140_v29, %v5133_v9  ;;  %v7802_v13 = vpack.c.bf16 %v5197_v52, %v5190_v56  ;;  %v5546_v56 = vld [vmem:[%s13747_s14 + $0x188] sm:$0xff] }
 0x8e8   :  { %v5081_v29 = vmul.f32 %v4955_v23, %v12765_v47  ;;  %v8232_v47 = vld.sshfl [vmem:[%s13737_s4] sm:$0x33 pattern:$0x76325410] }
 0x8e9   :  { %7664 = vmatmul.mubr.msk.f32.vlgmr.msra.gmra.mrb[36].mxu1 %vm4872_vm7, %v4860_v0  ;;  %v5154_v0 = vmul.f32 %v5028_v30, %v12916_v24 }
 0x8ea   :  { %7773 = vmatpush1.bf16.msra.mxu1 %v7772_v21  ;;  %6337 = vmatprep.mubr.msk.f32.mxu1 %vm4787_vm6, %v12628_v4  ;;  %v7790_v21 = vpack.c.bf16 %v5155_v5, %v5148_v10  ;;  %v4969_v10 = vld [vmem:[%s13746_s13 + $0xa0] sm:$0xff]  ;;  %v4976_v5 = vld [vmem:[%s13746_s13 + $0xd8] sm:$0xff] }
 0x8eb   :  { %7775 = vmatprep.subr.bf16.mxu1 %v7774_v60  ;;  %v5035_v60 = vld [vmem:[%s13746_s13 + $0x2b0] sm:$0xff]  ;;  %v7792_v27 = vpack.c.bf16 %v5154_v0, %v5147_v35  ;;  %v5095_v30 = vmul.f32 %v4969_v10, %v12801_v42  ;;  %v5102_v7 = vmul.f32 %v4976_v5, %v12803_v31  ;;  %v4997_v35 = vld [vmem:[%s13746_s13 + $0x180] sm:$0xff]  ;;  %v5004_v0 = vld [vmem:[%s13746_s13 + $0x1b8] sm:$0xff] }
 0x8ec   :  { %v5161_v25 = vmul.f32 %v5035_v60, %v12929_v33  ;;  %v5547_v10 = vld [vmem:[%s13747_s14 + $0x190] sm:$0xff]  ;;  %v5548_v5 = vld [vmem:[%s13747_s14 + $0x198] sm:$0xff] }
 0x8ed   :  { %v7846_v42 = vpack.c.bf16 %v5102_v7, %v5095_v30  ;;  %v5531_v30 = vld [vmem:[%s13747_s14 + $0x110] sm:$0xff]  ;;  %v5532_v7 = vld [vmem:[%s13747_s14 + $0x118] sm:$0xff] }
 0x8ee   :  { %7777 = vmatpush1.bf16.msra.mxu1 %v7776_v44  ;;  %v7794_v44 = vpack.c.bf16 %v5169_v12, %v5162_v48  ;;  %v7796_v26 = vpack.c.bf16 %v5168_v57, %v5161_v25  ;;  %v5130_v48 = vmul.f32 %v5004_v0, %v12847_v43  ;;  %v5032_v43 = vld [vmem:[%s13746_s13 + $0x298] sm:$0xff]  ;;  %v5549_v0 = vld [vmem:[%s13747_s14 + $0x1a0] sm:$0xff] }
 0x8ef   :  { %7779 = vmatprep.subr.bf16.mxu1 %v7778_v62  ;;  %v5049_v62 = vld [vmem:[%s13746_s13 + $0x320] sm:$0xff] }
 0x8f0   :  { %v5175_v18 = vmul.f32 %v5049_v62, %v12951_v45 }
 0x8f2   :  { %7781 = vmatpush1.bf16.msra.mxu1 %v7780_v1  ;;  %v7798_v1 = vpack.c.bf16 %v5183_v46, %v5176_v49  ;;  %v7800_v63 = vpack.c.bf16 %v5182_v6, %v5175_v18 }
 0x8f3   :  { %7783 = vmatprep.subr.bf16.mxu1 %v7782_v58  ;;  %v5063_v58 = vld [vmem:[%s13746_s13 + $0x390] sm:$0xff] }
 0x8f4   :  { %v5189_v36 = vmul.f32 %v5063_v58, %v12979_v11  ;;  %v5529_v58 = vld [vmem:[%s13747_s14 + $0x100] sm:$0xff] }
 0x8f6   :  { %7785 = vmatpush1.bf16.msra.mxu1 %v7784_v53  ;;  %v4962_v53 = vld [vmem:[%s13746_s13 + $0x68] sm:$0xff]  ;;  %v7804_v9 = vpack.c.bf16 %v5196_v19, %v5189_v36  ;;  %v5577_v36 = vld [vmem:[%s13747_s14 + $0x280] sm:$0xff] }
 0x8f7   :  { %7787 = vmatprep.subr.bf16.mxu1 %v7786_v40  ;;  %v5088_v40 = vmul.f32 %v4962_v53, %v12770_v61  ;;  %v4983_v61 = vld [vmem:[%s13746_s13 + $0x110] sm:$0xff]  ;;  %v5578_v19 = vld [vmem:[%s13747_s14 + $0x288] sm:$0xff]  ;;  %v5561_v53 = vld [vmem:[%s13747_s14 + $0x200] sm:$0xff] }
 0x8f8   :  { %v5109_v31 = vmul.f32 %v4983_v61, %v12831_v51  ;;  %v5011_v51 = vld [vmem:[%s13746_s13 + $0x1f0] sm:$0xff]  ;;  %v7933_v23 = vpack.c.bf16 %v5578_v19, %v5577_v36  ;;  %v5557_v19 = vld [vmem:[%s13747_s14 + $0x1e0] sm:$0xff] }
 0x8f9   :  { %v7843_v38 = vpack.c.bf16 %v5088_v40, %v5081_v29  ;;  %v5137_v60 = vmul.f32 %v5011_v51, %v12877_v8  ;;  %v5039_v8 = vld [vmem:[%s13746_s13 + $0x2d0] sm:$0xff]  ;;  %v5534_v51 = vld [vmem:[%s13747_s14 + $0x128] sm:$0xff] }
 0x8fa   :  { %7789 = vmatpush1.bf16.msra.mxu1 %v7788_v17  ;;  %v5116_v17 = vmul.f32 %v4990_v59, %v12833_v15  ;;  %v5018_v15 = vld [vmem:[%s13746_s13 + $0x228] sm:$0xff]  ;;  %v5165_v57 = vmul.f32 %v5039_v8, %v12929_v33  ;;  %v5067_v33 = vld [vmem:[%s13746_s13 + $0x3b0] sm:$0xff]  ;;  %v5580_v59 = vld [vmem:[%s13747_s14 + $0x298] sm:$0xff] }
 0x8fb   :  { %7791 = vmatprep.subr.bf16.mxu1 %v7790_v21  ;;  %v5144_v34 = vmul.f32 %v5018_v15, %v12886_v22  ;;  %v5046_v22 = vld [vmem:[%s13746_s13 + $0x308] sm:$0xff]  ;;  %v5193_v50 = vmul.f32 %v5067_v33, %v12979_v11  ;;  %v5511_v11 = vld [vmem:[%s13747_s14 + $0x70] sm:$0xff] }
 0x8fc   :  { %v7849_v21 = vpack.c.bf16 %v5116_v17, %v5109_v31  ;;  %v5579_v61 = vld [vmem:[%s13747_s14 + $0x290] sm:$0xff]  ;;  %v5564_v17 = vld [vmem:[%s13747_s14 + $0x218] sm:$0xff]  ;;  %v5554_v33 = vld [vmem:[%s13747_s14 + $0x1c8] sm:$0xff] }
 0x8fd   :  { %v7855_v55 = vpack.c.bf16 %v5144_v34, %v5137_v60  ;;  %v5563_v31 = vld [vmem:[%s13747_s14 + $0x210] sm:$0xff]  ;;  %v5582_v60 = vld [vmem:[%s13747_s14 + $0x2a8] sm:$0xff]  ;;  %v5565_v34 = vld [vmem:[%s13747_s14 + $0x220] sm:$0xff] }
 0x8fe   :  { %7793 = vmatpush1.bf16.msra.mxu1 %v7792_v27  ;;  %v5158_v27 = vmul.f32 %v5032_v43, %v12916_v24  ;;  %v5060_v24 = vld [vmem:[%s13746_s13 + $0x378] sm:$0xff]  ;;  %v5566_v43 = vld [vmem:[%s13747_s14 + $0x228] sm:$0xff] }
 0x8ff   :  { %7795 = vmatprep.subr.bf16.mxu1 %v7794_v44  ;;  %v5172_v44 = vmul.f32 %v5046_v22, %v12938_v2  ;;  %v5186_v62 = vmul.f32 %v5060_v24, %v12960_v32  ;;  %v5074_v2 = vld [vmem:[%s13746_s13 + $0x3e8] sm:$0xff]  ;;  %v5527_v32 = vld [vmem:[%s13747_s14 + $0xf0] sm:$0xff] }
 0x900   :  { %v5200_v54 = vmul.f32 %v5074_v2, %v12990_v14  ;;  %v5512_v14 = vld [vmem:[%s13747_s14 + $0x78] sm:$0xff]  ;;  %v5535_v22 = vld [vmem:[%s13747_s14 + $0x130] sm:$0xff]  ;;  %v5537_v2 = vld [vmem:[%s13747_s14 + $0x140] sm:$0xff] }
 0x901   :  { %v7861_v49 = vpack.c.bf16 %v5172_v44, %v5165_v57  ;;  %v7899_v6 = vpack.c.bf16 %v5512_v14, %v5511_v11  ;;  %v5583_v57 = vld [vmem:[%s13747_s14 + $0x2b0] sm:$0xff]  ;;  %v5569_v11 = vld [vmem:[%s13747_s14 + $0x240] sm:$0xff]  ;;  %v5570_v14 = vld [vmem:[%s13747_s14 + $0x248] sm:$0xff] }
 0x902   :  { %7797 = vmatpush1.bf16.msra.mxu1 %v7796_v26  ;;  %v5528_v26 = vld [vmem:[%s13747_s14 + $0xf8] sm:$0xff]  ;;  %v5567_v24 = vld [vmem:[%s13747_s14 + $0x230] sm:$0xff]  ;;  %v7951_v36 = vpack.c.bf16 %v5570_v14, %v5569_v11 }
 0x903   :  { %7799 = vmatprep.subr.bf16.mxu1 %v7798_v1  ;;  %v7897_v18 = vpack.c.bf16 %v5528_v26, %v5527_v32  ;;  %v5545_v1 = vld [vmem:[%s13747_s14 + $0x180] sm:$0xff]  ;;  %v5586_v32 = vld [vmem:[%s13747_s14 + $0x2c8] sm:$0xff]  ;;  %v5603_v11 = vld [vmem:[%s13747_s14 + $0x350] sm:$0xff] }
 0x904   :  { %v7901_v52 = vpack.c.bf16 %v5546_v56, %v5545_v1  ;;  %v5556_v1 = vld [vmem:[%s13747_s14 + $0x1d8] sm:$0xff]  ;;  %v5539_v56 = vld [vmem:[%s13747_s14 + $0x150] sm:$0xff] }
 0x905   :  { %7898 = vmatprep.subr.bf16.mxu0 %v7897_v18  ;;  %v5604_v14 = vld [vmem:[%s13747_s14 + $0x358] sm:$0xff] }
 0x906   :  { %7801 = vmatpush1.bf16.msra.mxu1 %v7800_v63  ;;  %7900 = vmatpush3.bf16.msra.mxu0 %v7899_v6  ;;  %v7903_v63 = vpack.c.bf16 %v5530_v37, %v5529_v58  ;;  %v5555_v6 = vld [vmem:[%s13747_s14 + $0x1d0] sm:$0xff] }
 0x907   :  { %7803 = vmatprep.subr.bf16.mxu1 %v7802_v13  ;;  %7934 = vmatprep.subr.bf16.mxu0 %v7933_v23  ;;  %v7921_v58 = vpack.c.bf16 %v5556_v1, %v5555_v6  ;;  %v5587_v37 = vld [vmem:[%s13747_s14 + $0x2d0] sm:$0xff]  ;;  %v7981_v6 = vpack.c.bf16 %v5604_v14, %v5603_v11  ;;  %v5605_v1 = vld [vmem:[%s13747_s14 + $0x360] sm:$0xff] }
 0x908   :  { %v5280_v13 = vpop.f32.mrb[38].mxu0 }
 0x909   :  { %v5282_v29 = vpop.f32.mrb[39].mxu0 }
 0x90a   :  { %7805 = vmatpush1.bf16.msra.mxu1 %v7804_v9  ;;  %v5562_v9 = vld [vmem:[%s13747_s14 + $0x208] sm:$0xff]  ;;  %5680 = vmatprep.mubr.f32.mxu0 %v5282_v29  ;;  %v5572_v29 = vld [vmem:[%s13747_s14 + $0x258] sm:$0xff] }
 0x90b   :  { %7842 = vmatprep.subr.bf16.mxu1 %v8422_v41  ;;  %v7935_v40 = vpack.c.bf16 %v5562_v9, %v5561_v53  ;;  %5681 = vmatmul.mubr.f32.vlgmr.msra.gmra.mrb[42].mxu0 %v5280_v13  ;;  %v5558_v13 = vld [vmem:[%s13747_s14 + $0x1e8] sm:$0xff]  ;;  %v5571_v9 = vld [vmem:[%s13747_s14 + $0x250] sm:$0xff] }
 0x90d   :  { %5350 = vmatmul.mubr.f32.vlgmr.msra.gmra.mrb[38].mxu1 %v8232_v47  ;;  %7936 = vmatpush3.bf16.msra.mxu0 %v7935_v40  ;;  %v5541_v40 = vld [vmem:[%s13747_s14 + $0x160] sm:$0xff] }
 0x90e   :  { %7844 = vmatpush1.bf16.msra.mxu1 %v7843_v38  ;;  %6339 = vmatprep.mubr.msk.f32.mxu1 %vm4787_vm6, %v12628_v4  ;;  %v5123_v4 = vmul.f32 %v4997_v35, %v12845_v16  ;;  %v5025_v16 = vld [vmem:[%s13746_s13 + $0x260] sm:$0xff]  ;;  %v7905_v38 = vpack.c.bf16 %v5548_v5, %v5547_v10  ;;  %v7939_v35 = vpack.c.bf16 %v5564_v17, %v5563_v31  ;;  %v5542_v5 = vld [vmem:[%s13747_s14 + $0x168] sm:$0xff] }
 0x90f   :  { %7845 = vmatprep.subr.bf16.mxu1 %v8422_v41  ;;  %v5151_v39 = vmul.f32 %v5025_v16, %v12907_v28  ;;  %v5053_v28 = vld [vmem:[%s13746_s13 + $0x340] sm:$0xff]  ;;  %v7925_v10 = vpack.c.bf16 %v5558_v13, %v5557_v19  ;;  %v5574_v17 = vld [vmem:[%s13747_s14 + $0x268] sm:$0xff] }
 0x910   :  { %v7852_v12 = vpack.c.bf16 %v5130_v48, %v5123_v4  ;;  %v5179_v46 = vmul.f32 %v5053_v28, %v12951_v45  ;;  %v7867_v45 = vpack.c.bf16 %v5200_v54, %v5193_v50  ;;  %v5533_v48 = vld [vmem:[%s13747_s14 + $0x120] sm:$0xff]  ;;  %v5584_v28 = vld [vmem:[%s13747_s14 + $0x2b8] sm:$0xff]  ;;  %v5538_v54 = vld [vmem:[%s13747_s14 + $0x148] sm:$0xff] }
 0x911   :  { %v7858_v25 = vpack.c.bf16 %v5158_v27, %v5151_v39  ;;  %v7911_v15 = vpack.c.bf16 %v5534_v51, %v5533_v48  ;;  %v5552_v39 = vld [vmem:[%s13747_s14 + $0x1b8] sm:$0xff]  ;;  %v7943_v27 = vpack.c.bf16 %v5566_v43, %v5565_v34  ;;  %v7919_v26 = vpack.c.bf16 %v5538_v54, %v5537_v2  ;;  %v5573_v31 = vld [vmem:[%s13747_s14 + $0x260] sm:$0xff]  ;;  %v5591_v51 = vld [vmem:[%s13747_s14 + $0x2f0] sm:$0xff] }
 0x912   :  { %7847 = vmatpush1.bf16.msra.mxu1 %v7846_v42  ;;  %v7864_v3 = vpack.c.bf16 %v5186_v62, %v5179_v46  ;;  %v7937_v42 = vpack.c.bf16 %v5580_v59, %v5579_v61  ;;  %v7945_v46 = vpack.c.bf16 %v5584_v28, %v5583_v57  ;;  %v5553_v62 = vld [vmem:[%s13747_s14 + $0x1c0] sm:$0xff]  ;;  %v7955_v61 = vpack.c.bf16 %v5572_v29, %v5571_v9  ;;  %v5576_v34 = vld [vmem:[%s13747_s14 + $0x278] sm:$0xff]  ;;  %v5599_v54 = vld [vmem:[%s13747_s14 + $0x330] sm:$0xff] }
 0x913   :  { %7848 = vmatprep.subr.bf16.mxu1 %v8422_v41  ;;  %v7917_v50 = vpack.c.bf16 %v5554_v33, %v5553_v62  ;;  %v7927_v59 = vpack.c.bf16 %v5542_v5, %v5541_v40  ;;  %v5593_v57 = vld [vmem:[%s13747_s14 + $0x300] sm:$0xff]  ;;  %v5596_v62 = vld [vmem:[%s13747_s14 + $0x318] sm:$0xff] }
 0x914   :  { %7938 = vmatprep.subr.bf16.mxu0 %v7937_v42  ;;  %v5597_v2 = vld [vmem:[%s13747_s14 + $0x320] sm:$0xff] }
 0x915   :  { %7940 = vmatpush3.bf16.msra.mxu0 %v7939_v35 }
 0x916   :  { %7850 = vmatpush1.bf16.msra.mxu1 %v7849_v21  ;;  %v5550_v21 = vld [vmem:[%s13747_s14 + $0x1a8] sm:$0xff] }
 0x917   :  { %7851 = vmatprep.subr.bf16.mxu1 %v8422_v41  ;;  %v7909_v4 = vpack.c.bf16 %v5550_v21, %v5549_v0  ;;  %v7959_v0 = vpack.c.bf16 %v5574_v17, %v5573_v31  ;;  %v5543_v21 = vld [vmem:[%s13747_s14 + $0x170] sm:$0xff] }
 0x91a   :  { %7853 = vmatpush1.bf16.msra.mxu1 %v7852_v12  ;;  %v5581_v12 = vld [vmem:[%s13747_s14 + $0x2a0] sm:$0xff] }
 0x91b   :  { %7854 = vmatprep.subr.bf16.mxu1 %v8422_v41  ;;  %v7941_v16 = vpack.c.bf16 %v5582_v60, %v5581_v12  ;;  %v5575_v60 = vld [vmem:[%s13747_s14 + $0x270] sm:$0xff] }
 0x91d   :  { %7942 = vmatprep.subr.bf16.mxu0 %v7941_v16  ;;  %v7963_v16 = vpack.c.bf16 %v5576_v34, %v5575_v60 }
 0x91e   :  { %7856 = vmatpush1.bf16.msra.mxu1 %v7855_v55  ;;  %v5551_v55 = vld [vmem:[%s13747_s14 + $0x1b0] sm:$0xff]  ;;  %7944 = vmatpush3.bf16.msra.mxu0 %v7943_v27 }
 0x91f   :  { %7857 = vmatprep.subr.bf16.mxu1 %v8422_v41  ;;  %v7913_v8 = vpack.c.bf16 %v5552_v39, %v5551_v55  ;;  %7946 = vmatprep.subr.bf16.mxu0 %v7945_v46  ;;  %v6333_v39 = vld [vmem:[%s13745_s12] ss:$0 sm:$0xff]  ;;  %v5595_v46 = vld [vmem:[%s13747_s14 + $0x310] sm:$0xff] }
 0x920   :  { %v7969_v33 = vpack.c.bf16 %v5596_v62, %v5595_v46 }
 0x922   :  { %7859 = vmatpush1.bf16.msra.mxu1 %v7858_v25  ;;  %v5536_v25 = vld [vmem:[%s13747_s14 + $0x138] sm:$0xff] }
 0x923   :  { %7860 = vmatprep.subr.bf16.mxu1 %v8422_v41  ;;  %v7915_v44 = vpack.c.bf16 %v5536_v25, %v5535_v22 }
 0x926   :  { %7862 = vmatpush1.bf16.msra.mxu1 %v7861_v49  ;;  %v5568_v49 = vld [vmem:[%s13747_s14 + $0x238] sm:$0xff] }
 0x927   :  { %7863 = vmatprep.subr.bf16.mxu1 %v8422_v41 }
 0x92a   :  { %7865 = vmatpush1.bf16.msra.mxu1 %v7864_v3  ;;  %v7947_v3 = vpack.c.bf16 %v5568_v49, %v5567_v24 }
 0x92b   :  { %7866 = vmatprep.subr.bf16.mxu1 %v8422_v41 }
 0x92c   :  { %7948 = vmatpush3.bf16.msra.mxu0 %v7947_v3  ;;  %v5422_v43 = vpop.f32.mrb[40].mxu0  ;;  %v5598_v3 = vld [vmem:[%s13747_s14 + $0x328] sm:$0xff] }
 0x92d   :  { %v5424_v55 = vpop.f32.mrb[41].mxu0 }
 0x92e   :  { %7868 = vmatpush1.bf16.msra.mxu1 %v7867_v45  ;;  %v5585_v45 = vld [vmem:[%s13747_s14 + $0x2c0] sm:$0xff]  ;;  %5820 = vmatprep.mubr.f32.mxu0 %v5424_v55 }
 0x92f   :  { %7902 = vmatprep.subr.bf16.mxu1 %v7901_v52  ;;  %v7949_v18 = vpack.c.bf16 %v5586_v32, %v5585_v45  ;;  %v5540_v52 = vld [vmem:[%s13747_s14 + $0x158] sm:$0xff]  ;;  %v5601_v32 = vld [vmem:[%s13747_s14 + $0x340] sm:$0xff] }
 0x930   :  { %v7923_v23 = vpack.c.bf16 %v5540_v52, %v5539_v56  ;;  %v5606_v56 = vld [vmem:[%s13747_s14 + $0x368] sm:$0xff] }
 0x931   :  { %5492 = vmatmul.mubr.f32.vlgmr.msra.gmra.mrb[40].mxu1 %v8232_v47  ;;  %v7907_v47 = vpack.c.bf16 %v5532_v7, %v5531_v30  ;;  %7950 = vmatprep.subr.bf16.mxu0 %v7949_v18  ;;  %v5590_v30 = vld [vmem:[%s13747_s14 + $0x2e8] sm:$0xff]  ;;  %v5559_v7 = vld [vmem:[%s13747_s14 + $0x1f0] sm:$0xff]  ;;  %v7984_v52 = vpack.c.bf16 %v5606_v56, %v5605_v1 }
 0x932   :  { %7904 = vmatpush3.bf16.msra.mxu1 %v7903_v63  ;;  %v5588_v63 = vld [vmem:[%s13747_s14 + $0x2d8] sm:$0xff]  ;;  %7952 = vmatpush3.bf16.msra.mxu0 %v7951_v36 }
 0x933   :  { %7906 = vmatprep.subr.bf16.mxu1 %v7905_v38  ;;  %v7953_v53 = vpack.c.bf16 %v5588_v63, %v5587_v37  ;;  %v5589_v38 = vld [vmem:[%s13747_s14 + $0x2e0] sm:$0xff]  ;;  %v5608_v37 = vld [vmem:[%s13747_s14 + $0x378] sm:$0xff] }
 0x934   :  { %v7957_v42 = vpack.c.bf16 %v5590_v30, %v5589_v38 }
 0x935   :  { %7954 = vmatprep.subr.bf16.mxu0 %v7953_v53 }
 0x936   :  { %7908 = vmatpush3.bf16.msra.mxu1 %v7907_v47  ;;  %v5560_v47 = vld [vmem:[%s13747_s14 + $0x1f8] sm:$0xff]  ;;  %7956 = vmatpush3.bf16.msra.mxu0 %v7955_v61 }
 0x937   :  { %7910 = vmatprep.subr.bf16.mxu1 %v7909_v4  ;;  %v7929_v35 = vpack.c.bf16 %v5560_v47, %v5559_v7  ;;  %7958 = vmatprep.subr.bf16.mxu0 %v7957_v42  ;;  %v5544_v4 = vld [vmem:[%s13747_s14 + $0x178] sm:$0xff] }
 0x938   :  { %v7931_v48 = vpack.c.bf16 %v5544_v4, %v5543_v21 }
 0x93a   :  { %7912 = vmatpush3.bf16.msra.mxu1 %v7911_v15  ;;  %v5592_v15 = vld [vmem:[%s13747_s14 + $0x2f8] sm:$0xff]  ;;  %7960 = vmatpush3.bf16.msra.mxu0 %v7959_v0 }
 0x93b   :  { %7914 = vmatprep.subr.bf16.mxu1 %v7913_v8  ;;  %v7961_v12 = vpack.c.bf16 %v5592_v15, %v5591_v51 }
 0x93d   :  { %7962 = vmatprep.subr.bf16.mxu0 %v7961_v12 }
 0x93e   :  { %7916 = vmatpush3.bf16.msra.mxu1 %v7915_v44  ;;  %7964 = vmatpush3.bf16.msra.mxu0 %v7963_v16  ;;  %v5594_v44 = vld [vmem:[%s13747_s14 + $0x308] sm:$0xff] }
 0x93f   :  { %7918 = vmatprep.subr.bf16.mxu1 %v7917_v50  ;;  %v7966_v24 = vpack.c.bf16 %v5594_v44, %v5593_v57  ;;  %v7972_v50 = vpack.c.bf16 %v5598_v3, %v5597_v2 }
 0x941   :  { %5821 = vmatmul.mubr.f32.vlgmr.msra.gmra.mrb[44].mxu0 %v5422_v43 }
 0x942   :  { %7920 = vmatpush3.bf16.msra.mxu1 %v7919_v26  ;;  %v5602_v26 = vld [vmem:[%s13747_s14 + $0x348] sm:$0xff] }
 0x943   :  { %7922 = vmatprep.subr.bf16.mxu1 %v7921_v58  ;;  %v7978_v18 = vpack.c.bf16 %v5602_v26, %v5601_v32  ;;  %v5607_v58 = vld [vmem:[%s13747_s14 + $0x370] sm:$0xff] }
 0x944   :  { %v7987_v63 = vpack.c.bf16 %v5608_v37, %v5607_v58 }
 0x946   :  { %7924 = vmatpush3.bf16.msra.mxu1 %v7923_v23 }
 0x947   :  { %7926 = vmatprep.subr.bf16.mxu1 %v7925_v10  ;;  %v6340_v10 = vld [vmem:[%s13748_s15] ss:$0 sm:$0xff] }
 0x94a   :  { %7928 = vmatpush3.bf16.msra.mxu1 %v7927_v59 }
 0x94b   :  { %7930 = vmatprep.subr.bf16.mxu1 %v7929_v35 }
 0x94e   :  { %7932 = vmatpush3.bf16.msra.mxu1 %v7931_v48 }
 0x94f   :  { %7965 = vmatprep.subr.bf16.mxu1 %v8422_v41 }
 0x9bc   :  { %v4942_v27 = vpop.f32.mrb[36].mxu1 }
 0x9bd   :  { %v4943_v8 = vadd.f32 %v6333_v39, %v4942_v27  ;;  %v7665_v22 = vpop.f32.mrb[37].mxu1 }
 0x9bf   :  { %8226 = vtanh.f32 %v4943_v8 }
 0x9c9   :  { %v8227_v25 = vpop.eup %8226 }
 0x9ca   :  { %4948 = vst.msk [vmem:[%s13750_s17] sm:$0x3] %vm4947_vm8, %v8227_v25 }
 0x9de   :  { %v7305_v13 = vpop.f32.mrb[42].mxu0 }
 0x9df   :  { %v7306_v23 = vpop.f32.mrb[43].mxu0 }
 0x9e0   :  { %v5351_v28 = vpop.f32.mrb[38].mxu1  ;;  %v7307_v53 = vadd.f32 %v7306_v23, %v7305_v13 }
 0x9e1   :  { %v5353_v49 = vpop.f32.mrb[39].mxu1 }
 0x9e2   :  { %5750 = vmatprep.mubr.f32.mxu1 %v5353_v49  ;;  %v5683_v30 = vadd.f32 %v7307_v53, %v6340_v10 }
 0x9e3   :  { %5751 = vmatmul.mubr.f32.vlgmr.msra.gmra.mrb[42].mxu1 %v5351_v28 }
 0x9e4   :  { %7967 = vmatpush3.bf16.msra.mxu1 %v7966_v24  ;;  %7698 = vmatprep.mubr.msk.f32.mxu1 %vm8416_vm4, %v14379_v20  ;;  %v5600_v20 = vld [vmem:[%s13747_s14 + $0x338] sm:$0xff]  ;;  %s8423_s14 = smov [#allocation5]  }
 0x9e5   :  { %7968 = vmatprep.subr.bf16.mxu1 %v8422_v41  ;;  %v7975_v45 = vpack.c.bf16 %v5600_v20, %v5599_v54  ;;  %s5915_s15 = sshll.u32 %s8423_s14, 4  ;;  %s5916_s15 = int_to_ptr.vmem [resolvable:$true] %s5915_s15 }
 0x9e6   :  { %s8233_s11 = scalar_lea.vmem %s5916_s15, 32  ;;  %p8238_p3 = scmp.lt.s32.totalorder %s5916_s15, %s5916_s15 }
 0x9e7   :  { %p8234_p2 = scmp.ne.s32.totalorder %s5916_s15, %s8233_s11  ;;  %p8239_p4 = scmp.lt.s32.totalorder %s8233_s11, %s8233_s11 }
 0x9e8   :  { %7970 = vmatpush3.bf16.msra.mxu1 %v7969_v33 }
 0x9e9   :  { %7971 = vmatprep.subr.bf16.mxu1 %v8422_v41  ;;  %p8240_p5 = por %p8239_p4, %p8238_p3 }
 0x9eb   :  { %p8241_p6 = pnand %p8240_p5, %p8234_p2 }
 0x9ec   :  { %7973 = vmatpush3.bf16.msra.mxu1 %v7972_v50 }
 0x9ed   :  { %7974 = vmatprep.subr.bf16.mxu1 %v8422_v41 }
 0x9f0   :  { %7976 = vmatpush3.bf16.msra.mxu1 %v7975_v45 }
 0x9f1   :  { %7977 = vmatprep.subr.bf16.mxu1 %v8422_v41 }
 0x9f4   :  { %7979 = vmatpush3.bf16.msra.mxu1 %v7978_v18 }
 0x9f5   :  { %7980 = vmatprep.subr.bf16.mxu1 %v8422_v41 }
 0x9f8   :  { %7982 = vmatpush3.bf16.msra.mxu1 %v7981_v6 }
 0x9f9   :  { %7983 = vmatprep.subr.bf16.mxu1 %v8422_v41 }
 0x9fc   :  { %7985 = vmatpush3.bf16.msra.mxu1 %v7984_v52 }
 0x9fd   :  { %7986 = vmatprep.subr.bf16.mxu1 %v8422_v41 }
 0xa00   :  { %7988 = vmatpush3.bf16.msra.mxu1 %v7987_v63 }
 0xa04   :  { %v5493_v36 = vpop.f32.mrb[40].mxu1 }
 0xa05   :  { %7699 = vmatmul.mubr.f32.vlgmr.msra.gmra.mrb[44].mxu1 %v5493_v36  ;;  %v5495_v19 = vpop.f32.mrb[41].mxu1 }
 0xa14   :  { %v7375_v9 = vpop.f32.mrb[44].mxu0 }
 0xa15   :  { %v7376_v29 = vpop.f32.mrb[45].mxu0 }
 0xa16   :  { %v7377_v40 = vadd.f32 %v7376_v29, %v7375_v9 }
 0xab6   :  { %v7340_v5 = vpop.f32.mrb[42].mxu1 }
 0xab7   :  { %v7341_v38 = vpop.f32.mrb[43].mxu1 }
 0xab8   :  { %v7342_v7 = vadd.f32 %v7341_v38, %v7340_v5 }
 0xaba   :  { %v5753_v47 = vadd.f32 %v7342_v7, %v5683_v30 }
 0xabc   :  { %v5823_v41 = vadd.f32 %v7377_v40, %v5753_v47 }
 0xad8   :  { %v5892_v61 = vpop.f32.mrb[44].mxu1 }
 0xad9   :  { %v5893_v59 = vadd.f32 %v5892_v61, %v5823_v41  ;;  %v7700_v42 = vpop.f32.mrb[45].mxu1 }
 0xadb   :  { %v5897_v31 = vsel %vm5896_vm9, %v5893_v59, -inf }
 0xadc   :  { %5898 = vmax.xlane.f32.xlu1 %v5897_v31 }
 0xb69   :  { %v5899_v17 = vpop.xlane.xlu1 %5898 }
 0xb6a   :  { %v5900_v35 = vsub.f32 %v5893_v59, %v5899_v17 }
 0xb6c   :  { %v5901_v0 = vmul.f32 1.442695, %v5900_v35 }
 0xb6e   :  { %8228 = vpow2.f32 %v5901_v0 }
 0xb78   :  { %v8229_v21 = vpop.eup %8228 }
 0xb79   :  { %v5903_v4 = vsel %vm5896_vm9, %v8229_v21, 0.0 }
 0xb7a   :  { %5904 = vadd.xlane.f32.xlu0 %v5903_v4 }
 0xc07   :  { %v5905_v48 = vpop.xlane.xlu0 %5904 }
 0xc08   :  { %8230 = vrcp.f32 %v5905_v48 }
 0xc12   :  { %v8231_v51 = vpop.eup %8230 }
 0xc13   :  { %v5907_v15 = vmul.f32 %v8231_v51, %v8229_v21 }
 0xc15   :  { %5908 = vst.msk [vmem:[#allocation5] sm:$0x3] %vm5896_vm9, %v5907_v15 }
 0xc16   :  { %8244 = shalt.err (!%p8241_p6)
}
 0xc17   :  { %s8245_s19 = scalar_lea.hbm %s13749_s16, 32 }
 0xc18   :  { %p8246_p7 = scmp.ne.s32.totalorder %s13749_s16, %s8245_s19  ;;  %p8249_p8 = scmp.lt.u32.totalorder %s8245_s19, %s13749_s16 }
 0xc1a   :  { %p8251_p9 = pnand %p8249_p8, %p8246_p7 }
 0xc1c   :  { %8254 = shalt.err (!%p8251_p9)
}
 0xc1d   :  { %5918 = dma.vmem_to_hbm [thread:$0]  %s5916_s15, 32, %s13749_s16, [#allocation6]  }
 0xc1e   :  { %8337 = dma.done.wait [#allocation6], 32  }
 0xc1f   :  { %8338 = vsyncadd [#allocation6], 4294967264 }
 0xc20   :  { %5926 = vsyncpa [#allocation6], 1 }
 0xc21   :  { %5927 = vsyncmov [#allocation4] }
 0xc24   :  { %s5928_s5 = vpop.sfrf %5927 }
 0xc25   :  { %p6341_p10 = scmp.ne.s32.totalorder %s5928_s5, 0 }
 0xc27   :  { %5932 = shalt.err (%p6341_p10)  }
 0xc28   :  { %5934 = vsyncmov [#allocation4 + $0x1] }
 0xc2b   :  { %s5935_s10 = vpop.sfrf %5934 }
 0xc2c   :  { %p6342_p11 = scmp.ne.s32.totalorder %s5935_s10, 0 }
 0xc2e   :  { %5939 = shalt.err (%p6342_p11)  }

</bundles_post_ra>
